<compile_context>
chip_gen: v5e
topology: v5e:2x2
jax: 0.10.0
libtpu: 0.0.40
codegen_flags: <defaults>
</compile_context>

<pallas_src>
import jax
import jax.numpy as jnp
from jax.experimental import pallas as pl
from jax.experimental.pallas import tpu as pltpu

F32 = jnp.float32
BF16 = jnp.bfloat16

# modality order matches torch concat order: (ecfp, bert, hashap, rdk)
ECFP_IDX, BERT_IDX, HASHAP_IDX, RDK_IDX = 0, 1, 2, 3
NUM_MODALITIES = 4
FP_DIM = 1024          # fingerprint input dim (= padded bert input dim)
BERT_DIM = 768
ENC_H = 256
ENC_O = 256
PROJ_H = 1024
PROJ_O = 256
PRED_LANES = 128       # predictor output padded to a full lane group


# ----------------------------- in-kernel helpers -----------------------------

def _elu(x):
    # PyTorch nn.ELU(alpha=1.0)
    return jnp.where(x > 0, x, jnp.exp(x) - 1.0)


def _erf(x):
    # Abramowitz & Stegun 7.1.26 rational approximation, |err| < 1.5e-7.
    p = jnp.float32(0.3275911)
    a1 = jnp.float32(0.254829592)
    a2 = jnp.float32(-0.284496736)
    a3 = jnp.float32(1.421413741)
    a4 = jnp.float32(-1.453152027)
    a5 = jnp.float32(1.061405429)
    ax = jnp.abs(x)
    t = 1.0 / (1.0 + p * ax)
    poly = ((((a5 * t + a4) * t + a3) * t + a2) * t + a1) * t
    y = 1.0 - poly * jnp.exp(-(ax * ax))
    return jnp.where(x < 0, -y, y)


def _gelu(x):
    # exact (erf-based) GELU, matching PyTorch nn.GELU default
    return 0.5 * x * (1.0 + _erf(x * jnp.float32(0.7071067811865476)))


# --------------------------------- kernel ------------------------------------

def fused_kernel(x_ref, fh_ref, mask_ref, wenc_ref, benc_ref,
                 w1_ref, b1_ref, w2_ref, b2_ref,
                 w3_ref, b3_ref, w4_ref, b4_ref,
                 wp_ref, bp_ref,
                 pred_ref, loss_ref,
                 x_scr, feats_scr):
    m = pl.program_id(0)

    # ---- raw input staging: non-BERT modalities read their fingerprint slab ----
    @pl.when(jnp.logical_and(m < NUM_MODALITIES, m != BERT_IDX))
    def _():
        x_scr[...] = x_ref[0]

    # ---- BERT modality: frozen stand-in encoder + masked mean pooling ----
    @pl.when(m == BERT_IDX)
    def _():
        # TODO(synk): the pretrained DebertaV2Model drug encoder has no Pallas
        # equivalent; frozen stand-in: last_hidden = tanh(first_hidden @ W + b).
        Bq, S, DH = fh_ref.shape
        fh32 = fh_ref[...].astype(F32)                               # [B, S, 768]
        x2d = fh32.reshape(Bq * S, DH).astype(BF16)
        last = jnp.tanh(
            jnp.dot(x2d, wenc_ref[...], preferred_element_type=F32)
            + benc_ref[...]).reshape(Bq, S, DH)
        mask = mask_ref[...]                                         # [B, S] f32
        avg = (fh32 + last) * 0.5 * mask[:, :, None]
        cnt = jnp.maximum(jnp.sum(mask, axis=1, keepdims=True), 1.0)  # guard /0
        x_scr[:, :DH] = jnp.sum(avg, axis=1) / cnt                   # pooled [B, 768]
        x_scr[:, DH:] = jnp.zeros((Bq, x_scr.shape[1] - DH), F32)

    # ---- ModalEncoder (Linear,ELU,Linear,ELU) + Projector (Linear,GELU,Linear) ----
    @pl.when(m < NUM_MODALITIES)
    def _():
        x = x_scr[...].astype(BF16)                                  # [B, 1024]
        h = _elu(jnp.dot(x, w1_ref[0], preferred_element_type=F32) + b1_ref[0])
        h = _elu(jnp.dot(h.astype(BF16), w2_ref[0],
                         preferred_element_type=F32) + b2_ref[0])
        h = _gelu(jnp.dot(h.astype(BF16), w3_ref[0],
                          preferred_element_type=F32) + b3_ref[0])
        feats_scr[m] = (jnp.dot(h.astype(BF16), w4_ref[0],
                                preferred_element_type=F32) + b4_ref[0])

    # ---- head: graph construction + CLR (InfoNCE/CE) + fusion + Predictor ----
    @pl.when(m == NUM_MODALITIES)
    def _():
        Mm, Bb, Dd = feats_scr.shape
        NB = Mm * Bb
        # flat features, modality-major: row r = mod*B + b
        flat = jnp.concatenate([feats_scr[i] for i in range(Mm)], axis=0)  # [NB, D]

        # ONE raw gram on the MXU; everything below is derived from it.
        G = jax.lax.dot_general(flat, flat, (((1,), (1,)), ((), ())),
                                preferred_element_type=F32)                # [NB, NB]

        ridx = jax.lax.broadcasted_iota(jnp.int32, (NB, NB), 0).astype(F32)
        cidx = jax.lax.broadcasted_iota(jnp.int32, (NB, NB), 1).astype(F32)
        inv_b = jnp.float32(1.0 / Bb)
        rmod = jnp.floor(ridx * inv_b)
        cmod = jnp.floor(cidx * inv_b)
        rsmp = ridx - rmod * Bb
        csmp = cidx - cmod * Bb
        full_diag = ridx == cidx
        same_sample = rsmp == csmp

        # norms from diag(G)
        diag_g = jnp.where(full_diag, G, 0.0)
        sqn_col = jnp.sum(diag_g, axis=1, keepdims=True)          # [NB, 1]
        sqn_row = jnp.sum(diag_g, axis=0, keepdims=True)          # [1, NB]
        nrm_col = jnp.sqrt(sqn_col)
        nrm_row = jnp.sqrt(sqn_row)

        # CLR gram = dot of L2-normalised features (F.normalize, eps=1e-12)
        NG = G / (jnp.maximum(nrm_col, 1e-12) * jnp.maximum(nrm_row, 1e-12))

        # graph_construct_per_sample on the same gram (cosine eps=1e-8);
        # softmax is over the 4 same-sample columns via masking.
        cosf = G / jnp.maximum(nrm_col * nrm_row, 1e-8)
        neg_big = jnp.float32(-1e30)                               # finite "-inf"
        sm = jax.nn.softmax(jnp.where(same_sample, cosf, neg_big), axis=-1)
        revised = cosf * sm                                        # exactly 0 off-sample
        rn = jnp.sqrt(jnp.sum(revised * revised, axis=-1, keepdims=True))
        graphf = revised / jnp.maximum(rn, 1e-12)   # graphf[m*B+b, n*B+b] = graph[b,m,n]

        # modality weights = diag(graph) per sample, as a [NB, 1] column
        mw = jnp.sum(jnp.where(full_diag, graphf, 0.0), axis=1, keepdims=True)

        # ---- CLR loss: masked log-sum-exp on the full [NB, NB] gram ----
        # (the torch reference applies no temperature -- self.temperature unused)
        eyeB = (jax.lax.broadcasted_iota(jnp.int32, (Bb, Bb), 0) ==
                jax.lax.broadcasted_iota(jnp.int32, (Bb, Bb), 1))
        r1 = jax.lax.broadcasted_iota(jnp.int32, (NB, 1), 0).astype(F32)
        rmod1 = jnp.floor(r1 * inv_b)                              # [NB, 1] row modality

        clr = jnp.float32(0.0)
        npairs = 0
        for i in range(Mm):
            for j in range(i + 1, Mm):
                # per-row weight graph[b, i, j] (torch uses (i,j) for BOTH views)
                blk = graphf[i * Bb:(i + 1) * Bb, j * Bb:(j + 1) * Bb]     # [B, B]
                gij = jnp.sum(jnp.where(eyeB, blk, 0.0), axis=1, keepdims=True)
                w_rows = jnp.concatenate([gij] * Mm, axis=0)               # [NB, 1]
                scaled = w_rows * NG

                row_in = (rmod == i) | (rmod == j)
                col_in = (cmod == i) | (cmod == j)
                valid = row_in & col_in & jnp.logical_not(full_diag)
                pos = same_sample & (((rmod == i) & (cmod == j)) |
                                     ((rmod == j) & (cmod == i)))

                masked = jnp.where(valid, scaled, neg_big)
                rmax = jnp.max(masked, axis=-1, keepdims=True)
                lse = rmax + jnp.log(jnp.sum(jnp.exp(masked - rmax),
                                             axis=-1, keepdims=True))
                pos_logit = jnp.sum(jnp.where(pos, scaled, 0.0),
                                    axis=-1, keepdims=True)

                in_pair_row = (rmod1 == i) | (rmod1 == j)                  # [NB, 1]
                pair_loss = jnp.sum(jnp.where(in_pair_row, lse - pos_logit,
                                              0.0)) / (2 * Bb)
                clr = clr + pair_loss                 # CE with label 0 (positive col)
                npairs += 1
        loss_ref[...] = jnp.zeros_like(loss_ref) + clr / npairs

        # ---- weighted fusion + Predictor: 4 small matmuls, no transpose ----
        acc = jnp.zeros((Bb, wp_ref.shape[1]), F32)
        for mm in range(Mm):
            w_m = mw[mm * Bb:(mm + 1) * Bb, :]                             # [B, 1]
            xm = (feats_scr[mm] * w_m).astype(BF16)
            acc = acc + jnp.dot(xm, wp_ref[mm * Dd:(mm + 1) * Dd, :],
                                preferred_element_type=F32)
        pred_ref[...] = acc + bp_ref[...]


# --------------------------------- wrapper ------------------------------------

def ppim_fused_call(x_raw, first_hidden, att_mask_f, params):
    NM = NUM_MODALITIES
    B, S, DH = first_hidden.shape
    FP = x_raw.shape[2]

    # per-modality weight blocks; the head step (m=NM) re-uses the last block
    # (same block index -> no extra DMA).
    last_mod = lambda m: (jnp.minimum(m, NM - 1), 0, 0)

    def x_map(m):
        # x_raw holds only (ecfp, hashap, rdk); bert/head map to a resident block.
        mm = jnp.minimum(m, NM - 1)
        return (jnp.maximum(mm - 1, 0), 0, 0)

    # NOTE: first_hidden / att_mask / w_enc / b_enc are only needed at the BERT
    # step but are tiny here; if B*S ever grows, switch them to memory_space=
    # pl.ANY and DMA them inside pl.when(m == BERT_IDX).
    in_specs = [
        pl.BlockSpec((1, B, FP), x_map),                               # x_raw
        pl.BlockSpec((B, S, DH), lambda m: (0, 0, 0)),                 # first_hidden
        pl.BlockSpec((B, S), lambda m: (0, 0)),                        # att_mask
        pl.BlockSpec((DH, DH), lambda m: (0, 0)),                      # w_enc (bf16)
        pl.BlockSpec((1, DH), lambda m: (0, 0)),                       # b_enc
        pl.BlockSpec((1, FP, ENC_H), last_mod),                        # W1 (bf16)
        pl.BlockSpec((1, 1, ENC_H), last_mod),                         # B1
        pl.BlockSpec((1, ENC_H, ENC_O), last_mod),                     # W2 (bf16)
        pl.BlockSpec((1, 1, ENC_O), last_mod),                         # B2
        pl.BlockSpec((1, ENC_O, PROJ_H), last_mod),                    # W3 (bf16)
        pl.BlockSpec((1, 1, PROJ_H), last_mod),                        # B3
        pl.BlockSpec((1, PROJ_H, PROJ_O), last_mod),                   # W4 (bf16)
        pl.BlockSpec((1, 1, PROJ_O), last_mod),                        # B4
        pl.BlockSpec((PROJ_O * NM, PRED_LANES), lambda m: (0, 0)),     # wp_pad (bf16)
        pl.BlockSpec((1, PRED_LANES), lambda m: (0, 0)),               # bp_pad
    ]
    out_specs = (pl.BlockSpec((B, PRED_LANES), lambda m: (0, 0)),
                 pl.BlockSpec((1, PRED_LANES), lambda m: (0, 0)))
    out_shape = (jax.ShapeDtypeStruct((B, PRED_LANES), F32),
                 jax.ShapeDtypeStruct((1, PRED_LANES), F32))

    return pl.pallas_call(
        fused_kernel,
        grid=(NM + 1,),
        in_specs=in_specs,
        out_specs=out_specs,
        out_shape=out_shape,
        scratch_shapes=[pltpu.VMEM((B, FP), F32),              # staged modality input
                        pltpu.VMEM((NM, B, PROJ_O), F32)],     # projected features
        compiler_params=pltpu.CompilerParams(
            # the head step consumes scratch written by the modality steps, so
            # the grid axis must be "arbitrary" (no cross-core split).
            dimension_semantics=("arbitrary",),
            vmem_limit_bytes=32 * 1024 * 1024),
    )(x_raw, first_hidden, att_mask_f,
      params['w_enc'], params['b_enc'],
      params['W1'], params['B1'], params['W2'], params['B2'],
      params['W3'], params['B3'], params['W4'], params['B4'],
      params['wp_pad'], params['bp_pad'])


# ----------------------------- parameter setup --------------------------------

def init_linear(key, din, dout):
    kw, kb = jax.random.split(key)
    bound = float(din) ** -0.5
    w = jax.random.uniform(kw, (din, dout), F32, -bound, bound)
    b = jax.random.uniform(kb, (1, dout), F32, -bound, bound)
    return w, b


def init_stacked_encoders(key, in_dims, pad_in=FP_DIM):
    """Per-modality ModalEncoder+Projector weights stacked along the modality
    axis; bert's 768-dim first layer is zero-padded to `pad_in`.  Weights are
    stored bf16 (HBM-byte reduction); biases stay f32."""
    stacks = [[] for _ in range(8)]
    for mi, din in enumerate(in_dims):
        k = jax.random.split(jax.random.fold_in(key, mi), 4)
        w1, b1 = init_linear(k[0], din, ENC_H)
        if din < pad_in:
            w1 = jnp.concatenate([w1, jnp.zeros((pad_in - din, ENC_H), F32)], axis=0)
        w2, b2 = init_linear(k[1], ENC_H, ENC_O)
        w3, b3 = init_linear(k[2], ENC_O, PROJ_H)
        w4, b4 = init_linear(k[3], PROJ_H, PROJ_O)
        for s, t in zip(stacks, (w1, b1, w2, b2, w3, b3, w4, b4)):
            s.append(t)
    stacked = [jnp.stack(s, axis=0) for s in stacks]
    return tuple(t.astype(BF16) if idx % 2 == 0 else t
                 for idx, t in enumerate(stacked))


# --------------------------------- forward ------------------------------------

def ppim_forward(params, input_id, att_mask, hashap, ecfp, rdkfp):
    # TODO(synk): the pretrained DebertaV2Model drug encoder has no Pallas
    # equivalent; replaced by a deterministic frozen stand-in (embedding lookup
    # for hidden_states[0]; a dense+tanh, fused into the kernel, for
    # hidden_states[-1]).
    first_hidden = jnp.take(params['emb'], input_id, axis=0)        # [B, S, 768] bf16
    att = att_mask.astype(F32)

    # stacked raw modality inputs (ecfp, hashap, rdk); bert is built in-kernel
    x_raw = jnp.stack([ecfp, hashap, rdkfp], axis=0)                 # [3, B, 1024]

    pred_pad, loss_pad = ppim_fused_call(x_raw, first_hidden, att, params)
    return pred_pad[:, :1], loss_pad[0, 0]


# ----------------------------------- main --------------------------------------

if __name__ == "__main__":
    key = jax.random.PRNGKey(0)
    B, S, VOCAB = 4, 8, 32
    ks = jax.random.split(key, 12)

    params = {'emb': (jax.random.normal(ks[0], (VOCAB, BERT_DIM), F32)
                      * 0.02).astype(BF16)}
    w_enc, b_enc = init_linear(ks[1], BERT_DIM, BERT_DIM)
    params['w_enc'] = w_enc.astype(BF16)
    params['b_enc'] = b_enc
    (params['W1'], params['B1'], params['W2'], params['B2'],
     params['W3'], params['B3'], params['W4'], params['B4']) = init_stacked_encoders(
        ks[2], in_dims=(FP_DIM, BERT_DIM, FP_DIM, FP_DIM))   # (ecfp, bert, hashap, rdk)
    wp, bp = init_linear(ks[3], PROJ_O * NUM_MODALITIES, 1)
    params['wp_pad'] = jnp.concatenate(
        [wp, jnp.zeros((PROJ_O * NUM_MODALITIES, PRED_LANES - 1), F32)],
        axis=1).astype(BF16)                                             # [1024, 128]
    params['bp_pad'] = jnp.concatenate(
        [bp, jnp.zeros((1, PRED_LANES - 1), F32)], axis=1)

    input_id = jax.random.randint(ks[7], (B, S), 0, VOCAB)
    att_mask = jnp.ones((B, S), jnp.int32).at[:, S - 2:].set(0)      # last 2 tokens padded
    hashap = (jax.random.uniform(ks[8], (B, FP_DIM)) > 0.5).astype(F32)
    ecfp = (jax.random.uniform(ks[9], (B, FP_DIM)) > 0.5).astype(F32)
    rdkfp = (jax.random.uniform(ks[10], (B, FP_DIM)) > 0.5).astype(F32)

    fwd = jax.jit(ppim_forward)
    pred, loss = fwd(params, input_id, att_mask, hashap, ecfp, rdkfp)
    jax.block_until_ready((pred, loss))
    assert pred.shape == (B, 1) and loss.shape == ()
    assert bool(jnp.all(jnp.isfinite(pred))) and bool(jnp.isfinite(loss))
    print("KERNEL_OK")
</pallas_src>

<mosaic_0001>
module attributes {stable_mosaic.version = 11 : i64} {
  func.func @fused_kernel(%arg0: i32, %arg1: memref<1x4x1024xf32, #tpu.memory_space<vmem>>, %arg2: memref<4x8x768xbf16, #tpu.memory_space<vmem>>, %arg3: memref<4x8xf32, #tpu.memory_space<vmem>>, %arg4: memref<768x768xbf16, #tpu.memory_space<vmem>>, %arg5: memref<1x768xf32, #tpu.memory_space<vmem>>, %arg6: memref<1x1024x256xbf16, #tpu.memory_space<vmem>>, %arg7: memref<1x1x256xf32, #tpu.memory_space<vmem>>, %arg8: memref<1x256x256xbf16, #tpu.memory_space<vmem>>, %arg9: memref<1x1x256xf32, #tpu.memory_space<vmem>>, %arg10: memref<1x256x1024xbf16, #tpu.memory_space<vmem>>, %arg11: memref<1x1x1024xf32, #tpu.memory_space<vmem>>, %arg12: memref<1x1024x256xbf16, #tpu.memory_space<vmem>>, %arg13: memref<1x1x256xf32, #tpu.memory_space<vmem>>, %arg14: memref<1024x128xbf16, #tpu.memory_space<vmem>>, %arg15: memref<1x128xf32, #tpu.memory_space<vmem>>, %arg16: memref<4x128xf32, #tpu.memory_space<vmem>>, %arg17: memref<1x128xf32, #tpu.memory_space<vmem>>, %arg18: memref<4x1024xf32, #tpu.memory_space<vmem>>, %arg19: memref<4x4x256xf32, #tpu.memory_space<vmem>>) attributes {dimension_semantics = [#tpu.dimension_semantics<arbitrary>], iteration_bounds = array<i64: 5>, scalar_prefetch = 0 : i64, scratch_operands = 2 : i64, tpu.core_type = #tpu.core_type<tc>, window_params = [{transform_indices = @transform_0, window_bounds = array<i64: 1, 4, 1024>}, {pipeline_mode = #tpu.pipeline_mode<synchronous>, transform_indices = @transform_1, window_bounds = array<i64: 4, 8, 768>}, {pipeline_mode = #tpu.pipeline_mode<synchronous>, transform_indices = @transform_2, window_bounds = array<i64: 4, 8>}, {pipeline_mode = #tpu.pipeline_mode<synchronous>, transform_indices = @transform_3, window_bounds = array<i64: 768, 768>}, {pipeline_mode = #tpu.pipeline_mode<synchronous>, transform_indices = @transform_4, window_bounds = array<i64: 1, 768>}, {transform_indices = @transform_5, window_bounds = array<i64: 1, 1024, 256>}, {transform_indices = @transform_6, window_bounds = array<i64: 1, 1, 256>}, {transform_indices = @transform_7, window_bounds = array<i64: 1, 256, 256>}, {transform_indices = @transform_8, window_bounds = array<i64: 1, 1, 256>}, {transform_indices = @transform_9, window_bounds = array<i64: 1, 256, 1024>}, {transform_indices = @transform_10, window_bounds = array<i64: 1, 1, 1024>}, {transform_indices = @transform_11, window_bounds = array<i64: 1, 1024, 256>}, {transform_indices = @transform_12, window_bounds = array<i64: 1, 1, 256>}, {pipeline_mode = #tpu.pipeline_mode<synchronous>, transform_indices = @transform_13, window_bounds = array<i64: 1024, 128>}, {pipeline_mode = #tpu.pipeline_mode<synchronous>, transform_indices = @transform_14, window_bounds = array<i64: 1, 128>}, {pipeline_mode = #tpu.pipeline_mode<synchronous>, transform_indices = @transform_15, window_bounds = array<i64: 4, 128>}, {pipeline_mode = #tpu.pipeline_mode<synchronous>, transform_indices = @transform_16, window_bounds = array<i64: 1, 128>}]} {
    %c4_i32 = arith.constant 4 : i32
    %0 = arith.cmpi slt, %arg0, %c4_i32 : i32
    %c1_i32 = arith.constant 1 : i32
    %1 = arith.cmpi ne, %arg0, %c1_i32 : i32
    %2 = arith.andi %0, %1 : i1
    %3 = arith.extui %2 : i1 to i32
    %c0_i32 = arith.constant 0 : i32
    %4 = arith.cmpi ne, %3, %c0_i32 : i32
    scf.if %4 {
      %c0 = arith.constant 0 : index
      %c0_6 = arith.constant 0 : index
      %c0_7 = arith.constant 0 : index
      %14 = vector.load %arg1[%c0, %c0_6, %c0_7] : memref<1x4x1024xf32, #tpu.memory_space<vmem>>, vector<1x4x1024xf32>
      %15 = vector.shape_cast %14 : vector<1x4x1024xf32> to vector<4x1024xf32>
      %c0_8 = arith.constant 0 : index
      %c0_9 = arith.constant 0 : index
      %16 = vector.load %arg18[%c0_8, %c0_9] : memref<4x1024xf32, #tpu.memory_space<vmem>>, vector<4x1024xf32>
      tpu.vector_store %arg18[%c0_8, %c0_9], %15 {strides = array<i32>} : memref<4x1024xf32, #tpu.memory_space<vmem>>, vector<4x1024xf32>,
    } else {
    }
    %c1_i32_0 = arith.constant 1 : i32
    %5 = arith.cmpi eq, %arg0, %c1_i32_0 : i32
    %6 = arith.extui %5 : i1 to i32
    %c0_i32_1 = arith.constant 0 : i32
    %7 = arith.cmpi ne, %6, %c0_i32_1 : i32
    scf.if %7 {
      %c0 = arith.constant 0 : index
      %c0_6 = arith.constant 0 : index
      %c0_7 = arith.constant 0 : index
      %14 = vector.load %arg2[%c0, %c0_6, %c0_7] : memref<4x8x768xbf16, #tpu.memory_space<vmem>>, vector<4x8x768xbf16>
      %15 = arith.extf %14 : vector<4x8x768xbf16> to vector<4x8x768xf32>
      %16 = vector.shape_cast %15 : vector<4x8x768xf32> to vector<32x768xf32>
      %17 = arith.truncf %16 : vector<32x768xf32> to vector<32x768xbf16>
      %c0_8 = arith.constant 0 : index
      %c0_9 = arith.constant 0 : index
      %18 = vector.load %arg4[%c0_8, %c0_9] : memref<768x768xbf16, #tpu.memory_space<vmem>>, vector<768x768xbf16>
      %cst = arith.constant dense<0.000000e+00> : vector<32x768xf32>
      %19 = tpu.matmul %17, %18, %cst {dimension_numbers = #tpu.dot_dimension_numbers<[1], [0], [0], [1], [0, 0, 1, 1], [], []>} : vector<32x768xbf16>, vector<768x768xbf16>, vector<32x768xf32> -> vector<32x768xf32>
      %c0_10 = arith.constant 0 : index
      %c0_11 = arith.constant 0 : index
      %20 = vector.load %arg5[%c0_10, %c0_11] : memref<1x768xf32, #tpu.memory_space<vmem>>, vector<1x768xf32>
      %21 = vector.broadcast %20 : vector<1x768xf32> to vector<32x768xf32>
      %22 = arith.addf %19, %21 : vector<32x768xf32>
      %23 = math.tanh %22 : vector<32x768xf32>
      %24 = vector.shape_cast %23 : vector<32x768xf32> to vector<4x8x768xf32>
      %c0_12 = arith.constant 0 : index
      %c0_13 = arith.constant 0 : index
      %25 = vector.load %arg3[%c0_12, %c0_13] : memref<4x8xf32, #tpu.memory_space<vmem>>, vector<4x8xf32>
      %26 = arith.addf %15, %24 : vector<4x8x768xf32>
      %cst_14 = arith.constant 5.000000e-01 : f32
      %27 = vector.broadcast %cst_14 : f32 to vector<4x8x768xf32>
      %28 = arith.mulf %26, %27 : vector<4x8x768xf32>
      %29 = vector.shape_cast %25 : vector<4x8xf32> to vector<4x8x1xf32>
      %30 = vector.broadcast %29 : vector<4x8x1xf32> to vector<4x8x768xf32>
      %31 = arith.mulf %28, %30 : vector<4x8x768xf32>
      %cst_15 = arith.constant dense<0.000000e+00> : vector<4xf32>
      %32 = vector.multi_reduction <add>, %25, %cst_15 [1] : vector<4x8xf32> to vector<4xf32>
      %33 = vector.shape_cast %32 : vector<4xf32> to vector<4x1xf32>
      %cst_16 = arith.constant 1.000000e+00 : f32
      %34 = vector.broadcast %cst_16 : f32 to vector<4x1xf32>
      %35 = arith.maximumf %33, %34 : vector<4x1xf32>
      %cst_17 = arith.constant dense<0.000000e+00> : vector<4x768xf32>
      %36 = vector.multi_reduction <add>, %31, %cst_17 [1] : vector<4x8x768xf32> to vector<4x768xf32>
      %37 = vector.broadcast %35 : vector<4x1xf32> to vector<4x768xf32>
      %38 = arith.divf %36, %37 : vector<4x768xf32>
      %c0_18 = arith.constant 0 : index
      %c0_19 = arith.constant 0 : index
      %39 = vector.load %arg18[%c0_18, %c0_19] : memref<4x1024xf32, #tpu.memory_space<vmem>>, vector<4x768xf32>
      tpu.vector_store %arg18[%c0_18, %c0_19], %38 {strides = array<i32>} : memref<4x1024xf32, #tpu.memory_space<vmem>>, vector<4x768xf32>,
      %cst_20 = arith.constant 0.000000e+00 : f32
      %40 = vector.broadcast %cst_20 : f32 to vector<4x256xf32>
      %c0_21 = arith.constant 0 : index
      %c768 = arith.constant 768 : index
      %41 = vector.load %arg18[%c0_21, %c768] : memref<4x1024xf32, #tpu.memory_space<vmem>>, vector<4x256xf32>
      tpu.vector_store %arg18[%c0_21, %c768], %40 {strides = array<i32>} : memref<4x1024xf32, #tpu.memory_space<vmem>>, vector<4x256xf32>,
    } else {
    }
    %c4_i32_2 = arith.constant 4 : i32
    %8 = arith.cmpi slt, %arg0, %c4_i32_2 : i32
    %9 = arith.extui %8 : i1 to i32
    %c0_i32_3 = arith.constant 0 : i32
    %10 = arith.cmpi ne, %9, %c0_i32_3 : i32
    scf.if %10 {
      %c0 = arith.constant 0 : index
      %c0_6 = arith.constant 0 : index
      %14 = vector.load %arg18[%c0, %c0_6] : memref<4x1024xf32, #tpu.memory_space<vmem>>, vector<4x1024xf32>
      %15 = arith.truncf %14 : vector<4x1024xf32> to vector<4x1024xbf16>
      %c0_7 = arith.constant 0 : index
      %c0_8 = arith.constant 0 : index
      %c0_9 = arith.constant 0 : index
      %16 = vector.load %arg6[%c0_7, %c0_8, %c0_9] : memref<1x1024x256xbf16, #tpu.memory_space<vmem>>, vector<1x1024x256xbf16>
      %17 = vector.shape_cast %16 : vector<1x1024x256xbf16> to vector<1024x256xbf16>
      %cst = arith.constant dense<0.000000e+00> : vector<4x256xf32>
      %18 = tpu.matmul %15, %17, %cst {dimension_numbers = #tpu.dot_dimension_numbers<[1], [0], [0], [1], [0, 0, 1, 1], [], []>} : vector<4x1024xbf16>, vector<1024x256xbf16>, vector<4x256xf32> -> vector<4x256xf32>
      %c0_10 = arith.constant 0 : index
      %c0_11 = arith.constant 0 : index
      %c0_12 = arith.constant 0 : index
      %19 = vector.load %arg7[%c0_10, %c0_11, %c0_12] : memref<1x1x256xf32, #tpu.memory_space<vmem>>, vector<1x1x256xf32>
      %20 = vector.shape_cast %19 : vector<1x1x256xf32> to vector<1x256xf32>
      %21 = vector.broadcast %20 : vector<1x256xf32> to vector<4x256xf32>
      %22 = arith.addf %18, %21 : vector<4x256xf32>
      %cst_13 = arith.constant 0.000000e+00 : f32
      %23 = vector.broadcast %cst_13 : f32 to vector<4x256xf32>
      %24 = arith.cmpf ogt, %22, %23 : vector<4x256xf32>
      %25 = math.exp %22 : vector<4x256xf32>
      %cst_14 = arith.constant 1.000000e+00 : f32
      %26 = vector.broadcast %cst_14 : f32 to vector<4x256xf32>
      %27 = arith.subf %25, %26 : vector<4x256xf32>
      %28 = arith.select %24, %22, %27 : vector<4x256xi1>, vector<4x256xf32>
      %29 = arith.truncf %28 : vector<4x256xf32> to vector<4x256xbf16>
      %c0_15 = arith.constant 0 : index
      %c0_16 = arith.constant 0 : index
      %c0_17 = arith.constant 0 : index
      %30 = vector.load %arg8[%c0_15, %c0_16, %c0_17] : memref<1x256x256xbf16, #tpu.memory_space<vmem>>, vector<1x256x256xbf16>
      %31 = vector.shape_cast %30 : vector<1x256x256xbf16> to vector<256x256xbf16>
      %cst_18 = arith.constant dense<0.000000e+00> : vector<4x256xf32>
      %32 = tpu.matmul %29, %31, %cst_18 {dimension_numbers = #tpu.dot_dimension_numbers<[1], [0], [0], [1], [0, 0, 1, 1], [], []>} : vector<4x256xbf16>, vector<256x256xbf16>, vector<4x256xf32> -> vector<4x256xf32>
      %c0_19 = arith.constant 0 : index
      %c0_20 = arith.constant 0 : index
      %c0_21 = arith.constant 0 : index
      %33 = vector.load %arg9[%c0_19, %c0_20, %c0_21] : memref<1x1x256xf32, #tpu.memory_space<vmem>>, vector<1x1x256xf32>
      %34 = vector.shape_cast %33 : vector<1x1x256xf32> to vector<1x256xf32>
      %35 = vector.broadcast %34 : vector<1x256xf32> to vector<4x256xf32>
      %36 = arith.addf %32, %35 : vector<4x256xf32>
      %cst_22 = arith.constant 0.000000e+00 : f32
      %37 = vector.broadcast %cst_22 : f32 to vector<4x256xf32>
      %38 = arith.cmpf ogt, %36, %37 : vector<4x256xf32>
      %39 = math.exp %36 : vector<4x256xf32>
      %cst_23 = arith.constant 1.000000e+00 : f32
      %40 = vector.broadcast %cst_23 : f32 to vector<4x256xf32>
      %41 = arith.subf %39, %40 : vector<4x256xf32>
      %42 = arith.select %38, %36, %41 : vector<4x256xi1>, vector<4x256xf32>
      %43 = arith.truncf %42 : vector<4x256xf32> to vector<4x256xbf16>
      %c0_24 = arith.constant 0 : index
      %c0_25 = arith.constant 0 : index
      %c0_26 = arith.constant 0 : index
      %44 = vector.load %arg10[%c0_24, %c0_25, %c0_26] : memref<1x256x1024xbf16, #tpu.memory_space<vmem>>, vector<1x256x1024xbf16>
      %45 = vector.shape_cast %44 : vector<1x256x1024xbf16> to vector<256x1024xbf16>
      %cst_27 = arith.constant dense<0.000000e+00> : vector<4x1024xf32>
      %46 = tpu.matmul %43, %45, %cst_27 {dimension_numbers = #tpu.dot_dimension_numbers<[1], [0], [0], [1], [0, 0, 1, 1], [], []>} : vector<4x256xbf16>, vector<256x1024xbf16>, vector<4x1024xf32> -> vector<4x1024xf32>
      %c0_28 = arith.constant 0 : index
      %c0_29 = arith.constant 0 : index
      %c0_30 = arith.constant 0 : index
      %47 = vector.load %arg11[%c0_28, %c0_29, %c0_30] : memref<1x1x1024xf32, #tpu.memory_space<vmem>>, vector<1x1x1024xf32>
      %48 = vector.shape_cast %47 : vector<1x1x1024xf32> to vector<1x1024xf32>
      %49 = vector.broadcast %48 : vector<1x1024xf32> to vector<4x1024xf32>
      %50 = arith.addf %46, %49 : vector<4x1024xf32>
      %cst_31 = arith.constant 5.000000e-01 : f32
      %51 = vector.broadcast %cst_31 : f32 to vector<4x1024xf32>
      %52 = arith.mulf %51, %50 : vector<4x1024xf32>
      %cst_32 = arith.constant 0.707106769 : f32
      %53 = vector.broadcast %cst_32 : f32 to vector<4x1024xf32>
      %54 = arith.mulf %50, %53 : vector<4x1024xf32>
      %55 = math.absf %54 : vector<4x1024xf32>
      %cst_33 = arith.constant 0.327591091 : f32
      %56 = vector.broadcast %cst_33 : f32 to vector<4x1024xf32>
      %57 = arith.mulf %56, %55 : vector<4x1024xf32>
      %cst_34 = arith.constant 1.000000e+00 : f32
      %58 = vector.broadcast %cst_34 : f32 to vector<4x1024xf32>
      %59 = arith.addf %58, %57 : vector<4x1024xf32>
      %cst_35 = arith.constant 1.000000e+00 : f32
      %60 = vector.broadcast %cst_35 : f32 to vector<4x1024xf32>
      %61 = arith.divf %60, %59 : vector<4x1024xf32>
      %cst_36 = arith.constant 1.06140542 : f32
      %62 = vector.broadcast %cst_36 : f32 to vector<4x1024xf32>
      %63 = arith.mulf %62, %61 : vector<4x1024xf32>
      %cst_37 = arith.constant -1.45315206 : f32
      %64 = vector.broadcast %cst_37 : f32 to vector<4x1024xf32>
      %65 = arith.addf %63, %64 : vector<4x1024xf32>
      %66 = arith.mulf %65, %61 : vector<4x1024xf32>
      %cst_38 = arith.constant 1.42141378 : f32
      %67 = vector.broadcast %cst_38 : f32 to vector<4x1024xf32>
      %68 = arith.addf %66, %67 : vector<4x1024xf32>
      %69 = arith.mulf %68, %61 : vector<4x1024xf32>
      %cst_39 = arith.constant -0.284496725 : f32
      %70 = vector.broadcast %cst_39 : f32 to vector<4x1024xf32>
      %71 = arith.addf %69, %70 : vector<4x1024xf32>
      %72 = arith.mulf %71, %61 : vector<4x1024xf32>
      %cst_40 = arith.constant 0.254829586 : f32
      %73 = vector.broadcast %cst_40 : f32 to vector<4x1024xf32>
      %74 = arith.addf %72, %73 : vector<4x1024xf32>
      %75 = arith.mulf %74, %61 : vector<4x1024xf32>
      %76 = arith.mulf %55, %55 : vector<4x1024xf32>
      %cst_41 = arith.constant 0.000000e+00 : f32
      %77 = vector.broadcast %cst_41 : f32 to vector<4x1024xf32>
      %78 = arith.subf %77, %76 : vector<4x1024xf32>
      %79 = math.exp %78 : vector<4x1024xf32>
      %80 = arith.mulf %75, %79 : vector<4x1024xf32>
      %cst_42 = arith.constant 1.000000e+00 : f32
      %81 = vector.broadcast %cst_42 : f32 to vector<4x1024xf32>
      %82 = arith.subf %81, %80 : vector<4x1024xf32>
      %cst_43 = arith.constant 0.000000e+00 : f32
      %83 = vector.broadcast %cst_43 : f32 to vector<4x1024xf32>
      %84 = arith.cmpf olt, %54, %83 : vector<4x1024xf32>
      %cst_44 = arith.constant 0.000000e+00 : f32
      %85 = vector.broadcast %cst_44 : f32 to vector<4x1024xf32>
      %86 = arith.subf %85, %82 : vector<4x1024xf32>
      %87 = arith.select %84, %86, %82 : vector<4x1024xi1>, vector<4x1024xf32>
      %cst_45 = arith.constant 1.000000e+00 : f32
      %88 = vector.broadcast %cst_45 : f32 to vector<4x1024xf32>
      %89 = arith.addf %88, %87 : vector<4x1024xf32>
      %90 = arith.mulf %52, %89 : vector<4x1024xf32>
      %91 = arith.truncf %90 : vector<4x1024xf32> to vector<4x1024xbf16>
      %c0_46 = arith.constant 0 : index
      %c0_47 = arith.constant 0 : index
      %c0_48 = arith.constant 0 : index
      %92 = vector.load %arg12[%c0_46, %c0_47, %c0_48] : memref<1x1024x256xbf16, #tpu.memory_space<vmem>>, vector<1x1024x256xbf16>
      %93 = vector.shape_cast %92 : vector<1x1024x256xbf16> to vector<1024x256xbf16>
      %cst_49 = arith.constant dense<0.000000e+00> : vector<4x256xf32>
      %94 = tpu.matmul %91, %93, %cst_49 {dimension_numbers = #tpu.dot_dimension_numbers<[1], [0], [0], [1], [0, 0, 1, 1], [], []>} : vector<4x1024xbf16>, vector<1024x256xbf16>, vector<4x256xf32> -> vector<4x256xf32>
      %c0_50 = arith.constant 0 : index
      %c0_51 = arith.constant 0 : index
      %c0_52 = arith.constant 0 : index
      %95 = vector.load %arg13[%c0_50, %c0_51, %c0_52] : memref<1x1x256xf32, #tpu.memory_space<vmem>>, vector<1x1x256xf32>
      %96 = vector.shape_cast %95 : vector<1x1x256xf32> to vector<1x256xf32>
      %97 = vector.broadcast %96 : vector<1x256xf32> to vector<4x256xf32>
      %98 = arith.addf %94, %97 : vector<4x256xf32>
      %99 = arith.index_cast %arg0 : i32 to index
      %c0_53 = arith.constant 0 : index
      %c0_54 = arith.constant 0 : index
      %100 = vector.load %arg19[%99, %c0_53, %c0_54] : memref<4x4x256xf32, #tpu.memory_space<vmem>>, vector<1x4x256xf32>
      %101 = vector.shape_cast %100 : vector<1x4x256xf32> to vector<4x256xf32>
      %102 = vector.shape_cast %98 : vector<4x256xf32> to vector<1x4x256xf32>
      tpu.vector_store %arg19[%99, %c0_53, %c0_54], %102 {strides = array<i32>} : memref<4x4x256xf32, #tpu.memory_space<vmem>>, vector<1x4x256xf32>,
    } else {
    }
    %c4_i32_4 = arith.constant 4 : i32
    %11 = arith.cmpi eq, %arg0, %c4_i32_4 : i32
    %12 = arith.extui %11 : i1 to i32
    %c0_i32_5 = arith.constant 0 : i32
    %13 = arith.cmpi ne, %12, %c0_i32_5 : i32
    scf.if %13 {
      %c0 = arith.constant 0 : index
      %c0_6 = arith.constant 0 : index
      %c0_7 = arith.constant 0 : index
      %14 = vector.load %arg19[%c0, %c0_6, %c0_7] : memref<4x4x256xf32, #tpu.memory_space<vmem>>, vector<1x4x256xf32>
      %15 = vector.shape_cast %14 : vector<1x4x256xf32> to vector<4x256xf32>
      %c1 = arith.constant 1 : index
      %c0_8 = arith.constant 0 : index
      %c0_9 = arith.constant 0 : index
      %16 = vector.load %arg19[%c1, %c0_8, %c0_9] : memref<4x4x256xf32, #tpu.memory_space<vmem>>, vector<1x4x256xf32>
      %17 = vector.shape_cast %16 : vector<1x4x256xf32> to vector<4x256xf32>
      %c2 = arith.constant 2 : index
      %c0_10 = arith.constant 0 : index
      %c0_11 = arith.constant 0 : index
      %18 = vector.load %arg19[%c2, %c0_10, %c0_11] : memref<4x4x256xf32, #tpu.memory_space<vmem>>, vector<1x4x256xf32>
      %19 = vector.shape_cast %18 : vector<1x4x256xf32> to vector<4x256xf32>
      %c3 = arith.constant 3 : index
      %c0_12 = arith.constant 0 : index
      %c0_13 = arith.constant 0 : index
      %20 = vector.load %arg19[%c3, %c0_12, %c0_13] : memref<4x4x256xf32, #tpu.memory_space<vmem>>, vector<1x4x256xf32>
      %21 = vector.shape_cast %20 : vector<1x4x256xf32> to vector<4x256xf32>
      %22 = tpu.concatenate %15, %17, %19, %21 in 0 : vector<4x256xf32>, vector<4x256xf32>, vector<4x256xf32>, vector<4x256xf32> -> vector<16x256xf32>
      %cst = arith.constant dense<0.000000e+00> : vector<16x16xf32>
      %23 = tpu.matmul %22, %22, %cst {dimension_numbers = #tpu.dot_dimension_numbers<[1], [1], [0], [0], [0, 0, 1, 0], [], []>} : vector<16x256xf32>, vector<16x256xf32>, vector<16x16xf32> -> vector<16x16xf32>
      %24 = tpu.iota {dimensions = array<i32: 0>} : vector<16x16xi32>
      %25 = arith.sitofp %24 : vector<16x16xi32> to vector<16x16xf32>
      %26 = tpu.iota {dimensions = array<i32: 1>} : vector<16x16xi32>
      %27 = arith.sitofp %26 : vector<16x16xi32> to vector<16x16xf32>
      %cst_14 = arith.constant 2.500000e-01 : f32
      %28 = vector.broadcast %cst_14 : f32 to vector<16x16xf32>
      %29 = arith.mulf %25, %28 : vector<16x16xf32>
      %30 = math.floor %29 : vector<16x16xf32>
      %cst_15 = arith.constant 2.500000e-01 : f32
      %31 = vector.broadcast %cst_15 : f32 to vector<16x16xf32>
      %32 = arith.mulf %27, %31 : vector<16x16xf32>
      %33 = math.floor %32 : vector<16x16xf32>
      %cst_16 = arith.constant 4.000000e+00 : f32
      %34 = vector.broadcast %cst_16 : f32 to vector<16x16xf32>
      %35 = arith.mulf %30, %34 : vector<16x16xf32>
      %36 = arith.subf %25, %35 : vector<16x16xf32>
      %cst_17 = arith.constant 4.000000e+00 : f32
      %37 = vector.broadcast %cst_17 : f32 to vector<16x16xf32>
      %38 = arith.mulf %33, %37 : vector<16x16xf32>
      %39 = arith.subf %27, %38 : vector<16x16xf32>
      %40 = arith.cmpf oeq, %25, %27 : vector<16x16xf32>
      %41 = arith.cmpf oeq, %36, %39 : vector<16x16xf32>
      %cst_18 = arith.constant 0.000000e+00 : f32
      %42 = vector.broadcast %cst_18 : f32 to vector<16x16xf32>
      %43 = arith.select %40, %23, %42 : vector<16x16xi1>, vector<16x16xf32>
      %cst_19 = arith.constant dense<0.000000e+00> : vector<16xf32>
      %44 = vector.multi_reduction <add>, %43, %cst_19 [1] : vector<16x16xf32> to vector<16xf32>
      %45 = vector.shape_cast %44 : vector<16xf32> to vector<16x1xf32>
      %cst_20 = arith.constant dense<0.000000e+00> : vector<16xf32>
      %46 = vector.multi_reduction <add>, %43, %cst_20 [0] : vector<16x16xf32> to vector<16xf32>
      %47 = vector.shape_cast %46 : vector<16xf32> to vector<1x16xf32>
      %48 = math.sqrt %45 : vector<16x1xf32>
      %49 = math.sqrt %47 : vector<1x16xf32>
      %cst_21 = arith.constant 9.99999996E-13 : f32
      %50 = vector.broadcast %cst_21 : f32 to vector<16x1xf32>
      %51 = arith.maximumf %48, %50 : vector<16x1xf32>
      %cst_22 = arith.constant 9.99999996E-13 : f32
      %52 = vector.broadcast %cst_22 : f32 to vector<1x16xf32>
      %53 = arith.maximumf %49, %52 : vector<1x16xf32>
      %54 = vector.broadcast %51 : vector<16x1xf32> to vector<16x16xf32>
      %55 = vector.broadcast %53 : vector<1x16xf32> to vector<16x16xf32>
      %56 = arith.mulf %54, %55 : vector<16x16xf32>
      %57 = arith.divf %23, %56 : vector<16x16xf32>
      %58 = vector.broadcast %48 : vector<16x1xf32> to vector<16x16xf32>
      %59 = vector.broadcast %49 : vector<1x16xf32> to vector<16x16xf32>
      %60 = arith.mulf %58, %59 : vector<16x16xf32>
      %cst_23 = arith.constant 9.99999993E-9 : f32
      %61 = vector.broadcast %cst_23 : f32 to vector<16x16xf32>
      %62 = arith.maximumf %60, %61 : vector<16x16xf32>
      %63 = arith.divf %23, %62 : vector<16x16xf32>
      %cst_24 = arith.constant -1.000000e+30 : f32
      %64 = vector.broadcast %cst_24 : f32 to vector<16x16xf32>
      %65 = arith.select %41, %63, %64 : vector<16x16xi1>, vector<16x16xf32>
      %cst_25 = arith.constant dense<0xFF800000> : vector<16xf32>
      %66 = vector.multi_reduction <maximumf>, %65, %cst_25 [1] : vector<16x16xf32> to vector<16xf32>
      %cst_26 = arith.constant 0xFF800000 : f32
      %67 = vector.broadcast %cst_26 : f32 to vector<16xf32>
      %68 = arith.maximumf %67, %66 : vector<16xf32>
      %69 = vector.shape_cast %68 : vector<16xf32> to vector<16x1xf32>
      %70 = vector.broadcast %69 : vector<16x1xf32> to vector<16x16xf32>
      %71 = arith.subf %65, %70 : vector<16x16xf32>
      %72 = math.exp %71 : vector<16x16xf32>
      %cst_27 = arith.constant dense<0.000000e+00> : vector<16xf32>
      %73 = vector.multi_reduction <add>, %72, %cst_27 [1] : vector<16x16xf32> to vector<16xf32>
      %74 = vector.shape_cast %73 : vector<16xf32> to vector<16x1xf32>
      %75 = vector.broadcast %74 : vector<16x1xf32> to vector<16x16xf32>
      %76 = arith.divf %72, %75 : vector<16x16xf32>
      %77 = arith.mulf %63, %76 : vector<16x16xf32>
      %78 = arith.mulf %77, %77 : vector<16x16xf32>
      %cst_28 = arith.constant dense<0.000000e+00> : vector<16xf32>
      %79 = vector.multi_reduction <add>, %78, %cst_28 [1] : vector<16x16xf32> to vector<16xf32>
      %80 = vector.shape_cast %79 : vector<16xf32> to vector<16x1xf32>
      %81 = math.sqrt %80 : vector<16x1xf32>
      %cst_29 = arith.constant 9.99999996E-13 : f32
      %82 = vector.broadcast %cst_29 : f32 to vector<16x1xf32>
      %83 = arith.maximumf %81, %82 : vector<16x1xf32>
      %84 = vector.broadcast %83 : vector<16x1xf32> to vector<16x16xf32>
      %85 = arith.divf %77, %84 : vector<16x16xf32>
      %cst_30 = arith.constant 0.000000e+00 : f32
      %86 = vector.broadcast %cst_30 : f32 to vector<16x16xf32>
      %87 = arith.select %40, %85, %86 : vector<16x16xi1>, vector<16x16xf32>
      %cst_31 = arith.constant dense<0.000000e+00> : vector<16xf32>
      %88 = vector.multi_reduction <add>, %87, %cst_31 [1] : vector<16x16xf32> to vector<16xf32>
      %89 = vector.shape_cast %88 : vector<16xf32> to vector<16x1xf32>
      %90 = tpu.iota {dimensions = array<i32: 0>} : vector<4x4xi32>
      %91 = tpu.iota {dimensions = array<i32: 1>} : vector<4x4xi32>
      %92 = arith.cmpi eq, %90, %91 : vector<4x4xi32>
      %93 = tpu.iota {dimensions = array<i32: 0>} : vector<16x1xi32>
      %94 = arith.sitofp %93 : vector<16x1xi32> to vector<16x1xf32>
      %cst_32 = arith.constant 2.500000e-01 : f32
      %95 = vector.broadcast %cst_32 : f32 to vector<16x1xf32>
      %96 = arith.mulf %94, %95 : vector<16x1xf32>
      %97 = math.floor %96 : vector<16x1xf32>
      %98 = vector.extract_strided_slice %85 {offsets = [0, 4], sizes = [4, 4], strides = [1, 1]} : vector<16x16xf32> to vector<4x4xf32>
      %cst_33 = arith.constant 0.000000e+00 : f32
      %99 = vector.broadcast %cst_33 : f32 to vector<4x4xf32>
      %100 = arith.select %92, %98, %99 : vector<4x4xi1>, vector<4x4xf32>
      %cst_34 = arith.constant dense<0.000000e+00> : vector<4xf32>
      %101 = vector.multi_reduction <add>, %100, %cst_34 [1] : vector<4x4xf32> to vector<4xf32>
      %102 = vector.shape_cast %101 : vector<4xf32> to vector<4x1xf32>
      %103 = tpu.concatenate %102, %102, %102, %102 in 0 : vector<4x1xf32>, vector<4x1xf32>, vector<4x1xf32>, vector<4x1xf32> -> vector<16x1xf32>
      %104 = vector.broadcast %103 : vector<16x1xf32> to vector<16x16xf32>
      %105 = arith.mulf %104, %57 : vector<16x16xf32>
      %cst_35 = arith.constant 0.000000e+00 : f32
      %106 = vector.broadcast %cst_35 : f32 to vector<16x16xf32>
      %107 = arith.cmpf oeq, %30, %106 : vector<16x16xf32>
      %cst_36 = arith.constant 1.000000e+00 : f32
      %108 = vector.broadcast %cst_36 : f32 to vector<16x16xf32>
      %109 = arith.cmpf oeq, %30, %108 : vector<16x16xf32>
      %110 = arith.ori %107, %109 : vector<16x16xi1>
      %cst_37 = arith.constant 0.000000e+00 : f32
      %111 = vector.broadcast %cst_37 : f32 to vector<16x16xf32>
      %112 = arith.cmpf oeq, %33, %111 : vector<16x16xf32>
      %cst_38 = arith.constant 1.000000e+00 : f32
      %113 = vector.broadcast %cst_38 : f32 to vector<16x16xf32>
      %114 = arith.cmpf oeq, %33, %113 : vector<16x16xf32>
      %115 = arith.ori %112, %114 : vector<16x16xi1>
      %116 = arith.andi %110, %115 : vector<16x16xi1>
      %cst_39 = arith.constant dense<true> : vector<16x16xi1>
      %117 = arith.xori %40, %cst_39 : vector<16x16xi1>
      %118 = arith.andi %116, %117 : vector<16x16xi1>
      %cst_40 = arith.constant 0.000000e+00 : f32
      %119 = vector.broadcast %cst_40 : f32 to vector<16x16xf32>
      %120 = arith.cmpf oeq, %30, %119 : vector<16x16xf32>
      %cst_41 = arith.constant 1.000000e+00 : f32
      %121 = vector.broadcast %cst_41 : f32 to vector<16x16xf32>
      %122 = arith.cmpf oeq, %33, %121 : vector<16x16xf32>
      %123 = arith.andi %120, %122 : vector<16x16xi1>
      %cst_42 = arith.constant 1.000000e+00 : f32
      %124 = vector.broadcast %cst_42 : f32 to vector<16x16xf32>
      %125 = arith.cmpf oeq, %30, %124 : vector<16x16xf32>
      %cst_43 = arith.constant 0.000000e+00 : f32
      %126 = vector.broadcast %cst_43 : f32 to vector<16x16xf32>
      %127 = arith.cmpf oeq, %33, %126 : vector<16x16xf32>
      %128 = arith.andi %125, %127 : vector<16x16xi1>
      %129 = arith.ori %123, %128 : vector<16x16xi1>
      %130 = arith.andi %41, %129 : vector<16x16xi1>
      %cst_44 = arith.constant -1.000000e+30 : f32
      %131 = vector.broadcast %cst_44 : f32 to vector<16x16xf32>
      %132 = arith.select %118, %105, %131 : vector<16x16xi1>, vector<16x16xf32>
      %cst_45 = arith.constant dense<0xFF800000> : vector<16xf32>
      %133 = vector.multi_reduction <maximumf>, %132, %cst_45 [1] : vector<16x16xf32> to vector<16xf32>
      %134 = vector.shape_cast %133 : vector<16xf32> to vector<16x1xf32>
      %135 = vector.broadcast %134 : vector<16x1xf32> to vector<16x16xf32>
      %136 = arith.subf %132, %135 : vector<16x16xf32>
      %137 = math.exp %136 : vector<16x16xf32>
      %cst_46 = arith.constant dense<0.000000e+00> : vector<16xf32>
      %138 = vector.multi_reduction <add>, %137, %cst_46 [1] : vector<16x16xf32> to vector<16xf32>
      %139 = vector.shape_cast %138 : vector<16xf32> to vector<16x1xf32>
      %140 = math.log %139 : vector<16x1xf32>
      %141 = arith.addf %134, %140 : vector<16x1xf32>
      %cst_47 = arith.constant 0.000000e+00 : f32
      %142 = vector.broadcast %cst_47 : f32 to vector<16x16xf32>
      %143 = arith.select %130, %105, %142 : vector<16x16xi1>, vector<16x16xf32>
      %cst_48 = arith.constant dense<0.000000e+00> : vector<16xf32>
      %144 = vector.multi_reduction <add>, %143, %cst_48 [1] : vector<16x16xf32> to vector<16xf32>
      %145 = vector.shape_cast %144 : vector<16xf32> to vector<16x1xf32>
      %cst_49 = arith.constant 0.000000e+00 : f32
      %146 = vector.broadcast %cst_49 : f32 to vector<16x1xf32>
      %147 = arith.cmpf oeq, %97, %146 : vector<16x1xf32>
      %cst_50 = arith.constant 1.000000e+00 : f32
      %148 = vector.broadcast %cst_50 : f32 to vector<16x1xf32>
      %149 = arith.cmpf oeq, %97, %148 : vector<16x1xf32>
      %150 = arith.ori %147, %149 : vector<16x1xi1>
      %151 = arith.subf %141, %145 : vector<16x1xf32>
      %cst_51 = arith.constant 0.000000e+00 : f32
      %152 = vector.broadcast %cst_51 : f32 to vector<16x1xf32>
      %153 = arith.select %150, %151, %152 : vector<16x1xi1>, vector<16x1xf32>
      %154 = vector.shape_cast %153 : vector<16x1xf32> to vector<1x16x1xf32>
      %cst_52 = arith.constant dense<0.000000e+00> : vector<1xf32>
      %155 = vector.multi_reduction <add>, %154, %cst_52 [1, 2] : vector<1x16x1xf32> to vector<1xf32>
      %156 = vector.shape_cast %155 : vector<1xf32> to vector<1x1x1xf32>
      %157 = vector.extract %156[0, 0, 0] : f32 from vector<1x1x1xf32>
      %cst_53 = arith.constant 8.000000e+00 : f32
      %158 = arith.divf %157, %cst_53 : f32
      %cst_54 = arith.constant 0.000000e+00 : f32
      %159 = arith.addf %cst_54, %158 : f32
      %160 = vector.extract_strided_slice %85 {offsets = [0, 8], sizes = [4, 4], strides = [1, 1]} : vector<16x16xf32> to vector<4x4xf32>
      %cst_55 = arith.constant 0.000000e+00 : f32
      %161 = vector.broadcast %cst_55 : f32 to vector<4x4xf32>
      %162 = arith.select %92, %160, %161 : vector<4x4xi1>, vector<4x4xf32>
      %cst_56 = arith.constant dense<0.000000e+00> : vector<4xf32>
      %163 = vector.multi_reduction <add>, %162, %cst_56 [1] : vector<4x4xf32> to vector<4xf32>
      %164 = vector.shape_cast %163 : vector<4xf32> to vector<4x1xf32>
      %165 = tpu.concatenate %164, %164, %164, %164 in 0 : vector<4x1xf32>, vector<4x1xf32>, vector<4x1xf32>, vector<4x1xf32> -> vector<16x1xf32>
      %166 = vector.broadcast %165 : vector<16x1xf32> to vector<16x16xf32>
      %167 = arith.mulf %166, %57 : vector<16x16xf32>
      %cst_57 = arith.constant 0.000000e+00 : f32
      %168 = vector.broadcast %cst_57 : f32 to vector<16x16xf32>
      %169 = arith.cmpf oeq, %30, %168 : vector<16x16xf32>
      %cst_58 = arith.constant 2.000000e+00 : f32
      %170 = vector.broadcast %cst_58 : f32 to vector<16x16xf32>
      %171 = arith.cmpf oeq, %30, %170 : vector<16x16xf32>
      %172 = arith.ori %169, %171 : vector<16x16xi1>
      %cst_59 = arith.constant 0.000000e+00 : f32
      %173 = vector.broadcast %cst_59 : f32 to vector<16x16xf32>
      %174 = arith.cmpf oeq, %33, %173 : vector<16x16xf32>
      %cst_60 = arith.constant 2.000000e+00 : f32
      %175 = vector.broadcast %cst_60 : f32 to vector<16x16xf32>
      %176 = arith.cmpf oeq, %33, %175 : vector<16x16xf32>
      %177 = arith.ori %174, %176 : vector<16x16xi1>
      %178 = arith.andi %172, %177 : vector<16x16xi1>
      %cst_61 = arith.constant dense<true> : vector<16x16xi1>
      %179 = arith.xori %40, %cst_61 : vector<16x16xi1>
      %180 = arith.andi %178, %179 : vector<16x16xi1>
      %cst_62 = arith.constant 0.000000e+00 : f32
      %181 = vector.broadcast %cst_62 : f32 to vector<16x16xf32>
      %182 = arith.cmpf oeq, %30, %181 : vector<16x16xf32>
      %cst_63 = arith.constant 2.000000e+00 : f32
      %183 = vector.broadcast %cst_63 : f32 to vector<16x16xf32>
      %184 = arith.cmpf oeq, %33, %183 : vector<16x16xf32>
      %185 = arith.andi %182, %184 : vector<16x16xi1>
      %cst_64 = arith.constant 2.000000e+00 : f32
      %186 = vector.broadcast %cst_64 : f32 to vector<16x16xf32>
      %187 = arith.cmpf oeq, %30, %186 : vector<16x16xf32>
      %cst_65 = arith.constant 0.000000e+00 : f32
      %188 = vector.broadcast %cst_65 : f32 to vector<16x16xf32>
      %189 = arith.cmpf oeq, %33, %188 : vector<16x16xf32>
      %190 = arith.andi %187, %189 : vector<16x16xi1>
      %191 = arith.ori %185, %190 : vector<16x16xi1>
      %192 = arith.andi %41, %191 : vector<16x16xi1>
      %cst_66 = arith.constant -1.000000e+30 : f32
      %193 = vector.broadcast %cst_66 : f32 to vector<16x16xf32>
      %194 = arith.select %180, %167, %193 : vector<16x16xi1>, vector<16x16xf32>
      %cst_67 = arith.constant dense<0xFF800000> : vector<16xf32>
      %195 = vector.multi_reduction <maximumf>, %194, %cst_67 [1] : vector<16x16xf32> to vector<16xf32>
      %196 = vector.shape_cast %195 : vector<16xf32> to vector<16x1xf32>
      %197 = vector.broadcast %196 : vector<16x1xf32> to vector<16x16xf32>
      %198 = arith.subf %194, %197 : vector<16x16xf32>
      %199 = math.exp %198 : vector<16x16xf32>
      %cst_68 = arith.constant dense<0.000000e+00> : vector<16xf32>
      %200 = vector.multi_reduction <add>, %199, %cst_68 [1] : vector<16x16xf32> to vector<16xf32>
      %201 = vector.shape_cast %200 : vector<16xf32> to vector<16x1xf32>
      %202 = math.log %201 : vector<16x1xf32>
      %203 = arith.addf %196, %202 : vector<16x1xf32>
      %cst_69 = arith.constant 0.000000e+00 : f32
      %204 = vector.broadcast %cst_69 : f32 to vector<16x16xf32>
      %205 = arith.select %192, %167, %204 : vector<16x16xi1>, vector<16x16xf32>
      %cst_70 = arith.constant dense<0.000000e+00> : vector<16xf32>
      %206 = vector.multi_reduction <add>, %205, %cst_70 [1] : vector<16x16xf32> to vector<16xf32>
      %207 = vector.shape_cast %206 : vector<16xf32> to vector<16x1xf32>
      %cst_71 = arith.constant 0.000000e+00 : f32
      %208 = vector.broadcast %cst_71 : f32 to vector<16x1xf32>
      %209 = arith.cmpf oeq, %97, %208 : vector<16x1xf32>
      %cst_72 = arith.constant 2.000000e+00 : f32
      %210 = vector.broadcast %cst_72 : f32 to vector<16x1xf32>
      %211 = arith.cmpf oeq, %97, %210 : vector<16x1xf32>
      %212 = arith.ori %209, %211 : vector<16x1xi1>
      %213 = arith.subf %203, %207 : vector<16x1xf32>
      %cst_73 = arith.constant 0.000000e+00 : f32
      %214 = vector.broadcast %cst_73 : f32 to vector<16x1xf32>
      %215 = arith.select %212, %213, %214 : vector<16x1xi1>, vector<16x1xf32>
      %216 = vector.shape_cast %215 : vector<16x1xf32> to vector<1x16x1xf32>
      %cst_74 = arith.constant dense<0.000000e+00> : vector<1xf32>
      %217 = vector.multi_reduction <add>, %216, %cst_74 [1, 2] : vector<1x16x1xf32> to vector<1xf32>
      %218 = vector.shape_cast %217 : vector<1xf32> to vector<1x1x1xf32>
      %219 = vector.extract %218[0, 0, 0] : f32 from vector<1x1x1xf32>
      %cst_75 = arith.constant 8.000000e+00 : f32
      %220 = arith.divf %219, %cst_75 : f32
      %221 = arith.addf %159, %220 : f32
      %222 = vector.extract_strided_slice %85 {offsets = [0, 12], sizes = [4, 4], strides = [1, 1]} : vector<16x16xf32> to vector<4x4xf32>
      %cst_76 = arith.constant 0.000000e+00 : f32
      %223 = vector.broadcast %cst_76 : f32 to vector<4x4xf32>
      %224 = arith.select %92, %222, %223 : vector<4x4xi1>, vector<4x4xf32>
      %cst_77 = arith.constant dense<0.000000e+00> : vector<4xf32>
      %225 = vector.multi_reduction <add>, %224, %cst_77 [1] : vector<4x4xf32> to vector<4xf32>
      %226 = vector.shape_cast %225 : vector<4xf32> to vector<4x1xf32>
      %227 = tpu.concatenate %226, %226, %226, %226 in 0 : vector<4x1xf32>, vector<4x1xf32>, vector<4x1xf32>, vector<4x1xf32> -> vector<16x1xf32>
      %228 = vector.broadcast %227 : vector<16x1xf32> to vector<16x16xf32>
      %229 = arith.mulf %228, %57 : vector<16x16xf32>
      %cst_78 = arith.constant 0.000000e+00 : f32
      %230 = vector.broadcast %cst_78 : f32 to vector<16x16xf32>
      %231 = arith.cmpf oeq, %30, %230 : vector<16x16xf32>
      %cst_79 = arith.constant 3.000000e+00 : f32
      %232 = vector.broadcast %cst_79 : f32 to vector<16x16xf32>
      %233 = arith.cmpf oeq, %30, %232 : vector<16x16xf32>
      %234 = arith.ori %231, %233 : vector<16x16xi1>
      %cst_80 = arith.constant 0.000000e+00 : f32
      %235 = vector.broadcast %cst_80 : f32 to vector<16x16xf32>
      %236 = arith.cmpf oeq, %33, %235 : vector<16x16xf32>
      %cst_81 = arith.constant 3.000000e+00 : f32
      %237 = vector.broadcast %cst_81 : f32 to vector<16x16xf32>
      %238 = arith.cmpf oeq, %33, %237 : vector<16x16xf32>
      %239 = arith.ori %236, %238 : vector<16x16xi1>
      %240 = arith.andi %234, %239 : vector<16x16xi1>
      %cst_82 = arith.constant dense<true> : vector<16x16xi1>
      %241 = arith.xori %40, %cst_82 : vector<16x16xi1>
      %242 = arith.andi %240, %241 : vector<16x16xi1>
      %cst_83 = arith.constant 0.000000e+00 : f32
      %243 = vector.broadcast %cst_83 : f32 to vector<16x16xf32>
      %244 = arith.cmpf oeq, %30, %243 : vector<16x16xf32>
      %cst_84 = arith.constant 3.000000e+00 : f32
      %245 = vector.broadcast %cst_84 : f32 to vector<16x16xf32>
      %246 = arith.cmpf oeq, %33, %245 : vector<16x16xf32>
      %247 = arith.andi %244, %246 : vector<16x16xi1>
      %cst_85 = arith.constant 3.000000e+00 : f32
      %248 = vector.broadcast %cst_85 : f32 to vector<16x16xf32>
      %249 = arith.cmpf oeq, %30, %248 : vector<16x16xf32>
      %cst_86 = arith.constant 0.000000e+00 : f32
      %250 = vector.broadcast %cst_86 : f32 to vector<16x16xf32>
      %251 = arith.cmpf oeq, %33, %250 : vector<16x16xf32>
      %252 = arith.andi %249, %251 : vector<16x16xi1>
      %253 = arith.ori %247, %252 : vector<16x16xi1>
      %254 = arith.andi %41, %253 : vector<16x16xi1>
      %cst_87 = arith.constant -1.000000e+30 : f32
      %255 = vector.broadcast %cst_87 : f32 to vector<16x16xf32>
      %256 = arith.select %242, %229, %255 : vector<16x16xi1>, vector<16x16xf32>
      %cst_88 = arith.constant dense<0xFF800000> : vector<16xf32>
      %257 = vector.multi_reduction <maximumf>, %256, %cst_88 [1] : vector<16x16xf32> to vector<16xf32>
      %258 = vector.shape_cast %257 : vector<16xf32> to vector<16x1xf32>
      %259 = vector.broadcast %258 : vector<16x1xf32> to vector<16x16xf32>
      %260 = arith.subf %256, %259 : vector<16x16xf32>
      %261 = math.exp %260 : vector<16x16xf32>
      %cst_89 = arith.constant dense<0.000000e+00> : vector<16xf32>
      %262 = vector.multi_reduction <add>, %261, %cst_89 [1] : vector<16x16xf32> to vector<16xf32>
      %263 = vector.shape_cast %262 : vector<16xf32> to vector<16x1xf32>
      %264 = math.log %263 : vector<16x1xf32>
      %265 = arith.addf %258, %264 : vector<16x1xf32>
      %cst_90 = arith.constant 0.000000e+00 : f32
      %266 = vector.broadcast %cst_90 : f32 to vector<16x16xf32>
      %267 = arith.select %254, %229, %266 : vector<16x16xi1>, vector<16x16xf32>
      %cst_91 = arith.constant dense<0.000000e+00> : vector<16xf32>
      %268 = vector.multi_reduction <add>, %267, %cst_91 [1] : vector<16x16xf32> to vector<16xf32>
      %269 = vector.shape_cast %268 : vector<16xf32> to vector<16x1xf32>
      %cst_92 = arith.constant 0.000000e+00 : f32
      %270 = vector.broadcast %cst_92 : f32 to vector<16x1xf32>
      %271 = arith.cmpf oeq, %97, %270 : vector<16x1xf32>
      %cst_93 = arith.constant 3.000000e+00 : f32
      %272 = vector.broadcast %cst_93 : f32 to vector<16x1xf32>
      %273 = arith.cmpf oeq, %97, %272 : vector<16x1xf32>
      %274 = arith.ori %271, %273 : vector<16x1xi1>
      %275 = arith.subf %265, %269 : vector<16x1xf32>
      %cst_94 = arith.constant 0.000000e+00 : f32
      %276 = vector.broadcast %cst_94 : f32 to vector<16x1xf32>
      %277 = arith.select %274, %275, %276 : vector<16x1xi1>, vector<16x1xf32>
      %278 = vector.shape_cast %277 : vector<16x1xf32> to vector<1x16x1xf32>
      %cst_95 = arith.constant dense<0.000000e+00> : vector<1xf32>
      %279 = vector.multi_reduction <add>, %278, %cst_95 [1, 2] : vector<1x16x1xf32> to vector<1xf32>
      %280 = vector.shape_cast %279 : vector<1xf32> to vector<1x1x1xf32>
      %281 = vector.extract %280[0, 0, 0] : f32 from vector<1x1x1xf32>
      %cst_96 = arith.constant 8.000000e+00 : f32
      %282 = arith.divf %281, %cst_96 : f32
      %283 = arith.addf %221, %282 : f32
      %284 = vector.extract_strided_slice %85 {offsets = [4, 8], sizes = [4, 4], strides = [1, 1]} : vector<16x16xf32> to vector<4x4xf32>
      %cst_97 = arith.constant 0.000000e+00 : f32
      %285 = vector.broadcast %cst_97 : f32 to vector<4x4xf32>
      %286 = arith.select %92, %284, %285 : vector<4x4xi1>, vector<4x4xf32>
      %cst_98 = arith.constant dense<0.000000e+00> : vector<4xf32>
      %287 = vector.multi_reduction <add>, %286, %cst_98 [1] : vector<4x4xf32> to vector<4xf32>
      %288 = vector.shape_cast %287 : vector<4xf32> to vector<4x1xf32>
      %289 = tpu.concatenate %288, %288, %288, %288 in 0 : vector<4x1xf32>, vector<4x1xf32>, vector<4x1xf32>, vector<4x1xf32> -> vector<16x1xf32>
      %290 = vector.broadcast %289 : vector<16x1xf32> to vector<16x16xf32>
      %291 = arith.mulf %290, %57 : vector<16x16xf32>
      %cst_99 = arith.constant 1.000000e+00 : f32
      %292 = vector.broadcast %cst_99 : f32 to vector<16x16xf32>
      %293 = arith.cmpf oeq, %30, %292 : vector<16x16xf32>
      %cst_100 = arith.constant 2.000000e+00 : f32
      %294 = vector.broadcast %cst_100 : f32 to vector<16x16xf32>
      %295 = arith.cmpf oeq, %30, %294 : vector<16x16xf32>
      %296 = arith.ori %293, %295 : vector<16x16xi1>
      %cst_101 = arith.constant 1.000000e+00 : f32
      %297 = vector.broadcast %cst_101 : f32 to vector<16x16xf32>
      %298 = arith.cmpf oeq, %33, %297 : vector<16x16xf32>
      %cst_102 = arith.constant 2.000000e+00 : f32
      %299 = vector.broadcast %cst_102 : f32 to vector<16x16xf32>
      %300 = arith.cmpf oeq, %33, %299 : vector<16x16xf32>
      %301 = arith.ori %298, %300 : vector<16x16xi1>
      %302 = arith.andi %296, %301 : vector<16x16xi1>
      %cst_103 = arith.constant dense<true> : vector<16x16xi1>
      %303 = arith.xori %40, %cst_103 : vector<16x16xi1>
      %304 = arith.andi %302, %303 : vector<16x16xi1>
      %cst_104 = arith.constant 1.000000e+00 : f32
      %305 = vector.broadcast %cst_104 : f32 to vector<16x16xf32>
      %306 = arith.cmpf oeq, %30, %305 : vector<16x16xf32>
      %cst_105 = arith.constant 2.000000e+00 : f32
      %307 = vector.broadcast %cst_105 : f32 to vector<16x16xf32>
      %308 = arith.cmpf oeq, %33, %307 : vector<16x16xf32>
      %309 = arith.andi %306, %308 : vector<16x16xi1>
      %cst_106 = arith.constant 2.000000e+00 : f32
      %310 = vector.broadcast %cst_106 : f32 to vector<16x16xf32>
      %311 = arith.cmpf oeq, %30, %310 : vector<16x16xf32>
      %cst_107 = arith.constant 1.000000e+00 : f32
      %312 = vector.broadcast %cst_107 : f32 to vector<16x16xf32>
      %313 = arith.cmpf oeq, %33, %312 : vector<16x16xf32>
      %314 = arith.andi %311, %313 : vector<16x16xi1>
      %315 = arith.ori %309, %314 : vector<16x16xi1>
      %316 = arith.andi %41, %315 : vector<16x16xi1>
      %cst_108 = arith.constant -1.000000e+30 : f32
      %317 = vector.broadcast %cst_108 : f32 to vector<16x16xf32>
      %318 = arith.select %304, %291, %317 : vector<16x16xi1>, vector<16x16xf32>
      %cst_109 = arith.constant dense<0xFF800000> : vector<16xf32>
      %319 = vector.multi_reduction <maximumf>, %318, %cst_109 [1] : vector<16x16xf32> to vector<16xf32>
      %320 = vector.shape_cast %319 : vector<16xf32> to vector<16x1xf32>
      %321 = vector.broadcast %320 : vector<16x1xf32> to vector<16x16xf32>
      %322 = arith.subf %318, %321 : vector<16x16xf32>
      %323 = math.exp %322 : vector<16x16xf32>
      %cst_110 = arith.constant dense<0.000000e+00> : vector<16xf32>
      %324 = vector.multi_reduction <add>, %323, %cst_110 [1] : vector<16x16xf32> to vector<16xf32>
      %325 = vector.shape_cast %324 : vector<16xf32> to vector<16x1xf32>
      %326 = math.log %325 : vector<16x1xf32>
      %327 = arith.addf %320, %326 : vector<16x1xf32>
      %cst_111 = arith.constant 0.000000e+00 : f32
      %328 = vector.broadcast %cst_111 : f32 to vector<16x16xf32>
      %329 = arith.select %316, %291, %328 : vector<16x16xi1>, vector<16x16xf32>
      %cst_112 = arith.constant dense<0.000000e+00> : vector<16xf32>
      %330 = vector.multi_reduction <add>, %329, %cst_112 [1] : vector<16x16xf32> to vector<16xf32>
      %331 = vector.shape_cast %330 : vector<16xf32> to vector<16x1xf32>
      %cst_113 = arith.constant 1.000000e+00 : f32
      %332 = vector.broadcast %cst_113 : f32 to vector<16x1xf32>
      %333 = arith.cmpf oeq, %97, %332 : vector<16x1xf32>
      %cst_114 = arith.constant 2.000000e+00 : f32
      %334 = vector.broadcast %cst_114 : f32 to vector<16x1xf32>
      %335 = arith.cmpf oeq, %97, %334 : vector<16x1xf32>
      %336 = arith.ori %333, %335 : vector<16x1xi1>
      %337 = arith.subf %327, %331 : vector<16x1xf32>
      %cst_115 = arith.constant 0.000000e+00 : f32
      %338 = vector.broadcast %cst_115 : f32 to vector<16x1xf32>
      %339 = arith.select %336, %337, %338 : vector<16x1xi1>, vector<16x1xf32>
      %340 = vector.shape_cast %339 : vector<16x1xf32> to vector<1x16x1xf32>
      %cst_116 = arith.constant dense<0.000000e+00> : vector<1xf32>
      %341 = vector.multi_reduction <add>, %340, %cst_116 [1, 2] : vector<1x16x1xf32> to vector<1xf32>
      %342 = vector.shape_cast %341 : vector<1xf32> to vector<1x1x1xf32>
      %343 = vector.extract %342[0, 0, 0] : f32 from vector<1x1x1xf32>
      %cst_117 = arith.constant 8.000000e+00 : f32
      %344 = arith.divf %343, %cst_117 : f32
      %345 = arith.addf %283, %344 : f32
      %346 = vector.extract_strided_slice %85 {offsets = [4, 12], sizes = [4, 4], strides = [1, 1]} : vector<16x16xf32> to vector<4x4xf32>
      %cst_118 = arith.constant 0.000000e+00 : f32
      %347 = vector.broadcast %cst_118 : f32 to vector<4x4xf32>
      %348 = arith.select %92, %346, %347 : vector<4x4xi1>, vector<4x4xf32>
      %cst_119 = arith.constant dense<0.000000e+00> : vector<4xf32>
      %349 = vector.multi_reduction <add>, %348, %cst_119 [1] : vector<4x4xf32> to vector<4xf32>
      %350 = vector.shape_cast %349 : vector<4xf32> to vector<4x1xf32>
      %351 = tpu.concatenate %350, %350, %350, %350 in 0 : vector<4x1xf32>, vector<4x1xf32>, vector<4x1xf32>, vector<4x1xf32> -> vector<16x1xf32>
      %352 = vector.broadcast %351 : vector<16x1xf32> to vector<16x16xf32>
      %353 = arith.mulf %352, %57 : vector<16x16xf32>
      %cst_120 = arith.constant 1.000000e+00 : f32
      %354 = vector.broadcast %cst_120 : f32 to vector<16x16xf32>
      %355 = arith.cmpf oeq, %30, %354 : vector<16x16xf32>
      %cst_121 = arith.constant 3.000000e+00 : f32
      %356 = vector.broadcast %cst_121 : f32 to vector<16x16xf32>
      %357 = arith.cmpf oeq, %30, %356 : vector<16x16xf32>
      %358 = arith.ori %355, %357 : vector<16x16xi1>
      %cst_122 = arith.constant 1.000000e+00 : f32
      %359 = vector.broadcast %cst_122 : f32 to vector<16x16xf32>
      %360 = arith.cmpf oeq, %33, %359 : vector<16x16xf32>
      %cst_123 = arith.constant 3.000000e+00 : f32
      %361 = vector.broadcast %cst_123 : f32 to vector<16x16xf32>
      %362 = arith.cmpf oeq, %33, %361 : vector<16x16xf32>
      %363 = arith.ori %360, %362 : vector<16x16xi1>
      %364 = arith.andi %358, %363 : vector<16x16xi1>
      %cst_124 = arith.constant dense<true> : vector<16x16xi1>
      %365 = arith.xori %40, %cst_124 : vector<16x16xi1>
      %366 = arith.andi %364, %365 : vector<16x16xi1>
      %cst_125 = arith.constant 1.000000e+00 : f32
      %367 = vector.broadcast %cst_125 : f32 to vector<16x16xf32>
      %368 = arith.cmpf oeq, %30, %367 : vector<16x16xf32>
      %cst_126 = arith.constant 3.000000e+00 : f32
      %369 = vector.broadcast %cst_126 : f32 to vector<16x16xf32>
      %370 = arith.cmpf oeq, %33, %369 : vector<16x16xf32>
      %371 = arith.andi %368, %370 : vector<16x16xi1>
      %cst_127 = arith.constant 3.000000e+00 : f32
      %372 = vector.broadcast %cst_127 : f32 to vector<16x16xf32>
      %373 = arith.cmpf oeq, %30, %372 : vector<16x16xf32>
      %cst_128 = arith.constant 1.000000e+00 : f32
      %374 = vector.broadcast %cst_128 : f32 to vector<16x16xf32>
      %375 = arith.cmpf oeq, %33, %374 : vector<16x16xf32>
      %376 = arith.andi %373, %375 : vector<16x16xi1>
      %377 = arith.ori %371, %376 : vector<16x16xi1>
      %378 = arith.andi %41, %377 : vector<16x16xi1>
      %cst_129 = arith.constant -1.000000e+30 : f32
      %379 = vector.broadcast %cst_129 : f32 to vector<16x16xf32>
      %380 = arith.select %366, %353, %379 : vector<16x16xi1>, vector<16x16xf32>
      %cst_130 = arith.constant dense<0xFF800000> : vector<16xf32>
      %381 = vector.multi_reduction <maximumf>, %380, %cst_130 [1] : vector<16x16xf32> to vector<16xf32>
      %382 = vector.shape_cast %381 : vector<16xf32> to vector<16x1xf32>
      %383 = vector.broadcast %382 : vector<16x1xf32> to vector<16x16xf32>
      %384 = arith.subf %380, %383 : vector<16x16xf32>
      %385 = math.exp %384 : vector<16x16xf32>
      %cst_131 = arith.constant dense<0.000000e+00> : vector<16xf32>
      %386 = vector.multi_reduction <add>, %385, %cst_131 [1] : vector<16x16xf32> to vector<16xf32>
      %387 = vector.shape_cast %386 : vector<16xf32> to vector<16x1xf32>
      %388 = math.log %387 : vector<16x1xf32>
      %389 = arith.addf %382, %388 : vector<16x1xf32>
      %cst_132 = arith.constant 0.000000e+00 : f32
      %390 = vector.broadcast %cst_132 : f32 to vector<16x16xf32>
      %391 = arith.select %378, %353, %390 : vector<16x16xi1>, vector<16x16xf32>
      %cst_133 = arith.constant dense<0.000000e+00> : vector<16xf32>
      %392 = vector.multi_reduction <add>, %391, %cst_133 [1] : vector<16x16xf32> to vector<16xf32>
      %393 = vector.shape_cast %392 : vector<16xf32> to vector<16x1xf32>
      %cst_134 = arith.constant 1.000000e+00 : f32
      %394 = vector.broadcast %cst_134 : f32 to vector<16x1xf32>
      %395 = arith.cmpf oeq, %97, %394 : vector<16x1xf32>
      %cst_135 = arith.constant 3.000000e+00 : f32
      %396 = vector.broadcast %cst_135 : f32 to vector<16x1xf32>
      %397 = arith.cmpf oeq, %97, %396 : vector<16x1xf32>
      %398 = arith.ori %395, %397 : vector<16x1xi1>
      %399 = arith.subf %389, %393 : vector<16x1xf32>
      %cst_136 = arith.constant 0.000000e+00 : f32
      %400 = vector.broadcast %cst_136 : f32 to vector<16x1xf32>
      %401 = arith.select %398, %399, %400 : vector<16x1xi1>, vector<16x1xf32>
      %402 = vector.shape_cast %401 : vector<16x1xf32> to vector<1x16x1xf32>
      %cst_137 = arith.constant dense<0.000000e+00> : vector<1xf32>
      %403 = vector.multi_reduction <add>, %402, %cst_137 [1, 2] : vector<1x16x1xf32> to vector<1xf32>
      %404 = vector.shape_cast %403 : vector<1xf32> to vector<1x1x1xf32>
      %405 = vector.extract %404[0, 0, 0] : f32 from vector<1x1x1xf32>
      %cst_138 = arith.constant 8.000000e+00 : f32
      %406 = arith.divf %405, %cst_138 : f32
      %407 = arith.addf %345, %406 : f32
      %408 = vector.extract_strided_slice %85 {offsets = [8, 12], sizes = [4, 4], strides = [1, 1]} : vector<16x16xf32> to vector<4x4xf32>
      %cst_139 = arith.constant 0.000000e+00 : f32
      %409 = vector.broadcast %cst_139 : f32 to vector<4x4xf32>
      %410 = arith.select %92, %408, %409 : vector<4x4xi1>, vector<4x4xf32>
      %cst_140 = arith.constant dense<0.000000e+00> : vector<4xf32>
      %411 = vector.multi_reduction <add>, %410, %cst_140 [1] : vector<4x4xf32> to vector<4xf32>
      %412 = vector.shape_cast %411 : vector<4xf32> to vector<4x1xf32>
      %413 = tpu.concatenate %412, %412, %412, %412 in 0 : vector<4x1xf32>, vector<4x1xf32>, vector<4x1xf32>, vector<4x1xf32> -> vector<16x1xf32>
      %414 = vector.broadcast %413 : vector<16x1xf32> to vector<16x16xf32>
      %415 = arith.mulf %414, %57 : vector<16x16xf32>
      %cst_141 = arith.constant 2.000000e+00 : f32
      %416 = vector.broadcast %cst_141 : f32 to vector<16x16xf32>
      %417 = arith.cmpf oeq, %30, %416 : vector<16x16xf32>
      %cst_142 = arith.constant 3.000000e+00 : f32
      %418 = vector.broadcast %cst_142 : f32 to vector<16x16xf32>
      %419 = arith.cmpf oeq, %30, %418 : vector<16x16xf32>
      %420 = arith.ori %417, %419 : vector<16x16xi1>
      %cst_143 = arith.constant 2.000000e+00 : f32
      %421 = vector.broadcast %cst_143 : f32 to vector<16x16xf32>
      %422 = arith.cmpf oeq, %33, %421 : vector<16x16xf32>
      %cst_144 = arith.constant 3.000000e+00 : f32
      %423 = vector.broadcast %cst_144 : f32 to vector<16x16xf32>
      %424 = arith.cmpf oeq, %33, %423 : vector<16x16xf32>
      %425 = arith.ori %422, %424 : vector<16x16xi1>
      %426 = arith.andi %420, %425 : vector<16x16xi1>
      %cst_145 = arith.constant dense<true> : vector<16x16xi1>
      %427 = arith.xori %40, %cst_145 : vector<16x16xi1>
      %428 = arith.andi %426, %427 : vector<16x16xi1>
      %cst_146 = arith.constant 2.000000e+00 : f32
      %429 = vector.broadcast %cst_146 : f32 to vector<16x16xf32>
      %430 = arith.cmpf oeq, %30, %429 : vector<16x16xf32>
      %cst_147 = arith.constant 3.000000e+00 : f32
      %431 = vector.broadcast %cst_147 : f32 to vector<16x16xf32>
      %432 = arith.cmpf oeq, %33, %431 : vector<16x16xf32>
      %433 = arith.andi %430, %432 : vector<16x16xi1>
      %cst_148 = arith.constant 3.000000e+00 : f32
      %434 = vector.broadcast %cst_148 : f32 to vector<16x16xf32>
      %435 = arith.cmpf oeq, %30, %434 : vector<16x16xf32>
      %cst_149 = arith.constant 2.000000e+00 : f32
      %436 = vector.broadcast %cst_149 : f32 to vector<16x16xf32>
      %437 = arith.cmpf oeq, %33, %436 : vector<16x16xf32>
      %438 = arith.andi %435, %437 : vector<16x16xi1>
      %439 = arith.ori %433, %438 : vector<16x16xi1>
      %440 = arith.andi %41, %439 : vector<16x16xi1>
      %cst_150 = arith.constant -1.000000e+30 : f32
      %441 = vector.broadcast %cst_150 : f32 to vector<16x16xf32>
      %442 = arith.select %428, %415, %441 : vector<16x16xi1>, vector<16x16xf32>
      %cst_151 = arith.constant dense<0xFF800000> : vector<16xf32>
      %443 = vector.multi_reduction <maximumf>, %442, %cst_151 [1] : vector<16x16xf32> to vector<16xf32>
      %444 = vector.shape_cast %443 : vector<16xf32> to vector<16x1xf32>
      %445 = vector.broadcast %444 : vector<16x1xf32> to vector<16x16xf32>
      %446 = arith.subf %442, %445 : vector<16x16xf32>
      %447 = math.exp %446 : vector<16x16xf32>
      %cst_152 = arith.constant dense<0.000000e+00> : vector<16xf32>
      %448 = vector.multi_reduction <add>, %447, %cst_152 [1] : vector<16x16xf32> to vector<16xf32>
      %449 = vector.shape_cast %448 : vector<16xf32> to vector<16x1xf32>
      %450 = math.log %449 : vector<16x1xf32>
      %451 = arith.addf %444, %450 : vector<16x1xf32>
      %cst_153 = arith.constant 0.000000e+00 : f32
      %452 = vector.broadcast %cst_153 : f32 to vector<16x16xf32>
      %453 = arith.select %440, %415, %452 : vector<16x16xi1>, vector<16x16xf32>
      %cst_154 = arith.constant dense<0.000000e+00> : vector<16xf32>
      %454 = vector.multi_reduction <add>, %453, %cst_154 [1] : vector<16x16xf32> to vector<16xf32>
      %455 = vector.shape_cast %454 : vector<16xf32> to vector<16x1xf32>
      %cst_155 = arith.constant 2.000000e+00 : f32
      %456 = vector.broadcast %cst_155 : f32 to vector<16x1xf32>
      %457 = arith.cmpf oeq, %97, %456 : vector<16x1xf32>
      %cst_156 = arith.constant 3.000000e+00 : f32
      %458 = vector.broadcast %cst_156 : f32 to vector<16x1xf32>
      %459 = arith.cmpf oeq, %97, %458 : vector<16x1xf32>
      %460 = arith.ori %457, %459 : vector<16x1xi1>
      %461 = arith.subf %451, %455 : vector<16x1xf32>
      %cst_157 = arith.constant 0.000000e+00 : f32
      %462 = vector.broadcast %cst_157 : f32 to vector<16x1xf32>
      %463 = arith.select %460, %461, %462 : vector<16x1xi1>, vector<16x1xf32>
      %464 = vector.shape_cast %463 : vector<16x1xf32> to vector<1x16x1xf32>
      %cst_158 = arith.constant dense<0.000000e+00> : vector<1xf32>
      %465 = vector.multi_reduction <add>, %464, %cst_158 [1, 2] : vector<1x16x1xf32> to vector<1xf32>
      %466 = vector.shape_cast %465 : vector<1xf32> to vector<1x1x1xf32>
      %467 = vector.extract %466[0, 0, 0] : f32 from vector<1x1x1xf32>
      %cst_159 = arith.constant 8.000000e+00 : f32
      %468 = arith.divf %467, %cst_159 : f32
      %469 = arith.addf %407, %468 : f32
      %cst_160 = arith.constant 0.000000e+00 : f32
      %470 = vector.broadcast %cst_160 : f32 to vector<1x128xf32>
      %cst_161 = arith.constant 6.000000e+00 : f32
      %471 = arith.divf %469, %cst_161 : f32
      %472 = vector.broadcast %471 : f32 to vector<1x128xf32>
      %473 = arith.addf %470, %472 : vector<1x128xf32>
      %c0_162 = arith.constant 0 : index
      %c0_163 = arith.constant 0 : index
      %474 = vector.load %arg17[%c0_162, %c0_163] : memref<1x128xf32, #tpu.memory_space<vmem>>, vector<1x128xf32>
      tpu.vector_store %arg17[%c0_162, %c0_163], %473 {strides = array<i32>} : memref<1x128xf32, #tpu.memory_space<vmem>>, vector<1x128xf32>,
      %cst_164 = arith.constant 0.000000e+00 : f32
      %475 = vector.broadcast %cst_164 : f32 to vector<4x128xf32>
      %476 = vector.extract_strided_slice %89 {offsets = [0, 0], sizes = [4, 1], strides = [1, 1]} : vector<16x1xf32> to vector<4x1xf32>
      %c0_165 = arith.constant 0 : index
      %c0_166 = arith.constant 0 : index
      %c0_167 = arith.constant 0 : index
      %477 = vector.load %arg19[%c0_165, %c0_166, %c0_167] : memref<4x4x256xf32, #tpu.memory_space<vmem>>, vector<1x4x256xf32>
      %478 = vector.shape_cast %477 : vector<1x4x256xf32> to vector<4x256xf32>
      %479 = vector.broadcast %476 : vector<4x1xf32> to vector<4x256xf32>
      %480 = arith.mulf %478, %479 : vector<4x256xf32>
      %481 = arith.truncf %480 : vector<4x256xf32> to vector<4x256xbf16>
      %c0_168 = arith.constant 0 : index
      %c0_169 = arith.constant 0 : index
      %482 = vector.load %arg14[%c0_168, %c0_169] : memref<1024x128xbf16, #tpu.memory_space<vmem>>, vector<256x128xbf16>
      %cst_170 = arith.constant dense<0.000000e+00> : vector<4x128xf32>
      %483 = tpu.matmul %481, %482, %cst_170 {dimension_numbers = #tpu.dot_dimension_numbers<[1], [0], [0], [1], [0, 0, 1, 1], [], []>} : vector<4x256xbf16>, vector<256x128xbf16>, vector<4x128xf32> -> vector<4x128xf32>
      %484 = arith.addf %475, %483 : vector<4x128xf32>
      %485 = vector.extract_strided_slice %89 {offsets = [4, 0], sizes = [4, 1], strides = [1, 1]} : vector<16x1xf32> to vector<4x1xf32>
      %c1_171 = arith.constant 1 : index
      %c0_172 = arith.constant 0 : index
      %c0_173 = arith.constant 0 : index
      %486 = vector.load %arg19[%c1_171, %c0_172, %c0_173] : memref<4x4x256xf32, #tpu.memory_space<vmem>>, vector<1x4x256xf32>
      %487 = vector.shape_cast %486 : vector<1x4x256xf32> to vector<4x256xf32>
      %488 = vector.broadcast %485 : vector<4x1xf32> to vector<4x256xf32>
      %489 = arith.mulf %487, %488 : vector<4x256xf32>
      %490 = arith.truncf %489 : vector<4x256xf32> to vector<4x256xbf16>
      %c256 = arith.constant 256 : index
      %c0_174 = arith.constant 0 : index
      %491 = vector.load %arg14[%c256, %c0_174] : memref<1024x128xbf16, #tpu.memory_space<vmem>>, vector<256x128xbf16>
      %cst_175 = arith.constant dense<0.000000e+00> : vector<4x128xf32>
      %492 = tpu.matmul %490, %491, %cst_175 {dimension_numbers = #tpu.dot_dimension_numbers<[1], [0], [0], [1], [0, 0, 1, 1], [], []>} : vector<4x256xbf16>, vector<256x128xbf16>, vector<4x128xf32> -> vector<4x128xf32>
      %493 = arith.addf %484, %492 : vector<4x128xf32>
      %494 = vector.extract_strided_slice %89 {offsets = [8, 0], sizes = [4, 1], strides = [1, 1]} : vector<16x1xf32> to vector<4x1xf32>
      %c2_176 = arith.constant 2 : index
      %c0_177 = arith.constant 0 : index
      %c0_178 = arith.constant 0 : index
      %495 = vector.load %arg19[%c2_176, %c0_177, %c0_178] : memref<4x4x256xf32, #tpu.memory_space<vmem>>, vector<1x4x256xf32>
      %496 = vector.shape_cast %495 : vector<1x4x256xf32> to vector<4x256xf32>
      %497 = vector.broadcast %494 : vector<4x1xf32> to vector<4x256xf32>
      %498 = arith.mulf %496, %497 : vector<4x256xf32>
      %499 = arith.truncf %498 : vector<4x256xf32> to vector<4x256xbf16>
      %c512 = arith.constant 512 : index
      %c0_179 = arith.constant 0 : index
      %500 = vector.load %arg14[%c512, %c0_179] : memref<1024x128xbf16, #tpu.memory_space<vmem>>, vector<256x128xbf16>
      %cst_180 = arith.constant dense<0.000000e+00> : vector<4x128xf32>
      %501 = tpu.matmul %499, %500, %cst_180 {dimension_numbers = #tpu.dot_dimension_numbers<[1], [0], [0], [1], [0, 0, 1, 1], [], []>} : vector<4x256xbf16>, vector<256x128xbf16>, vector<4x128xf32> -> vector<4x128xf32>
      %502 = arith.addf %493, %501 : vector<4x128xf32>
      %503 = vector.extract_strided_slice %89 {offsets = [12, 0], sizes = [4, 1], strides = [1, 1]} : vector<16x1xf32> to vector<4x1xf32>
      %c3_181 = arith.constant 3 : index
      %c0_182 = arith.constant 0 : index
      %c0_183 = arith.constant 0 : index
      %504 = vector.load %arg19[%c3_181, %c0_182, %c0_183] : memref<4x4x256xf32, #tpu.memory_space<vmem>>, vector<1x4x256xf32>
      %505 = vector.shape_cast %504 : vector<1x4x256xf32> to vector<4x256xf32>
      %506 = vector.broadcast %503 : vector<4x1xf32> to vector<4x256xf32>
      %507 = arith.mulf %505, %506 : vector<4x256xf32>
      %508 = arith.truncf %507 : vector<4x256xf32> to vector<4x256xbf16>
      %c768 = arith.constant 768 : index
      %c0_184 = arith.constant 0 : index
      %509 = vector.load %arg14[%c768, %c0_184] : memref<1024x128xbf16, #tpu.memory_space<vmem>>, vector<256x128xbf16>
      %cst_185 = arith.constant dense<0.000000e+00> : vector<4x128xf32>
      %510 = tpu.matmul %508, %509, %cst_185 {dimension_numbers = #tpu.dot_dimension_numbers<[1], [0], [0], [1], [0, 0, 1, 1], [], []>} : vector<4x256xbf16>, vector<256x128xbf16>, vector<4x128xf32> -> vector<4x128xf32>
      %511 = arith.addf %502, %510 : vector<4x128xf32>
      %c0_186 = arith.constant 0 : index
      %c0_187 = arith.constant 0 : index
      %512 = vector.load %arg15[%c0_186, %c0_187] : memref<1x128xf32, #tpu.memory_space<vmem>>, vector<1x128xf32>
      %513 = vector.broadcast %512 : vector<1x128xf32> to vector<4x128xf32>
      %514 = arith.addf %511, %513 : vector<4x128xf32>
      %c0_188 = arith.constant 0 : index
      %c0_189 = arith.constant 0 : index
      %515 = vector.load %arg16[%c0_188, %c0_189] : memref<4x128xf32, #tpu.memory_space<vmem>>, vector<4x128xf32>
      tpu.vector_store %arg16[%c0_188, %c0_189], %514 {strides = array<i32>} : memref<4x128xf32, #tpu.memory_space<vmem>>, vector<4x128xf32>,
    } else {
    }
    return
  }
  func.func @transform_0(%arg0: i32) -> (i32, i32, i32) {
    %c3_i32 = arith.constant 3 : i32
    %0 = arith.minsi %arg0, %c3_i32 : i32
    %c1_i32 = arith.constant 1 : i32
    %1 = arith.subi %0, %c1_i32 : i32
    %c0_i32 = arith.constant 0 : i32
    %2 = arith.maxsi %1, %c0_i32 : i32
    %c0_i32_0 = arith.constant 0 : i32
    %c0_i32_1 = arith.constant 0 : i32
    %c0_i32_2 = arith.constant 0 : i32
    return %2, %c0_i32_0, %c0_i32_1 : i32, i32, i32
  }
  func.func @transform_1(%arg0: i32) -> (i32, i32, i32) {
    %c0_i32 = arith.constant 0 : i32
    %c0_i32_0 = arith.constant 0 : i32
    %c0_i32_1 = arith.constant 0 : i32
    %c0_i32_2 = arith.constant 0 : i32
    return %c0_i32, %c0_i32_0, %c0_i32_1 : i32, i32, i32
  }
  func.func @transform_2(%arg0: i32) -> (i32, i32) {
    %c0_i32 = arith.constant 0 : i32
    %c0_i32_0 = arith.constant 0 : i32
    %c0_i32_1 = arith.constant 0 : i32
    return %c0_i32, %c0_i32_0 : i32, i32
  }
  func.func @transform_3(%arg0: i32) -> (i32, i32) {
    %c0_i32 = arith.constant 0 : i32
    %c0_i32_0 = arith.constant 0 : i32
    %c0_i32_1 = arith.constant 0 : i32
    return %c0_i32, %c0_i32_0 : i32, i32
  }
  func.func @transform_4(%arg0: i32) -> (i32, i32) {
    %c0_i32 = arith.constant 0 : i32
    %c0_i32_0 = arith.constant 0 : i32
    %c0_i32_1 = arith.constant 0 : i32
    return %c0_i32, %c0_i32_0 : i32, i32
  }
  func.func @transform_5(%arg0: i32) -> (i32, i32, i32) {
    %c3_i32 = arith.constant 3 : i32
    %0 = arith.minsi %arg0, %c3_i32 : i32
    %c0_i32 = arith.constant 0 : i32
    %c0_i32_0 = arith.constant 0 : i32
    %c0_i32_1 = arith.constant 0 : i32
    return %0, %c0_i32, %c0_i32_0 : i32, i32, i32
  }
  func.func @transform_6(%arg0: i32) -> (i32, i32, i32) {
    %c3_i32 = arith.constant 3 : i32
    %0 = arith.minsi %arg0, %c3_i32 : i32
    %c0_i32 = arith.constant 0 : i32
    %c0_i32_0 = arith.constant 0 : i32
    %c0_i32_1 = arith.constant 0 : i32
    return %0, %c0_i32, %c0_i32_0 : i32, i32, i32
  }
  func.func @transform_7(%arg0: i32) -> (i32, i32, i32) {
    %c3_i32 = arith.constant 3 : i32
    %0 = arith.minsi %arg0, %c3_i32 : i32
    %c0_i32 = arith.constant 0 : i32
    %c0_i32_0 = arith.constant 0 : i32
    %c0_i32_1 = arith.constant 0 : i32
    return %0, %c0_i32, %c0_i32_0 : i32, i32, i32
  }
  func.func @transform_8(%arg0: i32) -> (i32, i32, i32) {
    %c3_i32 = arith.constant 3 : i32
    %0 = arith.minsi %arg0, %c3_i32 : i32
    %c0_i32 = arith.constant 0 : i32
    %c0_i32_0 = arith.constant 0 : i32
    %c0_i32_1 = arith.constant 0 : i32
    return %0, %c0_i32, %c0_i32_0 : i32, i32, i32
  }
  func.func @transform_9(%arg0: i32) -> (i32, i32, i32) {
    %c3_i32 = arith.constant 3 : i32
    %0 = arith.minsi %arg0, %c3_i32 : i32
    %c0_i32 = arith.constant 0 : i32
    %c0_i32_0 = arith.constant 0 : i32
    %c0_i32_1 = arith.constant 0 : i32
    return %0, %c0_i32, %c0_i32_0 : i32, i32, i32
  }
  func.func @transform_10(%arg0: i32) -> (i32, i32, i32) {
    %c3_i32 = arith.constant 3 : i32
    %0 = arith.minsi %arg0, %c3_i32 : i32
    %c0_i32 = arith.constant 0 : i32
    %c0_i32_0 = arith.constant 0 : i32
    %c0_i32_1 = arith.constant 0 : i32
    return %0, %c0_i32, %c0_i32_0 : i32, i32, i32
  }
  func.func @transform_11(%arg0: i32) -> (i32, i32, i32) {
    %c3_i32 = arith.constant 3 : i32
    %0 = arith.minsi %arg0, %c3_i32 : i32
    %c0_i32 = arith.constant 0 : i32
    %c0_i32_0 = arith.constant 0 : i32
    %c0_i32_1 = arith.constant 0 : i32
    return %0, %c0_i32, %c0_i32_0 : i32, i32, i32
  }
  func.func @transform_12(%arg0: i32) -> (i32, i32, i32) {
    %c3_i32 = arith.constant 3 : i32
    %0 = arith.minsi %arg0, %c3_i32 : i32
    %c0_i32 = arith.constant 0 : i32
    %c0_i32_0 = arith.constant 0 : i32
    %c0_i32_1 = arith.constant 0 : i32
    return %0, %c0_i32, %c0_i32_0 : i32, i32, i32
  }
  func.func @transform_13(%arg0: i32) -> (i32, i32) {
    %c0_i32 = arith.constant 0 : i32
    %c0_i32_0 = arith.constant 0 : i32
    %c0_i32_1 = arith.constant 0 : i32
    return %c0_i32, %c0_i32_0 : i32, i32
  }
  func.func @transform_14(%arg0: i32) -> (i32, i32) {
    %c0_i32 = arith.constant 0 : i32
    %c0_i32_0 = arith.constant 0 : i32
    %c0_i32_1 = arith.constant 0 : i32
    return %c0_i32, %c0_i32_0 : i32, i32
  }
  func.func @transform_15(%arg0: i32) -> (i32, i32) {
    %c0_i32 = arith.constant 0 : i32
    %c0_i32_0 = arith.constant 0 : i32
    %c0_i32_1 = arith.constant 0 : i32
    return %c0_i32, %c0_i32_0 : i32, i32
  }
  func.func @transform_16(%arg0: i32) -> (i32, i32) {
    %c0_i32 = arith.constant 0 : i32
    %c0_i32_0 = arith.constant 0 : i32
    %c0_i32_1 = arith.constant 0 : i32
    return %c0_i32, %c0_i32_0 : i32, i32
  }
}

</mosaic_0001>

<bundles_post_ra>
// kernel: ppim_forward.1
= control target key start
LH: loop header
LB: loop body
LE: loop exit
PB: predicated region body
PF: predicated region fallthrough
CT: control target
= control target key end

     0   :  { %s17632_s0 = inlined_call_operand.vmem [shape: f32[3,4,1024], index: 0, kind: input, shape index: {}]   ;;  %s17633_s1 = inlined_call_operand.vmem [shape: bf16[4,8,768], index: 1, kind: input, shape index: {}]   ;;  %s17634_s2 = inlined_call_operand.vmem [shape: f32[4,8], index: 2, kind: input, shape index: {}]   ;;  %s17635_s3 = inlined_call_operand.hbm [shape: bf16[768,768], index: 3, kind: input, shape index: {}]   ;;  %s17636_s4 = inlined_call_operand.hbm [shape: f32[1,768], index: 4, kind: input, shape index: {}]   ;;  %s17637_s5 = inlined_call_operand.hbm [shape: bf16[4,1024,256], index: 5, kind: input, shape index: {}]   ;;  %s17638_s6 = inlined_call_operand.hbm [shape: f32[4,1,256], index: 6, kind: input, shape index: {}]   ;;  %s17639_s7 = inlined_call_operand.hbm [shape: bf16[4,256,256], index: 7, kind: input, shape index: {}]   ;;  %s17640_s8 = inlined_call_operand.hbm [shape: f32[4,1,256], index: 8, kind: input, shape index: {}]   ;;  %s17641_s9 = inlined_call_operand.hbm [shape: bf16[4,256,1024], index: 9, kind: input, shape index: {}]   ;;  %s17642_s10 = inlined_call_operand.hbm [shape: f32[4,1,1024], index: 10, kind: input, shape index: {}]   ;;  %s17643_s11 = inlined_call_operand.hbm [shape: bf16[4,1024,256], index: 11, kind: input, shape index: {}]   ;;  %s17644_s12 = inlined_call_operand.hbm [shape: f32[4,1,256], index: 12, kind: input, shape index: {}]   ;;  %s17645_s13 = inlined_call_operand.hbm [shape: bf16[1024,128], index: 13, kind: input, shape index: {}]   ;;  %s17646_s14 = inlined_call_operand.hbm [shape: f32[1,128], index: 14, kind: input, shape index: {}]   ;;  %s17647_s15 = inlined_call_operand.vmem [shape: f32[4,128], index: 15, kind: output, shape index: {0}]   ;;  %s17648_s16 = inlined_call_operand.hbm [shape: f32[1,128], index: 16, kind: output, shape index: {1}]  }
   0x1   :  { %17769 = sst [smem:[#allocation53_spill]] %s17632_s0 }
   0x2   :  { %17770 = sst [smem:[#allocation54_spill]] %s17633_s1 }
   0x3   :  { %17771 = sst [smem:[#allocation55_spill]] %s17634_s2 }
   0x4   :  { %17772 = sst [smem:[#allocation56_spill]] %s17635_s3 }
   0x5   :  { %17773 = sst [smem:[#allocation57_spill]] %s17637_s5 }
   0x6   :  { %17774 = sst [smem:[#allocation58_spill]] %s17638_s6 }
   0x7   :  { %17775 = sst [smem:[#allocation59_spill]] %s17639_s7 }
   0x8   :  { %17776 = sst [smem:[#allocation60_spill]] %s17640_s8 }
   0x9   :  { %17777 = sst [smem:[#allocation61_spill]] %s17644_s12 }
   0xa   :  { %17778 = sst [smem:[#allocation62_spill]] %s17645_s13 }
   0xb   :  { %17779 = sst [smem:[#allocation63_spill]] %s17646_s14 }
   0xc   :  { %17780 = sst [smem:[#allocation64_spill]] %s17647_s15 }
   0xd   :  { %17781 = sst [smem:[#allocation65_spill]] %s17648_s16 }
   0xe   :  { %22 = vsyncpa [#allocation5], 0 }
   0xf   :  { %23 = vsyncpa [#allocation8], 0 }
  0x10   :  { %24 = vsyncpa [#allocation19], 0 }
  0x11   :  { %25 = vsyncpa [#allocation6], 0  ;;  %s14218_s21 = smov 0   ;;  %s14220_s22 = smov 0  }
  0x12   :  { %s14222_s23 = smov 0   ;;  %s14224_s24 = smov 0  }
  0x13 LB: > { %17782 = sst [smem:[#allocation27_spill]] %s14100_s22  ;;  %s14237_s25 = sadd.s32 4294967295, %s14108_s24   ;;  %s14108_s24 = sphi %s14224_s24, %s18172_s24   ;;  %s14104_s23 = sphi %s14222_s23, %s18175_s23   ;;  %s14100_s22 = sphi %s14220_s22, %s18174_s22   ;;  %s14096_s21 = sphi %s14218_s21, %s18173_s21  }
  0x14   : > { %17783 = sst [smem:[#allocation28_spill]] %s14104_s23  ;;  %p169_p0 = scmp.ne.s32.totalorder %s14104_s23, %s14100_s22 }
  0x15   : > { %17784 = sst [smem:[#allocation29_spill]] %s14237_s25  ;;  %p170_p1 = scmp.eq.s32.totalorder %s14108_s24, 0 }
  0x16   : > { %p175_p2 = scmp.ne.s32.totalorder %s14100_s22, %s14096_s21  ;;  %p176_p3 = scmp.eq.s32.totalorder %s14237_s25, 0 }
  0x17   : > { %p14245_p4 = por %p170_p1, %p169_p0  ;;  %p9416_p5 = scmp.ge.s32.totalorder %s14108_s24, 1 }
  0x18   : > { %p14252_p6 = por %p176_p3, %p175_p2  ;;  %p480_p7 = scmp.lt.s32.totalorder %s14108_s24, 6 }
  0x19   : > { %s17788_s3 = sld [smem:[#allocation56_spill]]  ;;  %s14110_s18 = smov [#allocation4]  }
  0x1a   : > { %s17786_s28 = scalar_select %p14252_p6, 1, 0 }
  0x1b   : > { %p14260_p8 = pnand %p9416_p5, %p480_p7  ;;  %s499_s19 = sshll.u32 %s14110_s18, 4  ;;  %s500_s19 = int_to_ptr.vmem [resolvable:$true] %s499_s19 }
  0x1c   : > { %17787 = sst [smem:[#allocation30_spill]] %s17786_s28  ;;  %p13418_p11 = scmp.lt.s32.totalorder %s14108_s24, 5 }
  0x1d   : > { %s17789_s17 = scalar_select %p14260_p8, 1, 0 }
  0x1e   : > { %p13376_p9 = pneg %p14260_p8  ;;  %s14274_s21 = sadd.s32 1, %s14108_s24  }
  0x1f   : > { %s497_s0 = sshll.u32 %s17788_s3, 4  ;;  %17790 = sst [smem:[#allocation31_spill]] %s17789_s17  ;;  %s498_s0 = int_to_ptr.hbm [resolvable:$true] %s497_s0 }
  0x20   : > { %p14268_p10 = pnand %p13376_p9, %p176_p3  ;;  %17792 = sst [smem:[#allocation32_spill]] %s14274_s21 }
  0x21   : > { %p155_p12 = scmp.lt.s32.totalorder %s14108_s24, 3  ;;  %s14111_s29 = smov 384  }
  0x22   : > { %s14112_s30 = smov 24   ;;  %p14281_p13 = pnand %p13418_p11, %p14245_p4 }
  0x23   : > { %13379 = dma.hbm_to_vmem [thread:$0]  (!%p14268_p10), %s498_s0, 36864, %s500_s19, [#allocation5], %s14111_s29, %s14111_s29, %s14112_s30  }
  0x24   : > { %p157_p0 = scmp.lt.s32.totalorder %s14274_s21, 3  ;;  %s569_s3 = sand.u32 1, %s14108_s24  }
  0x25   : > { %s14287_s26 = scalar_select %p155_p12, %s14108_s24, 3 }
  0x26   : > { %s158_s16 = scalar_select %p157_p0, %s14274_s21, 3 }
  0x27   : > { %s14292_s15 = sand.u32 1, %s14104_s23   ;;  %s14299_s27 = sshll.u32 %s14287_s26, 10 }
  0x28   : > { %s159_s2 = ssub.s32 %s14287_s26, %s158_s16  ;;  %s14296_s1 = sshll.u32 %s14292_s15, 10 }
  0x29   : > { %p160_p1 = scmp.eq.s32.totalorder %s159_s2, 0  ;;  %s573_s0 = scalar_lea.vmem [#allocation9], %s14296_s1 }
  0x2a   : > { %s583_s19 = sshll.u32 %s573_s0, 4  ;;  %s17794_s29 = sadd.s32 1, %s14104_s23  ;;  %s584_s19 = int_to_ptr.vmem [resolvable:$true] %s583_s19 }
  0x2b   : > { %s14305_s30 = scalar_select %p160_p1, %s14104_s23, %s17794_s29  }
  0x2c   : > { %s17796_s5 = sld [smem:[#allocation57_spill]]  ;;  %s14311_s16 = scalar_lea.sflag [#allocation5], %s569_s3 }
  0x2d   : > { %17795 = sst [smem:[#allocation33_spill]] %s14305_s30  ;;  %p14315_p4 = pneg %p14281_p13 }
  0x32   : > { %s580_s21 = scalar_lea.hbm %s17796_s5, %s14299_s27 }
  0x33   : > { %s581_s22 = sshll.u32 %s580_s21, 4  ;;  %s13703_s21 = scalar_lea.hbm %s17796_s5, 4096  ;;  %s582_s22 = int_to_ptr.hbm [resolvable:$true] %s581_s22 }
  0x34   : > { %s13696_s25 = sshra.s32 %s582_s22, 4  ;;  %s13697_s25 = int_to_ptr.hbm [resolvable:$true] %s13696_s25 }
  0x35   : > { %s13698_s2 = scalar_lea.hbm %s13697_s25, 1024  ;;  %p13704_p9 = scmp.lt.s32.totalorder %s13697_s25, %s17796_s5 }
  0x36   : > { %p13699_p2 = scmp.ne.s32.totalorder %s13697_s25, %s13698_s2  ;;  %p13705_p11 = scmp.lt.s32.totalorder %s13703_s21, %s13698_s2 }
  0x38   : > { %p13701_p5 = pnand %p14315_p4, %p13699_p2  ;;  %p13706_p12 = por %p13705_p11, %p13704_p9 }
  0x3a   : > { %p13702_p7 = pneg %p13701_p5 }
  0x3c   : > { %p13707_p0 = pnand %p13706_p12, %p13702_p7 }
  0x3e   : > { %13710 = shalt.err (!%p13707_p0)
}
  0x3f   : > { %s17660_s24 = smov 128   ;;  %s17662_s30 = smov 8  }
  0x40   : > { %13392 = dma.hbm_to_vmem [thread:$0]  (!%p14281_p13), %s582_s22, 16384, %s584_s19, %s14311_s16, %s17660_s24, %s17660_s24, %s17662_s30  }
  0x41   : > { %s14334_s28 = sshll.u32 %s14292_s15, 1  ;;  %s14337_s25 = sshll.u32 %s14287_s26, 1 }
  0x42   : > { %s17798_s6 = sld [smem:[#allocation58_spill]]  ;;  %s597_s3 = scalar_lea.vmem [#allocation10], %s14334_s28 }
  0x43   : > { %s607_s5 = sshll.u32 %s597_s3, 4  ;;  %s608_s5 = int_to_ptr.vmem [resolvable:$true] %s607_s5 }
  0x48   : > { %s603_s21 = scalar_lea.hbm %s17798_s6, %s14337_s25  ;;  %s13733_s24 = scalar_lea.hbm %s17798_s6, 8 }
  0x49   : > { %s605_s29 = sshll.u32 %s603_s21, 4  ;;  %s606_s29 = int_to_ptr.hbm [resolvable:$true] %s605_s29 }
  0x4a   : > { %s13726_s23 = sshra.s32 %s606_s29, 4  ;;  %s13727_s23 = int_to_ptr.hbm [resolvable:$true] %s13726_s23 }
  0x4b   : > { %s13728_s12 = scalar_lea.hbm %s13727_s23, 2  ;;  %p13734_p7 = scmp.lt.s32.totalorder %s13727_s23, %s17798_s6 }
  0x4c   : > { %p13729_p1 = scmp.ne.s32.totalorder %s13727_s23, %s13728_s12  ;;  %p13735_p9 = scmp.lt.s32.totalorder %s13733_s24, %s13728_s12 }
  0x4e   : > { %p13731_p2 = pnand %p13729_p1, %p14315_p4  ;;  %p13736_p11 = por %p13735_p9, %p13734_p7 }
  0x50   : > { %p13732_p5 = pneg %p13731_p2 }
  0x52   : > { %p13737_p12 = pnand %p13736_p11, %p13732_p5 }
  0x54   : > { %13740 = shalt.err (!%p13737_p12)
}
  0x55   : > { %13395 = dma.hbm_to_vmem [thread:$0]  (!%p14281_p13), %s606_s29, 32, %s608_s5, %s14311_s16  }
  0x56   : > { %s9427_s2 = sshll.u32 %s14292_s15, 8  ;;  %s12549_s0 = sshll.u32 %s14287_s26, 8 }
  0x57   : > { %s17799_s7 = sld [smem:[#allocation59_spill]]  ;;  %s618_s14 = scalar_lea.vmem [#allocation11], %s9427_s2 }
  0x58   : > { %s628_s23 = sshll.u32 %s618_s14, 4  ;;  %s629_s23 = int_to_ptr.vmem [resolvable:$true] %s628_s23 }
  0x5d   : > { %s625_s22 = scalar_lea.hbm %s17799_s7, %s12549_s0  ;;  %s13763_s29 = scalar_lea.hbm %s17799_s7, 1024 }
  0x5e   : > { %s626_s19 = sshll.u32 %s625_s22, 4  ;;  %s627_s19 = int_to_ptr.hbm [resolvable:$true] %s626_s19 }
  0x5f   : > { %s13756_s12 = sshra.s32 %s627_s19, 4  ;;  %s13757_s12 = int_to_ptr.hbm [resolvable:$true] %s13756_s12 }
  0x60   : > { %s13758_s30 = scalar_lea.hbm %s13757_s12, 256  ;;  %p13764_p5 = scmp.lt.s32.totalorder %s13757_s12, %s17799_s7 }
  0x61   : > { %p13759_p0 = scmp.ne.s32.totalorder %s13757_s12, %s13758_s30  ;;  %p13765_p7 = scmp.lt.s32.totalorder %s13763_s29, %s13758_s30 }
  0x63   : > { %p13761_p1 = pnand %p13759_p0, %p14315_p4  ;;  %p13766_p9 = por %p13765_p7, %p13764_p5 }
  0x65   : > { %p13762_p2 = pneg %p13761_p1 }
  0x67   : > { %p13767_p11 = pnand %p13766_p9, %p13762_p2 }
  0x69   : > { %13770 = shalt.err (!%p13767_p11)
}
  0x6a   : > { %s17800_s2 = smov 8   ;;  %s17801_s0 = smov 128  }
  0x6b   : > { %13398 = dma.hbm_to_vmem [thread:$0]  (!%p14281_p13), %s627_s19, 4096, %s629_s23, %s14311_s16, %s17801_s0, %s17801_s0, %s17800_s2  }
  0x6c   : > { %s17802_s8 = sld [smem:[#allocation60_spill]]  ;;  %s642_s13 = scalar_lea.vmem [#allocation12], %s14334_s28 }
  0x6d   : > { %s652_s14 = sshll.u32 %s642_s13, 4  ;;  %s653_s14 = int_to_ptr.vmem [resolvable:$true] %s652_s14 }
  0x72   : > { %s648_s22 = scalar_lea.hbm %s17802_s8, %s14337_s25  ;;  %s13793_s19 = scalar_lea.hbm %s17802_s8, 8 }
  0x73   : > { %s650_s6 = sshll.u32 %s648_s22, 4  ;;  %s651_s6 = int_to_ptr.hbm [resolvable:$true] %s650_s6 }
  0x74   : > { %s13786_s12 = sshra.s32 %s651_s6, 4  ;;  %s13787_s12 = int_to_ptr.hbm [resolvable:$true] %s13786_s12 }
  0x75   : > { %s13788_s30 = scalar_lea.hbm %s13787_s12, 2  ;;  %p13794_p2 = scmp.lt.s32.totalorder %s13787_s12, %s17802_s8 }
  0x76   : > { %p13789_p12 = scmp.ne.s32.totalorder %s13787_s12, %s13788_s30  ;;  %p13795_p5 = scmp.lt.s32.totalorder %s13793_s19, %s13788_s30 }
  0x78   : > { %p13791_p0 = pnand %p13789_p12, %p14315_p4  ;;  %p13796_p7 = por %p13795_p5, %p13794_p2 }
  0x7a   : > { %p13792_p1 = pneg %p13791_p0 }
  0x7c   : > { %p13797_p9 = pnand %p13796_p7, %p13792_p1 }
  0x7e   : > { %13800 = shalt.err (!%p13797_p9)
}
  0x7f   : > { %13401 = dma.hbm_to_vmem [thread:$0]  (!%p14281_p13), %s651_s6, 32, %s653_s14, %s14311_s16  }
  0x80   : > { %s670_s22 = scalar_lea.hbm %s17641_s9, %s14299_s27  ;;  %s663_s24 = scalar_lea.vmem [#allocation13], %s14296_s1 }
  0x81   : > { %s671_s13 = sshll.u32 %s670_s22, 4  ;;  %s673_s5 = sshll.u32 %s663_s24, 4  ;;  %s672_s13 = int_to_ptr.hbm [resolvable:$true] %s671_s13  ;;  %s674_s5 = int_to_ptr.vmem [resolvable:$true] %s673_s5 }
  0x82   : > { %s13816_s12 = sshra.s32 %s672_s13, 4  ;;  %s13823_s6 = scalar_lea.hbm %s17641_s9, 4096  ;;  %s13817_s12 = int_to_ptr.hbm [resolvable:$true] %s13816_s12 }
  0x83   : > { %s13818_s30 = scalar_lea.hbm %s13817_s12, 1024  ;;  %p13824_p1 = scmp.lt.s32.totalorder %s13817_s12, %s17641_s9 }
  0x84   : > { %p13819_p11 = scmp.ne.s32.totalorder %s13817_s12, %s13818_s30  ;;  %p13825_p2 = scmp.lt.s32.totalorder %s13823_s6, %s13818_s30 }
  0x86   : > { %p13821_p12 = pnand %p13819_p11, %p14315_p4  ;;  %p13826_p5 = por %p13825_p2, %p13824_p1 }
  0x88   : > { %p13822_p0 = pneg %p13821_p12 }
  0x8a   : > { %p13827_p7 = pnand %p13826_p5, %p13822_p0 }
  0x8c   : > { %13830 = shalt.err (!%p13827_p7)
}
  0x8d   : > { %s14115_s21 = smov 512   ;;  %s14116_s3 = smov 32  }
  0x8e   : > { %13404 = dma.hbm_to_vmem [thread:$0]  (!%p14281_p13), %s672_s13, 16384, %s674_s5, %s14311_s16, %s14115_s21, %s14115_s21, %s14116_s3  }
  0x8f   : > { %s9435_s22 = sshll.u32 %s14292_s15, 3  ;;  %s9436_s24 = sshll.u32 %s14287_s26, 3 }
  0x90   : > { %s693_s14 = scalar_lea.hbm %s17642_s10, %s9436_s24  ;;  %s687_s30 = scalar_lea.vmem [#allocation14], %s9435_s22 }
  0x91   : > { %s695_s12 = sshll.u32 %s693_s14, 4  ;;  %s697_s6 = sshll.u32 %s687_s30, 4  ;;  %s696_s12 = int_to_ptr.hbm [resolvable:$true] %s695_s12  ;;  %s698_s6 = int_to_ptr.vmem [resolvable:$true] %s697_s6 }
  0x92   : > { %s13846_s29 = sshra.s32 %s696_s12, 4  ;;  %s13853_s15 = scalar_lea.hbm %s17642_s10, 32  ;;  %s13847_s29 = int_to_ptr.hbm [resolvable:$true] %s13846_s29 }
  0x93   : > { %s13848_s7 = scalar_lea.hbm %s13847_s29, 8  ;;  %p13854_p0 = scmp.lt.s32.totalorder %s13847_s29, %s17642_s10 }
  0x94   : > { %p13849_p9 = scmp.ne.s32.totalorder %s13847_s29, %s13848_s7  ;;  %p13855_p1 = scmp.lt.s32.totalorder %s13853_s15, %s13848_s7 }
  0x96   : > { %p13851_p11 = pnand %p13849_p9, %p14315_p4  ;;  %p13856_p2 = por %p13855_p1, %p13854_p0 }
  0x98   : > { %p13852_p12 = pneg %p13851_p11 }
  0x9a   : > { %p13857_p5 = pnand %p13856_p2, %p13852_p12 }
  0x9c   : > { %13860 = shalt.err (!%p13857_p5)
}
  0x9d   : > { %13407 = dma.hbm_to_vmem [thread:$0]  (!%p14281_p13), %s696_s12, 128, %s698_s6, %s14311_s16  }
  0x9e   : > { %s512_s8 = sshll.u32 %s17636_s4, 4  ;;  %s14117_s22 = smov [#allocation7]   ;;  %s513_s8 = int_to_ptr.hbm [resolvable:$true] %s512_s8 }
  0x9f   : > { %s514_s24 = sshll.u32 %s14117_s22, 4  ;;  %s715_s23 = scalar_lea.hbm %s17643_s11, %s14299_s27  ;;  %s515_s24 = int_to_ptr.vmem [resolvable:$true] %s514_s24 }
  0xa0   : > { %13382 = dma.hbm_to_vmem [thread:$0]  (!%p14268_p10), %s513_s8, 96, %s515_s24, [#allocation8]  }
  0xa1   : > { %s708_s14 = scalar_lea.vmem [#allocation15], %s14296_s1  ;;  %s716_s29 = sshll.u32 %s715_s23, 4  ;;  %s717_s29 = int_to_ptr.hbm [resolvable:$true] %s716_s29 }
  0xa2   : > { %s718_s30 = sshll.u32 %s708_s14, 4  ;;  %s17803_s13 = sld [smem:[#allocation62_spill]]  ;;  %s719_s30 = int_to_ptr.vmem [resolvable:$true] %s718_s30 }
  0xa3   : > { %s13906_s26 = sshra.s32 %s717_s29, 4  ;;  %s13913_s27 = scalar_lea.hbm %s17643_s11, 4096  ;;  %s13907_s26 = int_to_ptr.hbm [resolvable:$true] %s13906_s26 }
  0xa4   : > { %s13908_s5 = scalar_lea.hbm %s13907_s26, 1024  ;;  %p13914_p12 = scmp.lt.s32.totalorder %s13907_s26, %s17643_s11 }
  0xa5   : > { %p13909_p7 = scmp.ne.s32.totalorder %s13907_s26, %s13908_s5  ;;  %p13915_p0 = scmp.lt.s32.totalorder %s13913_s27, %s13908_s5 }
  0xa7   : > { %p13911_p9 = pnand %p13909_p7, %p14315_p4  ;;  %p13916_p1 = por %p13915_p0, %p13914_p12 }
  0xa8   : > { %s523_s15 = sshll.u32 %s17803_s13, 4  ;;  %s524_s15 = int_to_ptr.hbm [resolvable:$true] %s523_s15 }
  0xa9   : > { %p13912_p11 = pneg %p13911_p9 }
  0xab   : > { %p13917_p2 = pnand %p13916_p1, %p13912_p11 }
  0xad   : > { %13920 = shalt.err (!%p13917_p2)
}
  0xae   : > { %13410 = dma.hbm_to_vmem [thread:$0]  (!%p14281_p13), %s717_s29, 16384, %s719_s30, %s14311_s16, %s17801_s0, %s17801_s0, %s17800_s2  }
  0xaf   : > { %s14118_s22 = smov [#allocation17]   ;;  %s14119_s7 = smov 64  }
  0xb0   : > { %s525_s24 = sshll.u32 %s14118_s22, 4  ;;  %s14120_s19 = smov 4   ;;  %s526_s24 = int_to_ptr.vmem [resolvable:$true] %s525_s24 }
  0xb1   : > { %13385 = dma.hbm_to_vmem [thread:$0]  (!%p14268_p10), %s524_s15, 8192, %s526_s24, [#allocation8], %s14119_s7, %s14119_s7, %s14120_s19  }
  0xb2   : > { %s17804_s12 = sld [smem:[#allocation63_spill]]  ;;  %s14121_s13 = smov [#allocation18]  }
  0xb3   : > { %s540_s26 = sshll.u32 %s14121_s13, 4  ;;  %s17805_s30 = sld [smem:[#allocation61_spill]]  ;;  %s541_s26 = int_to_ptr.vmem [resolvable:$true] %s540_s26 }
  0xb4   : > { %s732_s5 = scalar_lea.vmem [#allocation16], %s14334_s28 }
  0xb5   : > { %s742_s21 = sshll.u32 %s732_s5, 4  ;;  %s743_s21 = int_to_ptr.vmem [resolvable:$true] %s742_s21 }
  0xb8   : > { %s538_s6 = sshll.u32 %s17804_s12, 4  ;;  %s539_s6 = int_to_ptr.hbm [resolvable:$true] %s538_s6 }
  0xb9   : > { %13388 = dma.hbm_to_vmem [thread:$0]  (!%p14268_p10), %s539_s6, 16, %s541_s26, [#allocation19]  }
  0xba   : > { %s738_s29 = scalar_lea.hbm %s17805_s30, %s14337_s25  ;;  %s14003_s20 = scalar_lea.hbm %s17805_s30, 8 }
  0xbb   : > { %s740_s3 = sshll.u32 %s738_s29, 4  ;;  %s741_s3 = int_to_ptr.hbm [resolvable:$true] %s740_s3 }
  0xbc   : > { %s13996_s15 = sshra.s32 %s741_s3, 4  ;;  %s13997_s15 = int_to_ptr.hbm [resolvable:$true] %s13996_s15 }
  0xbd   : > { %s13998_s27 = scalar_lea.hbm %s13997_s15, 2  ;;  %p14004_p10 = scmp.lt.s32.totalorder %s13997_s15, %s17805_s30 }
  0xbe   : > { %p13999_p5 = scmp.ne.s32.totalorder %s13997_s15, %s13998_s27  ;;  %p14005_p11 = scmp.lt.s32.totalorder %s14003_s20, %s13998_s27 }
  0xc0   : > { %p14001_p7 = pnand %p13999_p5, %p14315_p4  ;;  %p14006_p12 = por %p14005_p11, %p14004_p10 }
  0xc2   : > { %p14002_p9 = pneg %p14001_p7 }
  0xc4   : > { %p14007_p0 = pnand %p14006_p12, %p14002_p9 }
  0xc6   : > { %14010 = shalt.err (!%p14007_p0)
}
  0xc7   : > { %13413 = dma.hbm_to_vmem [thread:$0]  (!%p14281_p13), %s741_s3, 32, %s743_s21, %s14311_s16  }
  0xc8   : > { %751 = sbr.rel (%p14260_p8) target bundleno = 3279 (0xccf), region = 80  ;;  %s17807_s17 = sld [smem:[#allocation29_spill]] (!%p14260_p8) }
  0xcd   : > { %14071 = dma.done.wait (%p176_p3), [#allocation5], 36864  }
  0xce   : > { %14073 = vsyncadd (%p176_p3), [#allocation5], 4294930432 }
  0xcf   : > { %14075 = dma.done.wait (%p176_p3), [#allocation8], 96  }
  0xd0   : > { %14077 = vsyncadd (%p176_p3), [#allocation8], 4294967200  ;;  %s17808_s25 = sld [smem:[#allocation27_spill]]  ;;  %s763_s7 = sand.u32 1, %s17807_s17  }
  0xd1   : > { %s764_s23 = scalar_lea.sflag [#allocation5], %s763_s7 }
  0xd6   : > { %s765_s16 = sand.u32 1, %s17808_s25  }
  0xd7   : > { %s9445_s19 = sshll.u32 %s765_s16, 10 }
  0xd8   : > { %s14484_s14 = scalar_lea.vmem [#allocation9], %s9445_s19 }
  0xd9   : > { %14079 = dma.done.wait (%p14252_p6), %s764_s23, 53472  }
  0xda   : > { %14081 = vsyncadd (%p14252_p6), %s764_s23, 4294913824  ;;  %s14490_s12 = sshll.u32 %s765_s16, 1  ;;  %s9447_s6 = sshll.u32 %s765_s16, 8 }
  0xdb   : > { %s9450_s13 = sshll.u32 %s765_s16, 3  ;;  %s777_s26 = scalar_lea.vmem [#allocation10], %s14490_s12 }
  0xdc   : > { %s14493_s2 = scalar_lea.vmem [#allocation11], %s9447_s6  ;;  %s797_s0 = scalar_lea.vmem [#allocation12], %s14490_s12 }
  0xdd   : > { %s14496_s29 = scalar_lea.vmem [#allocation13], %s9445_s19  ;;  %s14498_s5 = scalar_lea.vmem [#allocation14], %s9450_s13 }
  0xde   : > { %s14500_s21 = scalar_lea.vmem [#allocation15], %s9445_s19  ;;  %s837_s3 = scalar_lea.vmem [#allocation16], %s14490_s12 }
  0xdf   : > { %14083 = dma.done.wait (%p176_p3), [#allocation8], 8192  }
  0xe0   : > { %14085 = vsyncadd (%p176_p3), [#allocation8], 4294959104 }
  0xe1   : > { %14087 = dma.done.wait (%p176_p3), [#allocation19], 16  }
  0xe2   : > { %14089 = vsyncadd (%p176_p3), [#allocation19], 4294967280  ;;  %p937_p6 = scmp.lt.s32.totalorder %s17807_s17, 3  ;;  %p968_p8 = scmp.lt.s32.totalorder %s17807_s17, 4 }
  0xe3   : > { %p969_p13 = scmp.ne.s32.totalorder %s17807_s17, 1  ;;  %s17810_s22 = sld [smem:[#allocation53_spill]] }
  0xe4   : > { %s938_s15 = scalar_select %p937_p6, %s17807_s17, 3 }
  0xe5   : > { %p970_p4 = pnand %p969_p13, %p968_p8 }
  0xe6   : > { %s9455_s27 = sadd.s32 4294967295, %s938_s15 }
  0xe7   : > { %p940_p1 = scmp.gt.s32.totalorder %s9455_s27, 0  ;;  %p9456_p2 = scmp.lt.s32.totalorder %s9455_s27, 2 }
  0xe8   : > { %973 = sbr.rel (%p970_p4) target bundleno = 242 (0xf2), region = 132 }
  0xe9   : > { %s18177_s27 = smov (!%p940_p1, %s9455_s27), 0 }
  0xea   : > { %s18179_s27 = smov (!%p9456_p2, %s18177_s27), 2 }
  0xeb   : > { %s12554_s1 = sshll.u32 %s18179_s27, 5 }
  0xec   : > { %s946_s24 = scalar_lea.vmem %s17810_s22, %s12554_s1 }
  0xed   : > { %v974_v0 = vld [vmem:[%s946_s24] sm:$0xff]  ;;  %v975_v1 = vld [vmem:[%s946_s24 + $0x8] sm:$0xff]  ;;  %v976_v2 = vld [vmem:[%s946_s24 + $0x10] sm:$0xff] }
  0xee   : > { %978 = vst [vmem:[#allocation2 + $0x10] sm:$0xff] %v974_v0  ;;  %v977_v3 = vld [vmem:[%s946_s24 + $0x18] sm:$0xff] }
  0xef   : > { %979 = vst [vmem:[#allocation2] sm:$0xff] %v975_v1 }
  0xf0   : > { %980 = vst [vmem:[#allocation2 + $0x18] sm:$0xff] %v976_v2 }
  0xf1   : > { %981 = vst [vmem:[#allocation2 + $0x8] sm:$0xff] %v977_v3 }
  0xf2 PF: > { %985 = sbr.rel (%p969_p13) target bundleno = 740 (0x2e4), region = 136 }
  0xf7   : > { %v9634_v4 = vld [vmem:[#allocation4 + $0x150] sm:$0xf]  ;;  %v12600_v5 = vld [vmem:[#allocation4 + $0x164] sm:$0xf0]  ;;  %v9610_v15 = vld [vmem:[#allocation4 + $0x120] sm:$0xf] }
  0xf8   : > { %v9826_v6 = vld [vmem:[#allocation4 + $0x2d0] sm:$0xf]  ;;  %v9635_v7 = vor.u32 %v12600_v5, %v9634_v4  ;;  %v12648_v8 = vld [vmem:[#allocation4 + $0x2e4] sm:$0xf0]  ;;  %v12594_v17 = vld [vmem:[#allocation4 + $0x134] sm:$0xf0] }
  0xf9   : > { %v10018_v9 = vld [vmem:[#allocation4 + $0x450] sm:$0xf]  ;;  %v12696_v10 = vld [vmem:[#allocation4 + $0x464] sm:$0xf0]  ;;  %v9827_v11 = vor.u32 %v12648_v8, %v9826_v6  ;;  %v9802_v18 = vld [vmem:[#allocation4 + $0x2a0] sm:$0xf]  ;;  %v9611_v20 = vor.u32 %v12594_v17, %v9610_v15 }
  0xfa   : > { %v10019_v12 = vor.u32 %v12696_v10, %v10018_v9  ;;  %v10210_v13 = vld [vmem:[#allocation4 + $0x5d0] sm:$0xf]  ;;  %v12744_v14 = vld [vmem:[#allocation4 + $0x5e4] sm:$0xf0]  ;;  %2776 = vmatpush.bf16.msra.mxu0 %v9635_v7  ;;  %v12642_v19 = vld [vmem:[#allocation4 + $0x2b4] sm:$0xf0] }
  0xfb   : > { %v10211_v16 = vor.u32 %v12744_v14, %v10210_v13  ;;  %2795 = vmatpush.bf16.msra.mxu1 %v9827_v11  ;;  %v9803_v21 = vor.u32 %v12642_v19, %v9802_v18  ;;  %v9994_v22 = vld [vmem:[#allocation4 + $0x420] sm:$0xf]  ;;  %v12690_v23 = vld [vmem:[#allocation4 + $0x434] sm:$0xf0]  ;;  %v9586_v27 = vld [vmem:[#allocation4 + $0xf0] sm:$0xf] }
  0xfc   : > { %2814 = vmatpush.bf16.msra.mxu2 %v10019_v12  ;;  %v10186_v24 = vld [vmem:[#allocation4 + $0x5a0] sm:$0xf]  ;;  %v9995_v25 = vor.u32 %v12690_v23, %v9994_v22  ;;  %v12738_v26 = vld [vmem:[#allocation4 + $0x5b4] sm:$0xf0]  ;;  %v12588_v28 = vld [vmem:[#allocation4 + $0x104] sm:$0xf0] }
  0xfd   : > { %2833 = vmatpush.bf16.msra.mxu3 %v10211_v16  ;;  %v10187_v29 = vor.u32 %v12738_v26, %v10186_v24  ;;  %v9778_v30 = vld [vmem:[#allocation4 + $0x270] sm:$0xf]  ;;  %v12636_v31 = vld [vmem:[#allocation4 + $0x284] sm:$0xf0]  ;;  %v9587_v33 = vor.u32 %v12588_v28, %v9586_v27  ;;  %v9562_v39 = vld [vmem:[#allocation4 + $0xc0] sm:$0xf] }
  0xfe   : > { %v9970_v32 = vld [vmem:[#allocation4 + $0x3f0] sm:$0xf]  ;;  %2777 = vmatpush.bf16.msra.mxu0 %v9611_v20  ;;  %v12684_v34 = vld [vmem:[#allocation4 + $0x404] sm:$0xf0]  ;;  %v9779_v37 = vor.u32 %v12636_v31, %v9778_v30  ;;  %v12582_v40 = vld [vmem:[#allocation4 + $0xd4] sm:$0xf0] }
  0xff   : > { %v10162_v35 = vld [vmem:[#allocation4 + $0x570] sm:$0xf]  ;;  %v12732_v36 = vld [vmem:[#allocation4 + $0x584] sm:$0xf0]  ;;  %2796 = vmatpush.bf16.msra.mxu1 %v9803_v21  ;;  %v9971_v38 = vor.u32 %v12684_v34, %v9970_v32  ;;  %v9754_v41 = vld [vmem:[#allocation4 + $0x240] sm:$0xf]  ;;  %v9563_v48 = vor.u32 %v12582_v40, %v9562_v39 }
 0x100   : > { %2815 = vmatpush.bf16.msra.mxu2 %v9995_v25  ;;  %v10163_v42 = vor.u32 %v12732_v36, %v10162_v35  ;;  %v12630_v43 = vld [vmem:[#allocation4 + $0x254] sm:$0xf0]  ;;  %v9946_v44 = vld [vmem:[#allocation4 + $0x3c0] sm:$0xf]  ;;  %v9538_v51 = vld [vmem:[#allocation4 + $0x90] sm:$0xf] }
 0x101   : > { %2834 = vmatpush.bf16.msra.mxu3 %v10187_v29  ;;  %v12678_v45 = vld [vmem:[#allocation4 + $0x3d4] sm:$0xf0]  ;;  %v10138_v46 = vld [vmem:[#allocation4 + $0x540] sm:$0xf]  ;;  %v9755_v49 = vor.u32 %v12630_v43, %v9754_v41  ;;  %v12576_v52 = vld [vmem:[#allocation4 + $0xa4] sm:$0xf0] }
 0x102   : > { %v12726_v47 = vld [vmem:[#allocation4 + $0x554] sm:$0xf0]  ;;  %2778 = vmatpush.bf16.msra.mxu0 %v9587_v33  ;;  %v9947_v50 = vor.u32 %v12678_v45, %v9946_v44  ;;  %v9730_v53 = vld [vmem:[#allocation4 + $0x210] sm:$0xf]  ;;  %v12624_v55 = vld [vmem:[#allocation4 + $0x224] sm:$0xf0]  ;;  %v9539_v60 = vor.u32 %v12576_v52, %v9538_v51 }
 0x103   : > { %2797 = vmatpush.bf16.msra.mxu1 %v9779_v37  ;;  %v10139_v54 = vor.u32 %v12726_v47, %v10138_v46  ;;  %v9922_v56 = vld [vmem:[#allocation4 + $0x390] sm:$0xf]  ;;  %v12672_v57 = vld [vmem:[#allocation4 + $0x3a4] sm:$0xf0]  ;;  %v9731_v61 = vor.u32 %v12624_v55, %v9730_v53  ;;  %v9514_v63 = vld [vmem:[#allocation4 + $0x60] sm:$0xf] }
 0x104   : > { %2816 = vmatpush.bf16.msra.mxu2 %v9971_v38  ;;  %v10114_v58 = vld [vmem:[#allocation4 + $0x510] sm:$0xf]  ;;  %v12720_v59 = vld [vmem:[#allocation4 + $0x524] sm:$0xf0]  ;;  %v9923_v62 = vor.u32 %v12672_v57, %v9922_v56  ;;  %v12570_v0 = vld [vmem:[#allocation4 + $0x74] sm:$0xf0] }
 0x105   : > { %2835 = vmatpush.bf16.msra.mxu3 %v10163_v42  ;;  %v9706_v1 = vld [vmem:[#allocation4 + $0x1e0] sm:$0xf]  ;;  %v10115_v2 = vor.u32 %v12720_v59, %v10114_v58  ;;  %v12618_v3 = vld [vmem:[#allocation4 + $0x1f4] sm:$0xf0]  ;;  %v9515_v8 = vor.u32 %v12570_v0, %v9514_v63  ;;  %v9490_v9 = vld [vmem:[#allocation4 + $0x30] sm:$0xf] }
 0x106   : > { %2779 = vmatpush.bf16.msra.mxu0 %v9563_v48  ;;  %v9898_v4 = vld [vmem:[#allocation4 + $0x360] sm:$0xf]  ;;  %v12666_v5 = vld [vmem:[#allocation4 + $0x374] sm:$0xf0]  ;;  %v9707_v10 = vor.u32 %v12618_v3, %v9706_v1  ;;  %v12564_v12 = vld [vmem:[#allocation4 + $0x44] sm:$0xf0] }
 0x107   : > { %2798 = vmatpush.bf16.msra.mxu1 %v9755_v49  ;;  %v10090_v6 = vld [vmem:[#allocation4 + $0x4e0] sm:$0xf]  ;;  %v12714_v7 = vld [vmem:[#allocation4 + $0x4f4] sm:$0xf0]  ;;  %v9899_v11 = vor.u32 %v12666_v5, %v9898_v4  ;;  %v9682_v13 = vld [vmem:[#allocation4 + $0x1b0] sm:$0xf]  ;;  %v9491_v22 = vor.u32 %v12564_v12, %v9490_v9 }
 0x108   : > { %2817 = vmatpush.bf16.msra.mxu2 %v9947_v50  ;;  %v12612_v14 = vld [vmem:[#allocation4 + $0x1c4] sm:$0xf0]  ;;  %v10091_v15 = vor.u32 %v12714_v7, %v10090_v6  ;;  %v9874_v16 = vld [vmem:[#allocation4 + $0x330] sm:$0xf]  ;;  %v9466_v20 = vld [vmem:[#allocation4] sm:$0xf] }
 0x109   : > { %2836 = vmatpush.bf16.msra.mxu3 %v10139_v54  ;;  %v12660_v17 = vld [vmem:[#allocation4 + $0x344] sm:$0xf0]  ;;  %v10066_v18 = vld [vmem:[#allocation4 + $0x4b0] sm:$0xf]  ;;  %v12558_v21 = vld [vmem:[#allocation4 + $0x14] sm:$0xf0]  ;;  %v9683_v26 = vor.u32 %v12612_v14, %v9682_v13 }
 0x10a   : > { %2780 = vmatpush.bf16.msra.mxu0 %v9539_v60  ;;  %v12708_v19 = vld [vmem:[#allocation4 + $0x4c4] sm:$0xf0]  ;;  %v9658_v23 = vld [vmem:[#allocation4 + $0x180] sm:$0xf]  ;;  %s17812_s18 = sld [smem:[#allocation54_spill]]  ;;  %v9875_v27 = vor.u32 %v12660_v17, %v9874_v16  ;;  %v9467_v35 = vor.u32 %v12558_v21, %v9466_v20  ;;  %vm3585_vm0 = vcmask 60416  }
 0x10b   : > { %2799 = vmatpush.bf16.msra.mxu1 %v9731_v61  ;;  %v12606_v28 = vld [vmem:[#allocation4 + $0x194] sm:$0xf0]  ;;  %v10067_v31 = vor.u32 %v12708_v19, %v10066_v18  ;;  %v9850_v32 = vld [vmem:[#allocation4 + $0x300] sm:$0xf]  ;;  %v12597_v39 = vld [vmem:[#allocation4 + $0x154] sm:$0xf] }
 0x10c   : > { %2818 = vmatpush.bf16.msra.mxu2 %v9923_v62  ;;  %v12654_v33 = vld [vmem:[#allocation4 + $0x314] sm:$0xf0]  ;;  %v10042_v34 = vld [vmem:[#allocation4 + $0x480] sm:$0xf]  ;;  %v9636_v40 = vld [vmem:[#allocation4 + $0x168] sm:$0xf0]  ;;  %v9659_v47 = vor.u32 %v12606_v28, %v9658_v23 }
 0x10d   : > { %2837 = vmatpush.bf16.msra.mxu3 %v10115_v2  ;;  %v12702_v36 = vld [vmem:[#allocation4 + $0x494] sm:$0xf0]  ;;  %v10594_v45 = vld [vmem:[#allocation4 + $0x8d0] sm:$0xf]  ;;  %v12840_v46 = vld [vmem:[#allocation4 + $0x8e4] sm:$0xf0]  ;;  %v9851_v48 = vor.u32 %v12654_v33, %v9850_v32  ;;  %v9639_v52 = vor.u32 %v12597_v39, %v9636_v40 }
 0x10e   : > { %2781 = vmatpush.bf16.msra.mxu0 %v9515_v8  ;;  %v10043_v51 = vor.u32 %v12702_v36, %v10042_v34  ;;  %v10402_v53 = vld [vmem:[#allocation4 + $0x750] sm:$0xf]  ;;  %v12792_v54 = vld [vmem:[#allocation4 + $0x764] sm:$0xf0]  ;;  %v12645_v55 = vld [vmem:[#allocation4 + $0x2d4] sm:$0xf]  ;;  %v10595_v57 = vor.u32 %v12840_v46, %v10594_v45 }
 0x10f   : > { %2800 = vmatpush.bf16.msra.mxu1 %v9707_v10  ;;  %v9828_v58 = vld [vmem:[#allocation4 + $0x2e8] sm:$0xf0]  ;;  %v12591_v59 = vld [vmem:[#allocation4 + $0x124] sm:$0xf]  ;;  %v9612_v60 = vld [vmem:[#allocation4 + $0x138] sm:$0xf0]  ;;  %v10403_v2 = vor.u32 %v12792_v54, %v10402_v53 }
 0x110   : > { %v14525_v24 = vld [vmem:[%s17812_s18] sm:$0xff]  ;;  %v14530_v25 = vld [vmem:[%s17812_s18 + $0x18] sm:$0xff]  ;;  %2819 = vmatpush.bf16.msra.mxu2 %v9899_v11  ;;  %v14535_v29 = vld [vmem:[%s17812_s18 + $0x8] sm:$0xff]  ;;  %v9831_v3 = vor.u32 %v12645_v55, %v9828_v58  ;;  %v9615_v4 = vor.u32 %v12591_v59, %v9612_v60  ;;  %s17825_s6 = sld [smem:[#allocation55_spill]]  ;;  %vm3858_vm13 = vcmask 1043456   ;;  %vm3872_vm14 = vcmask 1041409  }
 0x111   : > { %17813 = vst [vmem:[#allocation34_spill] sm:$0xff] %v14535_v29  ;;  %v14540_v30 = vld [vmem:[%s17812_s18 + $0x20] sm:$0xff]  ;;  %2838 = vmatpush.bf16.msra.mxu3 %v10091_v15  ;;  %v17687_v37 = vunpack.c.l.bf16 %v14525_v24  ;;  %v17686_v38 = vunpack.c.l.bf16 %v14530_v25  ;;  %v17683_v41 = vunpack.c.h.bf16 %v14525_v24  ;;  %v17682_v42 = vunpack.c.h.bf16 %v14530_v25  ;;  %v10570_v63 = vld [vmem:[#allocation4 + $0x8a0] sm:$0xf]  ;;  %v12639_v7 = vld [vmem:[#allocation4 + $0x2a4] sm:$0xf] }
 0x112   : > { %17814 = vst [vmem:[#allocation35_spill] sm:$0xff] %v14540_v30  ;;  %2782 = vmatpush.bf16.msra.mxu0 %v9491_v22  ;;  %v17678_v43 = vunpack.c.l.bf16 %v14535_v29  ;;  %v17679_v44 = vunpack.c.l.bf16 %v14540_v30  ;;  %v17676_v49 = vunpack.c.h.bf16 %v14535_v29  ;;  %v17666_v50 = vunpack.c.h.bf16 %v14540_v30  ;;  %v12834_v0 = vld [vmem:[#allocation4 + $0x8b4] sm:$0xf0]  ;;  %v10378_v5 = vld [vmem:[#allocation4 + $0x720] sm:$0xf]  ;;  %v14581_v28 = vld [vmem:[%s17812_s18 + $0x30] sm:$0xff] }
 0x113   : > { %2801 = vmatpush.bf16.msra.mxu1 %v9683_v26  ;;  %v14554_v56 = vpack.c.bf16 %v17686_v38, %v17687_v37  ;;  %v14560_v61 = vpack.c.bf16 %v17682_v42, %v17683_v41  ;;  %v12786_v6 = vld [vmem:[#allocation4 + $0x734] sm:$0xf0]  ;;  %v10571_v8 = vor.u32 %v12834_v0, %v10570_v63  ;;  %v9804_v9 = vld [vmem:[#allocation4 + $0x2b8] sm:$0xf0]  ;;  %v12585_v10 = vld [vmem:[#allocation4 + $0xf4] sm:$0xf]  ;;  %v17681_v54 = vunpack.c.h.bf16 %v14581_v28 }
 0x114   : > { %2820 = vmatpush.bf16.msra.mxu2 %v9875_v27  ;;  %v14566_v62 = vpack.c.bf16 %v17679_v44, %v17678_v43  ;;  %v14572_v1 = vpack.c.bf16 %v17666_v50, %v17676_v49  ;;  %v9588_v11 = vld [vmem:[#allocation4 + $0x108] sm:$0xf0]  ;;  %v10546_v12 = vld [vmem:[#allocation4 + $0x870] sm:$0xf]  ;;  %v12828_v13 = vld [vmem:[#allocation4 + $0x884] sm:$0xf0]  ;;  %v10379_v14 = vor.u32 %v12786_v6, %v10378_v5  ;;  %v9807_v16 = vor.u32 %v12639_v7, %v9804_v9 }
 0x115   : > { %2839 = vmatpush.bf16.msra.mxu3 %v10067_v31  ;;  %17815 = vst [vmem:[#allocation36_spill] sm:$0xff] %v14560_v61  ;;  %v10354_v15 = vld [vmem:[#allocation4 + $0x6f0] sm:$0xf]  ;;  %v9591_v17 = vor.u32 %v12585_v10, %v9588_v11  ;;  %v12780_v18 = vld [vmem:[#allocation4 + $0x704] sm:$0xf0]  ;;  %v10547_v21 = vor.u32 %v12828_v13, %v10546_v12  ;;  %v14586_v31 = vld [vmem:[%s17812_s18 + $0x48] sm:$0xff] }
 0x116   : > { %2783 = vmatpush.bf16.msra.mxu0 %v9467_v35  ;;  %17816 = vst [vmem:[#allocation37_spill] sm:$0xff] %v14566_v62  ;;  %v12633_v19 = vld [vmem:[#allocation4 + $0x274] sm:$0xf]  ;;  %v9780_v20 = vld [vmem:[#allocation4 + $0x288] sm:$0xf0]  ;;  %v10355_v32 = vor.u32 %v12780_v18, %v10354_v15  ;;  %v17680_v55 = vunpack.c.h.bf16 %v14586_v31 }
 0x117   : > { %2802 = vmatpush.bf16.msra.mxu1 %v9659_v47  ;;  %17817 = vst [vmem:[#allocation38_spill] sm:$0xff] %v14572_v1  ;;  %v12579_v22 = vld [vmem:[#allocation4 + $0xc4] sm:$0xf]  ;;  %v9564_v23 = vld [vmem:[#allocation4 + $0xd8] sm:$0xf0]  ;;  %v14591_v33 = vld [vmem:[%s17812_s18 + $0x38] sm:$0xff]  ;;  %v9783_v35 = vor.u32 %v12633_v19, %v9780_v20 }
 0x118   : > { %2821 = vmatpush.bf16.msra.mxu2 %v9851_v48  ;;  %v10522_v26 = vld [vmem:[#allocation4 + $0x840] sm:$0xf]  ;;  %v12822_v27 = vld [vmem:[#allocation4 + $0x854] sm:$0xf0]  ;;  %17818 = vst [vmem:[#allocation39_spill] sm:$0xff] %v14591_v33  ;;  %v14596_v34 = vld [vmem:[%s17812_s18 + $0x50] sm:$0xff]  ;;  %v9567_v36 = vor.u32 %v12579_v22, %v9564_v23  ;;  %v17685_v48 = vunpack.c.l.bf16 %v14581_v28  ;;  %v17665_v0 = vunpack.c.h.bf16 %v14591_v33  ;;  %v14616_v13 = vpack.c.bf16 %v17680_v55, %v17681_v54 }
 0x119   : > { %2840 = vmatpush.bf16.msra.mxu3 %v10043_v51  ;;  %2784 = vmatmul.bf16.vlgmr.msra.gmra.mxu0 %v14554_v56  ;;  %17819 = vst [vmem:[#allocation40_spill] sm:$0xff] %v14596_v34  ;;  %v10330_v39 = vld [vmem:[#allocation4 + $0x6c0] sm:$0xf]  ;;  %v12774_v40 = vld [vmem:[#allocation4 + $0x6d4] sm:$0xf0]  ;;  %v10523_v46 = vor.u32 %v12822_v27, %v10522_v26  ;;  %v17684_v51 = vunpack.c.l.bf16 %v14586_v31  ;;  %v17675_v58 = vunpack.c.l.bf16 %v14596_v34 }
 0x11a   : > { %2803 = vmatmul.bf16.vlgmr.msra.gmra.mxu1 %v14560_v61  ;;  %2852 = vmatpush.bf16.msrb.mxu0 %v10403_v2  ;;  %v12627_v45 = vld [vmem:[#allocation4 + $0x244] sm:$0xf]  ;;  %v9756_v47 = vld [vmem:[#allocation4 + $0x258] sm:$0xf0]  ;;  %v9540_v53 = vld [vmem:[#allocation4 + $0xa8] sm:$0xf0]  ;;  %v10331_v63 = vor.u32 %v12774_v40, %v10330_v39  ;;  %v17664_v2 = vunpack.c.h.bf16 %v14596_v34 }
 0x11b   : > { %2871 = vmatpush.bf16.msrb.mxu1 %v10595_v57  ;;  %2822 = vmatmul.bf16.vlgmr.msra.gmra.mxu2 %v14566_v62  ;;  %v17677_v57 = vunpack.c.l.bf16 %v14591_v33  ;;  %v10498_v59 = vld [vmem:[#allocation4 + $0x810] sm:$0xf]  ;;  %v12816_v60 = vld [vmem:[#allocation4 + $0x824] sm:$0xf0]  ;;  %v12621_v7 = vld [vmem:[#allocation4 + $0x214] sm:$0xf] }
 0x11c   : > { %2890 = vmatpush.bf16.msrb.mxu2 %v9639_v52  ;;  %2841 = vmatmul.bf16.vlgmr.msra.gmra.mxu3 %v14572_v1  ;;  %v12573_v52 = vld [vmem:[#allocation4 + $0x94] sm:$0xf]  ;;  %v10306_v5 = vld [vmem:[#allocation4 + $0x690] sm:$0xf]  ;;  %v12768_v6 = vld [vmem:[#allocation4 + $0x6a4] sm:$0xf0]  ;;  %v10499_v9 = vor.u32 %v12816_v60, %v10498_v59 }
 0x11d   : > { %2909 = vmatpush.bf16.msrb.mxu3 %v9831_v3  ;;  %v9759_v3 = vor.u32 %v12627_v45, %v9756_v47  ;;  %v9732_v10 = vld [vmem:[#allocation4 + $0x228] sm:$0xf0]  ;;  %v12567_v11 = vld [vmem:[#allocation4 + $0x64] sm:$0xf]  ;;  %v9516_v12 = vld [vmem:[#allocation4 + $0x78] sm:$0xf0]  ;;  %v10307_v18 = vor.u32 %v12768_v6, %v10306_v5 }
 0x11e   : > { %2853 = vmatpush.bf16.msrb.mxu0 %v10379_v14  ;;  %17820 = vst [vmem:[#allocation41_spill] sm:$0xff] %v14616_v13  ;;  %v14622_v14 = vpack.c.bf16 %v17675_v58, %v17677_v57  ;;  %v10474_v15 = vld [vmem:[#allocation4 + $0x7e0] sm:$0xf]  ;;  %v9735_v19 = vor.u32 %v12621_v7, %v9732_v10  ;;  %v9519_v20 = vor.u32 %v12567_v11, %v9516_v12  ;;  %v12762_v22 = vld [vmem:[#allocation4 + $0x674] sm:$0xf0]  ;;  %v14637_v7 = vld [vmem:[%s17812_s18 + $0x10] sm:$0xff] }
 0x11f   : > { %2872 = vmatpush.bf16.msrb.mxu1 %v10571_v8  ;;  %v14610_v8 = vpack.c.bf16 %v17684_v51, %v17685_v48  ;;  %v12615_v23 = vld [vmem:[#allocation4 + $0x1e4] sm:$0xf]  ;;  %v9708_v27 = vld [vmem:[#allocation4 + $0x1f8] sm:$0xf0]  ;;  %v12804_v39 = vld [vmem:[#allocation4 + $0x7c4] sm:$0xf0] }
 0x120   : > { %2891 = vmatpush.bf16.msrb.mxu2 %v9615_v4  ;;  %v9543_v4 = vor.u32 %v12573_v52, %v9540_v53  ;;  %17821 = vst [vmem:[#allocation42_spill] sm:$0xff] %v14622_v14  ;;  %v10258_v45 = vld [vmem:[#allocation4 + $0x630] sm:$0xf]  ;;  %v12609_v47 = vld [vmem:[#allocation4 + $0x1b4] sm:$0xf]  ;;  %v9711_v52 = vor.u32 %v12615_v23, %v9708_v27  ;;  %v14642_v11 = vld [vmem:[%s17812_s18 + $0x28] sm:$0xff] }
 0x121   : > { %2910 = vmatpush.bf16.msrb.mxu3 %v9807_v16  ;;  %v12810_v16 = vld [vmem:[#allocation4 + $0x7f4] sm:$0xf0]  ;;  %v9684_v59 = vld [vmem:[#allocation4 + $0x1c8] sm:$0xf0]  ;;  %v12555_v60 = vld [vmem:[#allocation4 + $0x4] sm:$0xf] }
 0x122   : > { %2854 = vmatpush.bf16.msrb.mxu0 %v10355_v32  ;;  %v10475_v26 = vor.u32 %v12810_v16, %v10474_v15  ;;  %v12561_v32 = vld [vmem:[#allocation4 + $0x34] sm:$0xf]  ;;  %v10426_v5 = vld [vmem:[#allocation4 + $0x780] sm:$0xf]  ;;  %v12798_v6 = vld [vmem:[#allocation4 + $0x794] sm:$0xf0] }
 0x123   : > { %2873 = vmatpush.bf16.msrb.mxu1 %v10547_v21  ;;  %v10282_v21 = vld [vmem:[#allocation4 + $0x660] sm:$0xf]  ;;  %17823 = vst [vmem:[#allocation44_spill] sm:$0xff] %v14637_v7  ;;  %v12750_v10 = vld [vmem:[#allocation4 + $0x614] sm:$0xf0] }
 0x124   : > { %2892 = vmatpush.bf16.msrb.mxu2 %v9591_v17  ;;  %v14628_v17 = vpack.c.bf16 %v17664_v2, %v17665_v0  ;;  %v10283_v40 = vor.u32 %v12762_v22, %v10282_v21  ;;  %17824 = vst [vmem:[#allocation45_spill] sm:$0xff] %v14642_v11  ;;  %v12789_v12 = vld [vmem:[#allocation4 + $0x754] sm:$0xf]  ;;  %v10404_v15 = vld [vmem:[#allocation4 + $0x768] sm:$0xf0]  ;;  %v9687_v22 = vor.u32 %v12609_v47, %v9684_v59  ;;  %v17670_v2 = vunpack.c.l.bf16 %v14642_v11 }
 0x125   : > { %2911 = vmatpush.bf16.msrb.mxu3 %v9783_v35  ;;  %v9492_v35 = vld [vmem:[#allocation4 + $0x48] sm:$0xf0]  ;;  %v14647_v21 = vld [vmem:[%s17825_s6] sm:$0xf]  ;;  %v12693_v27 = vld [vmem:[#allocation4 + $0x454] sm:$0xf]  ;;  %v17667_v47 = vunpack.c.h.bf16 %v14642_v11 }
 0x126   : > { %2855 = vmatpush.bf16.msrb.mxu0 %v10331_v63  ;;  %17822 = vst [vmem:[#allocation43_spill] sm:$0xff] %v14628_v17  ;;  %v9495_v53 = vor.u32 %v12561_v32, %v9492_v35  ;;  %v9468_v63 = vld [vmem:[#allocation4 + $0x18] sm:$0xf0]  ;;  %v10427_v35 = vor.u32 %v12798_v6, %v10426_v5  ;;  %v10596_v59 = vld [vmem:[#allocation4 + $0x8e8] sm:$0xf0] }
 0x127   : > { %2874 = vmatpush.bf16.msrb.mxu1 %v10523_v46  ;;  %v12756_v46 = vld [vmem:[#allocation4 + $0x644] sm:$0xf0]  ;;  %v9471_v23 = vor.u32 %v12555_v60, %v9468_v63  ;;  %v12783_v60 = vld [vmem:[#allocation4 + $0x724] sm:$0xf]  ;;  %v10380_v63 = vld [vmem:[#allocation4 + $0x738] sm:$0xf0] }
 0x128   : > { %2893 = vmatpush.bf16.msrb.mxu2 %v9567_v36  ;;  %v10450_v36 = vld [vmem:[#allocation4 + $0x7b0] sm:$0xf]  ;;  %v10259_v16 = vor.u32 %v12756_v46, %v10258_v45  ;;  %v12837_v45 = vld [vmem:[#allocation4 + $0x8d4] sm:$0xf]  ;;  %v3586_v46 = vsel %vm3585_vm0, %v14647_v21, 0.0  ;;  %v10383_v0 = vor.u32 %v12783_v60, %v10380_v63  ;;  %v3533_v63 = vperm.slane %v14647_v21, 0 }
 0x129   : > { %2912 = vmatpush.bf16.msrb.mxu3 %v9759_v3  ;;  %2789 = vmatmul.bf16.gmra.mxu0 %v14610_v8  ;;  %v3534_v3 = vlaneseq  ;;  %v12687_v6 = vld [vmem:[#allocation4 + $0x424] sm:$0xf]  ;;  %v10548_v60 = vld [vmem:[#allocation4 + $0x888] sm:$0xf0]  ;;  %v12601_v58 = vld [vmem:[#allocation4 + $0x16c] sm:$0xf0] }
 0x12a   : > { %2808 = vmatmul.bf16.gmra.mxu1 %v14616_v13  ;;  %2856 = vmatpush.bf16.msrb.mxu0 %v10307_v18  ;;  %v12603_v18 = vld [vmem:[#allocation4 + $0x184] sm:$0xf]  ;;  %v9834_v49 = vld [vmem:[#allocation4 + $0x2d8] sm:$0xf]  ;;  %v12649_v57 = vld [vmem:[#allocation4 + $0x2ec] sm:$0xf0] }
 0x12b   : > { %2875 = vmatpush.bf16.msrb.mxu1 %v10499_v9  ;;  %2827 = vmatmul.bf16.gmra.mxu2 %v14622_v14  ;;  %v10234_v9 = vld [vmem:[#allocation4 + $0x600] sm:$0xf]  ;;  %v3535_v32 = vshrl.u32 %v3534_v3, 7  ;;  %v12735_v50 = vld [vmem:[#allocation4 + $0x5a4] sm:$0xf] }
 0x12c   : > { %2894 = vmatpush.bf16.msrb.mxu2 %v9543_v4  ;;  %2846 = vmatmul.bf16.gmra.mxu3 %v14628_v17  ;;  %v10451_v4 = vor.u32 %v12804_v39, %v10450_v36  ;;  %v17669_v36 = vunpack.c.l.bf16 %v14637_v7  ;;  %v10407_v39 = vor.u32 %v12789_v12, %v10404_v15  ;;  %v10235_v3 = vor.u32 %v12750_v10, %v10234_v9  ;;  %v9996_v12 = vld [vmem:[#allocation4 + $0x438] sm:$0xf0]  ;;  %v10218_v43 = vld [vmem:[#allocation4 + $0x5d8] sm:$0xf]  ;;  %v9620_v44 = vld [vmem:[#allocation4 + $0x140] sm:$0xf0] }
 0x12d   : > { %2913 = vmatpush.bf16.msrb.mxu3 %v9735_v19  ;;  %v12741_v19 = vld [vmem:[#allocation4 + $0x5d4] sm:$0xf]  ;;  %3587 = vadd.xlane.f32.xlu0 %v3586_v46  ;;  %v10599_v15 = vor.u32 %v12837_v45, %v10596_v59  ;;  %v10572_v10 = vld [vmem:[#allocation4 + $0x8b8] sm:$0xf0]  ;;  %v10164_v46 = vld [vmem:[#allocation4 + $0x588] sm:$0xf0] }
 0x12e   : > { %2857 = vmatpush.bf16.msrb.mxu0 %v10283_v40  ;;  %v10020_v40 = vld [vmem:[#allocation4 + $0x468] sm:$0xf0]  ;;  %13481 = vset.pattern.permute.xlu1 %v3535_v32  ;;  %v12825_v59 = vld [vmem:[#allocation4 + $0x874] sm:$0xf]  ;;  %v10010_v41 = vld [vmem:[#allocation4 + $0x430] sm:$0xf] }
 0x12f   : > { %2876 = vmatpush.bf16.msrb.mxu1 %v10475_v26  ;;  %v9660_v26 = vld [vmem:[#allocation4 + $0x198] sm:$0xf0]  ;;  %13480 = vset.pattern.permute.xlu0 %v3535_v32  ;;  %v10023_v5 = vor.u32 %v12693_v27, %v10020_v40  ;;  %v12681_v27 = vld [vmem:[#allocation4 + $0x3f4] sm:$0xf]  ;;  %v12796_v55 = vld [vmem:[#allocation4 + $0x78c] sm:$0xf] }
 0x130   : > { %2895 = vmatpush.bf16.msrb.mxu2 %v9519_v20  ;;  %v10212_v20 = vld [vmem:[#allocation4 + $0x5e8] sm:$0xf0]  ;;  %13482 = vset.pattern.permute.xlu2 %v3535_v32  ;;  %v12771_v32 = vld [vmem:[#allocation4 + $0x6c4] sm:$0xf]  ;;  %v12692_v51 = vld [vmem:[#allocation4 + $0x444] sm:$0xf0] }
 0x131   : > { %2914 = vmatpush.bf16.msrb.mxu3 %v9711_v52  ;;  %v17668_v52 = vunpack.c.h.bf16 %v14637_v7  ;;  %v9722_v38 = vld [vmem:[#allocation4 + $0x1f0] sm:$0xf]  ;;  %v12836_v29 = vld [vmem:[#allocation4 + $0x8c4] sm:$0xf0] }
 0x132   : > { %2858 = vmatpush.bf16.msrb.mxu0 %v10259_v16  ;;  %v14658_v16 = vpack.c.bf16 %v17670_v2, %v17669_v36  ;;  %v12807_v36 = vld [vmem:[#allocation4 + $0x7e4] sm:$0xf]  ;;  %v10394_v11 = vld [vmem:[#allocation4 + $0x730] sm:$0xf] }
 0x133   : > { %2877 = vmatpush.bf16.msrb.mxu1 %v10451_v4  ;;  %v9663_v4 = vor.u32 %v12603_v18, %v9660_v26  ;;  %v14664_v9 = vpack.c.bf16 %v17667_v47, %v17668_v52  ;;  %v12777_v18 = vld [vmem:[#allocation4 + $0x6f4] sm:$0xf]  ;;  %v10092_v52 = vld [vmem:[#allocation4 + $0x4f8] sm:$0xf0] }
 0x134   : > { %2896 = vmatpush.bf16.msrb.mxu2 %v9495_v53  ;;  %v10215_v53 = vor.u32 %v12741_v19, %v10212_v20  ;;  %v10188_v19 = vld [vmem:[#allocation4 + $0x5b8] sm:$0xf0]  ;;  %v12831_v20 = vld [vmem:[#allocation4 + $0x8a4] sm:$0xf]  ;;  %17826 = vst [vmem:[#allocation46_spill] sm:$0xff] %v14658_v16 }
 0x135   : > { %2915 = vmatpush.bf16.msrb.mxu3 %v9687_v22  ;;  %17827 = vst [vmem:[#allocation47_spill] sm:$0xff] %v14664_v9  ;;  %v10356_v22 = vld [vmem:[#allocation4 + $0x708] sm:$0xf0]  ;;  %v10191_v26 = vor.u32 %v12735_v50, %v10188_v19  ;;  %v10575_v40 = vor.u32 %v12831_v20, %v10572_v10  ;;  %v12819_v19 = vld [vmem:[#allocation4 + $0x844] sm:$0xf]  ;;  %v14674_v10 = vld [vmem:[%s17812_s18 + $0x40] sm:$0xff] }
 0x136   : > { %2859 = vmatpush.bf16.msrb.mxu0 %v10235_v3  ;;  %v10359_v45 = vor.u32 %v12777_v18, %v10356_v22  ;;  %v12675_v3 = vld [vmem:[#allocation4 + $0x3c4] sm:$0xf]  ;;  %v10524_v20 = vld [vmem:[#allocation4 + $0x858] sm:$0xf0]  ;;  %17828 = vst [vmem:[#allocation48_spill] sm:$0xff] %v14674_v10  ;;  %3538 = vperm.xlu1 %13481, %v3533_v63   ;;  %v17673_v47 = vunpack.c.h.bf16 %v14674_v10 }
 0x137   : > { %2878 = vmatpush.bf16.msrb.mxu1 %v10427_v35  ;;  %v9972_v35 = vld [vmem:[#allocation4 + $0x408] sm:$0xf0]  ;;  %v12765_v18 = vld [vmem:[#allocation4 + $0x694] sm:$0xf] }
 0x138   : > { %2897 = vmatpush.bf16.msrb.mxu2 %v9471_v23  ;;  %v9999_v23 = vor.u32 %v12687_v6, %v9996_v12  ;;  %v9975_v50 = vor.u32 %v12681_v27, %v9972_v35  ;;  %v10551_v6 = vor.u32 %v12825_v59, %v10548_v60  ;;  %v10308_v22 = vld [vmem:[#allocation4 + $0x6a8] sm:$0xf0]  ;;  %v12669_v35 = vld [vmem:[#allocation4 + $0x394] sm:$0xf] }
 0x139   : > { %2916 = vmatpush.bf16.msrb.mxu3 %v9663_v4  ;;  %2860 = vmatmul.bf16.vlgmr.msrb.gmra.mxu0 %v14658_v16  ;;  %v9948_v4 = vld [vmem:[#allocation4 + $0x3d8] sm:$0xf0]  ;;  %v10311_v59 = vor.u32 %v12765_v18, %v10308_v22  ;;  %v10116_v60 = vld [vmem:[#allocation4 + $0x528] sm:$0xf0]  ;;  %v12711_v22 = vld [vmem:[#allocation4 + $0x4e4] sm:$0xf] }
 0x13a   : > { %2928 = vmatpush.bf16.msra.mxu0 %v10023_v5  ;;  %2879 = vmatmul.bf16.vlgmr.msrb.gmra.mxu1 %v14664_v9  ;;  %v12723_v5 = vld [vmem:[#allocation4 + $0x544] sm:$0xf] }
 0x13b   : > { %2947 = vmatpush.bf16.msra.mxu1 %v10215_v53  ;;  %v10332_v53 = vld [vmem:[#allocation4 + $0x6d8] sm:$0xf0]  ;;  %2898 = vmatmul.bf16.vlgmr.msrb.gmra.mxu2 %v14554_v56 }
 0x13c   : > { %2966 = vmatpush.bf16.msra.mxu2 %v10407_v39  ;;  %v12729_v39 = vld [vmem:[#allocation4 + $0x574] sm:$0xf]  ;;  %2917 = vmatmul.bf16.vlgmr.msrb.gmra.mxu3 %v14560_v61  ;;  %v10335_v12 = vor.u32 %v12771_v32, %v10332_v53  ;;  %v10500_v53 = vld [vmem:[#allocation4 + $0x828] sm:$0xf0] }
 0x13d   : > { %2985 = vmatpush.bf16.msra.mxu3 %v10599_v15  ;;  %v10140_v15 = vld [vmem:[#allocation4 + $0x558] sm:$0xf0]  ;;  %v12813_v32 = vld [vmem:[#allocation4 + $0x814] sm:$0xf] }
 0x13e   : > { %2929 = vmatpush.bf16.msra.mxu0 %v9999_v23  ;;  %v14679_v23 = vld [vmem:[%s17812_s18 + $0x58] sm:$0xff]  ;;  %v10143_v27 = vor.u32 %v12723_v5, %v10140_v15  ;;  %v9900_v15 = vld [vmem:[#allocation4 + $0x378] sm:$0xf0] }
 0x13f   : > { %2948 = vmatpush.bf16.msra.mxu1 %v10191_v26  ;;  %17829 = vst [vmem:[#allocation49_spill] sm:$0xff] %v14679_v23  ;;  %v9951_v26 = vor.u32 %v12675_v3, %v9948_v4  ;;  %v17671_v63 = vunpack.c.l.bf16 %v14679_v23  ;;  %v10284_v3 = vld [vmem:[#allocation4 + $0x678] sm:$0xf0]  ;;  %v3540_v4 = vperm.slane %v14647_v21, 1 }
 0x140   : > { %2967 = vmatpush.bf16.msra.mxu2 %v10383_v0  ;;  %v10167_v0 = vor.u32 %v12729_v39, %v10164_v46  ;;  %v9924_v39 = vld [vmem:[#allocation4 + $0x3a8] sm:$0xf0]  ;;  %v17674_v46 = vunpack.c.l.bf16 %v14674_v10  ;;  %v12716_v10 = vld [vmem:[#allocation4 + $0x504] sm:$0xf0] }
 0x141   : > { %2986 = vmatpush.bf16.msra.mxu3 %v10575_v40  ;;  %v12717_v40 = vld [vmem:[#allocation4 + $0x514] sm:$0xf]  ;;  %v9927_v5 = vor.u32 %v12669_v35, %v9924_v39  ;;  %v10260_v39 = vld [vmem:[#allocation4 + $0x648] sm:$0xf0]  ;;  %3545 = vperm.xlu0 %13480, %v3540_v4   ;;  %v12747_v4 = vld [vmem:[#allocation4 + $0x604] sm:$0xf] }
 0x142   : > { %2930 = vmatpush.bf16.msra.mxu0 %v9975_v50  ;;  %v17672_v50 = vunpack.c.h.bf16 %v14679_v23  ;;  %v14691_v2 = vpack.c.bf16 %v17671_v63, %v17674_v46  ;;  %v12753_v35 = vld [vmem:[#allocation4 + $0x634] sm:$0xf]  ;;  %v9642_v46 = vld [vmem:[#allocation4 + $0x158] sm:$0xf]  ;;  %v12620_v23 = vld [vmem:[#allocation4 + $0x204] sm:$0xf0] }
 0x143   : > { %2949 = vmatpush.bf16.msra.mxu1 %v10167_v0  ;;  %v12759_v0 = vld [vmem:[#allocation4 + $0x664] sm:$0xf]  ;;  %v12801_v63 = vld [vmem:[#allocation4 + $0x7b4] sm:$0xf] }
 0x144   : > { %2968 = vmatpush.bf16.msra.mxu2 %v10359_v45  ;;  %v10527_v45 = vor.u32 %v12819_v19, %v10524_v20  ;;  %v3547_v19 = vperm.slane %v14647_v21, 2  ;;  %v10503_v20 = vor.u32 %v12813_v32, %v10500_v53  ;;  %v10287_v18 = vor.u32 %v12759_v0, %v10284_v3  ;;  %17830 = vst [vmem:[#allocation50_spill] sm:$0xff] %v14691_v2  ;;  %v12705_v0 = vld [vmem:[#allocation4 + $0x4b4] sm:$0xf]  ;;  %v10068_v3 = vld [vmem:[#allocation4 + $0x4c8] sm:$0xf0] }
 0x145   : > { %2987 = vmatpush.bf16.msra.mxu3 %v10551_v6  ;;  %v10119_v6 = vor.u32 %v12717_v40, %v10116_v60  ;;  %v9876_v60 = vld [vmem:[#allocation4 + $0x348] sm:$0xf0]  ;;  %v10263_v53 = vor.u32 %v12753_v35, %v10260_v39  ;;  %v12795_v35 = vld [vmem:[#allocation4 + $0x784] sm:$0xf]  ;;  %v10428_v39 = vld [vmem:[#allocation4 + $0x798] sm:$0xf0] }
 0x146   : > { %2931 = vmatpush.bf16.msra.mxu0 %v9951_v26  ;;  %v14697_v26 = vpack.c.bf16 %v17672_v50, %v17673_v47  ;;  %3552 = vperm.xlu1 %13481, %v3547_v19   ;;  %v10452_v50 = vld [vmem:[#allocation4 + $0x7c8] sm:$0xf0]  ;;  %v10236_v19 = vld [vmem:[#allocation4 + $0x618] sm:$0xf0] }
 0x147   : > { %2950 = vmatpush.bf16.msra.mxu1 %v10143_v27  ;;  %v10476_v27 = vld [vmem:[#allocation4 + $0x7f8] sm:$0xf0] }
 0x148   : > { %2969 = vmatpush.bf16.msra.mxu2 %v10335_v12  ;;  %v12663_v12 = vld [vmem:[#allocation4 + $0x364] sm:$0xf]  ;;  %17831 = vst [vmem:[#allocation51_spill] sm:$0xff] %v14697_v26  ;;  %v10479_v32 = vor.u32 %v12807_v36, %v10476_v27  ;;  %v10044_v27 = vld [vmem:[#allocation4 + $0x498] sm:$0xf0] }
 0x149   : > { %2988 = vmatpush.bf16.msra.mxu3 %v10527_v45  ;;  %v9903_v40 = vor.u32 %v12663_v12, %v9900_v15  ;;  %v10095_v45 = vor.u32 %v12711_v22, %v10092_v52  ;;  %2865 = vmatmul.bf16.gmra.mxu0 %v14691_v2  ;;  %v10026_v52 = vld [vmem:[#allocation4 + $0x458] sm:$0xf]  ;;  %v12651_v12 = vld [vmem:[#allocation4 + $0x304] sm:$0xf]  ;;  %v9852_v15 = vld [vmem:[#allocation4 + $0x318] sm:$0xf0]  ;;  %v10239_v22 = vor.u32 %v12747_v4, %v10236_v19 }
 0x14a   : > { %2932 = vmatpush.bf16.msra.mxu0 %v9927_v5  ;;  %2884 = vmatmul.bf16.gmra.mxu1 %v14697_v26  ;;  %v12697_v5 = vld [vmem:[#allocation4 + $0x46c] sm:$0xf0]  ;;  %v12595_v4 = vld [vmem:[#allocation4 + $0x13c] sm:$0xf0] }
 0x14b   : > { %2951 = vmatpush.bf16.msra.mxu1 %v10119_v6  ;;  %2903 = vmatmul.bf16.gmra.mxu2 %v14610_v8  ;;  %v10071_v6 = vor.u32 %v12705_v0, %v10068_v3  ;;  %v10027_v47 = vor.u32 %v12697_v5, %v10026_v52  ;;  %v12691_v0 = vld [vmem:[#allocation4 + $0x43c] sm:$0xf0]  ;;  %v9618_v3 = vld [vmem:[#allocation4 + $0x128] sm:$0xf] }
 0x14c   : > { %2970 = vmatpush.bf16.msra.mxu2 %v10311_v59  ;;  %v12657_v59 = vld [vmem:[#allocation4 + $0x334] sm:$0xf]  ;;  %2922 = vmatmul.bf16.gmra.mxu3 %v14616_v13  ;;  %v9810_v52 = vld [vmem:[#allocation4 + $0x2a8] sm:$0xf]  ;;  %v12643_v5 = vld [vmem:[#allocation4 + $0x2bc] sm:$0xf0] }
 0x14d   : > { %2989 = vmatpush.bf16.msra.mxu3 %v10503_v20  ;;  %v9879_v36 = vor.u32 %v12657_v59, %v9876_v60  ;;  %v12699_v20 = vld [vmem:[#allocation4 + $0x484] sm:$0xf]  ;;  %v10002_v60 = vld [vmem:[#allocation4 + $0x428] sm:$0xf] }
 0x14e   : > { %2933 = vmatpush.bf16.msra.mxu0 %v9903_v40  ;;  %v12745_v40 = vld [vmem:[#allocation4 + $0x5ec] sm:$0xf0]  ;;  %v10047_v59 = vor.u32 %v12699_v20, %v10044_v27  ;;  %v10003_v19 = vor.u32 %v12691_v0, %v10002_v60  ;;  %v10170_v27 = vld [vmem:[#allocation4 + $0x578] sm:$0xf] }
 0x14f   : > { %2952 = vmatpush.bf16.msra.mxu1 %v10095_v45  ;;  %v9855_v45 = vor.u32 %v12651_v12, %v9852_v15  ;;  %v12739_v12 = vld [vmem:[#allocation4 + $0x5bc] sm:$0xf0]  ;;  %v9978_v15 = vld [vmem:[#allocation4 + $0x3f8] sm:$0xf]  ;;  %v12685_v20 = vld [vmem:[#allocation4 + $0x40c] sm:$0xf0] }
 0x150   : > { %2971 = vmatpush.bf16.msra.mxu2 %v10287_v18  ;;  %v10455_v18 = vor.u32 %v12801_v63, %v10452_v50  ;;  %v10431_v63 = vor.u32 %v12795_v35, %v10428_v39  ;;  %v9643_v50 = vor.u32 %v12601_v58, %v9642_v46  ;;  %v9594_v58 = vld [vmem:[#allocation4 + $0xf8] sm:$0xf]  ;;  %v12637_v46 = vld [vmem:[#allocation4 + $0x28c] sm:$0xf0]  ;;  %v9954_v39 = vld [vmem:[#allocation4 + $0x3c8] sm:$0xf] }
 0x151   : > { %2990 = vmatpush.bf16.msra.mxu3 %v10479_v32  ;;  %v9835_v32 = vor.u32 %v12649_v57, %v9834_v49  ;;  %v9786_v57 = vld [vmem:[#allocation4 + $0x278] sm:$0xf]  ;;  %v12733_v35 = vld [vmem:[#allocation4 + $0x58c] sm:$0xf0] }
 0x152   : > { %2934 = vmatpush.bf16.msra.mxu0 %v9879_v36  ;;  %v9619_v36 = vor.u32 %v12595_v4, %v9618_v3  ;;  %v9787_v60 = vor.u32 %v12637_v46, %v9786_v57  ;;  %v10171_v0 = vor.u32 %v12733_v35, %v10170_v27  ;;  %v10146_v3 = vld [vmem:[#allocation4 + $0x548] sm:$0xf]  ;;  %v12727_v4 = vld [vmem:[#allocation4 + $0x55c] sm:$0xf0]  ;;  %v3554_v46 = vperm.slane %v14647_v21, 3 }
 0x153   : > { %2953 = vmatpush.bf16.msra.mxu1 %v10071_v6  ;;  %v10194_v6 = vld [vmem:[#allocation4 + $0x5a8] sm:$0xf]  ;;  %v12571_v27 = vld [vmem:[#allocation4 + $0x7c] sm:$0xf0]  ;;  %v12565_v21 = vld [vmem:[#allocation4 + $0x4c] sm:$0xf0] }
 0x154   : > { %2972 = vmatpush.bf16.msra.mxu2 %v10263_v53  ;;  %v10219_v53 = vor.u32 %v12745_v40, %v10218_v43  ;;  %v9811_v43 = vor.u32 %v12643_v5, %v9810_v52  ;;  %v10195_v49 = vor.u32 %v12739_v12, %v10194_v6  ;;  %v12679_v40 = vld [vmem:[#allocation4 + $0x3dc] sm:$0xf0]  ;;  %v12673_v52 = vld [vmem:[#allocation4 + $0x3ac] sm:$0xf0]  ;;  %v9546_v5 = vld [vmem:[#allocation4 + $0x98] sm:$0xf]  ;;  %v10147_v12 = vor.u32 %v12727_v4, %v10146_v3 }
 0x155   : > { %2991 = vmatpush.bf16.msra.mxu3 %v10455_v18  ;;  %v9979_v18 = vor.u32 %v12685_v20, %v9978_v15  ;;  %v9738_v15 = vld [vmem:[#allocation4 + $0x218] sm:$0xf]  ;;  %v12625_v20 = vld [vmem:[#allocation4 + $0x22c] sm:$0xf0]  ;;  %v9906_v57 = vld [vmem:[#allocation4 + $0x368] sm:$0xf]  ;;  %3559 = vperm.xlu2 %13482, %v3554_v46  }
 0x156   : > { %2935 = vmatpush.bf16.msra.mxu0 %v9855_v45  ;;  %v9570_v45 = vld [vmem:[#allocation4 + $0xc8] sm:$0xf]  ;;  %v9739_v35 = vor.u32 %v12625_v20, %v9738_v15  ;;  %v12655_v20 = vld [vmem:[#allocation4 + $0x31c] sm:$0xf0]  ;;  %v12793_v46 = vld [vmem:[#allocation4 + $0x76c] sm:$0xf0] }
 0x157   : > { %2954 = vmatpush.bf16.msra.mxu1 %v10047_v59  ;;  %v12583_v59 = vld [vmem:[#allocation4 + $0xdc] sm:$0xf0]  ;;  %v9858_v15 = vld [vmem:[#allocation4 + $0x308] sm:$0xf] }
 0x158   : > { %2973 = vmatpush.bf16.msra.mxu2 %v10239_v22 }
 0x159   : > { %2992 = vmatpush.bf16.msra.mxu3 %v10431_v63  ;;  %2936 = vmatmul.bf16.vlgmr.msra.gmra.mxu0 %v14566_v62  ;;  %v9762_v63 = vld [vmem:[#allocation4 + $0x248] sm:$0xf] }
 0x15a   : > { %3004 = vmatpush.bf16.msrb.mxu0 %v9643_v50  ;;  %2955 = vmatmul.bf16.vlgmr.msra.gmra.mxu1 %v14572_v1  ;;  %v12631_v50 = vld [vmem:[#allocation4 + $0x25c] sm:$0xf0] }
 0x15b   : > { %3023 = vmatpush.bf16.msrb.mxu1 %v9835_v32  ;;  %2974 = vmatmul.bf16.vlgmr.msra.gmra.mxu2 %v14658_v16  ;;  %v9955_v32 = vor.u32 %v12679_v40, %v9954_v39  ;;  %v9763_v6 = vor.u32 %v12631_v50, %v9762_v63  ;;  %v9714_v40 = vld [vmem:[#allocation4 + $0x1e8] sm:$0xf]  ;;  %v12715_v63 = vld [vmem:[#allocation4 + $0x4fc] sm:$0xf0]  ;;  %v9882_v50 = vld [vmem:[#allocation4 + $0x338] sm:$0xf] }
 0x15c   : > { %3042 = vmatpush.bf16.msrb.mxu2 %v10027_v47  ;;  %v12589_v47 = vld [vmem:[#allocation4 + $0x10c] sm:$0xf0]  ;;  %2993 = vmatmul.bf16.vlgmr.msra.gmra.mxu3 %v14664_v9 }
 0x15d   : > { %3061 = vmatpush.bf16.msrb.mxu3 %v10219_v53  ;;  %v9595_v22 = vor.u32 %v12589_v47, %v9594_v58  ;;  %v9571_v53 = vor.u32 %v12583_v59, %v9570_v45  ;;  %v10122_v58 = vld [vmem:[#allocation4 + $0x518] sm:$0xf]  ;;  %v12619_v45 = vld [vmem:[#allocation4 + $0x1fc] sm:$0xf0] }
 0x15e   : > { %3005 = vmatpush.bf16.msrb.mxu0 %v9619_v36  ;;  %v12577_v36 = vld [vmem:[#allocation4 + $0xac] sm:$0xf0]  ;;  %v9715_v3 = vor.u32 %v12619_v45, %v9714_v40  ;;  %v9859_v40 = vor.u32 %v12655_v20, %v9858_v15  ;;  %v12835_v20 = vld [vmem:[#allocation4 + $0x8bc] sm:$0xf0] }
 0x15f   : > { %3024 = vmatpush.bf16.msrb.mxu1 %v9811_v43  ;;  %v9547_v43 = vor.u32 %v12577_v36, %v9546_v5  ;;  %v10074_v5 = vld [vmem:[#allocation4 + $0x4b8] sm:$0xf] }
 0x160   : > { %3043 = vmatpush.bf16.msrb.mxu2 %v10003_v19  ;;  %v9930_v19 = vld [vmem:[#allocation4 + $0x398] sm:$0xf] }
 0x161   : > { %3062 = vmatpush.bf16.msrb.mxu3 %v10195_v49  ;;  %v9931_v47 = vor.u32 %v12673_v52, %v9930_v19  ;;  %v12721_v49 = vld [vmem:[#allocation4 + $0x52c] sm:$0xf0]  ;;  %v9690_v19 = vld [vmem:[#allocation4 + $0x1b8] sm:$0xf] }
 0x162   : > { %3006 = vmatpush.bf16.msrb.mxu0 %v9595_v22  ;;  %v9522_v22 = vld [vmem:[#allocation4 + $0x68] sm:$0xf]  ;;  %v10123_v39 = vor.u32 %v12721_v49, %v10122_v58  ;;  %v12613_v52 = vld [vmem:[#allocation4 + $0x1cc] sm:$0xf0]  ;;  %v9644_v49 = vld [vmem:[#allocation4 + $0x170] sm:$0xf0] }
 0x163   : > { %3025 = vmatpush.bf16.msrb.mxu1 %v9787_v60  ;;  %v9523_v60 = vor.u32 %v12571_v27, %v9522_v22  ;;  %v9474_v58 = vld [vmem:[#allocation4 + $0x8] sm:$0xf] }
 0x164   : > { %3044 = vmatpush.bf16.msrb.mxu2 %v9979_v18  ;;  %v12667_v18 = vld [vmem:[#allocation4 + $0x37c] sm:$0xf0]  ;;  %v9666_v27 = vld [vmem:[#allocation4 + $0x188] sm:$0xf] }
 0x165   : > { %3063 = vmatpush.bf16.msrb.mxu3 %v10171_v0  ;;  %v9907_v59 = vor.u32 %v12667_v18, %v9906_v57  ;;  %v10098_v0 = vld [vmem:[#allocation4 + $0x4e8] sm:$0xf]  ;;  %v10410_v57 = vld [vmem:[#allocation4 + $0x758] sm:$0xf]  ;;  %v9691_v18 = vor.u32 %v12613_v52, %v9690_v19 }
 0x166   : > { %3007 = vmatpush.bf16.msrb.mxu0 %v9571_v53  ;;  %v9498_v53 = vld [vmem:[#allocation4 + $0x38] sm:$0xf]  ;;  %v10099_v4 = vor.u32 %v12715_v63, %v10098_v0  ;;  %v12841_v0 = vld [vmem:[#allocation4 + $0x8ec] sm:$0xf0] }
 0x167   : > { %3026 = vmatpush.bf16.msrb.mxu1 %v9763_v6  ;;  %v9499_v6 = vor.u32 %v12565_v21, %v9498_v53  ;;  %v9836_v53 = vld [vmem:[#allocation4 + $0x2f0] sm:$0xf0]  ;;  %v12592_v21 = vld [vmem:[#allocation4 + $0x12c] sm:$0xf] }
 0x168   : > { %3045 = vmatpush.bf16.msrb.mxu2 %v9955_v32  ;;  %v12661_v32 = vld [vmem:[#allocation4 + $0x34c] sm:$0xf0] }
 0x169   : > { %3064 = vmatpush.bf16.msrb.mxu3 %v10147_v12  ;;  %v9883_v36 = vor.u32 %v12661_v32, %v9882_v50  ;;  %v12709_v12 = vld [vmem:[#allocation4 + $0x4cc] sm:$0xf0]  ;;  %2941 = vmatmul.bf16.gmra.mxu0 %v14622_v14  ;;  %v10411_v50 = vor.u32 %v12793_v46, %v10410_v57  ;;  %v12646_v32 = vld [vmem:[#allocation4 + $0x2dc] sm:$0xf] }
 0x16a   : > { %3008 = vmatpush.bf16.msrb.mxu0 %v9547_v43  ;;  %2960 = vmatmul.bf16.gmra.mxu1 %v14628_v17  ;;  %v12598_v43 = vld [vmem:[#allocation4 + $0x15c] sm:$0xf]  ;;  %v10075_v22 = vor.u32 %v12709_v12, %v10074_v5  ;;  %v9623_v12 = vor.u32 %v12592_v21, %v9620_v44  ;;  %v9788_v44 = vld [vmem:[#allocation4 + $0x290] sm:$0xf0]  ;;  %v12823_v21 = vld [vmem:[#allocation4 + $0x85c] sm:$0xf0] }
 0x16b   : > { %3027 = vmatpush.bf16.msrb.mxu1 %v9739_v35  ;;  %2979 = vmatmul.bf16.gmra.mxu2 %v14691_v2  ;;  %v12607_v35 = vld [vmem:[#allocation4 + $0x19c] sm:$0xf0]  ;;  %v9647_v63 = vor.u32 %v12598_v43, %v9644_v49  ;;  %v12586_v43 = vld [vmem:[#allocation4 + $0xfc] sm:$0xf]  ;;  %v9596_v49 = vld [vmem:[#allocation4 + $0x110] sm:$0xf0] }
 0x16c   : > { %3046 = vmatpush.bf16.msrb.mxu2 %v9931_v47  ;;  %v12559_v47 = vld [vmem:[#allocation4 + $0x1c] sm:$0xf0]  ;;  %2998 = vmatmul.bf16.gmra.mxu3 %v14697_v26  ;;  %v9667_v19 = vor.u32 %v12607_v35, %v9666_v27  ;;  %v10554_v27 = vld [vmem:[#allocation4 + $0x878] sm:$0xf]  ;;  %v12829_v35 = vld [vmem:[#allocation4 + $0x88c] sm:$0xf0] }
 0x16d   : > { %3065 = vmatpush.bf16.msrb.mxu3 %v10123_v39  ;;  %v10050_v39 = vld [vmem:[#allocation4 + $0x488] sm:$0xf]  ;;  %v9475_v45 = vor.u32 %v12559_v47, %v9474_v58  ;;  %v12640_v58 = vld [vmem:[#allocation4 + $0x2ac] sm:$0xf]  ;;  %v9812_v47 = vld [vmem:[#allocation4 + $0x2c0] sm:$0xf0] }
 0x16e   : > { %3009 = vmatpush.bf16.msrb.mxu0 %v9523_v60  ;;  %v10602_v60 = vld [vmem:[#allocation4 + $0x8d8] sm:$0xf]  ;;  %v9815_v46 = vor.u32 %v12640_v58, %v9812_v47  ;;  %v12817_v47 = vld [vmem:[#allocation4 + $0x82c] sm:$0xf0] }
 0x16f   : > { %3028 = vmatpush.bf16.msrb.mxu1 %v9715_v3  ;;  %v10386_v3 = vld [vmem:[#allocation4 + $0x728] sm:$0xf]  ;;  %v10603_v5 = vor.u32 %v12841_v0, %v10602_v60  ;;  %v9572_v60 = vld [vmem:[#allocation4 + $0xe0] sm:$0xf0]  ;;  %v10555_v0 = vor.u32 %v12829_v35, %v10554_v27  ;;  %v10506_v58 = vld [vmem:[#allocation4 + $0x818] sm:$0xf] }
 0x170   : > { %3047 = vmatpush.bf16.msrb.mxu2 %v9907_v59  ;;  %v12703_v59 = vld [vmem:[#allocation4 + $0x49c] sm:$0xf0]  ;;  %v10507_v27 = vor.u32 %v12817_v47, %v10506_v58  ;;  %v10242_v58 = vld [vmem:[#allocation4 + $0x608] sm:$0xf] }
 0x171   : > { %3066 = vmatpush.bf16.msrb.mxu3 %v10099_v4  ;;  %v12787_v4 = vld [vmem:[#allocation4 + $0x73c] sm:$0xf0]  ;;  %v10051_v52 = vor.u32 %v12703_v59, %v10050_v39  ;;  %v12634_v39 = vld [vmem:[#allocation4 + $0x27c] sm:$0xf]  ;;  %v12580_v59 = vld [vmem:[#allocation4 + $0xcc] sm:$0xf] }
 0x172   : > { %3010 = vmatpush.bf16.msrb.mxu0 %v9499_v6  ;;  %v10578_v6 = vld [vmem:[#allocation4 + $0x8a8] sm:$0xf]  ;;  %v10387_v15 = vor.u32 %v12787_v4, %v10386_v3  ;;  %v12628_v3 = vld [vmem:[#allocation4 + $0x24c] sm:$0xf]  ;;  %v9764_v4 = vld [vmem:[#allocation4 + $0x260] sm:$0xf0] }
 0x173   : > { %3029 = vmatpush.bf16.msrb.mxu1 %v9691_v18  ;;  %v10579_v57 = vor.u32 %v12835_v20, %v10578_v6  ;;  %v10362_v18 = vld [vmem:[#allocation4 + $0x6f8] sm:$0xf]  ;;  %v12769_v20 = vld [vmem:[#allocation4 + $0x6ac] sm:$0xf0]  ;;  %v12751_v47 = vld [vmem:[#allocation4 + $0x61c] sm:$0xf0] }
 0x174   : > { %3048 = vmatpush.bf16.msrb.mxu2 %v9883_v36  ;;  %v9839_v36 = vor.u32 %v12646_v32, %v9836_v53  ;;  %v12775_v32 = vld [vmem:[#allocation4 + $0x6dc] sm:$0xf0]  ;;  %v10530_v53 = vld [vmem:[#allocation4 + $0x848] sm:$0xf] }
 0x175   : > { %3067 = vmatpush.bf16.msrb.mxu3 %v10075_v22  ;;  %v12781_v22 = vld [vmem:[#allocation4 + $0x70c] sm:$0xf0]  ;;  %v10531_v6 = vor.u32 %v12823_v21, %v10530_v53 }
 0x176   : > { %3011 = vmatpush.bf16.msrb.mxu0 %v9475_v45  ;;  %v10363_v45 = vor.u32 %v12781_v22, %v10362_v18  ;;  %v12568_v18 = vld [vmem:[#allocation4 + $0x6c] sm:$0xf]  ;;  %v9524_v22 = vld [vmem:[#allocation4 + $0x80] sm:$0xf0] }
 0x177   : > { %3030 = vmatpush.bf16.msrb.mxu1 %v9667_v19  ;;  %v9575_v19 = vor.u32 %v12580_v59, %v9572_v60  ;;  %v12616_v59 = vld [vmem:[#allocation4 + $0x1ec] sm:$0xf]  ;;  %v9716_v60 = vld [vmem:[#allocation4 + $0x200] sm:$0xf0] }
 0x178   : > { %3049 = vmatpush.bf16.msrb.mxu2 %v9859_v40  ;;  %v9599_v40 = vor.u32 %v12586_v43, %v9596_v49  ;;  %v12622_v43 = vld [vmem:[#allocation4 + $0x21c] sm:$0xf]  ;;  %v9740_v49 = vld [vmem:[#allocation4 + $0x230] sm:$0xf0]  ;;  %v9719_v21 = vor.u32 %v12616_v59, %v9716_v60  ;;  %v10243_v59 = vor.u32 %v12751_v47, %v10242_v58  ;;  %v10580_v58 = vld [vmem:[#allocation4 + $0x8c0] sm:$0xf0] }
 0x179   : > { %3068 = vmatpush.bf16.msrb.mxu3 %v10051_v52  ;;  %3012 = vmatmul.bf16.vlgmr.msrb.gmra.mxu0 %v14554_v56  ;;  %v9743_v35 = vor.u32 %v12622_v43, %v9740_v49  ;;  %v10220_v60 = vld [vmem:[#allocation4 + $0x5f0] sm:$0xf0] }
 0x17a   : > { %3080 = vmatpush.bf16.msra.mxu0 %v10411_v50  ;;  %v10338_v50 = vld [vmem:[#allocation4 + $0x6c8] sm:$0xf]  ;;  %3031 = vmatmul.bf16.vlgmr.msrb.gmra.mxu1 %v14560_v61 }
 0x17b   : > { %3099 = vmatpush.bf16.msra.mxu1 %v10603_v5  ;;  %3050 = vmatmul.bf16.vlgmr.msrb.gmra.mxu2 %v14566_v62  ;;  %v10339_v52 = vor.u32 %v12775_v32, %v10338_v50  ;;  %v12574_v5 = vld [vmem:[#allocation4 + $0x9c] sm:$0xf]  ;;  %v9500_v32 = vld [vmem:[#allocation4 + $0x50] sm:$0xf0] }
 0x17c   : > { %3118 = vmatpush.bf16.msra.mxu2 %v9647_v63  ;;  %v9791_v63 = vor.u32 %v12634_v39, %v9788_v44  ;;  %3069 = vmatmul.bf16.vlgmr.msrb.gmra.mxu3 %v14572_v1  ;;  %v10290_v39 = vld [vmem:[#allocation4 + $0x668] sm:$0xf]  ;;  %v12763_v44 = vld [vmem:[#allocation4 + $0x67c] sm:$0xf0]  ;;  %v12562_v50 = vld [vmem:[#allocation4 + $0x3c] sm:$0xf] }
 0x17d   : > { %3137 = vmatpush.bf16.msra.mxu3 %v9839_v36  ;;  %v9548_v36 = vld [vmem:[#allocation4 + $0xb0] sm:$0xf0] }
 0x17e   : > { %3081 = vmatpush.bf16.msra.mxu0 %v10387_v15  ;;  %v10314_v15 = vld [vmem:[#allocation4 + $0x698] sm:$0xf] }
 0x17f   : > { %3100 = vmatpush.bf16.msra.mxu1 %v10579_v57  ;;  %v9551_v57 = vor.u32 %v12574_v5, %v9548_v36  ;;  %v12610_v5 = vld [vmem:[#allocation4 + $0x1bc] sm:$0xf]  ;;  %v9692_v36 = vld [vmem:[#allocation4 + $0x1d0] sm:$0xf0] }
 0x180   : > { %3119 = vmatpush.bf16.msra.mxu2 %v9623_v12  ;;  %v9767_v12 = vor.u32 %v12628_v3, %v9764_v4  ;;  %v10266_v3 = vld [vmem:[#allocation4 + $0x638] sm:$0xf]  ;;  %v12757_v4 = vld [vmem:[#allocation4 + $0x64c] sm:$0xf0]  ;;  %v9695_v49 = vor.u32 %v12610_v5, %v9692_v36  ;;  %v12688_v36 = vld [vmem:[#allocation4 + $0x42c] sm:$0xf] }
 0x181   : > { %3138 = vmatpush.bf16.msra.mxu3 %v9815_v46  ;;  %v10315_v46 = vor.u32 %v12769_v20, %v10314_v15  ;;  %v10267_v15 = vor.u32 %v12757_v4, %v10266_v3  ;;  %v9476_v20 = vld [vmem:[#allocation4 + $0x20] sm:$0xf0]  ;;  %v12784_v4 = vld [vmem:[#allocation4 + $0x72c] sm:$0xf] }
 0x182   : > { %3082 = vmatpush.bf16.msra.mxu0 %v10363_v45  ;;  %v12811_v45 = vld [vmem:[#allocation4 + $0x7fc] sm:$0xf0] }
 0x183   : > { %3101 = vmatpush.bf16.msra.mxu1 %v10555_v0  ;;  %v9527_v0 = vor.u32 %v12568_v18, %v9524_v22  ;;  %v12604_v18 = vld [vmem:[#allocation4 + $0x18c] sm:$0xf]  ;;  %v9668_v22 = vld [vmem:[#allocation4 + $0x1a0] sm:$0xf0] }
 0x184   : > { %3120 = vmatpush.bf16.msra.mxu2 %v9599_v40  ;;  %v10482_v40 = vld [vmem:[#allocation4 + $0x7e8] sm:$0xf] }
 0x185   : > { %3139 = vmatpush.bf16.msra.mxu3 %v9791_v63  ;;  %v10291_v63 = vor.u32 %v12763_v44, %v10290_v39  ;;  %v10483_v53 = vor.u32 %v12811_v45, %v10482_v40  ;;  %v12694_v39 = vld [vmem:[#allocation4 + $0x45c] sm:$0xf]  ;;  %v10028_v44 = vld [vmem:[#allocation4 + $0x470] sm:$0xf0] }
 0x186   : > { %3083 = vmatpush.bf16.msra.mxu0 %v10339_v52  ;;  %v12805_v52 = vld [vmem:[#allocation4 + $0x7cc] sm:$0xf0]  ;;  %v12742_v40 = vld [vmem:[#allocation4 + $0x5dc] sm:$0xf]  ;;  %v10031_v3 = vor.u32 %v12694_v39, %v10028_v44 }
 0x187   : > { %3102 = vmatpush.bf16.msra.mxu1 %v10531_v6  ;;  %v12556_v6 = vld [vmem:[#allocation4 + $0xc] sm:$0xf]  ;;  %v12730_v39 = vld [vmem:[#allocation4 + $0x57c] sm:$0xf] }
 0x188   : > { %3121 = vmatpush.bf16.msra.mxu2 %v9575_v19  ;;  %v10458_v19 = vld [vmem:[#allocation4 + $0x7b8] sm:$0xf]  ;;  %v9479_v45 = vor.u32 %v12556_v6, %v9476_v20  ;;  %v10196_v6 = vld [vmem:[#allocation4 + $0x5c0] sm:$0xf0]  ;;  %v12832_v20 = vld [vmem:[#allocation4 + $0x8ac] sm:$0xf] }
 0x189   : > { %3140 = vmatpush.bf16.msra.mxu3 %v9767_v12  ;;  %v9503_v12 = vor.u32 %v12562_v50, %v9500_v32  ;;  %v10459_v43 = vor.u32 %v12805_v52, %v10458_v19  ;;  %3017 = vmatmul.bf16.gmra.mxu0 %v14610_v8  ;;  %v9671_v32 = vor.u32 %v12604_v18, %v9668_v22  ;;  %v10388_v19 = vld [vmem:[#allocation4 + $0x740] sm:$0xf0]  ;;  %v12778_v18 = vld [vmem:[#allocation4 + $0x6fc] sm:$0xf]  ;;  %v10364_v22 = vld [vmem:[#allocation4 + $0x710] sm:$0xf0] }
 0x18a   : > { %3084 = vmatpush.bf16.msra.mxu0 %v10315_v46  ;;  %v12799_v46 = vld [vmem:[#allocation4 + $0x79c] sm:$0xf0]  ;;  %3036 = vmatmul.bf16.gmra.mxu1 %v14616_v13  ;;  %v10223_v52 = vor.u32 %v12742_v40, %v10220_v60  ;;  %v10391_v47 = vor.u32 %v12784_v4, %v10388_v19  ;;  %v10172_v40 = vld [vmem:[#allocation4 + $0x590] sm:$0xf0] }
 0x18b   : > { %3103 = vmatpush.bf16.msra.mxu1 %v10507_v27  ;;  %v12790_v27 = vld [vmem:[#allocation4 + $0x75c] sm:$0xf]  ;;  %3055 = vmatmul.bf16.gmra.mxu2 %v14622_v14  ;;  %v10175_v4 = vor.u32 %v12730_v39, %v10172_v40 }
 0x18c   : > { %3122 = vmatpush.bf16.msra.mxu2 %v9551_v57  ;;  %v10434_v57 = vld [vmem:[#allocation4 + $0x788] sm:$0xf]  ;;  %3074 = vmatmul.bf16.gmra.mxu3 %v14628_v17 }
 0x18d   : > { %3141 = vmatpush.bf16.msra.mxu3 %v9743_v35  ;;  %v10412_v35 = vld [vmem:[#allocation4 + $0x770] sm:$0xf0]  ;;  %v10435_v50 = vor.u32 %v12799_v46, %v10434_v57  ;;  %v10583_v46 = vor.u32 %v12832_v20, %v10580_v58 }
 0x18e   : > { %3085 = vmatpush.bf16.msra.mxu0 %v10291_v63  ;;  %v10604_v63 = vld [vmem:[#allocation4 + $0x8f0] sm:$0xf0] }
 0x18f   : > { %3104 = vmatpush.bf16.msra.mxu1 %v10483_v53  ;;  %v14720_v53 = vld [vmem:[#allocation7] sm:$0x3f] }
 0x190   : > { %3123 = vmatpush.bf16.msra.mxu2 %v9527_v0  ;;  %v12838_v0 = vld [vmem:[#allocation4 + $0x8dc] sm:$0xf] }
 0x191   : > { %3142 = vmatpush.bf16.msra.mxu3 %v9719_v21  ;;  %v10415_v21 = vor.u32 %v12790_v27, %v10412_v35  ;;  %v10607_v5 = vor.u32 %v12838_v0, %v10604_v63  ;;  %v12682_v27 = vld [vmem:[#allocation4 + $0x3fc] sm:$0xf]  ;;  %v9980_v35 = vld [vmem:[#allocation4 + $0x410] sm:$0xf0]  ;;  %v10367_v63 = vor.u32 %v12778_v18, %v10364_v22 }
 0x192   : > { %3086 = vmatpush.bf16.msra.mxu0 %v10267_v15  ;;  %v12736_v15 = vld [vmem:[#allocation4 + $0x5ac] sm:$0xf]  ;;  %v12670_v22 = vld [vmem:[#allocation4 + $0x39c] sm:$0xf] }
 0x193   : > { %3105 = vmatpush.bf16.msra.mxu1 %v10459_v43  ;;  %v10199_v57 = vor.u32 %v12736_v15, %v10196_v6  ;;  %v12820_v15 = vld [vmem:[#allocation4 + $0x84c] sm:$0xf]  ;;  %v10532_v6 = vld [vmem:[#allocation4 + $0x860] sm:$0xf0] }
 0x194   : > { %3124 = vmatpush.bf16.msra.mxu2 %v9503_v12  ;;  %v10004_v12 = vld [vmem:[#allocation4 + $0x440] sm:$0xf0]  ;;  %v10535_v18 = vor.u32 %v12820_v15, %v10532_v6  ;;  %v12712_v15 = vld [vmem:[#allocation4 + $0x4ec] sm:$0xf] }
 0x195   : > { %3143 = vmatpush.bf16.msra.mxu3 %v9695_v49  ;;  %v10007_v43 = vor.u32 %v12688_v36, %v10004_v12  ;;  %v14723_v49 = vperm.slane %v14720_v53, 0  ;;  %v12724_v36 = vld [vmem:[#allocation4 + $0x54c] sm:$0xf]  ;;  %v10148_v12 = vld [vmem:[#allocation4 + $0x560] sm:$0xf0] }
 0x196   : > { %3087 = vmatpush.bf16.msra.mxu0 %v10243_v59  ;;  %v2785_v44 = vpop.f32.mrf.mxu0  ;;  %v10556_v59 = vld [vmem:[#allocation4 + $0x890] sm:$0xf0]  ;;  %v10100_v6 = vld [vmem:[#allocation4 + $0x500] sm:$0xf0] }
 0x197   : > { %3106 = vmatpush.bf16.msra.mxu1 %v10435_v50  ;;  %v2786_v60 = vadd.f32 %v2785_v44, %v14723_v49  ;;  %v2804_v0 = vpop.f32.mrf.mxu1  ;;  %v9983_v50 = vor.u32 %v12682_v27, %v9980_v35  ;;  %v9932_v27 = vld [vmem:[#allocation4 + $0x3b0] sm:$0xf0]  ;;  %v12718_v35 = vld [vmem:[#allocation4 + $0x51c] sm:$0xf] }
 0x198   : > { %3125 = vmatpush.bf16.msra.mxu2 %v9479_v45  ;;  %v12826_v45 = vld [vmem:[#allocation4 + $0x87c] sm:$0xf] }
 0x199   : > { %3144 = vmatpush.bf16.msra.mxu3 %v9671_v32  ;;  %v12772_v32 = vld [vmem:[#allocation4 + $0x6cc] sm:$0xf]  ;;  %v10559_v19 = vor.u32 %v12826_v45, %v10556_v59  ;;  %3088 = vmatmul.bf16.vlgmr.msra.gmra.mxu0 %v14658_v16  ;;  %v10124_v45 = vld [vmem:[#allocation4 + $0x530] sm:$0xf0]  ;;  %v12814_v59 = vld [vmem:[#allocation4 + $0x81c] sm:$0xf] }
 0x19a   : > { %3156 = vmatpush.bf16.msrb.mxu0 %v10031_v3  ;;  %v2805_v3 = vadd.f32 %v2804_v0, %v2786_v60  ;;  %3107 = vmatmul.bf16.vlgmr.msra.gmra.mxu1 %v14664_v9  ;;  %v10508_v60 = vld [vmem:[#allocation4 + $0x830] sm:$0xf0] }
 0x19b   : > { %3175 = vmatpush.bf16.msrb.mxu1 %v10223_v52  ;;  %v12676_v52 = vld [vmem:[#allocation4 + $0x3cc] sm:$0xf]  ;;  %3126 = vmatmul.bf16.vlgmr.msra.gmra.mxu2 %v14554_v56 }
 0x19c   : > { %3194 = vmatpush.bf16.msrb.mxu2 %v10415_v21  ;;  %v10340_v21 = vld [vmem:[#allocation4 + $0x6e0] sm:$0xf0]  ;;  %3145 = vmatmul.bf16.vlgmr.msra.gmra.mxu3 %v14560_v61 }
 0x19d   : > { %3213 = vmatpush.bf16.msrb.mxu3 %v10607_v5  ;;  %v9956_v5 = vld [vmem:[#allocation4 + $0x3e0] sm:$0xf0]  ;;  %v10343_v20 = vor.u32 %v12772_v32, %v10340_v21  ;;  %v9935_v21 = vor.u32 %v12670_v22, %v9932_v27  ;;  %v10103_v22 = vor.u32 %v12712_v15, %v10100_v6  ;;  %v9884_v27 = vld [vmem:[#allocation4 + $0x350] sm:$0xf0] }
 0x19e   : > { %3157 = vmatpush.bf16.msrb.mxu0 %v10007_v43  ;;  %v9959_v58 = vor.u32 %v12676_v52, %v9956_v5  ;;  %v10316_v43 = vld [vmem:[#allocation4 + $0x6b0] sm:$0xf0]  ;;  %v2787_v40 = vpop.f32.mrf.mxu0  ;;  %v10511_v5 = vor.u32 %v12814_v59, %v10508_v60  ;;  %v9860_v15 = vld [vmem:[#allocation4 + $0x320] sm:$0xf0] }
 0x19f   : > { %3176 = vmatpush.bf16.msrb.mxu1 %v10199_v57  ;;  %v2823_v57 = vpop.f32.mrf.mxu2  ;;  %v2842_v44 = vpop.f32.mrf.mxu3  ;;  %v2788_v0 = vadd.f32 %v2787_v40, %v14723_v49  ;;  %v10484_v40 = vld [vmem:[#allocation4 + $0x800] sm:$0xf0]  ;;  %v10076_v60 = vld [vmem:[#allocation4 + $0x4d0] sm:$0xf0] }
 0x1a0   : > { %3195 = vmatpush.bf16.msrb.mxu2 %v10391_v47  ;;  %v12766_v47 = vld [vmem:[#allocation4 + $0x69c] sm:$0xf]  ;;  %v2824_v39 = vadd.f32 %v2823_v57, %v2805_v3  ;;  %v10127_v3 = vor.u32 %v12718_v35, %v10124_v45  ;;  %v12808_v57 = vld [vmem:[#allocation4 + $0x7ec] sm:$0xf] }
 0x1a1   : > { %3214 = vmatpush.bf16.msrb.mxu3 %v10583_v46  ;;  %v10151_v46 = vor.u32 %v12724_v36, %v10148_v12  ;;  %v10319_v32 = vor.u32 %v12766_v47, %v10316_v43  ;;  %v12664_v36 = vld [vmem:[#allocation4 + $0x36c] sm:$0xf]  ;;  %v9908_v12 = vld [vmem:[#allocation4 + $0x380] sm:$0xf0]  ;;  %v10268_v47 = vld [vmem:[#allocation4 + $0x650] sm:$0xf0] }
 0x1a2   : > { %3158 = vmatpush.bf16.msrb.mxu0 %v9983_v50  ;;  %v14731_v50 = vadd.f32 %v2842_v44, %v2824_v39  ;;  %v12706_v35 = vld [vmem:[#allocation4 + $0x4bc] sm:$0xf] }
 0x1a3   : > { %3177 = vmatpush.bf16.msrb.mxu1 %v10175_v4  ;;  %v12760_v4 = vld [vmem:[#allocation4 + $0x66c] sm:$0xf] }
 0x1a4   : > { %3196 = vmatpush.bf16.msrb.mxu2 %v10367_v63  ;;  %v2806_v63 = vpop.f32.mrf.mxu1 }
 0x1a5   : > { %3215 = vmatpush.bf16.msrb.mxu3 %v10559_v19  ;;  %v10292_v19 = vld [vmem:[#allocation4 + $0x680] sm:$0xf0]  ;;  %v2807_v52 = vadd.f32 %v2806_v63, %v2788_v0  ;;  %v12802_v0 = vld [vmem:[#allocation4 + $0x7bc] sm:$0xf]  ;;  %v10460_v63 = vld [vmem:[#allocation4 + $0x7d0] sm:$0xf0] }
 0x1a6   : > { %3159 = vmatpush.bf16.msrb.mxu0 %v9959_v58  ;;  %v10295_v39 = vor.u32 %v12760_v4, %v10292_v19  ;;  %v12754_v58 = vld [vmem:[#allocation4 + $0x63c] sm:$0xf]  ;;  %v2790_v59 = vpop.f32.mrf.mxu0  ;;  %v12748_v4 = vld [vmem:[#allocation4 + $0x60c] sm:$0xf] }
 0x1a7   : > { %3178 = vmatpush.bf16.msrb.mxu1 %v10151_v46  ;;  %v2825_v43 = vpop.f32.mrf.mxu2  ;;  %v10487_v46 = vor.u32 %v12808_v57, %v10484_v40  ;;  %v2844_v45 = vpop.f32.mrf.mxu3  ;;  %v10463_v57 = vor.u32 %v12802_v0, %v10460_v63  ;;  %v12700_v40 = vld [vmem:[#allocation4 + $0x48c] sm:$0xf] }
 0x1a8   : > { %3197 = vmatpush.bf16.msrb.mxu2 %v10343_v20  ;;  %v9911_v20 = vor.u32 %v12664_v36, %v9908_v12  ;;  %v2826_v44 = vadd.f32 %v2825_v43, %v2807_v52  ;;  %v10244_v36 = vld [vmem:[#allocation4 + $0x620] sm:$0xf0]  ;;  %v12652_v12 = vld [vmem:[#allocation4 + $0x30c] sm:$0xf]  ;;  %v10079_v52 = vor.u32 %v12706_v35, %v10076_v60  ;;  %v10226_v35 = vld [vmem:[#allocation4 + $0x5e0] sm:$0xf] }
 0x1a9   : > { %3216 = vmatpush.bf16.msrb.mxu3 %v10535_v18  ;;  %v12658_v18 = vld [vmem:[#allocation4 + $0x33c] sm:$0xf]  ;;  %v10052_v43 = vld [vmem:[#allocation4 + $0x4a0] sm:$0xf0]  ;;  %3093 = vmatmul.bf16.gmra.mxu0 %v14691_v2 }
 0x1aa   : > { %3160 = vmatpush.bf16.msrb.mxu0 %v9935_v21  ;;  %v14734_v19 = vadd.f32 %v2844_v45, %v2826_v44  ;;  %3112 = vmatmul.bf16.gmra.mxu1 %v14697_v26  ;;  %v10436_v44 = vld [vmem:[#allocation4 + $0x7a0] sm:$0xf0]  ;;  %v12746_v45 = vld [vmem:[#allocation4 + $0x5f4] sm:$0xf0]  ;;  %v10055_v60 = vor.u32 %v12700_v40, %v10052_v43 }
 0x1ab   : > { %3179 = vmatpush.bf16.msrb.mxu1 %v10127_v3  ;;  %v10271_v3 = vor.u32 %v12754_v58, %v10268_v47  ;;  %3131 = vmatmul.bf16.gmra.mxu2 %v14610_v8  ;;  %v9650_v58 = vld [vmem:[#allocation4 + $0x160] sm:$0xf]  ;;  %v12602_v47 = vld [vmem:[#allocation4 + $0x174] sm:$0xf0]  ;;  %v10439_v0 = vor.u32 %v12796_v55, %v10436_v44  ;;  %v12644_v55 = vld [vmem:[#allocation4 + $0x2c4] sm:$0xf0] }
 0x1ac   : > { %3198 = vmatpush.bf16.msrb.mxu2 %v10319_v32  ;;  %v2791_v32 = vadd.f32 %v2790_v59, %v14723_v49  ;;  %v2809_v21 = vpop.f32.mrf.mxu1  ;;  %3150 = vmatmul.bf16.gmra.mxu3 %v14616_v13  ;;  %v9651_v42 = vor.u32 %v12602_v47, %v9650_v58  ;;  %v9602_v47 = vld [vmem:[#allocation4 + $0x100] sm:$0xf] }
 0x1ad   : > { %3217 = vmatpush.bf16.msrb.mxu3 %v10511_v5  ;;  %v9887_v5 = vor.u32 %v12658_v18, %v9884_v27  ;;  %v9863_v18 = vor.u32 %v12652_v12, %v9860_v15  ;;  %v12650_v27 = vld [vmem:[#allocation4 + $0x2f4] sm:$0xf0]  ;;  %v12596_v12 = vld [vmem:[#allocation4 + $0x144] sm:$0xf0]  ;;  %v9818_v15 = vld [vmem:[#allocation4 + $0x2b0] sm:$0xf] }
 0x1ae   : > { %3161 = vmatpush.bf16.msrb.mxu0 %v9911_v20  ;;  %v2810_v6 = vadd.f32 %v2809_v21, %v2791_v32  ;;  %v12698_v20 = vld [vmem:[#allocation4 + $0x474] sm:$0xf0]  ;;  %v14740_v21 = vpop.f32.mrf.mxu0  ;;  %v9819_v43 = vor.u32 %v12644_v55, %v9818_v15  ;;  %v12728_v15 = vld [vmem:[#allocation4 + $0x564] sm:$0xf0] }
 0x1af   : > { %3180 = vmatpush.bf16.msrb.mxu1 %v10103_v22  ;;  %v9842_v22 = vld [vmem:[#allocation4 + $0x2e0] sm:$0xf]  ;;  %v2828_v59 = vpop.f32.mrf.mxu2  ;;  %v2847_v32 = vpop.f32.mrf.mxu3 }
 0x1b0   : > { %3199 = vmatpush.bf16.msrb.mxu2 %v10295_v39  ;;  %v10034_v39 = vld [vmem:[#allocation4 + $0x460] sm:$0xf]  ;;  %v2829_v63 = vadd.f32 %v2828_v59, %v2810_v6  ;;  %v10202_v6 = vld [vmem:[#allocation4 + $0x5b0] sm:$0xf] }
 0x1b1   : > { %3218 = vmatpush.bf16.msrb.mxu3 %v10487_v46  ;;  %v10247_v46 = vor.u32 %v12748_v4, %v10244_v36  ;;  %v10035_v54 = vor.u32 %v12698_v20, %v10034_v39  ;;  %v9843_v4 = vor.u32 %v12650_v27, %v9842_v22  ;;  %v9626_v36 = vld [vmem:[#allocation4 + $0x130] sm:$0xf]  ;;  %v9986_v39 = vld [vmem:[#allocation4 + $0x400] sm:$0xf]  ;;  %v12686_v20 = vld [vmem:[#allocation4 + $0x414] sm:$0xf0] }
 0x1b2   : > { %3162 = vmatpush.bf16.msrb.mxu0 %v9887_v5  ;;  %v10227_v5 = vor.u32 %v12746_v45, %v10226_v35  ;;  %v14744_v48 = vadd.f32 %v2847_v32, %v2829_v63  ;;  %v9627_v40 = vor.u32 %v12596_v12, %v9626_v36  ;;  %v12590_v22 = vld [vmem:[#allocation4 + $0x114] sm:$0xf0]  ;;  %v9987_v35 = vor.u32 %v12686_v20, %v9986_v39  ;;  %v9962_v59 = vld [vmem:[#allocation4 + $0x3d0] sm:$0xf]  ;;  %v12632_v36 = vld [vmem:[#allocation4 + $0x264] sm:$0xf0] }
 0x1b3   : > { %3181 = vmatpush.bf16.msrb.mxu1 %v10079_v52  ;;  %v12740_v52 = vld [vmem:[#allocation4 + $0x5c4] sm:$0xf0]  ;;  %v12638_v27 = vld [vmem:[#allocation4 + $0x294] sm:$0xf0]  ;;  %v9603_v45 = vor.u32 %v12590_v22, %v9602_v47  ;;  %v9578_v32 = vld [vmem:[#allocation4 + $0xd0] sm:$0xf] }
 0x1b4   : > { %3200 = vmatpush.bf16.msrb.mxu2 %v10271_v3  ;;  %v14742_v3 = vpop.f32.mrf.mxu1  ;;  %v10203_v44 = vor.u32 %v12740_v52, %v10202_v6  ;;  %v10154_v12 = vld [vmem:[#allocation4 + $0x550] sm:$0xf]  ;;  %v9938_v52 = vld [vmem:[#allocation4 + $0x3a0] sm:$0xf]  ;;  %v12578_v20 = vld [vmem:[#allocation4 + $0xb4] sm:$0xf0] }
 0x1b5   : > { %3219 = vmatpush.bf16.msrb.mxu3 %v10463_v57  ;;  %v10011_v57 = vor.u32 %v12692_v51, %v10010_v41  ;;  %v9554_v39 = vld [vmem:[#allocation4 + $0xa0] sm:$0xf] }
 0x1b6   : > { %3163 = vmatpush.bf16.msrb.mxu0 %v9863_v18  ;;  %v2861_v41 = vpop.f32.mrf.mxu0  ;;  %v9746_v47 = vld [vmem:[#allocation4 + $0x220] sm:$0xf] }
 0x1b7   : > { %3182 = vmatpush.bf16.msrb.mxu1 %v10055_v60  ;;  %v14746_v58 = vpop.f32.mrf.mxu2  ;;  %v14748_v18 = vpop.f32.mrf.mxu3  ;;  %v12680_v60 = vld [vmem:[#allocation4 + $0x3e4] sm:$0xf0] }
 0x1b8   : > { %3201 = vmatpush.bf16.msrb.mxu2 %v10247_v46  ;;  %v9794_v46 = vld [vmem:[#allocation4 + $0x280] sm:$0xf]  ;;  %v9963_v55 = vor.u32 %v12680_v60, %v9962_v59 }
 0x1b9   : > { %3220 = vmatpush.bf16.msrb.mxu3 %v10439_v0  ;;  %v9795_v0 = vor.u32 %v12638_v27, %v9794_v46  ;;  %3164 = vmatmul.bf16.vlgmr.msrb.gmra.mxu0 %v14566_v62  ;;  %v12626_v27 = vld [vmem:[#allocation4 + $0x234] sm:$0xf0] }
 0x1ba   : > { %3232 = vmatpush.bf16.msra.mxu0 %v9651_v42  ;;  %v12734_v42 = vld [vmem:[#allocation4 + $0x594] sm:$0xf0]  ;;  %3183 = vmatmul.bf16.vlgmr.msrb.gmra.mxu1 %v14572_v1 }
 0x1bb   : > { %3251 = vmatpush.bf16.msra.mxu1 %v9843_v4  ;;  %v12584_v4 = vld [vmem:[#allocation4 + $0xe4] sm:$0xf0]  ;;  %3202 = vmatmul.bf16.vlgmr.msrb.gmra.mxu2 %v14658_v16 }
 0x1bc   : > { %3270 = vmatpush.bf16.msra.mxu2 %v10035_v54  ;;  %v10178_v54 = vld [vmem:[#allocation4 + $0x580] sm:$0xf]  ;;  %v14750_v51 = vpop.f32.mrf.mxu1  ;;  %3221 = vmatmul.bf16.vlgmr.msrb.gmra.mxu3 %v14664_v9  ;;  %v9579_v6 = vor.u32 %v12584_v4, %v9578_v32  ;;  %v12668_v32 = vld [vmem:[#allocation4 + $0x384] sm:$0xf0]  ;;  %v2862_v4 = vadd.f32 %v2861_v41, %v14731_v50  ;;  %v10538_v9 = vld [vmem:[#allocation4 + $0x850] sm:$0xf] }
 0x1bd   : > { %3289 = vmatpush.bf16.msra.mxu3 %v10227_v5  ;;  %v10179_v63 = vor.u32 %v12734_v42, %v10178_v54  ;;  %v9770_v5 = vld [vmem:[#allocation4 + $0x250] sm:$0xf]  ;;  %v10130_v54 = vld [vmem:[#allocation4 + $0x520] sm:$0xf]  ;;  %v12722_v42 = vld [vmem:[#allocation4 + $0x534] sm:$0xf0] }
 0x1be   : > { %3233 = vmatpush.bf16.msra.mxu0 %v9627_v40  ;;  %v3588_v40 = vpop.xlane.xlu0 %3587 }
 0x1bf   : > { %3252 = vmatpush.bf16.msra.mxu1 %v9819_v43  ;;  %v9771_v43 = vor.u32 %v12632_v36, %v9770_v5  ;;  %v14756_v22 = vpop.f32.mrf.mxu2  ;;  %v14758_v46 = vpop.f32.mrf.mxu3  ;;  %v14760_v59 = vmax.f32 %v3588_v40, 1.0  ;;  %v9747_v5 = vor.u32 %v12626_v27, %v9746_v47  ;;  %v10131_v36 = vor.u32 %v12722_v42, %v10130_v54  ;;  %v10106_v40 = vld [vmem:[#allocation4 + $0x4f0] sm:$0xf]  ;;  %v12614_v42 = vld [vmem:[#allocation4 + $0x1d4] sm:$0xf0] }
 0x1c0   : > { %3271 = vmatpush.bf16.msra.mxu2 %v10011_v57  ;;  %v12674_v57 = vld [vmem:[#allocation4 + $0x3b4] sm:$0xf0] }
 0x1c1   : > { %3290 = vmatpush.bf16.msra.mxu3 %v10203_v44  ;;  %v10155_v44 = vor.u32 %v12728_v15, %v10154_v12  ;;  %v9939_v60 = vor.u32 %v12674_v57, %v9938_v52  ;;  %v9530_v12 = vld [vmem:[#allocation4 + $0x70] sm:$0xf]  ;;  %v12572_v15 = vld [vmem:[#allocation4 + $0x84] sm:$0xf0]  ;;  %13483 = vrcp.f32 %v14760_v59  ;;  %v12662_v52 = vld [vmem:[#allocation4 + $0x354] sm:$0xf0]  ;;  %v2881_v57 = vadd.f32 %v14750_v51, %v2862_v4 }
 0x1c2   : > { %3234 = vmatpush.bf16.msra.mxu0 %v9603_v45  ;;  %v9531_v41 = vor.u32 %v12572_v15, %v9530_v12  ;;  %v14777_v51 = vrot.slane %v14760_v59, 2  ;;  %v9482_v4 = vld [vmem:[#allocation4 + $0x10] sm:$0xf]  ;;  %v12608_v15 = vld [vmem:[#allocation4 + $0x1a4] sm:$0xf0]  ;;  %vm3747_vm1 = vweird.f32 %v14760_v59 }
 0x1c3   : > { %3253 = vmatpush.bf16.msra.mxu1 %v9795_v0  ;;  %v9555_v0 = vor.u32 %v12578_v20, %v9554_v39  ;;  %v12566_v39 = vld [vmem:[#allocation4 + $0x54] sm:$0xf0]  ;;  %v9698_v20 = vld [vmem:[#allocation4 + $0x1c0] sm:$0xf]  ;;  %v9674_v12 = vld [vmem:[#allocation4 + $0x190] sm:$0xf] }
 0x1c4   : > { %3272 = vmatpush.bf16.msra.mxu2 %v9987_v35  ;;  %v2863_v35 = vpop.f32.mrf.mxu0  ;;  %v2882_v45 = vpop.f32.mrf.mxu1  ;;  %vm3787_vm8 = vweird.f32 %v14777_v51 }
 0x1c5   : > { %3291 = vmatpush.bf16.msra.mxu3 %v10179_v63  ;;  %v9914_v63 = vld [vmem:[#allocation4 + $0x370] sm:$0xf]  ;;  %v2864_v37 = vadd.f32 %v2863_v35, %v14734_v19  ;;  %v10107_v19 = vor.u32 %v12716_v10, %v10106_v40  ;;  %v10082_v35 = vld [vmem:[#allocation4 + $0x4c0] sm:$0xf] }
 0x1c6   : > { %3235 = vmatpush.bf16.msra.mxu0 %v9579_v6  ;;  %v9915_v50 = vor.u32 %v12668_v32, %v9914_v63  ;;  %v9890_v6 = vld [vmem:[#allocation4 + $0x340] sm:$0xf]  ;;  %v12656_v32 = vld [vmem:[#allocation4 + $0x324] sm:$0xf0]  ;;  %v10058_v40 = vld [vmem:[#allocation4 + $0x490] sm:$0xf] }
 0x1c7   : > { %3254 = vmatpush.bf16.msra.mxu1 %v9771_v43  ;;  %v9723_v43 = vor.u32 %v12620_v23, %v9722_v38  ;;  %v2883_v47 = vadd.f32 %v2882_v45, %v2864_v37  ;;  %v14769_v27 = vpop.f32.mrf.mxu2  ;;  %v14771_v54 = vpop.f32.mrf.mxu3  ;;  %v14783_v37 = vld [vmem:[#allocation4 + $0x310] sm:$0xf]  ;;  %v9891_v45 = vor.u32 %v12662_v52, %v9890_v6  ;;  %v9652_v6 = vld [vmem:[#allocation4 + $0x178] sm:$0xf0]  ;;  %v2793_v52 = vadd.f32 %v14740_v21, %v14723_v49 }
 0x1c8   : > { %3273 = vmatpush.bf16.msra.mxu2 %v9963_v55  ;;  %v14765_v55 = vrot.slane %v14760_v59, 1  ;;  %v14785_v38 = vpop.eup %13483 }
 0x1c9   : > { %3292 = vmatpush.bf16.msra.mxu3 %v10155_v44  ;;  %v9506_v44 = vld [vmem:[#allocation4 + $0x40] sm:$0xf]  ;;  %3169 = vmatmul.bf16.gmra.mxu0 %v14622_v14  ;;  %v14798_v49 = vmul.f32 %v14785_v38, %v14760_v59  ;;  %v2812_v33 = vadd.f32 %v14742_v3, %v2793_v52  ;;  %vm3748_vm2 = vweird.f32 %v14785_v38 }
 0x1ca   : > { %3236 = vmatpush.bf16.msra.mxu0 %v9555_v0  ;;  %v14774_v0 = vperm.slane %v14720_v53, 1  ;;  %13485 = vrcp.f32 %v14765_v55  ;;  %v9507_v63 = vor.u32 %v12566_v39, %v9506_v44  ;;  %v12560_v53 = vld [vmem:[#allocation4 + $0x24] sm:$0xf0]  ;;  %3188 = vmatmul.bf16.gmra.mxu1 %v14628_v17  ;;  %v9867_v44 = vor.u32 %v12656_v32, %v14783_v37  ;;  %vm14881_vm3 = vmor %vm3747_vm1, %vm3748_vm2 }
 0x1cb   : > { %3255 = vmatpush.bf16.msra.mxu1 %v9747_v5  ;;  %13487 = vtanh.f32 %v2881_v57  ;;  %v9699_v5 = vor.u32 %v12614_v42, %v9698_v20  ;;  %3207 = vmatmul.bf16.gmra.mxu2 %v14691_v2  ;;  %v10418_v57 = vld [vmem:[#allocation4 + $0x760] sm:$0xf]  ;;  %v9483_v39 = vor.u32 %v12560_v53, %v9482_v4  ;;  %v12842_v20 = vld [vmem:[#allocation4 + $0x8f4] sm:$0xf0]  ;;  %v9844_v42 = vld [vmem:[#allocation4 + $0x2f8] sm:$0xf0]  ;;  %v2831_v52 = vadd.f32 %v14746_v58, %v2812_v33 }
 0x1cc   : > { %3274 = vmatpush.bf16.msra.mxu2 %v9939_v60  ;;  %v12710_v60 = vld [vmem:[#allocation4 + $0x4d4] sm:$0xf0]  ;;  %v2866_v10 = vpop.f32.mrf.mxu0  ;;  %v14781_v23 = vpop.f32.mrf.mxu1  ;;  %13489 = vtanh.f32 %v2883_v47  ;;  %3226 = vmatmul.bf16.gmra.mxu3 %v14697_v26  ;;  %v12647_v47 = vld [vmem:[#allocation4 + $0x2e4] sm:$0xf]  ;;  %v12593_v4 = vld [vmem:[#allocation4 + $0x134] sm:$0xf]  ;;  %v17834_v26 = vunpack.c.l.bf16 %v14530_v25  ;;  %vm3767_vm4 = vweird.f32 %v14765_v55 }
 0x1cd   : > { %3293 = vmatpush.bf16.msra.mxu3 %v10131_v36  ;;  %v10083_v36 = vor.u32 %v12710_v60, %v10082_v35  ;;  %v9675_v60 = vor.u32 %v12608_v15, %v9674_v12  ;;  %13491 = vrcp.f32 %v14777_v51  ;;  %v9628_v53 = vld [vmem:[#allocation4 + $0x148] sm:$0xf0]  ;;  %v2867_v21 = vadd.f32 %v2866_v10, %v14744_v48  ;;  %v12641_v48 = vld [vmem:[#allocation4 + $0x2b4] sm:$0xf]  ;;  %v12776_v2 = vld [vmem:[#allocation4 + $0x6e4] sm:$0xf0] }
 0x1ce   : > { %3237 = vmatpush.bf16.msra.mxu0 %v9531_v41  ;;  %v12599_v41 = vld [vmem:[#allocation4 + $0x164] sm:$0xf]  ;;  %v9847_v15 = vor.u32 %v12647_v47, %v9844_v42  ;;  %v9820_v10 = vld [vmem:[#allocation4 + $0x2c8] sm:$0xf0]  ;;  %v17833_v47 = vunpack.c.l.bf16 %v14525_v24  ;;  %vm3874_vm1 = vcmask 1045509  }
 0x1cf   : > { %3256 = vmatpush.bf16.msra.mxu1 %v9723_v43  ;;  %v12794_v43 = vld [vmem:[#allocation4 + $0x774] sm:$0xf0]  ;;  %v14804_v37 = vpop.f32.mrf.mxu3  ;;  %v2886_v58 = vadd.f32 %v14781_v23, %v2867_v21 }
 0x1d0   : > { %3275 = vmatpush.bf16.msra.mxu2 %v9915_v50  ;;  %v12704_v50 = vld [vmem:[#allocation4 + $0x4a4] sm:$0xf0]  ;;  %v14794_v35 = vpop.eup %13485  ;;  %v10419_v32 = vor.u32 %v12794_v43, %v10418_v57  ;;  %v2900_v43 = vadd.f32 %v14756_v22, %v14774_v0  ;;  %v3773_v22 = vand.u32 2147483648, %v14765_v55 }
 0x1d1   : > { %3294 = vmatpush.bf16.msra.mxu3 %v10107_v19  ;;  %v10610_v19 = vld [vmem:[#allocation4 + $0x8e0] sm:$0xf]  ;;  %v10059_v7 = vor.u32 %v12704_v50, %v10058_v40  ;;  %v13488_v34 = vpop.eup %13487  ;;  %v12788_v40 = vld [vmem:[#allocation4 + $0x744] sm:$0xf0]  ;;  %v10586_v50 = vld [vmem:[#allocation4 + $0x8b0] sm:$0xf]  ;;  %v14819_v3 = vmul.f32 %v14794_v35, %v14765_v55  ;;  %13493 = vtanh.f32 %v2886_v58  ;;  %vm3768_vm5 = vweird.f32 %v14794_v35 }
 0x1d2   : > { %3238 = vmatpush.bf16.msra.mxu0 %v9507_v63  ;;  %v9655_v63 = vor.u32 %v12599_v41, %v9652_v6  ;;  %v10611_v12 = vor.u32 %v12842_v20, %v10610_v19  ;;  %v13490_v30 = vpop.eup %13489  ;;  %v14811_v41 = vrot.slane %v14760_v59, 3  ;;  %v17832_v6 = vand.u32 2147483648, %v14760_v59  ;;  %v10346_v58 = vld [vmem:[#allocation4 + $0x6d0] sm:$0xf]  ;;  %vm14936_vm6 = vmor %vm3767_vm4, %vm3768_vm5 }
 0x1d3   : > { %3257 = vmatpush.bf16.msra.mxu1 %v9699_v5  ;;  %v3744_v19 = vsub.f32 1.0, %v14798_v49  ;;  %v9631_v20 = vor.u32 %v12593_v4, %v9628_v53  ;;  %v3485_v42 = vadd.f32 %v13488_v34, %v17833_v47  ;;  %v3491_v33 = vadd.f32 %v13490_v30, %v17834_v26  ;;  %v14832_v49 = vpop.eup %13491  ;;  %v9604_v34 = vld [vmem:[#allocation4 + $0x118] sm:$0xf0]  ;;  %v10370_v4 = vld [vmem:[#allocation4 + $0x700] sm:$0xf]  ;;  %v14834_v53 = vpop.permute.xlu1 %3538 }
 0x1d4   : > { %3276 = vmatpush.bf16.msra.mxu2 %v9891_v45  ;;  %v14802_v45 = vpop.f32.mrf.mxu2  ;;  %v2868_v5 = vpop.f32.mrf.mxu0  ;;  %v14815_v57 = vor.u32 1.1754944e-38, %v17832_v6  ;;  %17835 = vst [vmem:[#allocation52_spill] sm:$0xff] %v14834_v53  ;;  %v3764_v26 = vsub.f32 1.0, %v14819_v3  ;;  %v14847_v3 = vor.u32 1.1754944e-38, %v3773_v22  ;;  %v9580_v6 = vld [vmem:[#allocation4 + $0xe8] sm:$0xf0]  ;;  %vm3788_vm9 = vweird.f32 %v14832_v49 }
 0x1d5   : > { %3295 = vmatpush.bf16.msra.mxu3 %v10083_v36  ;;  %v14808_v36 = vpop.f32.mrf.mxu1  ;;  %v3509_v30 = vmul.f32 0.5, %v3485_v42  ;;  %v3745_v16 = vmul.f32 %v14785_v38, %v3744_v19  ;;  %v12629_v22 = vld [vmem:[#allocation4 + $0x254] sm:$0xf]  ;;  %v10514_v19 = vld [vmem:[#allocation4 + $0x820] sm:$0xf]  ;;  %vm15026_vm12 = vmor %vm3787_vm8, %vm3788_vm9  ;;  %vm3807_vm15 = vweird.f32 %v14811_v41  ;;  %vm3877_vm4 = vcmask 1042434  }
 0x1d6   : > { %3239 = vmatpush.bf16.msra.mxu0 %v9483_v39  ;;  %v10587_v39 = vor.u32 %v12836_v29, %v10586_v50  ;;  %v12830_v29 = vld [vmem:[#allocation4 + $0x894] sm:$0xf0]  ;;  %v3515_v50 = vmul.f32 0.5, %v3491_v33  ;;  %vm3879_vm5 = vcmask 1046534  }
 0x1d7   : > { %3258 = vmatpush.bf16.msra.mxu1 %v9675_v60  ;;  %v12587_v60 = vld [vmem:[#allocation4 + $0x104] sm:$0xf]  ;;  %v14840_v21 = vpop.f32.mrf.mxu3 }
 0x1d8   : > { %3277 = vmatpush.bf16.msra.mxu2 %v9867_v44  ;;  %v10395_v44 = vor.u32 %v12788_v40, %v10394_v11  ;;  %v10562_v11 = vld [vmem:[#allocation4 + $0x880] sm:$0xf]  ;;  %v2919_v40 = vadd.f32 %v14758_v46, %v2900_v43  ;;  %v9607_v47 = vor.u32 %v12587_v60, %v9604_v34  ;;  %v2902_v60 = vadd.f32 %v14769_v27, %v14774_v0  ;;  %v12575_v27 = vld [vmem:[#allocation4 + $0xa4] sm:$0xf] }
 0x1d9   : > { %3296 = vmatpush.bf16.msra.mxu3 %v10059_v7  ;;  %v9823_v7 = vor.u32 %v12641_v48, %v9820_v10  ;;  %v14845_v48 = vmul.f32 %v14832_v49, %v14777_v51  ;;  %v10563_v43 = vor.u32 %v12830_v29, %v10562_v11  ;;  %3240 = vmatmul.bf16.vlgmr.msra.gmra.mxu0 %v14554_v56 }
 0x1da   : > { %3308 = vmatpush.bf16.msrb.mxu0 %v10419_v32  ;;  %v2850_v32 = vadd.f32 %v14748_v18, %v2831_v52  ;;  %v14849_v52 = vpop.permute.xlu0 %3545  ;;  %3259 = vmatmul.bf16.vlgmr.msra.gmra.mxu1 %v14560_v61  ;;  %v10347_v29 = vor.u32 %v12776_v2, %v10346_v58  ;;  %v3765_v2 = vmul.f32 %v14794_v35, %v3764_v26  ;;  %v17838_v26 = vunpack.c.l.bf16 %v14581_v28 }
 0x1db   : > { %3327 = vmatpush.bf16.msrb.mxu1 %v10611_v12  ;;  %v12635_v12 = vld [vmem:[#allocation4 + $0x284] sm:$0xf]  ;;  %v14860_v34 = vmul.f32 %v14849_v52, %v3515_v50  ;;  %3278 = vmatmul.bf16.vlgmr.msra.gmra.mxu2 %v14566_v62  ;;  %v10490_v62 = vld [vmem:[#allocation4 + $0x7f0] sm:$0xf] }
 0x1dc   : > { %3346 = vmatpush.bf16.msrb.mxu2 %v9655_v63  ;;  %v12782_v63 = vld [vmem:[#allocation4 + $0x714] sm:$0xf0]  ;;  %v14838_v23 = vpop.f32.mrf.mxu2  ;;  %v2937_v18 = vpop.f32.mrf.mxu0  ;;  %3297 = vmatmul.bf16.vlgmr.msra.gmra.mxu3 %v14572_v1  ;;  %v12764_v1 = vld [vmem:[#allocation4 + $0x684] sm:$0xf0] }
 0x1dd   : > { %3365 = vmatpush.bf16.msrb.mxu3 %v9847_v15  ;;  %v9796_v15 = vld [vmem:[#allocation4 + $0x298] sm:$0xf0]  ;;  %v2956_v10 = vpop.f32.mrf.mxu1  ;;  %v10371_v42 = vor.u32 %v12782_v63, %v10370_v4  ;;  %v2938_v46 = vadd.f32 %v2937_v18, %v2919_v40  ;;  %v12770_v18 = vld [vmem:[#allocation4 + $0x6b4] sm:$0xf0] }
 0x1de   : > { %3309 = vmatpush.bf16.msrb.mxu0 %v10395_v44  ;;  %v12581_v44 = vld [vmem:[#allocation4 + $0xd4] sm:$0xf]  ;;  %v9799_v33 = vor.u32 %v12635_v12, %v9796_v15  ;;  %v13494_v12 = vpop.eup %13493  ;;  %v12818_v4 = vld [vmem:[#allocation4 + $0x834] sm:$0xf0] }
 0x1df   : > { %3328 = vmatpush.bf16.msrb.mxu1 %v10587_v39  ;;  %v14853_v39 = vmul.f32 %v14834_v53, %v3509_v30  ;;  %v9583_v11 = vor.u32 %v12581_v44, %v9580_v6  ;;  %v10322_v30 = vld [vmem:[#allocation4 + $0x6a0] sm:$0xf]  ;;  %v2957_v15 = vadd.f32 %v2956_v10, %v2938_v46  ;;  %v12623_v44 = vld [vmem:[#allocation4 + $0x224] sm:$0xf]  ;;  %v9748_v10 = vld [vmem:[#allocation4 + $0x238] sm:$0xf0]  ;;  %v2921_v46 = vadd.f32 %v14771_v54, %v2902_v60 }
 0x1e0   : > { %3347 = vmatpush.bf16.msrb.mxu2 %v9631_v20  ;;  %v2869_v20 = vadd.f32 %v2868_v5, %v2850_v32  ;;  %v12824_v5 = vld [vmem:[#allocation4 + $0x864] sm:$0xf0]  ;;  %v9556_v32 = vld [vmem:[#allocation4 + $0xb8] sm:$0xf0]  ;;  %v10323_v54 = vor.u32 %v12770_v18, %v10322_v30  ;;  %v12569_v60 = vld [vmem:[#allocation4 + $0x74] sm:$0xf] }
 0x1e1   : > { %3366 = vmatpush.bf16.msrb.mxu3 %v9823_v7  ;;  %v9772_v7 = vld [vmem:[#allocation4 + $0x268] sm:$0xf0]  ;;  %v10539_v40 = vor.u32 %v12824_v5, %v10538_v9  ;;  %v3590_v6 = vrot.slane %v14853_v39, 4  ;;  %v3626_v9 = vrot.slane %v14860_v34, 4  ;;  %v9559_v5 = vor.u32 %v12575_v27, %v9556_v32 }
 0x1e2   : > { %v2888_v63 = vadd.f32 %v14808_v36, %v2869_v20  ;;  %3310 = vmatpush.bf16.msrb.mxu0 %v10371_v42  ;;  %v9775_v50 = vor.u32 %v12629_v22, %v9772_v7  ;;  %v14870_v36 = vadd.f32 %v14785_v38, %v3745_v16  ;;  %v2994_v42 = vpop.f32.mrf.mxu3  ;;  %v3497_v22 = vadd.f32 %v13494_v12, %v17838_v26  ;;  %v10298_v20 = vld [vmem:[#allocation4 + $0x670] sm:$0xf]  ;;  %v14904_v12 = vld [vmem:[#allocation4 + $0x58] sm:$0xf0] }
 0x1e3   : > { %3329 = vmatpush.bf16.msrb.mxu1 %v10563_v43  ;;  %v10515_v7 = vor.u32 %v12818_v4, %v10514_v19  ;;  %v9751_v32 = vor.u32 %v12623_v44, %v9748_v10  ;;  %v14889_v61 = vadd.f32 %v3590_v6, %v14853_v39  ;;  %v12812_v4 = vld [vmem:[#allocation4 + $0x804] sm:$0xf0]  ;;  %v12617_v19 = vld [vmem:[#allocation4 + $0x1f4] sm:$0xf]  ;;  %v14900_v30 = vadd.f32 %v3626_v9, %v14860_v34  ;;  %v14902_v39 = vld [vmem:[#allocation4 + $0x44] sm:$0xf]  ;;  %v14915_v34 = vpop.permute.xlu1 %3552 }
 0x1e4   : > { %3348 = vmatpush.bf16.msrb.mxu2 %v9607_v47  ;;  %v2975_v47 = vpop.f32.mrf.mxu2  ;;  %13495 = vtanh.f32 %v2888_v63  ;;  %v2905_v63 = vadd.f32 %v14802_v45, %v14774_v0  ;;  %v14906_v45 = vld [vmem:[#allocation4 + $0x640] sm:$0xf]  ;;  %v10299_v6 = vor.u32 %v12764_v1, %v10298_v20  ;;  %v17839_v26 = vsub.f32 1.0, %v14845_v48 }
 0x1e5   : > { %3367 = vmatpush.bf16.msrb.mxu3 %v9799_v33  ;;  %v2976_v43 = vadd.f32 %v2975_v47, %v2957_v15  ;;  %v2939_v33 = vpop.f32.mrf.mxu0  ;;  %v2958_v58 = vpop.f32.mrf.mxu1  ;;  %v9532_v15 = vld [vmem:[#allocation4 + $0x88] sm:$0xf0]  ;;  %13497 = vrcp.f32 %v14811_v41  ;;  %v14913_v44 = vld [vmem:[#allocation4 + $0x7c0] sm:$0xf] }
 0x1e6   : > { %3311 = vmatpush.bf16.msrb.mxu0 %v10347_v29  ;;  %v2940_v27 = vadd.f32 %v2939_v33, %v2921_v46  ;;  %v9535_v18 = vor.u32 %v12569_v60, %v9532_v15  ;;  %v10491_v46 = vor.u32 %v12812_v4, %v10490_v62  ;;  %v14919_v33 = vld [vmem:[#allocation4 + $0x1c4] sm:$0xf]  ;;  %v2924_v20 = vadd.f32 %v14804_v37, %v2905_v63  ;;  %v14945_v63 = vld [vmem:[#allocation4 + $0x14] sm:$0xf]  ;;  %v14947_v4 = vld [vmem:[#allocation4 + $0x28] sm:$0xf0] }
 0x1e7   : > { %v2995_v47 = vadd.f32 %v2994_v42, %v2976_v43  ;;  %3330 = vmatpush.bf16.msrb.mxu1 %v10539_v40  ;;  %v3521_v40 = vmul.f32 0.5, %v3497_v22  ;;  %v14911_v42 = vld [vmem:[#allocation4 + $0x654] sm:$0xf0]  ;;  %v3785_v22 = vmul.f32 %v14832_v49, %v17839_v26  ;;  %v10612_v37 = vld [vmem:[#allocation4 + $0x8f8] sm:$0xf0] }
 0x1e8   : > { %3349 = vmatpush.bf16.msrb.mxu2 %v9583_v11  ;;  %v9724_v11 = vld [vmem:[#allocation4 + $0x208] sm:$0xf0]  ;;  %v2959_v10 = vadd.f32 %v2958_v58, %v2940_v27  ;;  %v14917_v43 = vld [vmem:[#allocation4 + $0x7d4] sm:$0xf0]  ;;  %v17840_v58 = vand.u32 2147483648, %v14777_v51  ;;  %v9511_v27 = vor.u32 %v14902_v39, %v14904_v12 }
 0x1e9   : > { %3368 = vmatpush.bf16.msrb.mxu3 %v9775_v50  ;;  %13499 = vtanh.f32 %v2995_v47  ;;  %v14909_v50 = vadd.f32 %v14794_v35, %v3765_v2  ;;  %v9727_v9 = vor.u32 %v12617_v19, %v9724_v11  ;;  %v14921_v2 = vld [vmem:[#allocation4 + $0x1d8] sm:$0xf0]  ;;  %v14952_v11 = vmul.f32 %v14915_v34, %v3521_v40  ;;  %v14958_v12 = vld [vmem:[#allocation4 + $0x610] sm:$0xf]  ;;  %3245 = vmatmul.bf16.gmra.mxu0 %v14610_v8 }
 0x1ea   : > { %3312 = vmatpush.bf16.msrb.mxu0 %v10323_v54  ;;  %v14930_v54 = vor.u32 1.1754944e-38, %v17840_v58  ;;  %v9703_v39 = vor.u32 %v14919_v33, %v14921_v2  ;;  %v17843_v58 = vunpack.c.l.bf16 %v14586_v31  ;;  %3264 = vmatmul.bf16.gmra.mxu1 %v14616_v13  ;;  %v12839_v2 = vld [vmem:[#allocation4 + $0x8e4] sm:$0xf] }
 0x1eb   : > { %3331 = vmatpush.bf16.msrb.mxu1 %v10515_v7  ;;  %v2996_v7 = vpop.f32.mrf.mxu3  ;;  %3283 = vmatmul.bf16.gmra.mxu2 %v14622_v14  ;;  %v12737_v14 = vld [vmem:[#allocation4 + $0x5b4] sm:$0xf] }
 0x1ec   : > { %3350 = vmatpush.bf16.msrb.mxu2 %v9559_v5  ;;  %v13496_v5 = vpop.eup %13495  ;;  %v2977_v62 = vpop.f32.mrf.mxu2  ;;  %3302 = vmatmul.bf16.gmra.mxu3 %v14628_v17 }
 0x1ed   : > { %3369 = vmatpush.bf16.msrb.mxu3 %v9751_v32  ;;  %v2978_v15 = vadd.f32 %v2977_v62, %v2959_v10  ;;  %v2942_v48 = vpop.f32.mrf.mxu0  ;;  %v2961_v47 = vpop.f32.mrf.mxu1  ;;  %v10275_v32 = vor.u32 %v14911_v42, %v14906_v45  ;;  %v10467_v10 = vor.u32 %v14917_v43, %v14913_v44  ;;  %v14960_v45 = vld [vmem:[#allocation4 + $0x624] sm:$0xf0]  ;;  %v14962_v42 = vld [vmem:[#allocation4 + $0x790] sm:$0xf]  ;;  %v3503_v62 = vadd.f32 %v13496_v5, %v17843_v58  ;;  %v14970_v44 = vld [vmem:[#allocation4 + $0x1a8] sm:$0xf0] }
 0x1ee   : > { %v14949_v19 = vpop.eup %13497  ;;  %3313 = vmatpush.bf16.msrb.mxu0 %v10299_v6  ;;  %v2943_v29 = vadd.f32 %v2942_v48, %v2924_v20  ;;  %v14968_v6 = vld [vmem:[#allocation4 + $0x194] sm:$0xf]  ;;  %v17844_v43 = vand.u32 2147483647, %v14760_v59  ;;  %v14988_v59 = vld [vmem:[#allocation4 + $0x764] sm:$0xf]  ;;  %v15003_v48 = vadd.f32 %v14832_v49, %v3785_v22  ;;  %v9487_v22 = vor.u32 %v14945_v63, %v14947_v4 }
 0x1ef   : > { %v13500_v26 = vpop.eup %13499  ;;  %v2997_v40 = vadd.f32 %v2996_v7, %v2978_v15  ;;  %3332 = vmatpush.bf16.msrb.mxu1 %v10491_v46  ;;  %v17847_v46 = vunpack.c.h.bf16 %v14525_v24  ;;  %v14990_v5 = vld [vmem:[#allocation4 + $0x778] sm:$0xf0]  ;;  %v14992_v20 = vld [vmem:[#allocation4 + $0x464] sm:$0xf]  ;;  %v17848_v7 = vand.u32 2147483647, %v14765_v55  ;;  %v2907_v24 = vadd.f32 %v14838_v23, %v14774_v0 }
 0x1f0   : > { %3351 = vmatpush.bf16.msrb.mxu2 %v9535_v18  ;;  %v14966_v18 = vld [vmem:[#allocation4 + $0x7a4] sm:$0xf0]  ;;  %vm14974_vm7 = vcmp.eq.f32.partialorder %v17844_v43, 8.507059e+37  ;;  %v10036_v55 = vld [vmem:[#allocation4 + $0x478] sm:$0xf0]  ;;  %v3662_v0 = vrot.slane %v14952_v11, 4  ;;  %vm3808_vm0 = vweird.f32 %v14949_v19 }
 0x1f1   : > { %3370 = vmatpush.bf16.msrb.mxu3 %v9727_v9  ;;  %v3486_v9 = vadd.f32 %v13500_v26, %v17847_v46  ;;  %vm14996_vm10 = vcmp.eq.f32.partialorder %v17848_v7, 8.507059e+37  ;;  %v15007_v26 = vmul.f32 %v14949_v19, %v14811_v41  ;;  %13501 = vtanh.f32 %v2997_v40  ;;  %v12743_v58 = vld [vmem:[#allocation4 + $0x5e4] sm:$0xf]  ;;  %v10228_v43 = vld [vmem:[#allocation4 + $0x5f8] sm:$0xf0]  ;;  %vm15199_vm2 = vmor %vm3807_vm15, %vm3808_vm0 }
 0x1f2   : > { %v17851_v46 = vand.u32 2147483647, %v14777_v51  ;;  %3314 = vmatpush.bf16.msrb.mxu0 %v10275_v32  ;;  %v10251_v40 = vor.u32 %v14960_v45, %v14958_v12  ;;  %v3527_v1 = vmul.f32 0.5, %v3503_v62  ;;  %v9679_v32 = vor.u32 %v14968_v6, %v14970_v44 }
 0x1f3   : > { %v3510_v23 = vmul.f32 0.5, %v3486_v9  ;;  %v2962_v9 = vadd.f32 %v2961_v47, %v2943_v29  ;;  %3333 = vmatpush.bf16.msrb.mxu1 %v10467_v10  ;;  %v17856_v63 = vrot.slane %v14889_v61, 2  ;;  %v2999_v45 = vpop.f32.mrf.mxu3  ;;  %v10423_v29 = vor.u32 %v14988_v59, %v14990_v5  ;;  %v12785_v10 = vld [vmem:[#allocation4 + $0x734] sm:$0xf] }
 0x1f4   : > { %vm15013_vm11 = vcmp.eq.f32.partialorder %v17851_v46, 8.507059e+37  ;;  %3352 = vmatpush.bf16.msrb.mxu2 %v9511_v27  ;;  %v10443_v27 = vor.u32 %v14966_v18, %v14962_v42  ;;  %v2980_v12 = vpop.f32.mrf.mxu2  ;;  %v10039_v47 = vor.u32 %v14992_v20, %v10036_v55  ;;  %v12689_v42 = vld [vmem:[#allocation4 + $0x434] sm:$0xf]  ;;  %v2926_v62 = vadd.f32 %v14840_v21, %v2907_v24  ;;  %v15054_v20 = vpop.permute.xlu2 %3559 }
 0x1f5   : > { %3371 = vmatpush.bf16.msrb.mxu3 %v9703_v39  ;;  %v15037_v4 = vadd.f32 %v17856_v63, %v14889_v61  ;;  %v3562_v51 = vmul.f32 %v14834_v53, %v3510_v23  ;;  %v10396_v39 = vld [vmem:[#allocation4 + $0x748] sm:$0xf0]  ;;  %v2981_v18 = vadd.f32 %v2980_v12, %v2962_v9  ;;  %v2944_v6 = vpop.f32.mrf.mxu0  ;;  %v2963_v44 = vpop.f32.mrf.mxu1  ;;  %v10231_v17 = vor.u32 %v12743_v58, %v10228_v43  ;;  %v15061_v12 = vld [vmem:[#allocation7] sm:$0x3f] }
 0x1f6   : > { %v10615_v61 = vor.u32 %v12839_v2, %v10612_v37  ;;  %v10012_v63 = vld [vmem:[#allocation4 + $0x448] sm:$0xf0]  ;;  %v17857_v53 = vrot.slane %v14900_v30, 2  ;;  %v3790_v59 = vsel %vm15026_vm12, %v14832_v49, %v15003_v48  ;;  %v3663_v21 = vadd.f32 %v3662_v0, %v14952_v11  ;;  %3315 = vmatpush.bf16.msrb.mxu0 %v10251_v40  ;;  %v12833_v37 = vld [vmem:[#allocation4 + $0x8b4] sm:$0xf] }
 0x1f7   : > { %v10204_v23 = vld [vmem:[#allocation4 + $0x5c8] sm:$0xf0]  ;;  %v3596_v5 = vrot.slane %v3562_v51, 4  ;;  %v13502_v24 = vpop.eup %13501  ;;  %v3804_v55 = vsub.f32 1.0, %v15007_v26  ;;  %v3000_v58 = vadd.f32 %v2999_v45, %v2981_v18  ;;  %3334 = vmatpush.bf16.msrb.mxu1 %v10443_v27  ;;  %v3594_v43 = vrot.slane %v15037_v4, 1  ;;  %v17864_v26 = vld [vmem:[#allocation36_spill] sm:$0xff] }
 0x1f8   : > { %v15047_v13 = vadd.f32 %v17857_v53, %v14900_v30  ;;  %3353 = vmatpush.bf16.msrb.mxu2 %v9487_v22  ;;  %v10588_v2 = vld [vmem:[#allocation4 + $0x8c8] sm:$0xf0]  ;;  %v2945_v53 = vadd.f32 %v2944_v6, %v2926_v62  ;;  %v10399_v30 = vor.u32 %v12785_v10, %v10396_v39  ;;  %v17858_v11 = vunpack.c.h.bf16 %v14530_v25  ;;  %v10372_v45 = vld [vmem:[#allocation4 + $0x718] sm:$0xf0]  ;;  %v12731_v39 = vld [vmem:[#allocation4 + $0x584] sm:$0xf] }
 0x1f9   : > { %3372 = vmatpush.bf16.msrb.mxu3 %v9679_v32  ;;  %v3597_v49 = vadd.f32 %v3596_v5, %v3562_v51  ;;  %v10015_v0 = vor.u32 %v12689_v42, %v10012_v63  ;;  %v3579_v22 = vmul.f32 %v15054_v20, %v3527_v1  ;;  %13503 = vtanh.f32 %v3000_v58  ;;  %v12779_v1 = vld [vmem:[#allocation4 + $0x704] sm:$0xf]  ;;  %v9988_v10 = vld [vmem:[#allocation4 + $0x418] sm:$0xf0]  ;;  %v15096_v5 = vld [vmem:[#allocation4 + $0x6d4] sm:$0xf] }
 0x1fa   : > { %v3492_v48 = vadd.f32 %v13502_v24, %v17858_v11  ;;  %3384 = vmatpush.bf16.msra.mxu0 %v10039_v47  ;;  %v10207_v40 = vor.u32 %v12737_v14, %v10204_v23  ;;  %v10591_v46 = vor.u32 %v12833_v37, %v10588_v2  ;;  %v3664_v9 = vrot.slane %v3663_v21, 2  ;;  %v10180_v42 = vld [vmem:[#allocation4 + $0x598] sm:$0xf0]  ;;  %v12827_v18 = vld [vmem:[#allocation4 + $0x884] sm:$0xf] }
 0x1fb   : > { %3403 = vmatpush.bf16.msra.mxu1 %v10231_v17  ;;  %v3598_v27 = vrot.slane %v3597_v49, 2  ;;  %v15064_v51 = vperm.slane %v15061_v12, 2  ;;  %v17859_v25 = vsel %vm14881_vm3, %v14785_v38, %v14870_v36  ;;  %v2964_v14 = vadd.f32 %v2963_v44, %v2945_v53  ;;  %v10564_v6 = vld [vmem:[#allocation4 + $0x898] sm:$0xf0]  ;;  %v10348_v37 = vld [vmem:[#allocation4 + $0x6e8] sm:$0xf0]  ;;  %3354 = vmatmul.bf16.vlgmr.msrb.gmra.mxu2 %v14554_v56 }
 0x1fc   : > { %3422 = vmatpush.bf16.msra.mxu2 %v10423_v29  ;;  %v3516_v32 = vmul.f32 0.5, %v3492_v48  ;;  %v15074_v17 = vsel %vm14974_vm7, %v14815_v57, %v17859_v25  ;;  %v12683_v29 = vld [vmem:[#allocation4 + $0x404] sm:$0xf]  ;;  %v17860_v47 = vsel %vm14936_vm6, %v14794_v35, %v14909_v50  ;;  %v2982_v33 = vpop.f32.mrf.mxu2  ;;  %v3001_v57 = vpop.f32.mrf.mxu3  ;;  %v3630_v60 = vrot.slane %v15047_v13, 1  ;;  %v15098_v58 = vld [vmem:[#allocation4 + $0x3d4] sm:$0xf]  ;;  %3373 = vmatmul.bf16.vlgmr.msrb.gmra.mxu3 %v17864_v26 }
 0x1fd   : > { %3441 = vmatpush.bf16.msra.mxu3 %v10615_v61  ;;  %v15084_v16 = vsel %vm14996_vm10, %v14847_v3, %v17860_v47  ;;  %v3599_v38 = vadd.f32 %v3598_v27, %v3597_v49  ;;  %v15091_v35 = vsel %vm15013_vm11, %v14930_v54, %v3790_v59  ;;  %v3698_v50 = vrot.slane %v3579_v22, 4  ;;  %v3013_v15 = vpop.f32.mrf.mxu0  ;;  %v3032_v62 = vpop.f32.mrf.mxu1  ;;  %v15100_v53 = vld [vmem:[#allocation4 + $0x3e8] sm:$0xf0]  ;;  %v15130_v47 = vld [vmem:[#allocation4 + $0x3b8] sm:$0xf0] }
 0x1fe   : > { %v3568_v36 = vmul.f32 %v14849_v52, %v3516_v32  ;;  %3385 = vmatpush.bf16.msra.mxu0 %v10015_v0  ;;  %v2983_v3 = vadd.f32 %v2982_v33, %v2964_v14  ;;  %v15093_v44 = vadd.f32 %v3664_v9, %v3663_v21  ;;  %v3014_v63 = vadd.f32 %v3013_v15, %v15064_v51  ;;  %v17862_v48 = vld [vmem:[#allocation46_spill] sm:$0xff]  ;;  %v15105_v9 = vld [vmem:[#allocation4 + $0x854] sm:$0xf] }
 0x1ff   : > { %3404 = vmatpush.bf16.msra.mxu1 %v10207_v40  ;;  %v10375_v23 = vor.u32 %v12779_v1, %v10372_v45  ;;  %v13504_v7 = vpop.eup %13503  ;;  %v3600_v54 = vrot.slane %v3599_v38, 1  ;;  %v9991_v2 = vor.u32 %v12683_v29, %v9988_v10  ;;  %v10183_v24 = vor.u32 %v12731_v39, %v10180_v42  ;;  %3316 = vmatmul.bf16.vlgmr.msrb.gmra.mxu0 %v17862_v48  ;;  %v12725_v40 = vld [vmem:[#allocation4 + $0x554] sm:$0xf]  ;;  %v10540_v14 = vld [vmem:[#allocation4 + $0x868] sm:$0xf0] }
 0x200   : > { %3423 = vmatpush.bf16.msra.mxu2 %v10399_v30  ;;  %v3632_v61 = vrot.slane %v3568_v36, 4  ;;  %v3002_v59 = vadd.f32 %v3001_v57, %v2983_v3  ;;  %v17861_v21 = vunpack.c.h.bf16 %v14581_v28  ;;  %v3033_v11 = vadd.f32 %v3032_v62, %v3014_v63  ;;  %v17863_v25 = vld [vmem:[#allocation47_spill] sm:$0xff]  ;;  %v15121_v1 = vld [vmem:[#allocation4 + $0x6a4] sm:$0xf]  ;;  %v15123_v45 = vld [vmem:[#allocation4 + $0x6b8] sm:$0xf0] }
 0x201   : > { %3442 = vmatpush.bf16.msra.mxu3 %v10591_v46  ;;  %v10567_v0 = vor.u32 %v12827_v18, %v10564_v6  ;;  %v10156_v46 = vld [vmem:[#allocation4 + $0x568] sm:$0xf0]  ;;  %v15110_v27 = vadd.f32 %v3594_v43, %v15037_v4  ;;  %v15115_v32 = vmul.f32 %v14949_v19, %v3804_v55  ;;  %v15117_v28 = vadd.f32 %v3698_v50, %v3579_v22  ;;  %v15128_v22 = vld [vmem:[#allocation4 + $0x3a4] sm:$0xf]  ;;  %v10132_v10 = vld [vmem:[#allocation4 + $0x538] sm:$0xf0] }
 0x202   : > { %v3633_v30 = vadd.f32 %v3632_v61, %v3568_v36  ;;  %v3498_v49 = vadd.f32 %v13504_v7, %v17861_v21  ;;  %13505 = vtanh.f32 %v3002_v59  ;;  %3335 = vmatmul.bf16.vlgmr.msrb.gmra.mxu1 %v17863_v25  ;;  %v3631_v4 = vadd.f32 %v3630_v60, %v15047_v13  ;;  %3386 = vmatpush.bf16.msra.mxu0 %v9991_v2  ;;  %v15135_v57 = vld [vmem:[#allocation4 + $0x524] sm:$0xf]  ;;  %v10516_v62 = vld [vmem:[#allocation4 + $0x838] sm:$0xf0] }
 0x203   : > { %v10351_v55 = vor.u32 %v15096_v5, %v10348_v37  ;;  %v3601_v36 = vadd.f32 %v3600_v54, %v3599_v38  ;;  %v3813_v56 = vand.u32 2147483648, %v14811_v41  ;;  %3405 = vmatpush.bf16.msra.mxu1 %v10183_v24  ;;  %v9967_v33 = vor.u32 %v15098_v58, %v15100_v53  ;;  %v12815_v15 = vld [vmem:[#allocation4 + $0x824] sm:$0xf]  ;;  %v15145_v37 = vld [vmem:[#allocation4 + $0x674] sm:$0xf] }
 0x204   : > { %v3634_v43 = vrot.slane %v3633_v30, 2  ;;  %v3522_v29 = vmul.f32 0.5, %v3498_v49  ;;  %3424 = vmatpush.bf16.msra.mxu2 %v10375_v23  ;;  %v10159_v13 = vor.u32 %v12725_v40, %v10156_v46  ;;  %v3666_v39 = vrot.slane %v15093_v44, 1  ;;  %v3051_v50 = vpop.f32.mrf.mxu2  ;;  %v3070_v3 = vpop.f32.mrf.mxu3  ;;  %v10300_v24 = vld [vmem:[#allocation4 + $0x688] sm:$0xf0] }
 0x205   : > { %3443 = vmatpush.bf16.msra.mxu3 %v10567_v0  ;;  %v10543_v38 = vor.u32 %v15105_v9, %v10540_v14  ;;  %v3700_v18 = vrot.slane %v15117_v28, 2  ;;  %v3052_v6 = vadd.f32 %v3051_v50, %v3033_v11  ;;  %v3015_v61 = vpop.f32.mrf.mxu0  ;;  %v3034_v63 = vpop.f32.mrf.mxu1  ;;  %v10327_v23 = vor.u32 %v15121_v1, %v15123_v45  ;;  %v15149_v58 = vld [vmem:[#allocation4 + $0x374] sm:$0xf]  ;;  %v9916_v11 = vld [vmem:[#allocation4 + $0x388] sm:$0xf0] }
 0x206   : > { %v3635_v42 = vadd.f32 %v3634_v43, %v3633_v30  ;;  %v3574_v60 = vmul.f32 %v14915_v34, %v3522_v29  ;;  %v9943_v5 = vor.u32 %v15128_v22, %v15130_v47  ;;  %v3016_v59 = vadd.f32 %v3015_v61, %v15064_v51  ;;  %3387 = vmatpush.bf16.msra.mxu0 %v9967_v33  ;;  %v12713_v0 = vld [vmem:[#allocation4 + $0x4f4] sm:$0xf]  ;;  %v10108_v40 = vld [vmem:[#allocation4 + $0x508] sm:$0xf0]  ;;  %v15158_v26 = vld [vmem:[#allocation4 + $0x644] sm:$0xf] }
 0x207   : > { %v10135_v2 = vor.u32 %v15135_v57, %v10132_v10  ;;  %v3757_v30 = vmul.f32 %v15074_v17, %v3601_v36  ;;  %v15154_v21 = vadd.f32 %v3070_v3, %v3052_v6  ;;  %3406 = vmatpush.bf16.msra.mxu1 %v10159_v13  ;;  %v10519_v49 = vor.u32 %v12815_v15, %v10516_v62  ;;  %v12809_v43 = vld [vmem:[#allocation4 + $0x7f4] sm:$0xf]  ;;  %v10492_v29 = vld [vmem:[#allocation4 + $0x808] sm:$0xf0]  ;;  %v15169_v33 = vld [vmem:[#allocation4 + $0x658] sm:$0xf0] }
 0x208   : > { %v3636_v7 = vrot.slane %v3635_v42, 1  ;;  %v3668_v54 = vrot.slane %v3574_v60, 4  ;;  %3425 = vmatpush.bf16.msra.mxu2 %v10351_v55  ;;  %v13506_v53 = vpop.eup %13505  ;;  %v17865_v14 = vunpack.c.h.bf16 %v14586_v31  ;;  %v3035_v45 = vadd.f32 %v3034_v63, %v3016_v59  ;;  %v15171_v31 = vld [vmem:[#allocation4 + $0x344] sm:$0xf]  ;;  %v15173_v13 = vld [vmem:[#allocation4 + $0x358] sm:$0xf0] }
 0x209   : > { %3444 = vmatpush.bf16.msra.mxu3 %v10543_v38  ;;  %v3756_v55 = vmul.f32 %v15074_v17, %v15110_v27  ;;  %v3776_v22 = vmul.f32 %v15084_v16, %v3631_v4  ;;  %v15164_v47 = vadd.f32 %v3666_v39, %v15093_v44  ;;  %v15167_v36 = vadd.f32 %v3700_v18, %v15117_v28  ;;  %v12707_v4 = vld [vmem:[#allocation4 + $0x4c4] sm:$0xf]  ;;  %v10468_v61 = vld [vmem:[#allocation4 + $0x7d8] sm:$0xf0] }
 0x20a   : > { %v3637_v46 = vadd.f32 %v3636_v7, %v3635_v42  ;;  %v3669_v9 = vadd.f32 %v3668_v54, %v3574_v60  ;;  %v3504_v1 = vadd.f32 %v13506_v53, %v17865_v14  ;;  %v10303_v27 = vor.u32 %v15145_v37, %v10300_v24  ;;  %v10084_v60 = vld [vmem:[#allocation4 + $0x4d8] sm:$0xf0]  ;;  %3388 = vmatpush.bf16.msra.mxu0 %v9943_v5  ;;  %v12803_v6 = vld [vmem:[#allocation4 + $0x7c4] sm:$0xf]  ;;  %v12749_v53 = vld [vmem:[#allocation4 + $0x614] sm:$0xf] }
 0x20b   : > { %v3846_v44 = vrot.slane %v3757_v30, 4  ;;  %3407 = vmatpush.bf16.msra.mxu1 %v10135_v2  ;;  %v9919_v28 = vor.u32 %v15149_v58, %v9916_v11  ;;  %v10111_v39 = vor.u32 %v12713_v0, %v10108_v40  ;;  %v10495_v18 = vor.u32 %v12809_v43, %v10492_v29  ;;  %v10252_v40 = vld [vmem:[#allocation4 + $0x628] sm:$0xf0]  ;;  %v12701_v29 = vld [vmem:[#allocation4 + $0x494] sm:$0xf]  ;;  %3359 = vmatmul.bf16.gmra.mxu2 %v14610_v8 }
 0x20c   : > { %v3777_v57 = vmul.f32 %v15084_v16, %v3637_v46  ;;  %v3670_v10 = vrot.slane %v3669_v9, 2  ;;  %v3528_v42 = vmul.f32 0.5, %v3504_v1  ;;  %3426 = vmatpush.bf16.msra.mxu2 %v10327_v23  ;;  %v3053_v15 = vpop.f32.mrf.mxu2  ;;  %v3072_v62 = vpop.f32.mrf.mxu3  ;;  %v10279_v5 = vor.u32 %v15158_v26, %v15169_v33  ;;  %v12653_v46 = vld [vmem:[#allocation4 + $0x314] sm:$0xf]  ;;  %v9868_v43 = vld [vmem:[#allocation4 + $0x328] sm:$0xf0] }
 0x20d   : > { %3445 = vmatpush.bf16.msra.mxu3 %v10519_v49  ;;  %v3054_v63 = vadd.f32 %v3053_v15, %v3035_v45  ;;  %v3018_v23 = vpop.f32.mrf.mxu0  ;;  %v3037_v37 = vpop.f32.mrf.mxu1  ;;  %v9895_v7 = vor.u32 %v15171_v31, %v15173_v13  ;;  %v10087_v54 = vor.u32 %v12707_v4, %v10084_v60  ;;  %v3859_v30 = vsel %vm3858_vm13, %v3756_v55, %v3846_v44  ;;  %v17866_v45 = vld [vmem:[#allocation50_spill] sm:$0xff]  ;;  %v17867_v31 = vld [vmem:[#allocation51_spill] sm:$0xff]  ;;  %v17870_v4 = vld [vmem:[#allocation41_spill] sm:$0xff] }
 0x20e   : > { %v3849_v50 = vrot.slane %v3777_v57, 4  ;;  %v3671_v3 = vadd.f32 %v3670_v10, %v3669_v9  ;;  %v3580_v38 = vmul.f32 %v15054_v20, %v3528_v42  ;;  %v3019_v58 = vadd.f32 %v3018_v23, %v15064_v51  ;;  %3389 = vmatpush.bf16.msra.mxu0 %v9919_v28  ;;  %v10060_v26 = vld [vmem:[#allocation4 + $0x4a8] sm:$0xf0]  ;;  %v12797_v13 = vld [vmem:[#allocation4 + $0x794] sm:$0xf]  ;;  %3378 = vmatmul.bf16.gmra.mxu3 %v17870_v4 }
 0x20f   : > { %v15186_v11 = vadd.f32 %v3072_v62, %v3054_v63  ;;  %3408 = vmatpush.bf16.msra.mxu1 %v10111_v39  ;;  %v10471_v0 = vor.u32 %v12803_v6, %v10468_v61  ;;  %3321 = vmatmul.bf16.gmra.mxu0 %v17866_v45  ;;  %v3806_v55 = vadd.f32 %v14949_v19, %v15115_v32  ;;  %v10444_v57 = vld [vmem:[#allocation4 + $0x7a8] sm:$0xf0]  ;;  %v3702_v39 = vrot.slane %v15167_v36, 1 }
 0x210   : > { %v3862_v59 = vsel %vm3858_vm13, %v3776_v22, %v3849_v50  ;;  %v3672_v2 = vrot.slane %v3671_v3, 1  ;;  %v3704_v24 = vrot.slane %v3580_v38, 4  ;;  %3427 = vmatpush.bf16.msra.mxu2 %v10303_v27  ;;  %v3038_v1 = vadd.f32 %v3037_v37, %v3019_v58  ;;  %v17873_v10 = vld [vmem:[#allocation42_spill] sm:$0xff] }
 0x211   : > { %v3871_v49 = vrot.slane %v3862_v59, 7  ;;  %3446 = vmatpush.bf16.msra.mxu3 %v10495_v18  ;;  %v3811_v22 = vand.u32 2147483647, %v14811_v41  ;;  %v10255_v60 = vor.u32 %v12749_v53, %v10252_v40  ;;  %v3796_v8 = vmul.f32 %v15091_v35, %v15164_v47 }
 0x212   : > { %v3673_v9 = vadd.f32 %v3672_v2, %v3671_v3  ;;  %v3705_v14 = vadd.f32 %v3704_v24, %v3580_v38  ;;  %3340 = vmatmul.bf16.gmra.mxu1 %v17867_v31  ;;  %3390 = vmatpush.bf16.msra.mxu0 %v9895_v7  ;;  %v9871_v44 = vor.u32 %v12653_v46, %v9868_v43  ;;  %v3814_v6 = vor.u32 1.1754944e-38, %v3813_v56  ;;  %v17871_v46 = vld [vmem:[#allocation37_spill] sm:$0xff] }
 0x213   : > { %v3873_v33 = vsel %vm3872_vm14, %v3871_v49, %v3859_v30  ;;  %3409 = vmatpush.bf16.msra.mxu1 %v10087_v54  ;;  %v10063_v28 = vor.u32 %v12701_v29, %v10060_v26  ;;  %v10447_v62 = vor.u32 %v12797_v13, %v10444_v57  ;;  %v3810_v18 = vsel %vm15199_vm2, %v14949_v19, %v3806_v55 }
 0x214   : > { %v3875_v32 = vsel %vm3874_vm1, %v3871_v49, %v3873_v33  ;;  %v3797_v42 = vmul.f32 %v15091_v35, %v3673_v9  ;;  %v3706_v27 = vrot.slane %v3705_v14, 2  ;;  %3428 = vmatpush.bf16.msra.mxu2 %v10279_v5  ;;  %v3056_v38 = vpop.f32.mrf.mxu2  ;;  %v3075_v15 = vpop.f32.mrf.mxu3  ;;  %vm3812_vm3 = vcmp.eq.f32.partialorder %v3811_v22, 8.507059e+37 }
 0x215   : > { %3447 = vmatpush.bf16.msra.mxu3 %v10471_v0  ;;  %v3057_v47 = vadd.f32 %v3056_v38, %v3038_v1  ;;  %v3020_v61 = vpop.f32.mrf.mxu0  ;;  %v15214_v63 = vpop.f32.mrf.mxu1  ;;  %v3703_v19 = vadd.f32 %v3702_v39, %v15167_v36  ;;  %v15218_v41 = vsel %vm3812_vm3, %v3814_v6, %v3810_v18  ;;  %vm3882_vm6 = vcmask 1043459  }
 0x216   : > { %v3852_v50 = vrot.slane %v3797_v42, 4  ;;  %v3707_v3 = vadd.f32 %v3706_v27, %v3705_v14  ;;  %3391 = vmatpush.bf16.msra.mxu0 %v9871_v44  ;;  %vm3884_vm7 = vcmask 1047559   ;;  %v17872_v14 = vld [vmem:[#allocation38_spill] sm:$0xff]  ;;  %v3021_v39 = vadd.f32 %v3020_v61, %v15064_v51 }
 0x217   : > { %v3076_v7 = vadd.f32 %v3075_v15, %v3057_v47  ;;  %3410 = vmatpush.bf16.msra.mxu1 %v10063_v28  ;;  %v3816_v24 = vmul.f32 %v15218_v41, %v3703_v19 }
 0x218   : > { %v3865_v23 = vsel %vm3858_vm13, %v3796_v8, %v3852_v50  ;;  %v3708_v37 = vrot.slane %v3707_v3, 1  ;;  %3429 = vmatpush.bf16.msra.mxu2 %v10255_v60 }
 0x219   : > { %v3876_v5 = vrot.slane %v3865_v23, 6  ;;  %3448 = vmatpush.bf16.msra.mxu3 %v10447_v62  ;;  %v3040_v62 = vadd.f32 %v15214_v63, %v3021_v39 }
 0x21a   : > { %v3709_v54 = vadd.f32 %v3708_v37, %v3707_v3 }
 0x21b   : > { %v3878_v56 = vsel %vm3877_vm4, %v3876_v5, %v3875_v32  ;;  %3430 = vmatmul.bf16.vlgmr.msra.gmra.mxu2 %v17862_v48  ;;  %v17874_v32 = vld [vmem:[#allocation43_spill] sm:$0xff] }
 0x21c   : > { %v3880_v59 = vsel %vm3879_vm5, %v3876_v5, %v3878_v56  ;;  %v3817_v2 = vmul.f32 %v15218_v41, %v3709_v54  ;;  %v3058_v53 = vpop.f32.mrf.mxu2  ;;  %v3077_v30 = vpop.f32.mrf.mxu3 }
 0x21d   : > { %v3089_v49 = vpop.f32.mrf.mxu0  ;;  %v3108_v0 = vpop.f32.mrf.mxu1 }
 0x21e   : > { %v3855_v58 = vrot.slane %v3817_v2, 4  ;;  %3449 = vmatmul.bf16.vlgmr.msra.gmra.mxu3 %v17863_v25  ;;  %v1327_v25 = vperm.slane %v15061_v12, 3  ;;  %v3090_v8 = vadd.f32 %v3089_v49, %v15154_v21 }
 0x21f   : > { %3392 = vmatmul.bf16.vlgmr.msra.gmra.mxu0 %v17871_v46 }
 0x220   : > { %v3868_v40 = vsel %vm3858_vm13, %v3816_v24, %v3855_v58  ;;  %v3109_v50 = vadd.f32 %v3108_v0, %v3090_v8  ;;  %v17875_v24 = vld [vmem:[#allocation35_spill] sm:$0xff]  ;;  %v17877_v0 = vld [vmem:[#allocation34_spill] sm:$0xff] }
 0x221   : > { %v3881_v36 = vrot.slane %v3868_v40, 5  ;;  %v17876_v58 = vunpack.c.l.bf16 %v17875_v24  ;;  %v17878_v40 = vunpack.c.l.bf16 %v17877_v0 }
 0x222   : > { %3411 = vmatmul.bf16.vlgmr.msra.gmra.mxu1 %v17872_v14 }
 0x223   : > { %v3883_v9 = vsel %vm3882_vm6, %v3881_v36, %v3880_v59 }
 0x224   : > { %v3885_v1 = vsel %vm3884_vm7, %v3881_v36, %v3883_v9  ;;  %v3127_v43 = vpop.f32.mrf.mxu2  ;;  %v3146_v29 = vpop.f32.mrf.mxu3 }
 0x225   : > { %3907 = vst [vmem:[#allocation2 + $0x10] sm:$0xff] %v3885_v1  ;;  %v3091_v26 = vpop.f32.mrf.mxu0  ;;  %v3110_v55 = vpop.f32.mrf.mxu1  ;;  %v3128_v44 = vadd.f32 %v3127_v43, %v1327_v25 }
 0x226   : > { %v3092_v27 = vadd.f32 %v3091_v26, %v15186_v11  ;;  %v3059_v11 = vadd.f32 %v3058_v53, %v3040_v62 }
 0x228   : > { %v3111_v28 = vadd.f32 %v3110_v55, %v3092_v27  ;;  %v3078_v5 = vadd.f32 %v3077_v30, %v3059_v11 }
 0x22a   : > { %13507 = vtanh.f32 %v3111_v28  ;;  %v17882_v28 = vld [vmem:[#allocation52_spill] sm:$0xff] }
 0x22b   : > { %3435 = vmatmul.bf16.gmra.mxu2 %v17866_v45  ;;  %v3147_v45 = vadd.f32 %v3146_v29, %v3128_v44  ;;  %13509 = vtanh.f32 %v3109_v50 }
 0x22c   : > { %v3129_v22 = vpop.f32.mrf.mxu2  ;;  %v3148_v33 = vpop.f32.mrf.mxu3 }
 0x22d   : > { %v3094_v13 = vpop.f32.mrf.mxu0  ;;  %v3113_v57 = vpop.f32.mrf.mxu1  ;;  %v3130_v47 = vadd.f32 %v3129_v22, %v1327_v25 }
 0x22e   : > { %3454 = vmatmul.bf16.gmra.mxu3 %v17867_v31  ;;  %v3095_v18 = vadd.f32 %v3094_v13, %v3076_v7 }
 0x22f   : > { %3397 = vmatmul.bf16.gmra.mxu0 %v17873_v10  ;;  %v3149_v61 = vadd.f32 %v3148_v33, %v3130_v47 }
 0x230   : > { %v3114_v23 = vadd.f32 %v3113_v57, %v3095_v18  ;;  %v13508_v21 = vpop.eup %13507 }
 0x231   : > { %v13510_v2 = vpop.eup %13509  ;;  %v3493_v49 = vadd.f32 %v13508_v21, %v17876_v58 }
 0x232   : > { %3416 = vmatmul.bf16.gmra.mxu1 %v17874_v32  ;;  %13511 = vtanh.f32 %v3114_v23  ;;  %v3487_v36 = vadd.f32 %v13510_v2, %v17878_v40  ;;  %v17879_v32 = vld [vmem:[#allocation39_spill] sm:$0xff]  ;;  %v15257_v40 = vperm.slane %v15061_v12, 4 }
 0x233   : > { %v3517_v30 = vmul.f32 0.5, %v3493_v49  ;;  %v17880_v27 = vunpack.c.l.bf16 %v17879_v32  ;;  %v17885_v49 = vunpack.c.h.bf16 %v17875_v24 }
 0x234   : > { %v3132_v48 = vpop.f32.mrf.mxu2  ;;  %v3151_v42 = vpop.f32.mrf.mxu3  ;;  %v3511_v26 = vmul.f32 0.5, %v3487_v36 }
 0x235   : > { %v3096_v4 = vpop.f32.mrf.mxu0  ;;  %v3115_v60 = vpop.f32.mrf.mxu1  ;;  %v3133_v46 = vadd.f32 %v3132_v48, %v1327_v25  ;;  %v3569_v57 = vmul.f32 %v14849_v52, %v3517_v30 }
 0x236   : > { %v3097_v63 = vadd.f32 %v3096_v4, %v3078_v5  ;;  %v3563_v39 = vmul.f32 %v17882_v28, %v3511_v26 }
 0x237   : > { %v3152_v55 = vadd.f32 %v3151_v42, %v3133_v46  ;;  %v3638_v42 = vrot.slane %v3569_v57, 4 }
 0x238   : > { %v3116_v9 = vadd.f32 %v3115_v60, %v3097_v63  ;;  %v13512_v1 = vpop.eup %13511  ;;  %v17881_v60 = vunpack.c.h.bf16 %v17877_v0  ;;  %v3602_v47 = vrot.slane %v3563_v39, 4 }
 0x239   : > { %v3499_v4 = vadd.f32 %v13512_v1, %v17880_v27 }
 0x23c   : > { %v3134_v3 = vpop.f32.mrf.mxu2  ;;  %v3153_v38 = vpop.f32.mrf.mxu3 }
 0x23d   : > { %v3165_v31 = vpop.f32.mrf.mxu0  ;;  %v3184_v15 = vpop.f32.mrf.mxu1  ;;  %v3135_v50 = vadd.f32 %v3134_v3, %v1327_v25  ;;  %v17883_v3 = vld [vmem:[#allocation40_spill] sm:$0xff] }
 0x23e   : > { %v3166_v6 = vadd.f32 %v3165_v31, %v3147_v45  ;;  %v3523_v31 = vmul.f32 0.5, %v3499_v4 }
 0x23f   : > { %v3154_v23 = vadd.f32 %v3153_v38, %v3135_v50 }
 0x240   : > { %v3185_v37 = vadd.f32 %v3184_v15, %v3166_v6  ;;  %v3575_v25 = vmul.f32 %v14915_v34, %v3523_v31 }
 0x242   : > { %v3674_v36 = vrot.slane %v3575_v25, 4 }
 0x244   : > { %v3203_v19 = vpop.f32.mrf.mxu2  ;;  %v3222_v51 = vpop.f32.mrf.mxu3 }
 0x245   : > { %v3204_v54 = vadd.f32 %v3203_v19, %v3185_v37  ;;  %v3167_v56 = vpop.f32.mrf.mxu0  ;;  %v3186_v59 = vpop.f32.mrf.mxu1  ;;  %v3639_v19 = vadd.f32 %v3638_v42, %v3569_v57 }
 0x246   : > { %v3168_v53 = vadd.f32 %v3167_v56, %v3149_v61 }
 0x247   : > { %v3223_v7 = vadd.f32 %v3222_v51, %v3204_v54  ;;  %v17884_v54 = vunpack.c.l.bf16 %v17883_v3  ;;  %v3640_v38 = vrot.slane %v3639_v19, 2 }
 0x248   : > { %v3187_v14 = vadd.f32 %v3186_v59, %v3168_v53 }
 0x249   : > { %13513 = vtanh.f32 %v3223_v7  ;;  %v3603_v7 = vadd.f32 %v3602_v47, %v3563_v39 }
 0x24a   : > { %13515 = vtanh.f32 %v3116_v9 }
 0x24c   : > { %v3205_v43 = vpop.f32.mrf.mxu2  ;;  %v3224_v29 = vpop.f32.mrf.mxu3 }
 0x24d   : > { %v3206_v22 = vadd.f32 %v3205_v43, %v3187_v14  ;;  %v3170_v33 = vpop.f32.mrf.mxu0  ;;  %v3189_v13 = vpop.f32.mrf.mxu1 }
 0x24e   : > { %v3171_v8 = vadd.f32 %v3170_v33, %v3152_v55 }
 0x24f   : > { %v13514_v10 = vpop.eup %13513  ;;  %v3225_v48 = vadd.f32 %v3224_v29, %v3206_v22  ;;  %v3604_v29 = vrot.slane %v3603_v7, 2  ;;  %v3641_v22 = vadd.f32 %v3640_v38, %v3639_v19 }
 0x250   : > { %v3488_v44 = vadd.f32 %v13514_v10, %v17881_v60  ;;  %v3190_v15 = vadd.f32 %v3189_v13, %v3171_v8  ;;  %v13516_v62 = vpop.eup %13515  ;;  %v3675_v10 = vadd.f32 %v3674_v36, %v3575_v25  ;;  %v17886_v60 = vunpack.c.h.bf16 %v17879_v32 }
 0x251   : > { %13517 = vtanh.f32 %v3225_v48  ;;  %v3505_v56 = vadd.f32 %v13516_v62, %v17884_v54  ;;  %v3605_v50 = vadd.f32 %v3604_v29, %v3603_v7  ;;  %v3642_v42 = vrot.slane %v3641_v22, 1 }
 0x252   : > { %v3512_v45 = vmul.f32 0.5, %v3488_v44  ;;  %v17887_v7 = vunpack.c.h.bf16 %v17883_v3 }
 0x253   : > { %v3529_v46 = vmul.f32 0.5, %v3505_v56  ;;  %v3643_v32 = vadd.f32 %v3642_v42, %v3641_v22 }
 0x254   : > { %v3564_v18 = vmul.f32 %v17882_v28, %v3512_v45  ;;  %v3208_v6 = vpop.f32.mrf.mxu2  ;;  %v3227_v11 = vpop.f32.mrf.mxu3 }
 0x255   : > { %v3209_v21 = vadd.f32 %v3208_v6, %v3190_v15  ;;  %v3172_v37 = vpop.f32.mrf.mxu0  ;;  %v3191_v5 = vpop.f32.mrf.mxu1  ;;  %v3581_v27 = vmul.f32 %v15054_v20, %v3529_v46  ;;  %v3676_v15 = vrot.slane %v3675_v10, 2 }
 0x256   : > { %v3608_v51 = vrot.slane %v3564_v18, 4  ;;  %v3173_v2 = vadd.f32 %v3172_v37, %v3154_v23 }
 0x257   : > { %v13518_v61 = vpop.eup %13517  ;;  %v3228_v59 = vadd.f32 %v3227_v11, %v3209_v21  ;;  %v3710_v62 = vrot.slane %v3581_v27, 4  ;;  %v3606_v21 = vrot.slane %v3605_v50, 1  ;;  %v3677_v56 = vadd.f32 %v3676_v15, %v3675_v10 }
 0x258   : > { %v3609_v58 = vadd.f32 %v3608_v51, %v3564_v18  ;;  %v3494_v63 = vadd.f32 %v13518_v61, %v17885_v49  ;;  %v3192_v30 = vadd.f32 %v3191_v5, %v3173_v2 }
 0x259   : > { %13519 = vtanh.f32 %v3228_v59  ;;  %v3711_v59 = vadd.f32 %v3710_v62, %v3581_v27 }
 0x25a   : > { %v3610_v53 = vrot.slane %v3609_v58, 2  ;;  %v3518_v0 = vmul.f32 0.5, %v3494_v63 }
 0x25c   : > { %v3611_v9 = vadd.f32 %v3610_v53, %v3609_v58  ;;  %v3570_v14 = vmul.f32 %v14849_v52, %v3518_v0  ;;  %v3210_v1 = vpop.f32.mrf.mxu2  ;;  %v3229_v43 = vpop.f32.mrf.mxu3  ;;  %v3607_v0 = vadd.f32 %v3606_v21, %v3605_v50 }
 0x25d   : > { %v3211_v26 = vadd.f32 %v3210_v1, %v3192_v30  ;;  %v3241_v24 = vpop.f32.mrf.mxu0  ;;  %v3260_v55 = vpop.f32.mrf.mxu1  ;;  %v3712_v1 = vrot.slane %v3711_v59, 2 }
 0x25e   : > { %v3644_v33 = vrot.slane %v3570_v14, 4  ;;  %v3242_v13 = vadd.f32 %v3241_v24, %v15257_v40  ;;  %v3612_v4 = vrot.slane %v3611_v9, 1  ;;  %v3758_v3 = vmul.f32 %v15074_v17, %v3607_v0 }
 0x25f   : > { %v13520_v57 = vpop.eup %13519  ;;  %v3230_v48 = vadd.f32 %v3229_v43, %v3211_v26 }
 0x260   : > { %v3645_v8 = vadd.f32 %v3644_v33, %v3570_v14  ;;  %v3500_v44 = vadd.f32 %v13520_v57, %v17886_v60  ;;  %v3261_v39 = vadd.f32 %v3260_v55, %v3242_v13  ;;  %v3613_v18 = vadd.f32 %v3612_v4, %v3611_v9 }
 0x261   : > { %13521 = vtanh.f32 %v3230_v48  ;;  %v3778_v9 = vmul.f32 %v15084_v16, %v3643_v32  ;;  %v3678_v14 = vrot.slane %v3677_v56, 1  ;;  %v3713_v60 = vadd.f32 %v3712_v1, %v3711_v59 }
 0x262   : > { %v3646_v45 = vrot.slane %v3645_v8, 2  ;;  %v3524_v31 = vmul.f32 0.5, %v3500_v44  ;;  %v3759_v2 = vmul.f32 %v15074_v17, %v3613_v18 }
 0x264   : > { %v3647_v6 = vadd.f32 %v3646_v45, %v3645_v8  ;;  %v3576_v11 = vmul.f32 %v14915_v34, %v3524_v31  ;;  %v3279_v47 = vpop.f32.mrf.mxu2  ;;  %v3298_v23 = vpop.f32.mrf.mxu3  ;;  %v3847_v43 = vrot.slane %v3759_v2, 4  ;;  %v3679_v8 = vadd.f32 %v3678_v14, %v3677_v56 }
 0x265   : > { %v3280_v37 = vadd.f32 %v3279_v47, %v3261_v39  ;;  %v3243_v5 = vpop.f32.mrf.mxu0  ;;  %v3262_v19 = vpop.f32.mrf.mxu1  ;;  %v3714_v47 = vrot.slane %v3713_v60, 1 }
 0x266   : > { %v3648_v51 = vrot.slane %v3647_v6, 1  ;;  %v3680_v61 = vrot.slane %v3576_v11, 4  ;;  %v3244_v25 = vadd.f32 %v3243_v5, %v15257_v40  ;;  %v3860_v50 = vsel %vm3858_vm13, %v3758_v3, %v3847_v43 }
 0x267   : > { %v13522_v54 = vpop.eup %13521  ;;  %v15267_v58 = vadd.f32 %v3298_v23, %v3280_v37  ;;  %v3715_v59 = vadd.f32 %v3714_v47, %v3713_v60 }
 0x268   : > { %v3649_v49 = vadd.f32 %v3648_v51, %v3647_v6  ;;  %v3681_v63 = vadd.f32 %v3680_v61, %v3576_v11  ;;  %v3506_v38 = vadd.f32 %v13522_v54, %v17887_v7  ;;  %v3263_v53 = vadd.f32 %v3262_v19, %v3244_v25 }
 0x269   : > { %v3798_v11 = vmul.f32 %v15091_v35, %v3679_v8 }
 0x26a   : > { %v3779_v36 = vmul.f32 %v15084_v16, %v3649_v49  ;;  %v3682_v46 = vrot.slane %v3681_v63, 2  ;;  %v3530_v30 = vmul.f32 0.5, %v3506_v38  ;;  %v3818_v38 = vmul.f32 %v15218_v41, %v3715_v59 }
 0x26c   : > { %v3850_v29 = vrot.slane %v3779_v36, 4  ;;  %v3683_v26 = vadd.f32 %v3682_v46, %v3681_v63  ;;  %v3582_v24 = vmul.f32 %v15054_v20, %v3530_v30  ;;  %v3281_v55 = vpop.f32.mrf.mxu2  ;;  %v3300_v22 = vpop.f32.mrf.mxu3 }
 0x26d   : > { %v3282_v33 = vadd.f32 %v3281_v55, %v3263_v53  ;;  %v3246_v13 = vpop.f32.mrf.mxu0  ;;  %v3265_v57 = vpop.f32.mrf.mxu1 }
 0x26e   : > { %v3863_v10 = vsel %vm3858_vm13, %v3778_v9, %v3850_v29  ;;  %v3684_v27 = vrot.slane %v3683_v26, 1  ;;  %v3716_v4 = vrot.slane %v3582_v24, 4  ;;  %v3247_v48 = vadd.f32 %v3246_v13, %v15257_v40 }
 0x26f   : > { %v3886_v44 = vrot.slane %v3863_v10, 7  ;;  %v3301_v39 = vadd.f32 %v3300_v22, %v3282_v33  ;;  %v1329_v10 = vperm.slane %v15061_v12, 5 }
 0x270   : > { %v3685_v42 = vadd.f32 %v3684_v27, %v3683_v26  ;;  %v3717_v45 = vadd.f32 %v3716_v4, %v3582_v24  ;;  %v3266_v31 = vadd.f32 %v3265_v57, %v3247_v48 }
 0x271   : > { %v3887_v15 = vsel %vm3872_vm14, %v3886_v44, %v3860_v50 }
 0x272   : > { %v3888_v62 = vsel %vm3874_vm1, %v3886_v44, %v3887_v15  ;;  %v3799_v18 = vmul.f32 %v15091_v35, %v3685_v42  ;;  %v3718_v6 = vrot.slane %v3717_v45, 2 }
 0x274   : > { %v3853_v23 = vrot.slane %v3799_v18, 4  ;;  %v3719_v21 = vadd.f32 %v3718_v6, %v3717_v45  ;;  %v3284_v37 = vpop.f32.mrf.mxu2  ;;  %v3303_v5 = vpop.f32.mrf.mxu3 }
 0x275   : > { %v3285_v19 = vadd.f32 %v3284_v37, %v3266_v31  ;;  %v3248_v32 = vpop.f32.mrf.mxu0  ;;  %v3267_v51 = vpop.f32.mrf.mxu1 }
 0x276   : > { %v3866_v61 = vsel %vm3858_vm13, %v3798_v11, %v3853_v23  ;;  %v3720_v25 = vrot.slane %v3719_v21, 1  ;;  %v3249_v42 = vadd.f32 %v3248_v32, %v15257_v40 }
 0x277   : > { %v3889_v54 = vrot.slane %v3866_v61, 6  ;;  %v3304_v56 = vadd.f32 %v3303_v5, %v3285_v19 }
 0x278   : > { %v3721_v2 = vadd.f32 %v3720_v25, %v3719_v21  ;;  %v3268_v6 = vadd.f32 %v3267_v51, %v3249_v42 }
 0x279   : > { %v3890_v49 = vsel %vm3877_vm4, %v3889_v54, %v3888_v62 }
 0x27a   : > { %v3891_v63 = vsel %vm3879_vm5, %v3889_v54, %v3890_v49  ;;  %v3819_v7 = vmul.f32 %v15218_v41, %v3721_v2  ;;  %v17888_v54 = vld [vmem:[#allocation45_spill] sm:$0xff] }
 0x27b   : > { %v17889_v59 = vunpack.c.l.bf16 %v17888_v54 }
 0x27c   : > { %v3856_v53 = vrot.slane %v3819_v7, 4  ;;  %v3286_v0 = vpop.f32.mrf.mxu2  ;;  %v3305_v36 = vpop.f32.mrf.mxu3 }
 0x27d   : > { %v3317_v46 = vpop.f32.mrf.mxu0 }
 0x27e   : > { %v3869_v30 = vsel %vm3858_vm13, %v3818_v38, %v3856_v53  ;;  %v3318_v60 = vadd.f32 %v3317_v46, %v15267_v58  ;;  %v17890_v53 = vld [vmem:[#allocation44_spill] sm:$0xff] }
 0x27f   : > { %v3336_v9 = vpop.f32.mrf.mxu1  ;;  %v3892_v14 = vrot.slane %v3869_v30, 5 }
 0x280   : > { %v3337_v31 = vadd.f32 %v3336_v9, %v3318_v60  ;;  %v17894_v60 = vunpack.c.h.bf16 %v17890_v53 }
 0x281   : > { %v3893_v1 = vsel %vm3882_vm6, %v3892_v14, %v3891_v63 }
 0x282   : > { %v3894_v43 = vsel %vm3884_vm7, %v3892_v14, %v3893_v1 }
 0x283   : > { %3908 = vst [vmem:[#allocation2] sm:$0xff] %v3894_v43 }
 0x284   : > { %v3355_v29 = vpop.f32.mrf.mxu2  ;;  %v3374_v26 = vpop.f32.mrf.mxu3 }
 0x285   : > { %v3319_v24 = vpop.f32.mrf.mxu0  ;;  %v3356_v44 = vadd.f32 %v3355_v29, %v1329_v10 }
 0x286   : > { %v3320_v27 = vadd.f32 %v3319_v24, %v3301_v39  ;;  %v3287_v39 = vadd.f32 %v3286_v0, %v3268_v6  ;;  %v17891_v0 = vunpack.c.l.bf16 %v17890_v53 }
 0x287   : > { %v3338_v55 = vpop.f32.mrf.mxu1  ;;  %v3375_v15 = vadd.f32 %v3374_v26, %v3356_v44 }
 0x288   : > { %v3339_v50 = vadd.f32 %v3338_v55, %v3320_v27  ;;  %v3306_v5 = vadd.f32 %v3305_v36, %v3287_v39 }
 0x28a   : > { %13523 = vtanh.f32 %v3339_v50 }
 0x28b   : > { %13525 = vtanh.f32 %v3337_v31 }
 0x28c   : > { %v3357_v22 = vpop.f32.mrf.mxu2  ;;  %v3376_v3 = vpop.f32.mrf.mxu3 }
 0x28d   : > { %v3322_v33 = vpop.f32.mrf.mxu0  ;;  %v3358_v23 = vadd.f32 %v3357_v22, %v1329_v10 }
 0x28e   : > { %v3323_v11 = vadd.f32 %v3322_v33, %v3304_v56  ;;  %v17892_v33 = vld [vmem:[#allocation48_spill] sm:$0xff] }
 0x28f   : > { %v3341_v13 = vpop.f32.mrf.mxu1  ;;  %v3377_v61 = vadd.f32 %v3376_v3, %v3358_v23 }
 0x290   : > { %v3342_v21 = vadd.f32 %v3341_v13, %v3323_v11  ;;  %v13524_v37 = vpop.eup %13523  ;;  %v17893_v13 = vunpack.c.l.bf16 %v17892_v33 }
 0x291   : > { %v3495_v2 = vadd.f32 %v13524_v37, %v17889_v59  ;;  %v13526_v49 = vpop.eup %13525 }
 0x292   : > { %13527 = vtanh.f32 %v3342_v21  ;;  %v3489_v46 = vadd.f32 %v13526_v49, %v17891_v0 }
 0x293   : > { %v3519_v36 = vmul.f32 0.5, %v3495_v2  ;;  %v17897_v2 = vunpack.c.h.bf16 %v17888_v54 }
 0x294   : > { %v3360_v57 = vpop.f32.mrf.mxu2  ;;  %v3379_v4 = vpop.f32.mrf.mxu3  ;;  %v3513_v55 = vmul.f32 0.5, %v3489_v46 }
 0x295   : > { %v3324_v48 = vpop.f32.mrf.mxu0  ;;  %v3361_v38 = vadd.f32 %v3360_v57, %v1329_v10  ;;  %v3571_v22 = vmul.f32 %v14849_v52, %v3519_v36 }
 0x296   : > { %v3325_v51 = vadd.f32 %v3324_v48, %v3306_v5 }
 0x297   : > { %v3343_v8 = vpop.f32.mrf.mxu1  ;;  %v3380_v43 = vadd.f32 %v3379_v4, %v3361_v38  ;;  %v3565_v4 = vmul.f32 %v17882_v28, %v3513_v55  ;;  %v3650_v42 = vrot.slane %v3571_v22, 4 }
 0x298   : > { %v3344_v30 = vadd.f32 %v3343_v8, %v3325_v51  ;;  %v13528_v14 = vpop.eup %13527 }
 0x299   : > { %v3501_v57 = vadd.f32 %v13528_v14, %v17893_v13  ;;  %v3614_v37 = vrot.slane %v3565_v4, 4 }
 0x29c   : > { %v3362_v45 = vpop.f32.mrf.mxu2  ;;  %v3381_v62 = vpop.f32.mrf.mxu3 }
 0x29d   : > { %v3393_v18 = vpop.f32.mrf.mxu0  ;;  %v3363_v50 = vadd.f32 %v3362_v45, %v1329_v10  ;;  %v17895_v45 = vld [vmem:[#allocation49_spill] sm:$0xff] }
 0x29e   : > { %v3394_v12 = vadd.f32 %v3393_v18, %v3375_v15  ;;  %v3525_v15 = vmul.f32 0.5, %v3501_v57 }
 0x29f   : > { %v3412_v47 = vpop.f32.mrf.mxu1 }
 0x2a0   : > { %v3413_v58 = vadd.f32 %v3412_v47, %v3394_v12  ;;  %v3382_v12 = vadd.f32 %v3381_v62, %v3363_v50  ;;  %v3577_v10 = vmul.f32 %v14915_v34, %v3525_v15  ;;  %v3615_v62 = vadd.f32 %v3614_v37, %v3565_v4 }
 0x2a4   : > { %v3431_v19 = vpop.f32.mrf.mxu2  ;;  %v3450_v32 = vpop.f32.mrf.mxu3 }
 0x2a5   : > { %v3432_v40 = vadd.f32 %v3431_v19, %v3413_v58  ;;  %v3395_v25 = vpop.f32.mrf.mxu0  ;;  %v3651_v58 = vadd.f32 %v3650_v42, %v3571_v22  ;;  %v14122_v42 = vmov 0.0  }
 0x2a6   : > { %v3396_v7 = vadd.f32 %v3395_v25, %v3377_v61  ;;  %v17896_v61 = vunpack.c.l.bf16 %v17895_v45  ;;  %3910 = vst [vmem:[#allocation2 + $0x8] sm:$0xff] %v14122_v42 }
 0x2a7   : > { %v3414_v56 = vpop.f32.mrf.mxu1  ;;  %v3451_v63 = vadd.f32 %v3450_v32, %v3432_v40 }
 0x2a8   : > { %v3415_v9 = vadd.f32 %v3414_v56, %v3396_v7  ;;  %v3686_v7 = vrot.slane %v3577_v10, 4 }
 0x2a9   : > { %13529 = vtanh.f32 %v3451_v63  ;;  %v3652_v63 = vrot.slane %v3651_v58, 2 }
 0x2aa   : > { %13531 = vtanh.f32 %v3344_v30 }
 0x2ab   : > { %v3653_v54 = vadd.f32 %v3652_v63, %v3651_v58 }
 0x2ac   : > { %v3433_v1 = vpop.f32.mrf.mxu2  ;;  %v3452_v26 = vpop.f32.mrf.mxu3 }
 0x2ad   : > { %v3434_v29 = vadd.f32 %v3433_v1, %v3415_v9  ;;  %v3398_v24 = vpop.f32.mrf.mxu0  ;;  %v3616_v9 = vrot.slane %v3615_v62, 2 }
 0x2ae   : > { %v3399_v48 = vadd.f32 %v3398_v24, %v3380_v43 }
 0x2af   : > { %v13530_v3 = vpop.eup %13529  ;;  %v3453_v27 = vadd.f32 %v3452_v26, %v3434_v29  ;;  %v3417_v44 = vpop.f32.mrf.mxu1  ;;  %v3687_v29 = vadd.f32 %v3686_v7, %v3577_v10  ;;  %v3617_v57 = vadd.f32 %v3616_v9, %v3615_v62 }
 0x2b0   : > { %v3490_v8 = vadd.f32 %v13530_v3, %v17894_v60  ;;  %v3418_v18 = vadd.f32 %v3417_v44, %v3399_v48  ;;  %v13532_v6 = vpop.eup %13531  ;;  %v17898_v3 = vunpack.c.h.bf16 %v17892_v33  ;;  %v3654_v48 = vrot.slane %v3653_v54, 1 }
 0x2b1   : > { %13533 = vtanh.f32 %v3453_v27  ;;  %v3507_v40 = vadd.f32 %v13532_v6, %v17896_v61  ;;  %v3688_v60 = vrot.slane %v3687_v29, 2 }
 0x2b2   : > { %v3514_v31 = vmul.f32 0.5, %v3490_v8 }
 0x2b3   : > { %v3531_v38 = vmul.f32 0.5, %v3507_v40  ;;  %v3689_v33 = vadd.f32 %v3688_v60, %v3687_v29 }
 0x2b4   : > { %v3566_v11 = vmul.f32 %v17882_v28, %v3514_v31  ;;  %v3436_v47 = vpop.f32.mrf.mxu2  ;;  %v3455_v23 = vpop.f32.mrf.mxu3  ;;  %v3618_v31 = vrot.slane %v3617_v57, 1 }
 0x2b5   : > { %v3437_v39 = vadd.f32 %v3436_v47, %v3418_v18  ;;  %v3400_v21 = vpop.f32.mrf.mxu0  ;;  %v3583_v26 = vmul.f32 %v15054_v20, %v3531_v38  ;;  %v3690_v61 = vrot.slane %v3689_v33, 1 }
 0x2b6   : > { %v3620_v5 = vrot.slane %v3566_v11, 4  ;;  %v3401_v25 = vadd.f32 %v3400_v21, %v3382_v12  ;;  %v17899_v21 = vunpack.c.h.bf16 %v17895_v45  ;;  %v3619_v58 = vadd.f32 %v3618_v31, %v3617_v57 }
 0x2b7   : > { %v13534_v19 = vpop.eup %13533  ;;  %v3456_v32 = vadd.f32 %v3455_v23, %v3437_v39  ;;  %v3419_v49 = vpop.f32.mrf.mxu1  ;;  %v3722_v8 = vrot.slane %v3583_v26, 4 }
 0x2b8   : > { %v3621_v59 = vadd.f32 %v3620_v5, %v3566_v11  ;;  %v3496_v28 = vadd.f32 %v13534_v19, %v17897_v2  ;;  %v3420_v53 = vadd.f32 %v3419_v49, %v3401_v25  ;;  %v3655_v11 = vadd.f32 %v3654_v48, %v3653_v54 }
 0x2b9   : > { %13535 = vtanh.f32 %v3456_v32  ;;  %v3723_v47 = vadd.f32 %v3722_v8, %v3583_v26 }
 0x2ba   : > { %v3622_v51 = vrot.slane %v3621_v59, 2  ;;  %v3520_v56 = vmul.f32 0.5, %v3496_v28  ;;  %v3780_v10 = vmul.f32 %v15084_v16, %v3655_v11  ;;  %v3760_v28 = vmul.f32 %v15074_v17, %v3619_v58 }
 0x2bb   : > { %v3724_v40 = vrot.slane %v3723_v47, 2 }
 0x2bc   : > { %v3623_v0 = vadd.f32 %v3622_v51, %v3621_v59  ;;  %v3572_v46 = vmul.f32 %v14849_v52, %v3520_v56  ;;  %v3438_v36 = vpop.f32.mrf.mxu2  ;;  %v3457_v1 = vpop.f32.mrf.mxu3  ;;  %v3691_v56 = vadd.f32 %v3690_v61, %v3689_v33 }
 0x2bd   : > { %v3439_v30 = vadd.f32 %v3438_v36, %v3420_v53  ;;  %v3725_v63 = vadd.f32 %v3724_v40, %v3723_v47 }
 0x2be   : > { %v3656_v14 = vrot.slane %v3572_v46, 4  ;;  %v3624_v55 = vrot.slane %v3623_v0, 1 }
 0x2bf   : > { %v13536_v43 = vpop.eup %13535  ;;  %v3458_v24 = vadd.f32 %v3457_v1, %v3439_v30  ;;  %v3726_v36 = vrot.slane %v3725_v63, 1 }
 0x2c0   : > { %v3657_v22 = vadd.f32 %v3656_v14, %v3572_v46  ;;  %v3502_v13 = vadd.f32 %v13536_v43, %v17898_v3  ;;  %v3625_v44 = vadd.f32 %v3624_v55, %v3623_v0 }
 0x2c1   : > { %13537 = vtanh.f32 %v3458_v24  ;;  %v3727_v54 = vadd.f32 %v3726_v36, %v3725_v63 }
 0x2c2   : > { %v3658_v27 = vrot.slane %v3657_v22, 2  ;;  %v3526_v52 = vmul.f32 0.5, %v3502_v13  ;;  %v3761_v12 = vmul.f32 %v15074_v17, %v3625_v44  ;;  %v3800_v17 = vmul.f32 %v15091_v35, %v3691_v56 }
 0x2c4   : > { %v3659_v50 = vadd.f32 %v3658_v27, %v3657_v22  ;;  %v3578_v4 = vmul.f32 %v14915_v34, %v3526_v52  ;;  %v3848_v32 = vrot.slane %v3761_v12, 4  ;;  %v3820_v22 = vmul.f32 %v15218_v41, %v3727_v54 }
 0x2c6   : > { %v3660_v15 = vrot.slane %v3659_v50, 1  ;;  %v3692_v18 = vrot.slane %v3578_v4, 4  ;;  %v3861_v7 = vsel %vm3858_vm13, %v3760_v28, %v3848_v32 }
 0x2c7   : > { %v13538_v6 = vpop.eup %13537 }
 0x2c8   : > { %v3661_v39 = vadd.f32 %v3660_v15, %v3659_v50  ;;  %v3693_v23 = vadd.f32 %v3692_v18, %v3578_v4  ;;  %v3508_v37 = vadd.f32 %v13538_v6, %v17899_v21 }
 0x2ca   : > { %v3781_v5 = vmul.f32 %v15084_v16, %v3661_v39  ;;  %v3694_v34 = vrot.slane %v3693_v23, 2  ;;  %v3532_v19 = vmul.f32 0.5, %v3508_v37 }
 0x2cc   : > { %v3851_v25 = vrot.slane %v3781_v5, 4  ;;  %v3695_v59 = vadd.f32 %v3694_v34, %v3693_v23  ;;  %v3584_v2 = vmul.f32 %v15054_v20, %v3532_v19 }
 0x2ce   : > { %v3864_v62 = vsel %vm3858_vm13, %v3780_v10, %v3851_v25  ;;  %v3696_v45 = vrot.slane %v3695_v59, 1  ;;  %v3728_v51 = vrot.slane %v3584_v2, 4 }
 0x2cf   : > { %v3895_v49 = vrot.slane %v3864_v62, 7 }
 0x2d0   : > { %v3697_v38 = vadd.f32 %v3696_v45, %v3695_v59  ;;  %v3729_v16 = vadd.f32 %v3728_v51, %v3584_v2 }
 0x2d1   : > { %v3896_v53 = vsel %vm3872_vm14, %v3895_v49, %v3861_v7 }
 0x2d2   : > { %v3897_v0 = vsel %vm3874_vm1, %v3895_v49, %v3896_v53  ;;  %v3801_v46 = vmul.f32 %v15091_v35, %v3697_v38  ;;  %v3730_v20 = vrot.slane %v3729_v16, 2 }
 0x2d4   : > { %v3854_v30 = vrot.slane %v3801_v46, 4  ;;  %v3731_v9 = vadd.f32 %v3730_v20, %v3729_v16 }
 0x2d6   : > { %v3867_v14 = vsel %vm3858_vm13, %v3800_v17, %v3854_v30  ;;  %v3732_v1 = vrot.slane %v3731_v9, 1 }
 0x2d7   : > { %v3898_v43 = vrot.slane %v3867_v14, 6 }
 0x2d8   : > { %v3733_v29 = vadd.f32 %v3732_v1, %v3731_v9 }
 0x2d9   : > { %v3899_v26 = vsel %vm3877_vm4, %v3898_v43, %v3897_v0 }
 0x2da   : > { %v3900_v24 = vsel %vm3879_vm5, %v3898_v43, %v3899_v26  ;;  %v3821_v55 = vmul.f32 %v15218_v41, %v3733_v29 }
 0x2dc   : > { %v3857_v3 = vrot.slane %v3821_v55, 4 }
 0x2de   : > { %v3870_v35 = vsel %vm3858_vm13, %v3820_v22, %v3857_v3 }
 0x2df   : > { %v3901_v13 = vrot.slane %v3870_v35, 5 }
 0x2e1   : > { %v3902_v57 = vsel %vm3882_vm6, %v3901_v13, %v3900_v24 }
 0x2e2   : > { %v3903_v27 = vsel %vm3884_vm7, %v3901_v13, %v3902_v57 }
 0x2e3   : > { %3909 = vst [vmem:[#allocation2 + $0x18] sm:$0xff] %v3903_v27 }
 0x2e4 PF: > { %s17900_s8 = sld [smem:[#allocation29_spill]] }
 0x2ea   : > { %p10616_p3 = scmp.ge.s32.totalorder %s17900_s8, 4 }
 0x2ec   : > { %3913 = sbr.rel (%p10616_p3) target bundleno = 1623 (0x657), region = 140 }
 0x2f1   : > { %v10675_v41 = vld [vmem:[%s14484_s14 + $0x70] sm:$0xf]  ;;  %v12858_v52 = vld [vmem:[%s14484_s14 + $0x74] sm:$0xf0]  ;;  %v10667_v18 = vld [vmem:[%s14484_s14 + $0x60] sm:$0xf] }
 0x2f2   : > { %v10739_v48 = vld [vmem:[%s14484_s14 + $0xf0] sm:$0xf]  ;;  %v10676_v60 = vor.u32 %v12858_v52, %v10675_v41  ;;  %v12874_v8 = vld [vmem:[%s14484_s14 + $0xf4] sm:$0xf0]  ;;  %v12856_v11 = vld [vmem:[%s14484_s14 + $0x64] sm:$0xf0] }
 0x2f3   : > { %v10803_v44 = vld [vmem:[%s14484_s14 + $0x170] sm:$0xf]  ;;  %v12890_v50 = vld [vmem:[%s14484_s14 + $0x174] sm:$0xf0]  ;;  %v10740_v4 = vor.u32 %v12874_v8, %v10739_v48  ;;  %v10731_v33 = vld [vmem:[%s14484_s14 + $0xe0] sm:$0xf]  ;;  %v10668_v12 = vor.u32 %v12856_v11, %v10667_v18 }
 0x2f4   : > { %v10804_v42 = vor.u32 %v12890_v50, %v10803_v44  ;;  %v10867_v31 = vld [vmem:[%s14484_s14 + $0x1f0] sm:$0xf]  ;;  %v12906_v15 = vld [vmem:[%s14484_s14 + $0x1f4] sm:$0xf0]  ;;  %4727 = vmatpush.bf16.msra.mxu0 %v10676_v60  ;;  %v12872_v47 = vld [vmem:[%s14484_s14 + $0xe4] sm:$0xf0] }
 0x2f5   : > { %v10868_v6 = vor.u32 %v12906_v15, %v10867_v31  ;;  %4740 = vmatpush.bf16.msra.mxu1 %v10740_v4  ;;  %v10732_v39 = vor.u32 %v12872_v47, %v10731_v33  ;;  %v10795_v23 = vld [vmem:[%s14484_s14 + $0x160] sm:$0xf]  ;;  %v12888_v21 = vld [vmem:[%s14484_s14 + $0x164] sm:$0xf0]  ;;  %v10659_v34 = vld [vmem:[%s14484_s14 + $0x50] sm:$0xf] }
 0x2f6   : > { %4753 = vmatpush.bf16.msra.mxu2 %v10804_v42  ;;  %v10859_v37 = vld [vmem:[%s14484_s14 + $0x1e0] sm:$0xf]  ;;  %v10796_v58 = vor.u32 %v12888_v21, %v10795_v23  ;;  %v12904_v5 = vld [vmem:[%s14484_s14 + $0x1e4] sm:$0xf0]  ;;  %v12854_v19 = vld [vmem:[%s14484_s14 + $0x54] sm:$0xf0] }
 0x2f7   : > { %4766 = vmatpush.bf16.msra.mxu3 %v10868_v6  ;;  %v10860_v10 = vor.u32 %v12904_v5, %v10859_v37  ;;  %v10723_v61 = vld [vmem:[%s14484_s14 + $0xd0] sm:$0xf]  ;;  %v12870_v40 = vld [vmem:[%s14484_s14 + $0xd4] sm:$0xf0]  ;;  %v10660_v25 = vor.u32 %v12854_v19, %v10659_v34  ;;  %v10651_v51 = vld [vmem:[%s14484_s14 + $0x40] sm:$0xf] }
 0x2f8   : > { %v10787_v32 = vld [vmem:[%s14484_s14 + $0x150] sm:$0xf]  ;;  %4728 = vmatpush.bf16.msra.mxu0 %v10668_v12  ;;  %v12886_v59 = vld [vmem:[%s14484_s14 + $0x154] sm:$0xf0]  ;;  %v10724_v62 = vor.u32 %v12870_v40, %v10723_v61  ;;  %v12852_v56 = vld [vmem:[%s14484_s14 + $0x44] sm:$0xf0] }
 0x2f9   : > { %v10851_v2 = vld [vmem:[%s14484_s14 + $0x1d0] sm:$0xf]  ;;  %v12902_v28 = vld [vmem:[%s14484_s14 + $0x1d4] sm:$0xf0]  ;;  %4741 = vmatpush.bf16.msra.mxu1 %v10732_v39  ;;  %v10788_v45 = vor.u32 %v12886_v59, %v10787_v32  ;;  %v10715_v49 = vld [vmem:[%s14484_s14 + $0xc0] sm:$0xf]  ;;  %v10652_v46 = vor.u32 %v12852_v56, %v10651_v51 }
 0x2fa   : > { %4754 = vmatpush.bf16.msra.mxu2 %v10796_v58  ;;  %v10852_v63 = vor.u32 %v12902_v28, %v10851_v2  ;;  %v12868_v7 = vld [vmem:[%s14484_s14 + $0xc4] sm:$0xf0]  ;;  %v10779_v38 = vld [vmem:[%s14484_s14 + $0x140] sm:$0xf]  ;;  %v10643_v36 = vld [vmem:[%s14484_s14 + $0x30] sm:$0xf] }
 0x2fb   : > { %4767 = vmatpush.bf16.msra.mxu3 %v10860_v10  ;;  %v12884_v16 = vld [vmem:[%s14484_s14 + $0x144] sm:$0xf0]  ;;  %v10843_v53 = vld [vmem:[%s14484_s14 + $0x1c0] sm:$0xf]  ;;  %v10716_v20 = vor.u32 %v12868_v7, %v10715_v49  ;;  %v12850_v30 = vld [vmem:[%s14484_s14 + $0x34] sm:$0xf0] }
 0x2fc   : > { %v12900_v0 = vld [vmem:[%s14484_s14 + $0x1c4] sm:$0xf0]  ;;  %4729 = vmatpush.bf16.msra.mxu0 %v10660_v25  ;;  %v10780_v17 = vor.u32 %v12884_v16, %v10779_v38  ;;  %v10707_v9 = vld [vmem:[%s14484_s14 + $0xb0] sm:$0xf]  ;;  %v12866_v1 = vld [vmem:[%s14484_s14 + $0xb4] sm:$0xf0]  ;;  %v10644_v24 = vor.u32 %v12850_v30, %v10643_v36 }
 0x2fd   : > { %4742 = vmatpush.bf16.msra.mxu1 %v10724_v62  ;;  %v10844_v14 = vor.u32 %v12900_v0, %v10843_v53  ;;  %v10771_v43 = vld [vmem:[%s14484_s14 + $0x130] sm:$0xf]  ;;  %v12882_v54 = vld [vmem:[%s14484_s14 + $0x134] sm:$0xf0]  ;;  %v10708_v55 = vor.u32 %v12866_v1, %v10707_v9  ;;  %v10635_v3 = vld [vmem:[%s14484_s14 + $0x20] sm:$0xf] }
 0x2fe   : > { %4755 = vmatpush.bf16.msra.mxu2 %v10788_v45  ;;  %v10835_v29 = vld [vmem:[%s14484_s14 + $0x1b0] sm:$0xf]  ;;  %v12898_v26 = vld [vmem:[%s14484_s14 + $0x1b4] sm:$0xf0]  ;;  %v10772_v22 = vor.u32 %v12882_v54, %v10771_v43  ;;  %v12848_v35 = vld [vmem:[%s14484_s14 + $0x24] sm:$0xf0] }
 0x2ff   : > { %4768 = vmatpush.bf16.msra.mxu3 %v10852_v63  ;;  %v10699_v13 = vld [vmem:[%s14484_s14 + $0xa0] sm:$0xf]  ;;  %v10836_v57 = vor.u32 %v12898_v26, %v10835_v29  ;;  %v12864_v27 = vld [vmem:[%s14484_s14 + $0xa4] sm:$0xf0]  ;;  %v10636_v8 = vor.u32 %v12848_v35, %v10635_v3  ;;  %v10627_v4 = vld [vmem:[%s14484_s14 + $0x10] sm:$0xf] }
 0x300   : > { %4730 = vmatpush.bf16.msra.mxu0 %v10652_v46  ;;  %v10763_v41 = vld [vmem:[%s14484_s14 + $0x120] sm:$0xf]  ;;  %v12880_v52 = vld [vmem:[%s14484_s14 + $0x124] sm:$0xf0]  ;;  %v10700_v44 = vor.u32 %v12864_v27, %v10699_v13  ;;  %v12846_v42 = vld [vmem:[%s14484_s14 + $0x14] sm:$0xf0] }
 0x301   : > { %4743 = vmatpush.bf16.msra.mxu1 %v10716_v20  ;;  %v10827_v48 = vld [vmem:[%s14484_s14 + $0x1a0] sm:$0xf]  ;;  %v12896_v60 = vld [vmem:[%s14484_s14 + $0x1a4] sm:$0xf0]  ;;  %v10764_v50 = vor.u32 %v12880_v52, %v10763_v41  ;;  %v10691_v31 = vld [vmem:[%s14484_s14 + $0x90] sm:$0xf]  ;;  %v10628_v12 = vor.u32 %v12846_v42, %v10627_v4 }
 0x302   : > { %4756 = vmatpush.bf16.msra.mxu2 %v10780_v17  ;;  %v10828_v15 = vor.u32 %v12896_v60, %v10827_v48  ;;  %v12862_v18 = vld [vmem:[%s14484_s14 + $0x94] sm:$0xf0]  ;;  %v10755_v6 = vld [vmem:[%s14484_s14 + $0x110] sm:$0xf]  ;;  %v10619_v39 = vld [vmem:[%s14484_s14] sm:$0xf] }
 0x303   : > { %4769 = vmatpush.bf16.msra.mxu3 %v10844_v14  ;;  %v12878_v11 = vld [vmem:[%s14484_s14 + $0x114] sm:$0xf0]  ;;  %v10819_v33 = vld [vmem:[%s14484_s14 + $0x190] sm:$0xf]  ;;  %v12844_v23 = vld [vmem:[%s14484_s14 + $0x4] sm:$0xf0]  ;;  %v10692_v21 = vor.u32 %v12862_v18, %v10691_v31 }
 0x304   : > { %4731 = vmatpush.bf16.msra.mxu0 %v10644_v24  ;;  %v12894_v47 = vld [vmem:[%s14484_s14 + $0x194] sm:$0xf0]  ;;  %v10756_v37 = vor.u32 %v12878_v11, %v10755_v6  ;;  %v10683_v58 = vld [vmem:[%s14484_s14 + $0x80] sm:$0xf]  ;;  %v12860_v5 = vld [vmem:[%s14484_s14 + $0x84] sm:$0xf0]  ;;  %v10620_v2 = vor.u32 %v12844_v23, %v10619_v39 }
 0x305   : > { %4744 = vmatpush.bf16.msra.mxu1 %v10708_v55  ;;  %v10747_v34 = vld [vmem:[%s14484_s14 + $0x100] sm:$0xf]  ;;  %v10820_v19 = vor.u32 %v12894_v47, %v10819_v33  ;;  %v12876_v10 = vld [vmem:[%s14484_s14 + $0x104] sm:$0xf0]  ;;  %v10931_v32 = vld [vmem:[%s14484_s14 + $0x270] sm:$0xf]  ;;  %v10684_v51 = vor.u32 %v12860_v5, %v10683_v58 }
 0x306   : > { %4757 = vmatpush.bf16.msra.mxu2 %v10772_v22  ;;  %v10811_v61 = vld [vmem:[%s14484_s14 + $0x180] sm:$0xf]  ;;  %v12892_v40 = vld [vmem:[%s14484_s14 + $0x184] sm:$0xf0]  ;;  %v12922_v25 = vld [vmem:[%s14484_s14 + $0x274] sm:$0xf0]  ;;  %v10748_v56 = vor.u32 %v12876_v10, %v10747_v34 }
 0x307   : > { %4770 = vmatpush.bf16.msra.mxu3 %v10836_v57  ;;  %v10995_v59 = vld [vmem:[%s14484_s14 + $0x2f0] sm:$0xf]  ;;  %v12938_v28 = vld [vmem:[%s14484_s14 + $0x2f4] sm:$0xf0]  ;;  %v10812_v7 = vor.u32 %v12892_v40, %v10811_v61  ;;  %v10932_v38 = vor.u32 %v12922_v25, %v10931_v32  ;;  %v10923_v0 = vld [vmem:[%s14484_s14 + $0x260] sm:$0xf] }
 0x308   : > { %4732 = vmatpush.bf16.msra.mxu0 %v10636_v8  ;;  %v11059_v62 = vld [vmem:[%s14484_s14 + $0x370] sm:$0xf]  ;;  %v12954_v45 = vld [vmem:[%s14484_s14 + $0x374] sm:$0xf0]  ;;  %v10996_v16 = vor.u32 %v12938_v28, %v10995_v59  ;;  %v12920_v46 = vld [vmem:[%s14484_s14 + $0x264] sm:$0xf0] }
 0x309   : > { %4745 = vmatpush.bf16.msra.mxu1 %v10700_v44  ;;  %v11123_v49 = vld [vmem:[%s14484_s14 + $0x3f0] sm:$0xf]  ;;  %v12970_v63 = vld [vmem:[%s14484_s14 + $0x3f4] sm:$0xf0]  ;;  %v11060_v53 = vor.u32 %v12954_v45, %v11059_v62  ;;  %v10987_v20 = vld [vmem:[%s14484_s14 + $0x2e0] sm:$0xf]  ;;  %v10924_v54 = vor.u32 %v12920_v46, %v10923_v0 }
 0x30a   : > { %4758 = vmatpush.bf16.msra.mxu2 %v10764_v50  ;;  %v11124_v17 = vor.u32 %v12970_v63, %v11123_v49  ;;  %v12936_v36 = vld [vmem:[%s14484_s14 + $0x2e4] sm:$0xf0]  ;;  %v11051_v30 = vld [vmem:[%s14484_s14 + $0x360] sm:$0xf]  ;;  %v10915_v29 = vld [vmem:[%s14484_s14 + $0x250] sm:$0xf] }
 0x30b   : > { %4771 = vmatpush.bf16.msra.mxu3 %v10828_v15  ;;  %v12952_v9 = vld [vmem:[%s14484_s14 + $0x364] sm:$0xf0]  ;;  %v11115_v14 = vld [vmem:[%s14484_s14 + $0x3e0] sm:$0xf]  ;;  %v10988_v26 = vor.u32 %v12936_v36, %v10987_v20  ;;  %v12918_v55 = vld [vmem:[%s14484_s14 + $0x254] sm:$0xf0] }
 0x30c   : > { %4733 = vmatpush.bf16.msra.mxu0 %v10628_v12  ;;  %v12968_v1 = vld [vmem:[%s14484_s14 + $0x3e4] sm:$0xf0]  ;;  %v3915_v43 = vld [vmem:[#allocation2] sm:$0xff]  ;;  %v11052_v24 = vor.u32 %v12952_v9, %v11051_v30  ;;  %v10979_v22 = vld [vmem:[%s14484_s14 + $0x2d0] sm:$0xf]  ;;  %v10916_v48 = vor.u32 %v12918_v55, %v10915_v29 }
 0x30d   : > { %4746 = vmatpush.bf16.msra.mxu1 %v10692_v21  ;;  %3924 = vst [vmem:[#allocation1 + $0x10] ss:$2 sm:$0xff] %v3915_v43  ;;  %v12934_v3 = vld [vmem:[%s14484_s14 + $0x2d4] sm:$0xf0]  ;;  %v11116_v35 = vor.u32 %v12968_v1, %v11115_v14  ;;  %v11043_v13 = vld [vmem:[%s14484_s14 + $0x350] sm:$0xf] }
 0x30e   : > { %4759 = vmatpush.bf16.msra.mxu2 %v10756_v37  ;;  %v12950_v57 = vld [vmem:[%s14484_s14 + $0x354] sm:$0xf0]  ;;  %v3914_v27 = vld [vmem:[#allocation2 + $0x10] sm:$0xff]  ;;  %v10907_v60 = vld [vmem:[%s14484_s14 + $0x240] sm:$0xf]  ;;  %v10980_v44 = vor.u32 %v12934_v3, %v10979_v22 }
 0x30f   : > { %4772 = vmatpush.bf16.msra.mxu3 %v10820_v19  ;;  %v11107_v41 = vld [vmem:[%s14484_s14 + $0x3d0] sm:$0xf]  ;;  %v12966_v52 = vld [vmem:[%s14484_s14 + $0x3d4] sm:$0xf0]  ;;  %3922 = vst [vmem:[#allocation1] ss:$2 sm:$0xff] %v3914_v27  ;;  %v11044_v50 = vor.u32 %v12950_v57, %v11043_v13 }
 0x310   : > { %4734 = vmatpush.bf16.msra.mxu0 %v10620_v2  ;;  %v12916_v8 = vld [vmem:[%s14484_s14 + $0x244] sm:$0xf0]  ;;  %v10971_v4 = vld [vmem:[%s14484_s14 + $0x2c0] sm:$0xf]  ;;  %v11108_v15 = vor.u32 %v12966_v52, %v11107_v41  ;;  %v10899_v23 = vld [vmem:[%s14484_s14 + $0x230] sm:$0xf] }
 0x311   : > { %4747 = vmatpush.bf16.msra.mxu1 %v10684_v51  ;;  %v12932_v42 = vld [vmem:[%s14484_s14 + $0x2c4] sm:$0xf0]  ;;  %v11035_v31 = vld [vmem:[%s14484_s14 + $0x340] sm:$0xf]  ;;  %v10908_v12 = vor.u32 %v12916_v8, %v10907_v60  ;;  %v12914_v21 = vld [vmem:[%s14484_s14 + $0x234] sm:$0xf0] }
 0x312   : > { %4760 = vmatpush.bf16.msra.mxu2 %v10748_v56  ;;  %v12948_v18 = vld [vmem:[%s14484_s14 + $0x344] sm:$0xf0]  ;;  %v11099_v6 = vld [vmem:[%s14484_s14 + $0x3c0] sm:$0xf]  ;;  %v10963_v37 = vld [vmem:[%s14484_s14 + $0x2b0] sm:$0xf]  ;;  %v10972_v5 = vor.u32 %v12932_v42, %v10971_v4  ;;  %v10900_v45 = vor.u32 %v12914_v21, %v10899_v23 }
 0x313   : > { %4773 = vmatpush.bf16.msra.mxu3 %v10812_v7  ;;  %v12964_v11 = vld [vmem:[%s14484_s14 + $0x3c4] sm:$0xf0]  ;;  %v11036_v34 = vor.u32 %v12948_v18, %v11035_v31  ;;  %v12930_v19 = vld [vmem:[%s14484_s14 + $0x2b4] sm:$0xf0]  ;;  %v11027_v10 = vld [vmem:[%s14484_s14 + $0x330] sm:$0xf] }
 0x314   : > { %4779 = vmatpush.bf16.msrb.mxu0 %v10932_v38  ;;  %v3931_v33 = vld.sshfl [vmem:[#allocation1 + $0x10] sm:$0xff pattern:$0x75316420]  ;;  %v3932_v47 = vld.sshfl [vmem:[#allocation1 + $0x18] sm:$0xff pattern:$0x75316420]  ;;  %v11100_v40 = vor.u32 %v12964_v11, %v11099_v6  ;;  %v10964_v51 = vor.u32 %v12930_v19, %v10963_v37 }
 0x315   : > { %4792 = vmatpush.bf16.msrb.mxu1 %v10996_v16  ;;  %v15432_v39 = vpack.c.bf16 %v3931_v33, %v3931_v33  ;;  %v15437_v58 = vpack.c.bf16 %v3932_v47, %v3932_v47  ;;  %v12946_v61 = vld [vmem:[%s14484_s14 + $0x334] sm:$0xf0]  ;;  %v11091_v59 = vld [vmem:[%s14484_s14 + $0x3b0] sm:$0xf]  ;;  %v10891_v49 = vld [vmem:[%s14484_s14 + $0x220] sm:$0xf] }
 0x316   : > { %4805 = vmatpush.bf16.msrb.mxu2 %v11060_v53  ;;  %v3929_v32 = vld.sshfl [vmem:[#allocation1] sm:$0xff pattern:$0x75316420]  ;;  %v3930_v25 = vld.sshfl [vmem:[#allocation1 + $0x8] sm:$0xff pattern:$0x75316420]  ;;  %v11028_v56 = vor.u32 %v12946_v61, %v11027_v10 }
 0x317   : > { %4818 = vmatpush.bf16.msrb.mxu3 %v11124_v17  ;;  %4761 = vmatmul.bf16.vlgmr.msra.gmra.mxu2 %v15432_v39  ;;  %v12962_v2 = vld [vmem:[%s14484_s14 + $0x3b4] sm:$0xf0]  ;;  %v15445_v28 = vpack.c.bf16 %v3929_v32, %v3929_v32  ;;  %v15448_v62 = vpack.c.bf16 %v3930_v25, %v3930_v25  ;;  %v12912_v63 = vld [vmem:[%s14484_s14 + $0x224] sm:$0xf0]  ;;  %v10955_v7 = vld [vmem:[%s14484_s14 + $0x2a0] sm:$0xf] }
 0x318   : > { %4780 = vmatpush.bf16.msrb.mxu0 %v10924_v54  ;;  %4774 = vmatmul.bf16.vlgmr.msra.gmra.mxu3 %v15437_v58  ;;  %v11092_v38 = vor.u32 %v12962_v2, %v11091_v59  ;;  %v12928_v16 = vld [vmem:[%s14484_s14 + $0x2a4] sm:$0xf0]  ;;  %v11019_v53 = vld [vmem:[%s14484_s14 + $0x320] sm:$0xf]  ;;  %v10892_v36 = vor.u32 %v12912_v63, %v10891_v49  ;;  %v10883_v30 = vld [vmem:[%s14484_s14 + $0x210] sm:$0xf] }
 0x319   : > { %4793 = vmatpush.bf16.msrb.mxu1 %v10988_v26  ;;  %4735 = vmatmul.bf16.vlgmr.msra.gmra.mxu0 %v15445_v28  ;;  %v12944_v0 = vld [vmem:[%s14484_s14 + $0x324] sm:$0xf0]  ;;  %v11083_v46 = vld [vmem:[%s14484_s14 + $0x3a0] sm:$0xf]  ;;  %v3916_v9 = vld [vmem:[#allocation2 + $0x18] sm:$0xff]  ;;  %v10956_v14 = vor.u32 %v12928_v16, %v10955_v7 }
 0x31a   : > { %4806 = vmatpush.bf16.msrb.mxu2 %v11052_v24  ;;  %4748 = vmatmul.bf16.vlgmr.msra.gmra.mxu1 %v15448_v62  ;;  %v12960_v20 = vld [vmem:[%s14484_s14 + $0x3a4] sm:$0xf0]  ;;  %v11020_v1 = vor.u32 %v12944_v0, %v11019_v53  ;;  %v12910_v43 = vld [vmem:[%s14484_s14 + $0x214] sm:$0xf0]  ;;  %v10947_v54 = vld [vmem:[%s14484_s14 + $0x290] sm:$0xf] }
 0x31b   : > { %4819 = vmatpush.bf16.msrb.mxu3 %v11116_v35  ;;  %v3917_v17 = vld [vmem:[#allocation2 + $0x8] sm:$0xff]  ;;  %3926 = vst [vmem:[#allocation1 + $0x20] ss:$2 sm:$0xff] %v3916_v9  ;;  %v11084_v29 = vor.u32 %v12960_v20, %v11083_v46  ;;  %v12926_v26 = vld [vmem:[%s14484_s14 + $0x294] sm:$0xf0]  ;;  %v10884_v13 = vor.u32 %v12910_v43, %v10883_v30 }
 0x31c   : > { %4781 = vmatpush.bf16.msrb.mxu0 %v10916_v48  ;;  %3928 = vst [vmem:[#allocation1 + $0x30] ss:$2 sm:$0xff] %v3917_v17  ;;  %v11011_v24 = vld [vmem:[%s14484_s14 + $0x310] sm:$0xf]  ;;  %v12942_v55 = vld [vmem:[%s14484_s14 + $0x314] sm:$0xf0]  ;;  %v10948_v52 = vor.u32 %v12926_v26, %v10947_v54 }
 0x31d   : > { %4794 = vmatpush.bf16.msrb.mxu1 %v10980_v44  ;;  %v11075_v22 = vld [vmem:[%s14484_s14 + $0x390] sm:$0xf]  ;;  %v12958_v3 = vld [vmem:[%s14484_s14 + $0x394] sm:$0xf0]  ;;  %v10875_v35 = vld [vmem:[%s14484_s14 + $0x200] sm:$0xf]  ;;  %v11012_v48 = vor.u32 %v12942_v55, %v11011_v24 }
 0x31e   : > { %4807 = vmatpush.bf16.msrb.mxu2 %v11044_v50  ;;  %v12908_v57 = vld [vmem:[%s14484_s14 + $0x204] sm:$0xf0]  ;;  %v10939_v27 = vld [vmem:[%s14484_s14 + $0x280] sm:$0xf]  ;;  %v11076_v50 = vor.u32 %v12958_v3, %v11075_v22  ;;  %v12857_v42 = vld [vmem:[%s14484_s14 + $0x74] sm:$0xf] }
 0x31f   : > { %4820 = vmatpush.bf16.msrb.mxu3 %v11108_v15  ;;  %v12924_v41 = vld [vmem:[%s14484_s14 + $0x284] sm:$0xf0]  ;;  %v11003_v60 = vld [vmem:[%s14484_s14 + $0x300] sm:$0xf]  ;;  %v10677_v31 = vld [vmem:[%s14484_s14 + $0x78] sm:$0xf0]  ;;  %v10876_v11 = vor.u32 %v12908_v57, %v10875_v35 }
 0x320   : > { %4782 = vmatpush.bf16.msrb.mxu0 %v10908_v12  ;;  %v12940_v8 = vld [vmem:[%s14484_s14 + $0x304] sm:$0xf0]  ;;  %v11067_v44 = vld [vmem:[%s14484_s14 + $0x380] sm:$0xf]  ;;  %v12873_v15 = vld [vmem:[%s14484_s14 + $0xf4] sm:$0xf]  ;;  %v10940_v23 = vor.u32 %v12924_v41, %v10939_v27  ;;  %v10680_v10 = vor.u32 %v12857_v42, %v10677_v31 }
 0x321   : > { %4795 = vmatpush.bf16.msrb.mxu1 %v10972_v5  ;;  %v12956_v4 = vld [vmem:[%s14484_s14 + $0x384] sm:$0xf0]  ;;  %v10741_v18 = vld [vmem:[%s14484_s14 + $0xf8] sm:$0xf0]  ;;  %v12889_v6 = vld [vmem:[%s14484_s14 + $0x174] sm:$0xf]  ;;  %v11004_v21 = vor.u32 %v12940_v8, %v11003_v60 }
 0x322   : > { %4808 = vmatpush.bf16.msrb.mxu2 %v11036_v34  ;;  %v10805_v33 = vld [vmem:[%s14484_s14 + $0x178] sm:$0xf0]  ;;  %v12905_v47 = vld [vmem:[%s14484_s14 + $0x1f4] sm:$0xf]  ;;  %v12855_v5 = vld [vmem:[%s14484_s14 + $0x64] sm:$0xf]  ;;  %v11068_v19 = vor.u32 %v12956_v4, %v11067_v44  ;;  %v10744_v32 = vor.u32 %v12873_v15, %v10741_v18 }
 0x323   : > { %4821 = vmatpush.bf16.msrb.mxu3 %v11100_v40  ;;  %v10869_v12 = vld [vmem:[%s14484_s14 + $0x1f8] sm:$0xf0]  ;;  %v3935_v37 = vld.sshfl [vmem:[#allocation1 + $0x30] sm:$0xff pattern:$0x75316420]  ;;  %v10808_v25 = vor.u32 %v12889_v6, %v10805_v33 }
 0x324   : > { %4783 = vmatpush.bf16.msrb.mxu0 %v10900_v45  ;;  %v10669_v34 = vld [vmem:[%s14484_s14 + $0x68] sm:$0xf0]  ;;  %v3933_v61 = vld.sshfl [vmem:[#allocation1 + $0x20] sm:$0xff pattern:$0x75316420]  ;;  %v10872_v45 = vor.u32 %v12905_v47, %v10869_v12 }
 0x325   : > { %4796 = vmatpush.bf16.msrb.mxu1 %v10964_v51  ;;  %v3936_v40 = vld.sshfl [vmem:[#allocation1 + $0x38] sm:$0xff pattern:$0x75316420]  ;;  %v12871_v59 = vld [vmem:[%s14484_s14 + $0xe4] sm:$0xf]  ;;  %v15487_v51 = vpack.c.bf16 %v3935_v37, %v3935_v37  ;;  %v15492_v7 = vpack.c.bf16 %v3933_v61, %v3933_v61  ;;  %v10672_v0 = vor.u32 %v12855_v5, %v10669_v34 }
 0x326   : > { %4809 = vmatpush.bf16.msrb.mxu2 %v11028_v56  ;;  %v3934_v2 = vld.sshfl [vmem:[#allocation1 + $0x28] sm:$0xff pattern:$0x75316420]  ;;  %v10733_v56 = vld [vmem:[%s14484_s14 + $0xe8] sm:$0xf0] }
 0x327   : > { %4822 = vmatpush.bf16.msrb.mxu3 %v11092_v38  ;;  %v12887_v49 = vld [vmem:[%s14484_s14 + $0x164] sm:$0xf]  ;;  %v10797_v63 = vld [vmem:[%s14484_s14 + $0x168] sm:$0xf0]  ;;  %v15494_v38 = vpack.c.bf16 %v3936_v40, %v3936_v40  ;;  %v15498_v46 = vpack.c.bf16 %v3934_v2, %v3934_v2  ;;  %v10736_v20 = vor.u32 %v12871_v59, %v10733_v56  ;;  %v10661_v30 = vld [vmem:[%s14484_s14 + $0x58] sm:$0xf0] }
 0x328   : > { %4784 = vmatpush.bf16.msrb.mxu0 %v10892_v36  ;;  %v12903_v16 = vld [vmem:[%s14484_s14 + $0x1e4] sm:$0xf]  ;;  %v10861_v53 = vld [vmem:[%s14484_s14 + $0x1e8] sm:$0xf0]  ;;  %v10800_v17 = vor.u32 %v12887_v49, %v10797_v63  ;;  %v12853_v36 = vld [vmem:[%s14484_s14 + $0x54] sm:$0xf] }
 0x329   : > { %4797 = vmatpush.bf16.msrb.mxu1 %v10956_v14  ;;  %v12869_v9 = vld [vmem:[%s14484_s14 + $0xd4] sm:$0xf]  ;;  %v10864_v14 = vor.u32 %v12903_v16, %v10861_v53  ;;  %v10789_v54 = vld [vmem:[%s14484_s14 + $0x158] sm:$0xf0]  ;;  %v10664_v24 = vor.u32 %v12853_v36, %v10661_v30  ;;  %v12851_v3 = vld [vmem:[%s14484_s14 + $0x44] sm:$0xf] }
 0x32a   : > { %4810 = vmatpush.bf16.msrb.mxu2 %v11020_v1  ;;  %v10725_v1 = vld [vmem:[%s14484_s14 + $0xd8] sm:$0xf0]  ;;  %v12885_v43 = vld [vmem:[%s14484_s14 + $0x154] sm:$0xf]  ;;  %v10653_v35 = vld [vmem:[%s14484_s14 + $0x48] sm:$0xf0] }
 0x32b   : > { %4823 = vmatpush.bf16.msrb.mxu3 %v11084_v29  ;;  %v12901_v29 = vld [vmem:[%s14484_s14 + $0x1d4] sm:$0xf]  ;;  %v10853_v26 = vld [vmem:[%s14484_s14 + $0x1d8] sm:$0xf0]  ;;  %v10728_v55 = vor.u32 %v12869_v9, %v10725_v1  ;;  %v10792_v22 = vor.u32 %v12885_v43, %v10789_v54  ;;  %v10717_v27 = vld [vmem:[%s14484_s14 + $0xc8] sm:$0xf0]  ;;  %v10656_v8 = vor.u32 %v12851_v3, %v10653_v35 }
 0x32c   : > { %4785 = vmatpush.bf16.msrb.mxu0 %v10884_v13  ;;  %v12867_v13 = vld [vmem:[%s14484_s14 + $0xc4] sm:$0xf]  ;;  %v10856_v57 = vor.u32 %v12901_v29, %v10853_v26  ;;  %v10845_v60 = vld [vmem:[%s14484_s14 + $0x1c8] sm:$0xf0]  ;;  %v12849_v4 = vld [vmem:[%s14484_s14 + $0x34] sm:$0xf] }
 0x32d   : > { %4798 = vmatpush.bf16.msrb.mxu1 %v10948_v52  ;;  %v12883_v41 = vld [vmem:[%s14484_s14 + $0x144] sm:$0xf]  ;;  %v10781_v52 = vld [vmem:[%s14484_s14 + $0x148] sm:$0xf0]  ;;  %v10720_v44 = vor.u32 %v12867_v13, %v10717_v27  ;;  %v10645_v42 = vld [vmem:[%s14484_s14 + $0x38] sm:$0xf0] }
 0x32e   : > { %4811 = vmatpush.bf16.msrb.mxu2 %v11012_v48  ;;  %v12899_v48 = vld [vmem:[%s14484_s14 + $0x1c4] sm:$0xf]  ;;  %v12865_v31 = vld [vmem:[%s14484_s14 + $0xb4] sm:$0xf]  ;;  %v10709_v18 = vld [vmem:[%s14484_s14 + $0xb8] sm:$0xf0]  ;;  %v10648_v12 = vor.u32 %v12849_v4, %v10645_v42 }
 0x32f   : > { %4824 = vmatpush.bf16.msrb.mxu3 %v11076_v50  ;;  %v10784_v50 = vor.u32 %v12883_v41, %v10781_v52  ;;  %v10848_v15 = vor.u32 %v12899_v48, %v10845_v60  ;;  %v12881_v6 = vld [vmem:[%s14484_s14 + $0x134] sm:$0xf]  ;;  %v10837_v47 = vld [vmem:[%s14484_s14 + $0x1b8] sm:$0xf0]  ;;  %v12847_v37 = vld [vmem:[%s14484_s14 + $0x24] sm:$0xf] }
 0x330   : > { %4786 = vmatpush.bf16.msrb.mxu0 %v10876_v11  ;;  %v10773_v11 = vld [vmem:[%s14484_s14 + $0x138] sm:$0xf0]  ;;  %v12897_v33 = vld [vmem:[%s14484_s14 + $0x1b4] sm:$0xf]  ;;  %v10637_v5 = vld [vmem:[%s14484_s14 + $0x28] sm:$0xf0] }
 0x331   : > { %4799 = vmatpush.bf16.msrb.mxu1 %v10940_v23  ;;  %v10712_v23 = vor.u32 %v12865_v31, %v10709_v18  ;;  %v12863_v34 = vld [vmem:[%s14484_s14 + $0xa4] sm:$0xf]  ;;  %v10765_v40 = vld [vmem:[%s14484_s14 + $0x128] sm:$0xf0]  ;;  %v10640_v59 = vor.u32 %v12847_v37, %v10637_v5  ;;  %v12845_v56 = vld [vmem:[%s14484_s14 + $0x14] sm:$0xf] }
 0x332   : > { %4812 = vmatpush.bf16.msrb.mxu2 %v11004_v21  ;;  %v10776_v21 = vor.u32 %v12881_v6, %v10773_v11  ;;  %v12879_v61 = vld [vmem:[%s14484_s14 + $0x124] sm:$0xf]  ;;  %v10629_v49 = vld [vmem:[%s14484_s14 + $0x18] sm:$0xf0]  ;;  %v12861_v63 = vld [vmem:[%s14484_s14 + $0x94] sm:$0xf] }
 0x333   : > { %4825 = vmatpush.bf16.msrb.mxu3 %v11068_v19  ;;  %4787 = vmatmul.bf16.vlgmr.msrb.gmra.mxu0 %v15492_v7  ;;  %v10840_v19 = vor.u32 %v12897_v33, %v10837_v47  ;;  %v10693_v53 = vld [vmem:[%s14484_s14 + $0x98] sm:$0xf0]  ;;  %v10632_v30 = vor.u32 %v12845_v56, %v10629_v49  ;;  %v12843_v9 = vld [vmem:[%s14484_s14 + $0x4] sm:$0xf]  ;;  %v10685_v29 = vld [vmem:[%s14484_s14 + $0x88] sm:$0xf0] }
 0x334   : > { %4831 = vmatpush.bf16.msra.mxu0 %v10680_v10  ;;  %4800 = vmatmul.bf16.vlgmr.msrb.gmra.mxu1 %v15498_v46  ;;  %v10701_v10 = vld [vmem:[%s14484_s14 + $0xa8] sm:$0xf0]  ;;  %v10821_v36 = vld [vmem:[%s14484_s14 + $0x198] sm:$0xf0]  ;;  %v10696_v1 = vor.u32 %v12861_v63, %v10693_v53  ;;  %v12859_v54 = vld [vmem:[%s14484_s14 + $0x84] sm:$0xf] }
 0x335   : > { %4844 = vmatpush.bf16.msra.mxu1 %v10744_v32  ;;  %4813 = vmatmul.bf16.vlgmr.msrb.gmra.mxu2 %v15487_v51  ;;  %v12895_v32 = vld [vmem:[%s14484_s14 + $0x1a4] sm:$0xf]  ;;  %v10704_v2 = vor.u32 %v12863_v34, %v10701_v10  ;;  %v10813_v3 = vld [vmem:[%s14484_s14 + $0x188] sm:$0xf0]  ;;  %v12921_v35 = vld [vmem:[%s14484_s14 + $0x274] sm:$0xf]  ;;  %v10688_v60 = vor.u32 %v12859_v54, %v10685_v29 }
 0x336   : > { %4857 = vmatpush.bf16.msra.mxu2 %v10808_v25  ;;  %4826 = vmatmul.bf16.vlgmr.msrb.gmra.mxu3 %v15494_v38  ;;  %v10829_v25 = vld [vmem:[%s14484_s14 + $0x1a8] sm:$0xf0]  ;;  %v12875_v26 = vld [vmem:[%s14484_s14 + $0x104] sm:$0xf]  ;;  %v10933_v13 = vld [vmem:[%s14484_s14 + $0x278] sm:$0xf0] }
 0x337   : > { %4870 = vmatpush.bf16.msra.mxu3 %v10872_v45  ;;  %v10768_v45 = vor.u32 %v12879_v61, %v10765_v40  ;;  %v10832_v16 = vor.u32 %v12895_v32, %v10829_v25  ;;  %v10997_v41 = vld [vmem:[%s14484_s14 + $0x2f8] sm:$0xf0]  ;;  %v12953_v52 = vld [vmem:[%s14484_s14 + $0x374] sm:$0xf]  ;;  %v10936_v42 = vor.u32 %v12921_v35, %v10933_v13  ;;  %v12919_v18 = vld [vmem:[%s14484_s14 + $0x264] sm:$0xf] }
 0x338   : > { %4832 = vmatpush.bf16.msra.mxu0 %v10672_v0  ;;  %v12877_v0 = vld [vmem:[%s14484_s14 + $0x114] sm:$0xf]  ;;  %v11061_v48 = vld [vmem:[%s14484_s14 + $0x378] sm:$0xf0]  ;;  %v10925_v6 = vld [vmem:[%s14484_s14 + $0x268] sm:$0xf0] }
 0x339   : > { %4845 = vmatpush.bf16.msra.mxu1 %v10736_v20  ;;  %v10757_v20 = vld [vmem:[%s14484_s14 + $0x118] sm:$0xf0]  ;;  %v12935_v11 = vld [vmem:[%s14484_s14 + $0x2e4] sm:$0xf]  ;;  %v10989_v47 = vld [vmem:[%s14484_s14 + $0x2e8] sm:$0xf0]  ;;  %v10928_v5 = vor.u32 %v12919_v18, %v10925_v6 }
 0x33a   : > { %4858 = vmatpush.bf16.msra.mxu2 %v10800_v17  ;;  %v12893_v17 = vld [vmem:[%s14484_s14 + $0x194] sm:$0xf]  ;;  %v10760_v43 = vor.u32 %v12877_v0, %v10757_v20  ;;  %v11117_v37 = vld [vmem:[%s14484_s14 + $0x3e8] sm:$0xf0]  ;;  %v10992_v34 = vor.u32 %v12935_v11, %v10989_v47  ;;  %v10917_v61 = vld [vmem:[%s14484_s14 + $0x258] sm:$0xf0] }
 0x33b   : > { %4871 = vmatpush.bf16.msra.mxu3 %v10864_v14  ;;  %v10621_v14 = vld [vmem:[%s14484_s14 + $0x8] sm:$0xf0]  ;;  %v12917_v10 = vld [vmem:[%s14484_s14 + $0x254] sm:$0xf]  ;;  %v10981_v25 = vld [vmem:[%s14484_s14 + $0x2d8] sm:$0xf0] }
 0x33c   : > { %4833 = vmatpush.bf16.msra.mxu0 %v10664_v24  ;;  %v10824_v24 = vor.u32 %v12893_v17, %v10821_v36  ;;  %v10624_v27 = vor.u32 %v12843_v9, %v10621_v14  ;;  %v12933_v40 = vld [vmem:[%s14484_s14 + $0x2d4] sm:$0xf]  ;;  %v11109_v56 = vld [vmem:[%s14484_s14 + $0x3d8] sm:$0xf0]  ;;  %v10920_v49 = vor.u32 %v12917_v10, %v10917_v61  ;;  %v10909_v53 = vld [vmem:[%s14484_s14 + $0x248] sm:$0xf0] }
 0x33d   : > { %4846 = vmatpush.bf16.msra.mxu1 %v10728_v55  ;;  %v10749_v55 = vld [vmem:[%s14484_s14 + $0x108] sm:$0xf0]  ;;  %v12931_v0 = vld [vmem:[%s14484_s14 + $0x2c4] sm:$0xf]  ;;  %v12929_v54 = vld [vmem:[%s14484_s14 + $0x2b4] sm:$0xf] }
 0x33e   : > { %4859 = vmatpush.bf16.msra.mxu2 %v10792_v22  ;;  %v12891_v22 = vld [vmem:[%s14484_s14 + $0x184] sm:$0xf]  ;;  %v10973_v20 = vld [vmem:[%s14484_s14 + $0x2c8] sm:$0xf0]  ;;  %v12909_v18 = vld [vmem:[%s14484_s14 + $0x214] sm:$0xf] }
 0x33f   : > { %4872 = vmatpush.bf16.msra.mxu3 %v10856_v57  ;;  %v12937_v57 = vld [vmem:[%s14484_s14 + $0x2f4] sm:$0xf]  ;;  %v10816_v4 = vor.u32 %v12891_v22, %v10813_v3  ;;  %v11037_v17 = vld [vmem:[%s14484_s14 + $0x348] sm:$0xf0]  ;;  %v12963_v36 = vld [vmem:[%s14484_s14 + $0x3c4] sm:$0xf]  ;;  %v10976_v9 = vor.u32 %v12931_v0, %v10973_v20 }
 0x340   : > { %4834 = vmatpush.bf16.msra.mxu0 %v10656_v8  ;;  %v10752_v8 = vor.u32 %v12875_v26, %v10749_v55  ;;  %v11000_v31 = vor.u32 %v12937_v57, %v10997_v41  ;;  %v10965_v26 = vld [vmem:[%s14484_s14 + $0x2b8] sm:$0xf0]  ;;  %v12961_v22 = vld [vmem:[%s14484_s14 + $0x3b4] sm:$0xf]  ;;  %v10893_v41 = vld [vmem:[%s14484_s14 + $0x228] sm:$0xf0] }
 0x341   : > { %4847 = vmatpush.bf16.msra.mxu1 %v10720_v44  ;;  %v12969_v44 = vld [vmem:[%s14484_s14 + $0x3f4] sm:$0xf]  ;;  %v11029_v55 = vld [vmem:[%s14484_s14 + $0x338] sm:$0xf0]  ;;  %v10968_v13 = vor.u32 %v12929_v54, %v10965_v26  ;;  %v12907_v10 = vld [vmem:[%s14484_s14 + $0x204] sm:$0xf] }
 0x342   : > { %4860 = vmatpush.bf16.msra.mxu2 %v10784_v50  ;;  %v11125_v50 = vld [vmem:[%s14484_s14 + $0x3f8] sm:$0xf0]  ;;  %v12925_v11 = vld [vmem:[%s14484_s14 + $0x294] sm:$0xf]  ;;  %v10877_v61 = vld [vmem:[%s14484_s14 + $0x208] sm:$0xf0] }
 0x343   : > { %4873 = vmatpush.bf16.msra.mxu3 %v10848_v15  ;;  %v11064_v15 = vor.u32 %v12953_v52, %v11061_v48  ;;  %v11128_v33 = vor.u32 %v12969_v44, %v11125_v50  ;;  %v11093_v3 = vld [vmem:[%s14484_s14 + $0x3b8] sm:$0xf0]  ;;  %v12927_v52 = vld [vmem:[%s14484_s14 + $0x2a4] sm:$0xf]  ;;  %v11021_v44 = vld [vmem:[%s14484_s14 + $0x328] sm:$0xf0] }
 0x344   : > { %4835 = vmatpush.bf16.msra.mxu0 %v10648_v12  ;;  %v12951_v12 = vld [vmem:[%s14484_s14 + $0x364] sm:$0xf]  ;;  %v11096_v48 = vor.u32 %v12961_v22, %v11093_v3  ;;  %v10885_v6 = vld [vmem:[%s14484_s14 + $0x218] sm:$0xf0]  ;;  %v12980_v26 = vld [vmem:[%s14493_s2 + $0x44] sm:$0xf0] }
 0x345   : > { %4848 = vmatpush.bf16.msra.mxu1 %v10712_v23  ;;  %v11053_v23 = vld [vmem:[%s14484_s14 + $0x368] sm:$0xf0]  ;;  %v12959_v50 = vld [vmem:[%s14484_s14 + $0x3a4] sm:$0xf]  ;;  %v10949_v47 = vld [vmem:[%s14484_s14 + $0x298] sm:$0xf0] }
 0x346   : > { %4861 = vmatpush.bf16.msra.mxu2 %v10776_v21  ;;  %v12967_v21 = vld [vmem:[%s14484_s14 + $0x3e4] sm:$0xf]  ;;  %v12986_v0 = vld [vmem:[%s14493_s2 + $0x74] sm:$0xf0]  ;;  %v11167_v22 = vld [vmem:[%s14493_s2 + $0x48] sm:$0xf0] }
 0x347   : > { %4874 = vmatpush.bf16.msra.mxu3 %v10840_v19  ;;  %v11056_v19 = vor.u32 %v12951_v12, %v11053_v23  ;;  %v11120_v32 = vor.u32 %v12967_v21, %v11117_v37  ;;  %v12941_v12 = vld [vmem:[%s14484_s14 + $0x314] sm:$0xf]  ;;  %v11013_v23 = vld [vmem:[%s14484_s14 + $0x318] sm:$0xf0] }
 0x348   : > { %4836 = vmatpush.bf16.msra.mxu0 %v10640_v59  ;;  %v12949_v59 = vld [vmem:[%s14484_s14 + $0x354] sm:$0xf]  ;;  %v11077_v37 = vld [vmem:[%s14484_s14 + $0x398] sm:$0xf0] }
 0x349   : > { %4849 = vmatpush.bf16.msra.mxu1 %v10704_v2  ;;  %v11045_v2 = vld [vmem:[%s14484_s14 + $0x358] sm:$0xf0]  ;;  %v12957_v21 = vld [vmem:[%s14484_s14 + $0x394] sm:$0xf] }
 0x34a   : > { %4862 = vmatpush.bf16.msra.mxu2 %v10768_v45  ;;  %v12965_v45 = vld [vmem:[%s14484_s14 + $0x3d4] sm:$0xf]  ;;  %v11048_v63 = vor.u32 %v12949_v59, %v11045_v2  ;;  %v12939_v59 = vld [vmem:[%s14484_s14 + $0x304] sm:$0xf]  ;;  %v11005_v2 = vld [vmem:[%s14484_s14 + $0x308] sm:$0xf0] }
 0x34b   : > { %4875 = vmatpush.bf16.msra.mxu3 %v10832_v16  ;;  %v12915_v16 = vld [vmem:[%s14484_s14 + $0x244] sm:$0xf] }
 0x34c   : > { %4837 = vmatpush.bf16.msra.mxu0 %v10632_v30  ;;  %v10912_v30 = vor.u32 %v12915_v16, %v10909_v53  ;;  %v11189_v53 = vld [vmem:[%s14493_s2 + $0x70] sm:$0xf] }
 0x34d   : > { %4850 = vmatpush.bf16.msra.mxu1 %v10696_v1  ;;  %v12913_v1 = vld [vmem:[%s14484_s14 + $0x234] sm:$0xf]  ;;  %v11190_v20 = vor.u32 %v12986_v0, %v11189_v53 }
 0x34e   : > { %4863 = vmatpush.bf16.msra.mxu2 %v10760_v43  ;;  %v10901_v43 = vld [vmem:[%s14484_s14 + $0x238] sm:$0xf0] }
 0x34f   : > { %4876 = vmatpush.bf16.msra.mxu3 %v10824_v24  ;;  %v12945_v24 = vld [vmem:[%s14484_s14 + $0x334] sm:$0xf]  ;;  %v10904_v35 = vor.u32 %v12913_v1, %v10901_v43  ;;  %v11175_v43 = vld [vmem:[%s14493_s2 + $0x58] sm:$0xf0] }
 0x350   : > { %4838 = vmatpush.bf16.msra.mxu0 %v10624_v27  ;;  %v11032_v57 = vor.u32 %v12945_v24, %v11029_v55  ;;  %v12911_v27 = vld [vmem:[%s14484_s14 + $0x224] sm:$0xf]  ;;  %v12979_v24 = vld [vmem:[%s14493_s2 + $0x44] sm:$0xf] }
 0x351   : > { %4851 = vmatpush.bf16.msra.mxu1 %v10688_v60  ;;  %v10957_v60 = vld [vmem:[%s14484_s14 + $0x2a8] sm:$0xf0]  ;;  %v11170_v3 = vor.u32 %v12979_v24, %v11167_v22  ;;  %v11247_v24 = vld [vmem:[%s14493_s2 + $0xe8] sm:$0xf0] }
 0x352   : > { %4864 = vmatpush.bf16.msra.mxu2 %v10752_v8  ;;  %v12943_v8 = vld [vmem:[%s14484_s14 + $0x324] sm:$0xf] }
 0x353   : > { %4877 = vmatpush.bf16.msra.mxu3 %v10816_v4  ;;  %4839 = vmatmul.bf16.vlgmr.msra.gmra.mxu0 %v15445_v28  ;;  %v11112_v28 = vor.u32 %v12965_v45, %v11109_v56  ;;  %v11085_v4 = vld [vmem:[%s14484_s14 + $0x3a8] sm:$0xf0]  ;;  %v12955_v45 = vld [vmem:[%s14484_s14 + $0x384] sm:$0xf] }
 0x354   : > { %4883 = vmatpush.bf16.msrb.mxu0 %v10936_v42  ;;  %4852 = vmatmul.bf16.vlgmr.msra.gmra.mxu1 %v15448_v62  ;;  %v11101_v62 = vld [vmem:[%s14484_s14 + $0x3c8] sm:$0xf0]  ;;  %v10896_v42 = vor.u32 %v12911_v27, %v10893_v41  ;;  %v12977_v27 = vld [vmem:[%s14493_s2 + $0x34] sm:$0xf] }
 0x355   : > { %4896 = vmatpush.bf16.msrb.mxu1 %v11000_v31  ;;  %4865 = vmatmul.bf16.vlgmr.msra.gmra.mxu2 %v15432_v39  ;;  %v10984_v39 = vor.u32 %v12933_v40, %v10981_v25  ;;  %v11104_v29 = vor.u32 %v12963_v36, %v11101_v62  ;;  %v10960_v31 = vor.u32 %v12927_v52, %v10957_v60  ;;  %v12923_v40 = vld [vmem:[%s14484_s14 + $0x284] sm:$0xf]  ;;  %v10941_v25 = vld [vmem:[%s14484_s14 + $0x288] sm:$0xf0]  ;;  %v11159_v52 = vld [vmem:[%s14493_s2 + $0x38] sm:$0xf0] }
 0x356   : > { %4909 = vmatpush.bf16.msrb.mxu2 %v11064_v15  ;;  %4878 = vmatmul.bf16.vlgmr.msra.gmra.mxu3 %v15437_v58  ;;  %v12947_v58 = vld [vmem:[%s14484_s14 + $0x344] sm:$0xf]  ;;  %v11024_v15 = vor.u32 %v12943_v8, %v11021_v44  ;;  %v11069_v56 = vld [vmem:[%s14484_s14 + $0x388] sm:$0xf0]  ;;  %s17919_s14 = sld [smem:[#allocation29_spill]] }
 0x357   : > { %4922 = vmatpush.bf16.msrb.mxu3 %v11128_v33  ;;  %v11040_v14 = vor.u32 %v12947_v58, %v11037_v17  ;;  %v11088_v33 = vor.u32 %v12959_v50, %v11085_v4  ;;  %v11072_v16 = vor.u32 %v12955_v45, %v11069_v56  ;;  %v11191_v58 = vld [vmem:[%s14493_s2 + $0x78] sm:$0xf0]  ;;  %v11181_v36 = vld [vmem:[%s14493_s2 + $0x60] sm:$0xf]  ;;  %v12984_v62 = vld [vmem:[%s14493_s2 + $0x64] sm:$0xf0] }
 0x358   : > { %4884 = vmatpush.bf16.msrb.mxu0 %v10928_v5  ;;  %v10888_v5 = vor.u32 %v12909_v18, %v10885_v6  ;;  %v11149_v44 = vld [vmem:[%s14493_s2 + $0x20] sm:$0xf]  ;;  %v12976_v50 = vld [vmem:[%s14493_s2 + $0x24] sm:$0xf0]  ;;  %v12975_v4 = vld [vmem:[%s14493_s2 + $0x24] sm:$0xf] }
 0x359   : > { %4897 = vmatpush.bf16.msrb.mxu1 %v10992_v34  ;;  %v10952_v34 = vor.u32 %v12925_v11, %v10949_v47  ;;  %v11141_v47 = vld [vmem:[%s14493_s2 + $0x10] sm:$0xf] }
 0x35a   : > { %4910 = vmatpush.bf16.msrb.mxu2 %v11056_v19  ;;  %v11016_v19 = vor.u32 %v12941_v12, %v11013_v23  ;;  %v12974_v12 = vld [vmem:[%s14493_s2 + $0x14] sm:$0xf0]  ;;  %v12973_v23 = vld [vmem:[%s14493_s2 + $0x14] sm:$0xf] }
 0x35b   : > { %4923 = vmatpush.bf16.msrb.mxu3 %v11120_v32  ;;  %v11080_v32 = vor.u32 %v12957_v21, %v11077_v37  ;;  %v11142_v21 = vor.u32 %v12974_v12, %v11141_v47  ;;  %v11143_v37 = vld [vmem:[%s14493_s2 + $0x18] sm:$0xf0]  ;;  %v11221_v47 = vld [vmem:[%s14493_s2 + $0xb0] sm:$0xf]  ;;  %v12994_v12 = vld [vmem:[%s14493_s2 + $0xb4] sm:$0xf0] }
 0x35c   : > { %4885 = vmatpush.bf16.msrb.mxu0 %v10920_v49  ;;  %v10880_v49 = vor.u32 %v12907_v10, %v10877_v61  ;;  %v11133_v10 = vld [vmem:[%s14493_s2] sm:$0xf]  ;;  %v12972_v61 = vld [vmem:[%s14493_s2 + $0x4] sm:$0xf0]  ;;  %s13259_s12 = sshll.u32 %s17919_s14, 3 }
 0x35d   : > { %4898 = vmatpush.bf16.msrb.mxu1 %v10984_v39  ;;  %v10944_v39 = vor.u32 %v12923_v40, %v10941_v25  ;;  %v12971_v40 = vld [vmem:[%s14493_s2 + $0x4] sm:$0xf]  ;;  %v11134_v25 = vor.u32 %v12972_v61, %v11133_v10  ;;  %v11213_v61 = vld [vmem:[%s14493_s2 + $0xa0] sm:$0xf] }
 0x35e   : > { %4911 = vmatpush.bf16.msrb.mxu2 %v11048_v63  ;;  %v11008_v63 = vor.u32 %v12939_v59, %v11005_v2  ;;  %v11135_v59 = vld [vmem:[%s14493_s2 + $0x8] sm:$0xf0] }
 0x35f   : > { %4924 = vmatpush.bf16.msrb.mxu3 %v11112_v28  ;;  %v12985_v28 = vld [vmem:[%s14493_s2 + $0x74] sm:$0xf]  ;;  %v11138_v45 = vor.u32 %v12971_v40, %v11135_v59  ;;  %v12992_v40 = vld [vmem:[%s14493_s2 + $0xa4] sm:$0xf0]  ;;  %v11215_v59 = vld [vmem:[%s14493_s2 + $0xa8] sm:$0xf0] }
 0x360   : > { %4886 = vmatpush.bf16.msrb.mxu0 %v10912_v30  ;;  %v11194_v17 = vor.u32 %v12985_v28, %v11191_v58  ;;  %v12983_v30 = vld [vmem:[%s14493_s2 + $0x64] sm:$0xf] }
 0x361   : > { %4899 = vmatpush.bf16.msrb.mxu1 %v10976_v9  ;;  %v12982_v9 = vld [vmem:[%s14493_s2 + $0x54] sm:$0xf0] }
 0x362   : > { %4912 = vmatpush.bf16.msrb.mxu2 %v11040_v14  ;;  %v12981_v14 = vld [vmem:[%s14493_s2 + $0x54] sm:$0xf] }
 0x363   : > { %4925 = vmatpush.bf16.msrb.mxu3 %v11104_v29  ;;  %v11178_v54 = vor.u32 %v12981_v14, %v11175_v43  ;;  %v11165_v29 = vld [vmem:[%s14493_s2 + $0x40] sm:$0xf]  ;;  %v11255_v14 = vld [vmem:[%s14493_s2 + $0xf8] sm:$0xf0]  ;;  %v13000_v43 = vld [vmem:[%s14493_s2 + $0xe4] sm:$0xf0] }
 0x364   : > { %4887 = vmatpush.bf16.msrb.mxu0 %v10904_v35  ;;  %v11166_v55 = vor.u32 %v12980_v26, %v11165_v29  ;;  %v15642_v35 = vld [vmem:[%s777_s26] sm:$0x3]  ;;  %v12999_v26 = vld [vmem:[%s14493_s2 + $0xe4] sm:$0xf]  ;;  %s7521_s26 = scalar_lea.vmem [#allocation3], %s13259_s12 }
 0x365   : > { %4900 = vmatpush.bf16.msrb.mxu1 %v10968_v13  ;;  %v11157_v13 = vld [vmem:[%s14493_s2 + $0x30] sm:$0xf]  ;;  %v4083_v60 = vperm.slane %v15642_v35, 0  ;;  %v11250_v22 = vor.u32 %v12999_v26, %v11247_v24 }
 0x366   : > { %4913 = vmatpush.bf16.msrb.mxu2 %v11032_v57  ;;  %v12978_v57 = vld [vmem:[%s14493_s2 + $0x34] sm:$0xf0] }
 0x367   : > { %4926 = vmatpush.bf16.msrb.mxu3 %v11096_v48  ;;  %v11158_v41 = vor.u32 %v12978_v57, %v11157_v13  ;;  %v11162_v48 = vor.u32 %v12977_v27, %v11159_v52  ;;  %v12998_v52 = vld [vmem:[%s14493_s2 + $0xd4] sm:$0xf0] }
 0x368   : > { %4888 = vmatpush.bf16.msrb.mxu0 %v10896_v42 }
 0x369   : > { %4901 = vmatpush.bf16.msrb.mxu1 %v10960_v31  ;;  %v11150_v31 = vor.u32 %v12976_v50, %v11149_v44 }
 0x36a   : > { %4914 = vmatpush.bf16.msrb.mxu2 %v11024_v15  ;;  %v11151_v15 = vld [vmem:[%s14493_s2 + $0x28] sm:$0xf0] }
 0x36b   : > { %4927 = vmatpush.bf16.msrb.mxu3 %v11088_v33  ;;  %v11154_v6 = vor.u32 %v12975_v4, %v11151_v15  ;;  %v12995_v15 = vld [vmem:[%s14493_s2 + $0xc4] sm:$0xf] }
 0x36c   : > { %4889 = vmatpush.bf16.msrb.mxu0 %v10888_v5  ;;  %v11146_v5 = vor.u32 %v12973_v23, %v11143_v37  ;;  %v12993_v23 = vld [vmem:[%s14493_s2 + $0xb4] sm:$0xf]  ;;  %v11222_v37 = vor.u32 %v12994_v12, %v11221_v47  ;;  %v13123_v47 = vld [vmem:[%s14496_s29 + $0x3c4] sm:$0xf] }
 0x36d   : > { %4902 = vmatpush.bf16.msrb.mxu1 %v10952_v34  ;;  %v11745_v12 = vld [vmem:[%s14496_s29 + $0x3e0] sm:$0xf0] }
 0x36e   : > { %4915 = vmatpush.bf16.msrb.mxu2 %v11016_v19 }
 0x36f   : > { %4928 = vmatpush.bf16.msrb.mxu3 %v11080_v32 }
 0x370   : > { %4890 = vmatpush.bf16.msrb.mxu0 %v10880_v49 }
 0x371   : > { %4903 = vmatpush.bf16.msrb.mxu1 %v10944_v39 }
 0x372   : > { %4916 = vmatpush.bf16.msrb.mxu2 %v11008_v63 }
 0x373   : > { %4929 = vmatpush.bf16.msrb.mxu3 %v11072_v16  ;;  %4891 = vmatmul.bf16.vlgmr.msrb.gmra.mxu0 %v15492_v7  ;;  %v11182_v7 = vor.u32 %v12984_v62, %v11181_v36 }
 0x374   : > { %4904 = vmatmul.bf16.vlgmr.msrb.gmra.mxu1 %v15498_v46  ;;  %5145 = vmatpush.bf16.msra.mxu0 %v11190_v20  ;;  %v11173_v46 = vld [vmem:[%s14493_s2 + $0x50] sm:$0xf] }
 0x375   : > { %4917 = vmatmul.bf16.vlgmr.msrb.gmra.mxu2 %v15487_v51  ;;  %v11183_v51 = vld [vmem:[%s14493_s2 + $0x68] sm:$0xf0]  ;;  %v11174_v1 = vor.u32 %v12982_v9, %v11173_v46 }
 0x376   : > { %4930 = vmatmul.bf16.vlgmr.msrb.gmra.mxu3 %v15494_v38  ;;  %5171 = vmatpush.bf16.msra.mxu2 %v11194_v17  ;;  %v11186_v38 = vor.u32 %v12983_v30, %v11183_v51  ;;  %v13002_v51 = vld [vmem:[%s14493_s2 + $0xf4] sm:$0xf0] }
 0x378   : > { %5146 = vmatpush.bf16.msra.mxu0 %v11182_v7  ;;  %v11253_v7 = vld [vmem:[%s14493_s2 + $0xf0] sm:$0xf] }
 0x379   : > { %v11254_v9 = vor.u32 %v13002_v51, %v11253_v7 }
 0x37a   : > { %5172 = vmatpush.bf16.msra.mxu2 %v11186_v38  ;;  %v13001_v38 = vld [vmem:[%s14493_s2 + $0xf4] sm:$0xf] }
 0x37b   : > { %v11258_v29 = vor.u32 %v13001_v38, %v11255_v14  ;;  %5158 = vmatpush.bf16.msra.mxu1 %v11254_v9 }
 0x37c   : > { %5147 = vmatpush.bf16.msra.mxu0 %v11174_v1  ;;  %v11245_v1 = vld [vmem:[%s14493_s2 + $0xe0] sm:$0xf] }
 0x37d   : > { %5184 = vmatpush.bf16.msra.mxu3 %v11258_v29 }
 0x37e   : > { %5173 = vmatpush.bf16.msra.mxu2 %v11178_v54 }
 0x380   : > { %5148 = vmatpush.bf16.msra.mxu0 %v11166_v55  ;;  %v11246_v55 = vor.u32 %v13000_v43, %v11245_v1 }
 0x381   : > { %5185 = vmatpush.bf16.msra.mxu3 %v11250_v22 }
 0x382   : > { %5174 = vmatpush.bf16.msra.mxu2 %v11170_v3  ;;  %5159 = vmatpush.bf16.msra.mxu1 %v11246_v55 }
 0x384   : > { %5149 = vmatpush.bf16.msra.mxu0 %v11158_v41  ;;  %v11237_v41 = vld [vmem:[%s14493_s2 + $0xd0] sm:$0xf] }
 0x386   : > { %5175 = vmatpush.bf16.msra.mxu2 %v11162_v48  ;;  %v12997_v48 = vld [vmem:[%s14493_s2 + $0xd4] sm:$0xf] }
 0x388   : > { %5150 = vmatpush.bf16.msra.mxu0 %v11150_v31  ;;  %v12996_v31 = vld [vmem:[%s14493_s2 + $0xc4] sm:$0xf0] }
 0x38a   : > { %5176 = vmatpush.bf16.msra.mxu2 %v11154_v6  ;;  %v11231_v6 = vld [vmem:[%s14493_s2 + $0xc8] sm:$0xf0] }
 0x38c   : > { %5151 = vmatpush.bf16.msra.mxu0 %v11142_v21 }
 0x38e   : > { %5177 = vmatpush.bf16.msra.mxu2 %v11146_v5  ;;  %v11223_v5 = vld [vmem:[%s14493_s2 + $0xb8] sm:$0xf0] }
 0x390   : > { %5152 = vmatpush.bf16.msra.mxu0 %v11134_v25  ;;  %v11214_v25 = vor.u32 %v12992_v40, %v11213_v61  ;;  %v11711_v61 = vld [vmem:[%s14496_s29 + $0x380] sm:$0xf] }
 0x391   : > { %v13119_v40 = vld [vmem:[%s14496_s29 + $0x39c] sm:$0xf0] }
 0x392   : > { %5178 = vmatpush.bf16.msra.mxu2 %v11138_v45  ;;  %v4084_v45 = vperm.slane %v15642_v35, 1  ;;  %v11199_v35 = vld [vmem:[%s14493_s2 + $0x88] sm:$0xf0] }
 0x396   : > { %v4736_v8 = vpop.f32.mrf.mxu0 }
 0x397   : > { %v4749_v42 = vpop.f32.mrf.mxu1  ;;  %v4737_v33 = vadd.f32 %v4736_v8, %v4083_v60  ;;  %v11238_v60 = vor.u32 %v12998_v52, %v11237_v41  ;;  %v11239_v8 = vld [vmem:[%s14493_s2 + $0xd8] sm:$0xf0] }
 0x398   : > { %v11242_v44 = vor.u32 %v12997_v48, %v11239_v8  ;;  %v11487_v48 = vld [vmem:[%s14496_s29 + $0x1c0] sm:$0xf]  ;;  %v13059_v8 = vld [vmem:[%s14496_s29 + $0x1c4] sm:$0xf] }
 0x399   : > { %v4750_v34 = vadd.f32 %v4749_v42, %v4737_v33  ;;  %5160 = vmatpush.bf16.msra.mxu1 %v11238_v60  ;;  %v11229_v42 = vld [vmem:[%s14493_s2 + $0xc0] sm:$0xf]  ;;  %v13063_v60 = vld [vmem:[%s14496_s29 + $0x1dc] sm:$0xf0] }
 0x39a   : > { %v4762_v18 = vpop.f32.mrf.mxu2  ;;  %5186 = vmatpush.bf16.msra.mxu3 %v11242_v44  ;;  %v11488_v44 = vor.u32 %v13063_v60, %v11487_v48  ;;  %v11583_v60 = vld [vmem:[%s14496_s29 + $0x280] sm:$0xf] }
 0x39b   : > { %v4775_v11 = vpop.f32.mrf.mxu3  ;;  %v4763_v49 = vadd.f32 %v4762_v18, %v4750_v34  ;;  %v11230_v18 = vor.u32 %v12996_v31, %v11229_v42  ;;  %v11226_v34 = vor.u32 %v12993_v23, %v11223_v5  ;;  %v13055_v42 = vld [vmem:[%s14496_s29 + $0x19c] sm:$0xf0] }
 0x39c   : > { %5995 = vmatpush.bf16.msrb.mxu0 %v11488_v44  ;;  %v11423_v5 = vld [vmem:[%s14496_s29 + $0x140] sm:$0xf] }
 0x39d   : > { %v4776_v39 = vadd.f32 %v4775_v11, %v4763_v49  ;;  %v11234_v11 = vor.u32 %v12995_v15, %v11231_v6  ;;  %5161 = vmatpush.bf16.msra.mxu1 %v11230_v18  ;;  %v11205_v49 = vld [vmem:[%s14493_s2 + $0x90] sm:$0xf]  ;;  %v13051_v15 = vld [vmem:[%s14496_s29 + $0x184] sm:$0xf]  ;;  %v11743_v6 = vld [vmem:[%s14496_s29 + $0x3c0] sm:$0xf] }
 0x39e   : > { %v4738_v19 = vpop.f32.mrf.mxu0  ;;  %v11457_v18 = vld [vmem:[%s14496_s29 + $0x1a0] sm:$0xf0]  ;;  %v13087_v44 = vld [vmem:[%s14496_s29 + $0x29c] sm:$0xf0] }
 0x39f   : > { %v4751_v32 = vpop.f32.mrf.mxu1  ;;  %5187 = vmatpush.bf16.msra.mxu3 %v11234_v11  ;;  %v11460_v23 = vor.u32 %v13051_v15, %v11457_v18  ;;  %v13015_v15 = vld [vmem:[%s14496_s29 + $0x5c] sm:$0xf0]  ;;  %v13011_v18 = vld [vmem:[%s14496_s29 + $0x44] sm:$0xf] }
 0x3a0   : > { %v12991_v32 = vld [vmem:[%s14493_s2 + $0xa4] sm:$0xf] }
 0x3a1   : > { %5162 = vmatpush.bf16.msra.mxu1 %v11222_v37  ;;  %v11748_v37 = vor.u32 %v13123_v47, %v11745_v12  ;;  %v11263_v47 = vld [vmem:[%s14496_s29] sm:$0xf] }
 0x3a2   : > { %v4764_v2 = vpop.f32.mrf.mxu2  ;;  %v11551_v12 = vld [vmem:[%s14496_s29 + $0x240] sm:$0xf] }
 0x3a3   : > { %v4777_v56 = vpop.f32.mrf.mxu3  ;;  %5188 = vmatpush.bf16.msra.mxu3 %v11226_v34  ;;  %v11218_v2 = vor.u32 %v12991_v32, %v11215_v59  ;;  %v13047_v34 = vld [vmem:[%s14496_s29 + $0x15c] sm:$0xf0]  ;;  %v11712_v32 = vor.u32 %v13119_v40, %v11711_v61  ;;  %v11713_v59 = vld [vmem:[%s14496_s29 + $0x3a0] sm:$0xf0] }
 0x3a4   : > { %v13003_v61 = vld [vmem:[%s14496_s29 + $0x4] sm:$0xf] }
 0x3a5   : > { %5163 = vmatpush.bf16.msra.mxu1 %v11214_v25  ;;  %v13115_v25 = vld [vmem:[%s14496_s29 + $0x384] sm:$0xf] }
 0x3a6   : > { %v11265_v40 = vld [vmem:[%s14496_s29 + $0x20] sm:$0xf0] }
 0x3a7   : > { %5189 = vmatpush.bf16.msra.mxu3 %v11218_v2  ;;  %v11424_v2 = vor.u32 %v13047_v34, %v11423_v5  ;;  %v11553_v5 = vld [vmem:[%s14496_s29 + $0x260] sm:$0xf0] }
 0x3b0   : > { %v4788_v63 = vpop.f32.mrf.mxu0 }
 0x3b1   : > { %v4789_v16 = vadd.f32 %v4788_v63, %v4776_v39  ;;  %v4801_v53 = vpop.f32.mrf.mxu1  ;;  %v12990_v39 = vld [vmem:[%s14493_s2 + $0x94] sm:$0xf0]  ;;  %v12989_v63 = vld [vmem:[%s14493_s2 + $0x94] sm:$0xf] }
 0x3b3   : > { %v4802_v0 = vadd.f32 %v4801_v53, %v4789_v16  ;;  %v11206_v53 = vor.u32 %v12990_v39, %v11205_v49  ;;  %v13039_v49 = vld [vmem:[%s14496_s29 + $0x11c] sm:$0xf0] }
 0x3b5   : > { %5164 = vmatpush.bf16.msra.mxu1 %v11206_v53  ;;  %v13107_v53 = vld [vmem:[%s14496_s29 + $0x344] sm:$0xf] }
 0x3b8   : > { %v4814_v28 = vpop.f32.mrf.mxu2  ;;  %v4790_v36 = vpop.f32.mrf.mxu0 }
 0x3b9   : > { %v4815_v20 = vadd.f32 %v4814_v28, %v4802_v0  ;;  %v4827_v58 = vpop.f32.mrf.mxu3  ;;  %v4803_v62 = vpop.f32.mrf.mxu1  ;;  %v11207_v0 = vld [vmem:[%s14493_s2 + $0x98] sm:$0xf0]  ;;  %v12987_v36 = vld [vmem:[%s14493_s2 + $0x84] sm:$0xf] }
 0x3ba   : > { %v11210_v28 = vor.u32 %v12989_v63, %v11207_v0  ;;  %v11679_v63 = vld [vmem:[%s14496_s29 + $0x340] sm:$0xf]  ;;  %v13035_v0 = vld [vmem:[%s14496_s29 + $0x104] sm:$0xf] }
 0x3bb   : > { %v4828_v17 = vadd.f32 %v4827_v58, %v4815_v20  ;;  %v11197_v58 = vld [vmem:[%s14493_s2 + $0x80] sm:$0xf] }
 0x3bc   : > { %5190 = vmatpush.bf16.msra.mxu3 %v11210_v28  ;;  %v11393_v28 = vld [vmem:[%s14496_s29 + $0x120] sm:$0xf0] }
 0x3bd   : > { %v4937_v30 = vmul.f32 1.442695, %v4828_v17  ;;  %vm4935_vm8 = vcmp.gt.f32.partialorder %v4828_v17, 0.0 }
 0x3bf   : > { %13540 = vpow2.f32 %v4937_v30  ;;  %v11202_v30 = vor.u32 %v12987_v36, %v11199_v35  ;;  %v11647_v36 = vld [vmem:[%s14496_s29 + $0x300] sm:$0xf] }
 0x3c0   : > { %v4816_v46 = vpop.f32.mrf.mxu2  ;;  %v13103_v35 = vld [vmem:[%s14496_s29 + $0x31c] sm:$0xf0] }
 0x3c1   : > { %v4829_v54 = vpop.f32.mrf.mxu3  ;;  %5191 = vmatpush.bf16.msra.mxu3 %v11202_v30  ;;  %v13099_v30 = vld [vmem:[%s14496_s29 + $0x304] sm:$0xf] }
 0x3c5   : > { %v13541_v3 = vpop.eup %13540  ;;  %6034 = vmatpush.bf16.msrb.mxu3 %v11748_v37  ;;  %v13075_v37 = vld [vmem:[%s14496_s29 + $0x244] sm:$0xf] }
 0x3c6   : > { %v11129_v13 = vadd.f32 -1.0, %v13541_v3 }
 0x3c8   : > { %v4943_v57 = vsel %vm4935_vm8, %v4828_v17, %v11129_v13  ;;  %v12988_v17 = vld [vmem:[%s14493_s2 + $0x84] sm:$0xf0] }
 0x3c9   : > { %v4945_v27 = vpack.c.bf16 %v4943_v57, %v4943_v57  ;;  %v11198_v62 = vor.u32 %v12988_v17, %v11197_v58 }
 0x3cb   : > { %5153 = vmatmul.bf16.vlgmr.msra.gmra.mxu0 %v4945_v27  ;;  %5179 = vmatmul.bf16.vlgmr.msra.gmra.mxu2 %v4945_v27 }
 0x3cc   : > { %5165 = vmatpush.bf16.msra.mxu1 %v11198_v62 }
 0x3d0   : > { %v4840_v50 = vpop.f32.mrf.mxu0 }
 0x3d1   : > { %v4853_v4 = vpop.f32.mrf.mxu1  ;;  %v4841_v20 = vadd.f32 %v4840_v50, %v4084_v45  ;;  %v11489_v50 = vld [vmem:[%s14496_s29 + $0x1e0] sm:$0xf0]  ;;  %v11716_v45 = vor.u32 %v13115_v25, %v11713_v59  ;;  %v13064_v25 = vld [vmem:[%s14496_s29 + $0x1e4] sm:$0xf0]  ;;  %v13060_v59 = vld [vmem:[%s14496_s29 + $0x1cc] sm:$0xf] }
 0x3d2   : > { %v11492_v31 = vor.u32 %v13059_v8, %v11489_v50  ;;  %v13083_v50 = vld [vmem:[%s14496_s29 + $0x284] sm:$0xf] }
 0x3d3   : > { %v4854_v7 = vadd.f32 %v4853_v4, %v4841_v20  ;;  %v11455_v4 = vld [vmem:[%s14496_s29 + $0x180] sm:$0xf]  ;;  %v11681_v20 = vld [vmem:[%s14496_s29 + $0x360] sm:$0xf0]  ;;  %6035 = vmatpush.bf16.msrb.mxu3 %v11716_v45  ;;  %v11497_v45 = vld [vmem:[%s14496_s29 + $0x1e8] sm:$0xf0] }
 0x3d4   : > { %v11456_v11 = vor.u32 %v13055_v42, %v11455_v4  ;;  %6021 = vmatpush.bf16.msrb.mxu2 %v11492_v31  ;;  %v11684_v17 = vor.u32 %v13107_v53, %v11681_v20  ;;  %v11585_v4 = vld [vmem:[%s14496_s29 + $0x2a0] sm:$0xf0]  ;;  %v11295_v31 = vld [vmem:[%s14496_s29 + $0x40] sm:$0xf]  ;;  %v11268_v20 = vor.u32 %v13003_v61, %v11265_v40  ;;  %v11655_v61 = vld [vmem:[%s14496_s29 + $0x308] sm:$0xf] }
 0x3d5   : > { %v13067_v53 = vld [vmem:[%s14496_s29 + $0x204] sm:$0xf]  ;;  %v13104_v40 = vld [vmem:[%s14496_s29 + $0x324] sm:$0xf0] }
 0x3d6   : > { %5996 = vmatpush.bf16.msrb.mxu0 %v11456_v11  ;;  %v11584_v11 = vor.u32 %v13087_v44, %v11583_v60  ;;  %v11399_v44 = vld [vmem:[%s14496_s29 + $0x108] sm:$0xf] }
 0x3d7   : > { %6036 = vmatpush.bf16.msrb.mxu3 %v11684_v17  ;;  %v13128_v17 = vld [vmem:[%s14496_s29 + $0x3e4] sm:$0xf0] }
 0x3d8   : > { %v4866_v33 = vpop.f32.mrf.mxu2  ;;  %v4842_v19 = vpop.f32.mrf.mxu0  ;;  %6022 = vmatpush.bf16.msrb.mxu2 %v11460_v23  ;;  %v11296_v23 = vor.u32 %v13015_v15, %v11295_v31  ;;  %v11401_v31 = vld [vmem:[%s14496_s29 + $0x128] sm:$0xf0] }
 0x3d9   : > { %v4879_v21 = vpop.f32.mrf.mxu3  ;;  %v4855_v10 = vpop.f32.mrf.mxu1  ;;  %v4867_v51 = vadd.f32 %v4866_v33, %v4854_v7  ;;  %v13127_v33 = vld [vmem:[%s14496_s29 + $0x3dc] sm:$0xf0]  ;;  %v13043_v19 = vld [vmem:[%s14496_s29 + $0x144] sm:$0xf] }
 0x3da   : > { %v11425_v10 = vld [vmem:[%s14496_s29 + $0x160] sm:$0xf0]  ;;  %5997 = vmatpush.bf16.msrb.mxu0 %v11424_v2 }
 0x3db   : > { %v4880_v38 = vadd.f32 %v4879_v21, %v4867_v51  ;;  %v11744_v21 = vor.u32 %v13127_v33, %v11743_v6  ;;  %v11428_v39 = vor.u32 %v13043_v19, %v11425_v10  ;;  %v11649_v7 = vld [vmem:[%s14496_s29 + $0x320] sm:$0xf0]  ;;  %v11396_v51 = vor.u32 %v13035_v0, %v11393_v28  ;;  %v13007_v10 = vld [vmem:[%s14496_s29 + $0x1c] sm:$0xf0]  ;;  %v11751_v28 = vld [vmem:[%s14496_s29 + $0x3c8] sm:$0xf] }
 0x3dc   : > { %v11297_v6 = vld [vmem:[%s14496_s29 + $0x60] sm:$0xf0]  ;;  %v11588_v33 = vor.u32 %v13083_v50, %v11585_v4  ;;  %v13040_v50 = vld [vmem:[%s14496_s29 + $0x124] sm:$0xf0]  ;;  %v13036_v4 = vld [vmem:[%s14496_s29 + $0x10c] sm:$0xf] }
 0x3dd   : > { %6008 = vmatpush.bf16.msrb.mxu1 %v11744_v21  ;;  %6023 = vmatpush.bf16.msrb.mxu2 %v11428_v39  ;;  %v13079_v21 = vld [vmem:[%s14496_s29 + $0x25c] sm:$0xf0]  ;;  %v11300_v19 = vor.u32 %v13011_v18, %v11297_v6  ;;  %v11521_v0 = vld [vmem:[%s14496_s29 + $0x220] sm:$0xf0]  ;;  %v11404_v15 = vor.u32 %v13036_v4, %v11401_v31  ;;  %v11687_v18 = vld [vmem:[%s14496_s29 + $0x348] sm:$0xf] }
 0x3de   : > { %v11519_v39 = vld [vmem:[%s14496_s29 + $0x200] sm:$0xf]  ;;  %v13112_v6 = vld [vmem:[%s14496_s29 + $0x364] sm:$0xf0]  ;;  %v11529_v4 = vld [vmem:[%s14496_s29 + $0x228] sm:$0xf0] }
 0x3df   : > { %v4979_v31 = vld [vmem:[%s797_s0] sm:$0x3] }
 0x3e0   : > { %v4868_v56 = vpop.f32.mrf.mxu2 }
 0x3e1   : > { %v4881_v16 = vpop.f32.mrf.mxu3  ;;  %v11391_v56 = vld [vmem:[%s14496_s29 + $0x100] sm:$0xf]  ;;  %6009 = vmatpush.bf16.msrb.mxu1 %v11712_v32  ;;  %6024 = vmatpush.bf16.msrb.mxu2 %v11396_v51  ;;  %v11495_v32 = vld [vmem:[%s14496_s29 + $0x1c8] sm:$0xf]  ;;  %v13052_v51 = vld [vmem:[%s14496_s29 + $0x18c] sm:$0xf] }
 0x3e2   : > { %v13111_v16 = vld [vmem:[%s14496_s29 + $0x35c] sm:$0xf0]  ;;  %v11392_v62 = vor.u32 %v13039_v49, %v11391_v56  ;;  %v11552_v56 = vor.u32 %v13079_v21, %v11551_v12  ;;  %v11556_v49 = vor.u32 %v13075_v37, %v11553_v5  ;;  %v13032_v21 = vld [vmem:[%s14496_s29 + $0xe4] sm:$0xf0]  ;;  %v13028_v37 = vld [vmem:[%s14496_s29 + $0xcc] sm:$0xf] }
 0x3e3   : > { %v11680_v58 = vor.u32 %v13111_v16, %v11679_v63  ;;  %v13071_v63 = vld [vmem:[%s14496_s29 + $0x21c] sm:$0xf0]  ;;  %v11264_v16 = vor.u32 %v13007_v10, %v11263_v47  ;;  %v11689_v47 = vld [vmem:[%s14496_s29 + $0x368] sm:$0xf0] }
 0x3e4   : > { %5998 = vmatpush.bf16.msrb.mxu0 %v11392_v62  ;;  %v11753_v62 = vld [vmem:[%s14496_s29 + $0x3e8] sm:$0xf0] }
 0x3e5   : > { %6010 = vmatpush.bf16.msrb.mxu1 %v11680_v58  ;;  %v11496_v58 = vor.u32 %v13064_v25, %v11495_v32  ;;  %v13100_v32 = vld [vmem:[%s14496_s29 + $0x30c] sm:$0xf]  ;;  %v11656_v25 = vor.u32 %v13104_v40, %v11655_v61  ;;  %v13061_v61 = vld [vmem:[%s14496_s29 + $0x1d4] sm:$0xf] }
 0x3e6   : > { %v11505_v40 = vld [vmem:[%s14496_s29 + $0x1f0] sm:$0xf0] }
 0x3f0   : > { %v4892_v46 = vpop.f32.mrf.mxu0 }
 0x3f1   : > { %v4905_v9 = vpop.f32.mrf.mxu1  ;;  %v4893_v14 = vadd.f32 %v4892_v46, %v4880_v38  ;;  %v11359_v38 = vld [vmem:[%s14496_s29 + $0xc0] sm:$0xf] }
 0x3f2   : > { %v13031_v46 = vld [vmem:[%s14496_s29 + $0xdc] sm:$0xf0] }
 0x3f3   : > { %v4906_v1 = vadd.f32 %v4905_v9, %v4893_v14  ;;  %v13027_v9 = vld [vmem:[%s14496_s29 + $0xc4] sm:$0xf] }
 0x3f4   : > { %v11361_v14 = vld [vmem:[%s14496_s29 + $0xe0] sm:$0xf0] }
 0x3f8   : > { %v4918_v43 = vpop.f32.mrf.mxu2  ;;  %v4894_v26 = vpop.f32.mrf.mxu0 }
 0x3f9   : > { %v4919_v54 = vadd.f32 %v4918_v43, %v4906_v1  ;;  %v4931_v29 = vpop.f32.mrf.mxu3  ;;  %v4907_v24 = vpop.f32.mrf.mxu1  ;;  %v11648_v1 = vor.u32 %v13103_v35, %v11647_v36  ;;  %v11652_v43 = vor.u32 %v13099_v30, %v11649_v7  ;;  %v13095_v26 = vld [vmem:[%s14496_s29 + $0x2dc] sm:$0xf0]  ;;  %v13124_v36 = vld [vmem:[%s14496_s29 + $0x3cc] sm:$0xf]  ;;  %v11500_v35 = vor.u32 %v13060_v59, %v11497_v45  ;;  %v11463_v30 = vld [vmem:[%s14496_s29 + $0x188] sm:$0xf] }
 0x3fa   : > { %v13091_v24 = vld [vmem:[%s14496_s29 + $0x2c4] sm:$0xf]  ;;  %v13056_v7 = vld [vmem:[%s14496_s29 + $0x1a4] sm:$0xf0]  ;;  %v11657_v59 = vld [vmem:[%s14496_s29 + $0x328] sm:$0xf0] }
 0x3fb   : > { %v4932_v55 = vadd.f32 %v4931_v29, %v4919_v54  ;;  %v11615_v54 = vld [vmem:[%s14496_s29 + $0x2c0] sm:$0xf]  ;;  %v11360_v29 = vor.u32 %v13031_v46, %v11359_v38  ;;  %6011 = vmatpush.bf16.msrb.mxu1 %v11648_v1  ;;  %6037 = vmatpush.bf16.msrb.mxu3 %v11652_v43  ;;  %v11465_v38 = vld [vmem:[%s14496_s29 + $0x1a8] sm:$0xf0]  ;;  %v11520_v46 = vor.u32 %v13071_v63, %v11519_v39  ;;  %v11719_v43 = vld [vmem:[%s14496_s29 + $0x388] sm:$0xf] }
 0x3fc   : > { %v11756_v1 = vor.u32 %v13124_v36, %v11753_v62  ;;  %v11335_v45 = vld [vmem:[%s14496_s29 + $0x88] sm:$0xf]  ;;  %v11337_v63 = vld [vmem:[%s14496_s29 + $0xa8] sm:$0xf0] }
 0x3fd   : > { %v4939_v22 = vmul.f32 1.442695, %v4932_v55  ;;  %vm4936_vm9 = vcmp.gt.f32.partialorder %v4932_v55, 0.0  ;;  %5999 = vmatpush.bf16.msrb.mxu0 %v11360_v29  ;;  %v11464_v29 = vor.u32 %v13056_v7, %v11463_v30  ;;  %v11303_v36 = vld [vmem:[%s14496_s29 + $0x48] sm:$0xf] }
 0x3fe   : > { %v13016_v62 = vld [vmem:[%s14496_s29 + $0x64] sm:$0xf0]  ;;  %v11305_v7 = vld [vmem:[%s14496_s29 + $0x68] sm:$0xf0] }
 0x3ff   : > { %13542 = vpow2.f32 %v4939_v22  ;;  %v11364_v22 = vor.u32 %v13027_v9, %v11361_v14  ;;  %v11524_v9 = vor.u32 %v13067_v53, %v11521_v0  ;;  %v11752_v14 = vor.u32 %v13128_v17, %v11751_v28  ;;  %v11623_v53 = vld [vmem:[%s14496_s29 + $0x2c8] sm:$0xf]  ;;  %v13092_v28 = vld [vmem:[%s14496_s29 + $0x2cc] sm:$0xf] }
 0x400   : > { %v4920_v3 = vpop.f32.mrf.mxu2  ;;  %v13096_v0 = vld [vmem:[%s14496_s29 + $0x2e4] sm:$0xf0]  ;;  %v11304_v30 = vor.u32 %v13016_v62, %v11303_v36  ;;  %v11439_v62 = vld [vmem:[%s14496_s29 + $0x150] sm:$0xf] }
 0x401   : > { %v4933_v13 = vpop.f32.mrf.mxu3  ;;  %v11327_v3 = vld [vmem:[%s14496_s29 + $0x80] sm:$0xf]  ;;  %6025 = vmatpush.bf16.msrb.mxu2 %v11364_v22  ;;  %v11468_v22 = vor.u32 %v13052_v51, %v11465_v38  ;;  %v11591_v38 = vld [vmem:[%s14496_s29 + $0x288] sm:$0xf] }
 0x402   : > { %v13023_v13 = vld [vmem:[%s14496_s29 + $0x9c] sm:$0xf0] }
 0x403   : > { %v11328_v8 = vor.u32 %v13023_v13, %v11327_v3  ;;  %v11431_v3 = vld [vmem:[%s14496_s29 + $0x148] sm:$0xf] }
 0x404   : > { %v13048_v13 = vld [vmem:[%s14496_s29 + $0x164] sm:$0xf0] }
 0x405   : > { %v13543_v57 = vpop.eup %13542  ;;  %6000 = vmatpush.bf16.msrb.mxu0 %v11328_v8  ;;  %v11432_v60 = vor.u32 %v13048_v13, %v11431_v3  ;;  %v11559_v3 = vld [vmem:[%s14496_s29 + $0x248] sm:$0xf] }
 0x406   : > { %v11130_v27 = vadd.f32 -1.0, %v13543_v57  ;;  %v13019_v57 = vld [vmem:[%s14496_s29 + $0x84] sm:$0xf]  ;;  %v13080_v13 = vld [vmem:[%s14496_s29 + $0x264] sm:$0xf0] }
 0x408   : > { %v4944_v41 = vsel %vm4936_vm9, %v4932_v55, %v11130_v27  ;;  %v11617_v55 = vld [vmem:[%s14496_s29 + $0x2e0] sm:$0xf0] }
 0x409   : > { %v4946_v52 = vpack.c.bf16 %v4944_v41, %v4944_v41  ;;  %v11329_v27 = vld [vmem:[%s14496_s29 + $0xa0] sm:$0xf0]  ;;  %v11620_v48 = vor.u32 %v13091_v24, %v11617_v55  ;;  %6001 = vmatpush.bf16.msrb.mxu0 %v11296_v23  ;;  %v13116_v24 = vld [vmem:[%s14496_s29 + $0x38c] sm:$0xf]  ;;  %v11367_v23 = vld [vmem:[%s14496_s29 + $0xc8] sm:$0xf] }
 0x40a   : > { %v11332_v42 = vor.u32 %v13019_v57, %v11329_v27  ;;  %v11721_v55 = vld [vmem:[%s14496_s29 + $0x3a8] sm:$0xf0]  ;;  %v11368_v5 = vor.u32 %v13032_v21, %v11367_v23 }
 0x40b   : > { %5166 = vmatmul.bf16.vlgmr.msra.gmra.mxu1 %v4946_v52  ;;  %5192 = vmatmul.bf16.vlgmr.msra.gmra.mxu3 %v4946_v52  ;;  %v11616_v52 = vor.u32 %v13095_v26, %v11615_v54  ;;  %v13120_v26 = vld [vmem:[%s14496_s29 + $0x3a4] sm:$0xf0]  ;;  %v13044_v57 = vld [vmem:[%s14496_s29 + $0x14c] sm:$0xf] }
 0x40c   : > { %6038 = vmatpush.bf16.msrb.mxu3 %v11620_v48  ;;  %6026 = vmatpush.bf16.msrb.mxu2 %v11332_v42  ;;  %v11433_v27 = vld [vmem:[%s14496_s29 + $0x168] sm:$0xf0]  ;;  %v11724_v48 = vor.u32 %v13116_v24, %v11721_v55  ;;  %v11400_v42 = vor.u32 %v13040_v50, %v11399_v44 }
 0x40d   : > { %6012 = vmatpush.bf16.msrb.mxu1 %v11616_v52  ;;  %6002 = vmatpush.bf16.msrb.mxu0 %v11264_v16  ;;  %v11720_v52 = vor.u32 %v13120_v26, %v11719_v43  ;;  %v11436_v8 = vor.u32 %v13044_v57, %v11433_v27  ;;  %v13004_v26 = vld [vmem:[%s14496_s29 + $0xc] sm:$0xf] }
 0x40e   : > { %v11273_v55 = vld [vmem:[%s14496_s29 + $0x28] sm:$0xf0] }
 0x40f   : > { %v13076_v57 = vld [vmem:[%s14496_s29 + $0x24c] sm:$0xf] }
 0x410   : > { %6039 = vmatpush.bf16.msrb.mxu3 %v11588_v33  ;;  %6027 = vmatpush.bf16.msrb.mxu2 %v11300_v19  ;;  %v11688_v33 = vor.u32 %v13112_v6, %v11687_v18  ;;  %v11369_v19 = vld [vmem:[%s14496_s29 + $0xe8] sm:$0xf0] }
 0x411   : > { %6013 = vmatpush.bf16.msrb.mxu1 %v11584_v11  ;;  %6047 = vmatpush.bf16.msra.mxu0 %v11496_v58  ;;  %v13108_v11 = vld [vmem:[%s14496_s29 + $0x34c] sm:$0xf]  ;;  %v11372_v10 = vor.u32 %v13028_v37, %v11369_v19  ;;  %v11503_v19 = vld [vmem:[%s14496_s29 + $0x1d0] sm:$0xf] }
 0x412   : > { %v11692_v12 = vor.u32 %v13108_v11, %v11689_v47  ;;  %v11625_v58 = vld [vmem:[%s14496_s29 + $0x2e8] sm:$0xf0]  ;;  %v4982_v11 = vperm.slane %v4979_v31, 1 }
 0x413   : > { %v11628_v17 = vor.u32 %v13092_v28, %v11625_v58  ;;  %v11561_v27 = vld [vmem:[%s14496_s29 + $0x268] sm:$0xf0]  ;;  %v13125_v28 = vld [vmem:[%s14496_s29 + $0x3d4] sm:$0xf] }
 0x414   : > { %6040 = vmatpush.bf16.msrb.mxu3 %v11556_v49  ;;  %6028 = vmatpush.bf16.msrb.mxu2 %v11268_v20  ;;  %v13020_v49 = vld [vmem:[%s14496_s29 + $0x8c] sm:$0xf]  ;;  %v11624_v20 = vor.u32 %v13096_v0, %v11623_v53  ;;  %v13129_v0 = vld [vmem:[%s14496_s29 + $0x3ec] sm:$0xf0] }
 0x415   : > { %6014 = vmatpush.bf16.msrb.mxu1 %v11552_v56  ;;  %6048 = vmatpush.bf16.msra.mxu0 %v11464_v29  ;;  %v13024_v56 = vld [vmem:[%s14496_s29 + $0xa4] sm:$0xf0]  ;;  %v11340_v16 = vor.u32 %v13020_v49, %v11337_v63  ;;  %v13068_v50 = vld [vmem:[%s14496_s29 + $0x20c] sm:$0xf]  ;;  %v13057_v49 = vld [vmem:[%s14496_s29 + $0x1ac] sm:$0xf0] }
 0x416   : > { %v11336_v39 = vor.u32 %v13024_v56, %v11335_v45  ;;  %v13008_v29 = vld [vmem:[%s14496_s29 + $0x24] sm:$0xf0]  ;;  %v11471_v45 = vld [vmem:[%s14496_s29 + $0x190] sm:$0xf]  ;;  %v11473_v63 = vld [vmem:[%s14496_s29 + $0x1b0] sm:$0xf0] }
 0x418   : > { %6073 = vmatpush.bf16.msra.mxu2 %v11500_v35  ;;  %6041 = vmatpush.bf16.msrb.mxu3 %v11524_v9  ;;  %v13012_v35 = vld [vmem:[%s14496_s29 + $0x4c] sm:$0xf] }
 0x419   : > { %6015 = vmatpush.bf16.msrb.mxu1 %v11520_v46  ;;  %6049 = vmatpush.bf16.msra.mxu0 %v11432_v60  ;;  %v11308_v51 = vor.u32 %v13012_v35, %v11305_v7  ;;  %v13088_v46 = vld [vmem:[%s14496_s29 + $0x2a4] sm:$0xf0]  ;;  %v13084_v9 = vld [vmem:[%s14496_s29 + $0x28c] sm:$0xf]  ;;  %v13049_v35 = vld [vmem:[%s14496_s29 + $0x16c] sm:$0xf0] }
 0x41a   : > { %v11527_v60 = vld [vmem:[%s14496_s29 + $0x208] sm:$0xf]  ;;  %v11441_v7 = vld [vmem:[%s14496_s29 + $0x170] sm:$0xf0] }
 0x41c   : > { %6086 = vmatpush.bf16.msra.mxu3 %v11756_v1  ;;  %6074 = vmatpush.bf16.msra.mxu2 %v11468_v22  ;;  %v11593_v1 = vld [vmem:[%s14496_s29 + $0x2a8] sm:$0xf0]  ;;  %v11276_v22 = vor.u32 %v13004_v26, %v11273_v55  ;;  %v13041_v55 = vld [vmem:[%s14496_s29 + $0x12c] sm:$0xf0] }
 0x41d   : > { %6060 = vmatpush.bf16.msra.mxu1 %v11752_v14  ;;  %6050 = vmatpush.bf16.msra.mxu0 %v11400_v42  ;;  %v11592_v14 = vor.u32 %v13088_v46, %v11591_v38  ;;  %v11596_v43 = vor.u32 %v13084_v9, %v11593_v1  ;;  %v11532_v42 = vor.u32 %v13068_v50, %v11529_v4  ;;  %v11727_v9 = vld [vmem:[%s14496_s29 + $0x390] sm:$0xf] }
 0x41e   : > { %v13121_v1 = vld [vmem:[%s14496_s29 + $0x3ac] sm:$0xf0] }
 0x41f   : > { %v11375_v50 = vld [vmem:[%s14496_s29 + $0xd0] sm:$0xf] }
 0x420   : > { %6087 = vmatpush.bf16.msra.mxu3 %v11724_v48  ;;  %6075 = vmatpush.bf16.msra.mxu2 %v11436_v8  ;;  %v11564_v48 = vor.u32 %v13076_v57, %v11561_v27  ;;  %v13072_v8 = vld [vmem:[%s14496_s29 + $0x224] sm:$0xf0]  ;;  %v11695_v27 = vld [vmem:[%s14496_s29 + $0x350] sm:$0xf] }
 0x421   : > { %6061 = vmatpush.bf16.msra.mxu1 %v11720_v52  ;;  %6051 = vmatpush.bf16.msra.mxu0 %v11368_v5  ;;  %v11560_v52 = vor.u32 %v13080_v13, %v11559_v3  ;;  %v11528_v44 = vor.u32 %v13072_v8, %v11527_v60  ;;  %v11409_v3 = vld [vmem:[%s14496_s29 + $0x130] sm:$0xf0]  ;;  %v11728_v13 = vor.u32 %v13121_v1, %v11727_v9  ;;  %v13033_v4 = vld [vmem:[%s14496_s29 + $0xec] sm:$0xf0]  ;;  %v13062_v9 = vld [vmem:[%s14496_s29 + $0x1dc] sm:$0xf] }
 0x422   : > { %v11697_v60 = vld [vmem:[%s14496_s29 + $0x370] sm:$0xf0]  ;;  %v11513_v1 = vld [vmem:[%s14496_s29 + $0x1f8] sm:$0xf0] }
 0x424   : > { %6076 = vmatpush.bf16.msra.mxu2 %v11404_v15  ;;  %6088 = vmatpush.bf16.msra.mxu3 %v11692_v12  ;;  %v4981_v15 = vperm.slane %v4979_v31, 0  ;;  %v11377_v31 = vld [vmem:[%s14496_s29 + $0xf0] sm:$0xf0] }
 0x425   : > { %6062 = vmatpush.bf16.msra.mxu1 %v11688_v33  ;;  %6052 = vmatpush.bf16.msra.mxu0 %v11336_v39  ;;  %v13053_v39 = vld [vmem:[%s14496_s29 + $0x194] sm:$0xf] }
 0x426   : > { %v11476_v36 = vor.u32 %v13053_v39, %v11473_v63  ;;  %v11313_v39 = vld [vmem:[%s14496_s29 + $0x70] sm:$0xf0] }
 0x428   : > { %6077 = vmatpush.bf16.msra.mxu2 %v11372_v10 }
 0x429   : > { %6063 = vmatpush.bf16.msra.mxu1 %v11656_v25  ;;  %6053 = vmatpush.bf16.msra.mxu0 %v11304_v30  ;;  %v13045_v30 = vld [vmem:[%s14496_s29 + $0x154] sm:$0xf] }
 0x42a   : > { %v11444_v26 = vor.u32 %v13045_v30, %v11441_v7  ;;  %v11281_v30 = vld [vmem:[%s14496_s29 + $0x30] sm:$0xf0]  ;;  %v11511_v7 = vld [vmem:[%s14496_s29 + $0x1d8] sm:$0xf] }
 0x42c   : > { %6078 = vmatpush.bf16.msra.mxu2 %v11340_v16  ;;  %v11759_v16 = vld [vmem:[%s14496_s29 + $0x3d0] sm:$0xf] }
 0x42d   : > { %6064 = vmatpush.bf16.msra.mxu1 %v11624_v20  ;;  %v11761_v20 = vld [vmem:[%s14496_s29 + $0x3f0] sm:$0xf0]  ;;  %v11760_v38 = vor.u32 %v13129_v0, %v11759_v16  ;;  %v13089_v0 = vld [vmem:[%s14496_s29 + $0x2ac] sm:$0xf0] }
 0x42e   : > { %v11764_v46 = vor.u32 %v13125_v28, %v11761_v20  ;;  %v13085_v28 = vld [vmem:[%s14496_s29 + $0x294] sm:$0xf] }
 0x42f   : > { %v11601_v20 = vld [vmem:[%s14496_s29 + $0x2b0] sm:$0xf0] }
 0x430   : > { %6079 = vmatpush.bf16.msra.mxu2 %v11308_v51 }
 0x431   : > { %6065 = vmatpush.bf16.msra.mxu1 %v11592_v14 }
 0x434   : > { %6080 = vmatpush.bf16.msra.mxu2 %v11276_v22  ;;  %v13037_v22 = vld [vmem:[%s14496_s29 + $0x114] sm:$0xf] }
 0x435   : > { %6066 = vmatpush.bf16.msra.mxu1 %v11560_v52  ;;  %v13113_v52 = vld [vmem:[%s14496_s29 + $0x36c] sm:$0xf0] }
 0x439   : > { %6067 = vmatpush.bf16.msra.mxu1 %v11528_v44  ;;  %v11412_v44 = vor.u32 %v13037_v22, %v11409_v3  ;;  %v11516_v3 = vor.u32 %v13062_v9, %v11513_v1 }
 0x448   : > { %v15738_v41 = vpop.f32.mrf.mxu0 }
 0x449   : > { %v5155_v18 = vadd.f32 %v15738_v41, %v4981_v15  ;;  %v13065_v41 = vld [vmem:[%s14496_s29 + $0x1ec] sm:$0xf0]  ;;  %v11696_v15 = vor.u32 %v13113_v52, %v11695_v27  ;;  %v13054_v27 = vld [vmem:[%s14496_s29 + $0x19c] sm:$0xf] }
 0x44e   : > { %v15753_v34 = vpop.f32.mrf.mxu2 }
 0x44f   : > { %v5181_v12 = vadd.f32 %v15753_v34, %v4982_v11  ;;  %v13105_v11 = vld [vmem:[%s14496_s29 + $0x32c] sm:$0xf0] }
 0x450   : > { %v5156_v2 = vpop.f32.mrf.mxu0 }
 0x451   : > { %v11660_v2 = vor.u32 %v13100_v32, %v11657_v59  ;;  %v11504_v59 = vor.u32 %v13065_v41, %v11503_v19  ;;  %v11345_v19 = vld [vmem:[%s14496_s29 + $0xb0] sm:$0xf0] }
 0x453   : > { %6089 = vmatpush.bf16.msra.mxu3 %v11660_v2  ;;  %v11508_v2 = vor.u32 %v13061_v61, %v11505_v40  ;;  %v11631_v61 = vld [vmem:[%s14496_s29 + $0x2d0] sm:$0xf] }
 0x454   : > { %v13097_v40 = vld [vmem:[%s14496_s29 + $0x2ec] sm:$0xf0] }
 0x455   : > { %v11632_v63 = vor.u32 %v13097_v40, %v11631_v61  ;;  %v13118_v61 = vld [vmem:[%s14496_s29 + $0x39c] sm:$0xf] }
 0x456   : > { %v5182_v54 = vpop.f32.mrf.mxu2  ;;  %v11737_v40 = vld [vmem:[%s14496_s29 + $0x3b8] sm:$0xf0] }
 0x457   : > { %6090 = vmatpush.bf16.msra.mxu3 %v11628_v17  ;;  %v11271_v54 = vld [vmem:[%s14496_s29 + $0x8] sm:$0xf]  ;;  %v11472_v17 = vor.u32 %v13057_v49, %v11471_v45  ;;  %v13017_v45 = vld [vmem:[%s14496_s29 + $0x6c] sm:$0xf0]  ;;  %v13013_v49 = vld [vmem:[%s14496_s29 + $0x54] sm:$0xf] }
 0x458   : > { %v11272_v24 = vor.u32 %v13008_v29, %v11271_v54  ;;  %v11729_v54 = vld [vmem:[%s14496_s29 + $0x3b0] sm:$0xf0]  ;;  %v11440_v29 = vor.u32 %v13049_v35, %v11439_v62  ;;  %v13009_v62 = vld [vmem:[%s14496_s29 + $0x2c] sm:$0xf0] }
 0x459   : > { %v13005_v35 = vld [vmem:[%s14496_s29 + $0x14] sm:$0xf] }
 0x45a   : > { %6054 = vmatpush.bf16.msra.mxu0 %v11272_v24  ;;  %v11407_v24 = vld [vmem:[%s14496_s29 + $0x110] sm:$0xf] }
 0x45b   : > { %6091 = vmatpush.bf16.msra.mxu3 %v11596_v43  ;;  %v13117_v43 = vld [vmem:[%s14496_s29 + $0x394] sm:$0xf]  ;;  %v11408_v8 = vor.u32 %v13041_v55, %v11407_v24  ;;  %v11284_v55 = vor.u32 %v13005_v35, %v11281_v30 }
 0x45c   : > { %v11732_v57 = vor.u32 %v13117_v43, %v11729_v54  ;;  %v11567_v43 = vld [vmem:[%s14496_s29 + $0x250] sm:$0xf] }
 0x45d   : > { %v13081_v54 = vld [vmem:[%s14496_s29 + $0x26c] sm:$0xf0] }
 0x45e   : > { %v11568_v52 = vor.u32 %v13081_v54, %v11567_v43  ;;  %v11351_v43 = vld [vmem:[%s14496_s29 + $0x98] sm:$0xf] }
 0x45f   : > { %6092 = vmatpush.bf16.msra.mxu3 %v11564_v48  ;;  %v13109_v48 = vld [vmem:[%s14496_s29 + $0x354] sm:$0xf]  ;;  %v13026_v54 = vld [vmem:[%s14496_s29 + $0xb4] sm:$0xf0] }
 0x463   : > { %6093 = vmatpush.bf16.msra.mxu3 %v11532_v42  ;;  %v13029_v42 = vld [vmem:[%s14496_s29 + $0xd4] sm:$0xf] }
 0x488   : > { %v5167_v6 = vpop.f32.mrf.mxu1 }
 0x489   : > { %v5168_v33 = vadd.f32 %v5167_v6, %v5155_v18  ;;  %v11700_v18 = vor.u32 %v13109_v48, %v11697_v60  ;;  %v11663_v6 = vld [vmem:[%s14496_s29 + $0x310] sm:$0xf]  ;;  %v11481_v60 = vld [vmem:[%s14496_s29 + $0x1b8] sm:$0xf0] }
 0x48b   : > { %v5199_v47 = vmul.f32 1.442695, %v5168_v33  ;;  %vm5197_vm10 = vcmp.gt.f32.partialorder %v5168_v33, 0.0 }
 0x48d   : > { %13544 = vpow2.f32 %v5199_v47  ;;  %v11665_v47 = vld [vmem:[%s14496_s29 + $0x330] sm:$0xf0] }
 0x48e   : > { %v5193_v23 = vpop.f32.mrf.mxu3 }
 0x48f   : > { %v5194_v21 = vadd.f32 %v5193_v23, %v5181_v12  ;;  %v11376_v12 = vor.u32 %v13033_v4, %v11375_v50  ;;  %v11380_v23 = vor.u32 %v13029_v42, %v11377_v31  ;;  %v13069_v50 = vld [vmem:[%s14496_s29 + $0x214] sm:$0xf]  ;;  %v11767_v42 = vld [vmem:[%s14496_s29 + $0x3d8] sm:$0xf] }
 0x490   : > { %v5169_v37 = vpop.f32.mrf.mxu1  ;;  %v11537_v4 = vld [vmem:[%s14496_s29 + $0x230] sm:$0xf0]  ;;  %v13130_v31 = vld [vmem:[%s14496_s29 + $0x3f4] sm:$0xf0] }
 0x491   : > { %v5201_v5 = vmul.f32 1.442695, %v5194_v21  ;;  %vm5198_vm11 = vcmp.gt.f32.partialorder %v5194_v21, 0.0  ;;  %v13025_v37 = vld [vmem:[%s14496_s29 + $0xac] sm:$0xf0] }
 0x493   : > { %v13545_v10 = vpop.eup %13544  ;;  %13546 = vpow2.f32 %v5201_v5  ;;  %v13021_v5 = vld [vmem:[%s14496_s29 + $0x94] sm:$0xf] }
 0x494   : > { %v11259_v32 = vadd.f32 -1.0, %v13545_v10  ;;  %v11664_v10 = vor.u32 %v13105_v11, %v11663_v6  ;;  %v11484_v11 = vor.u32 %v13054_v27, %v11481_v60  ;;  %v11352_v27 = vor.u32 %v13026_v54, %v11351_v43  ;;  %v13018_v60 = vld [vmem:[%s14496_s29 + $0x74] sm:$0xf0]  ;;  %v11799_v54 = vld [vmem:[%s14500_s21 + $0x30] sm:$0xf] }
 0x496   : > { %v5205_v34 = vsel %vm5197_vm10, %v5168_v33, %v11259_v32  ;;  %v5195_v25 = vpop.f32.mrf.mxu3  ;;  %v13101_v33 = vld [vmem:[%s14496_s29 + $0x314] sm:$0xf] }
 0x497   : > { %v15835_v56 = vpack.c.bf16 %v5205_v34, %v5205_v34  ;;  %v11668_v41 = vor.u32 %v13101_v33, %v11665_v47  ;;  %v13093_v32 = vld [vmem:[%s14496_s29 + $0x2d4] sm:$0xf]  ;;  %v11447_v33 = vld [vmem:[%s14496_s29 + $0x158] sm:$0xf] }
 0x498   : > { %v11633_v34 = vld [vmem:[%s14496_s29 + $0x2f0] sm:$0xf0] }
 0x499   : > { %v13547_v53 = vpop.eup %13546  ;;  %6003 = vmatmul.bf16.vlgmr.msrb.gmra.mxu0 %v15835_v56  ;;  %6029 = vmatmul.bf16.vlgmr.msrb.gmra.mxu2 %v15835_v56  ;;  %v11636_v16 = vor.u32 %v13093_v32, %v11633_v34 }
 0x49a   : > { %v11260_v58 = vadd.f32 -1.0, %v13547_v53  ;;  %6099 = vmatpush.bf16.msrb.mxu0 %v11504_v59  ;;  %6125 = vmatpush.bf16.msrb.mxu2 %v11508_v2  ;;  %v11348_v59 = vor.u32 %v13021_v5, %v11345_v19  ;;  %v11311_v2 = vld [vmem:[%s14496_s29 + $0x50] sm:$0xf]  ;;  %v11768_v5 = vor.u32 %v13130_v31, %v11767_v42  ;;  %v11607_v42 = vld [vmem:[%s14496_s29 + $0x298] sm:$0xf] }
 0x49b   : > { %v11599_v53 = vld [vmem:[%s14496_s29 + $0x290] sm:$0xf]  ;;  %v13090_v31 = vld [vmem:[%s14496_s29 + $0x2b4] sm:$0xf0] }
 0x49c   : > { %v5206_v51 = vsel %vm5198_vm11, %v5194_v21, %v11260_v58  ;;  %v11343_v21 = vld [vmem:[%s14496_s29 + $0x90] sm:$0xf]  ;;  %v11312_v58 = vor.u32 %v13017_v45, %v11311_v2  ;;  %v13038_v2 = vld [vmem:[%s14496_s29 + $0x11c] sm:$0xf] }
 0x49d   : > { %v15851_v14 = vpack.c.bf16 %v5206_v51, %v5206_v51  ;;  %v11344_v25 = vor.u32 %v13025_v37, %v11343_v21  ;;  %v13066_v51 = vld [vmem:[%s14496_s29 + $0x1f4] sm:$0xf0]  ;;  %v13046_v21 = vld [vmem:[%s14496_s29 + $0x15c] sm:$0xf] }
 0x49e   : > { %6100 = vmatpush.bf16.msrb.mxu0 %v11472_v17  ;;  %6126 = vmatpush.bf16.msrb.mxu2 %v11476_v36  ;;  %v11316_v17 = vor.u32 %v13013_v49, %v11313_v39  ;;  %v11279_v36 = vld [vmem:[%s14496_s29 + $0x10] sm:$0xf]  ;;  %v11512_v22 = vor.u32 %v13066_v51, %v11511_v7  ;;  %v11449_v37 = vld [vmem:[%s14496_s29 + $0x178] sm:$0xf0]  ;;  %v11740_v39 = vor.u32 %v13118_v61, %v11737_v40  ;;  %v11671_v7 = vld [vmem:[%s14496_s29 + $0x318] sm:$0xf] }
 0x49f   : > { %6016 = vmatmul.bf16.vlgmr.msrb.gmra.mxu1 %v15851_v14  ;;  %6042 = vmatmul.bf16.vlgmr.msrb.gmra.mxu3 %v15851_v14  ;;  %v11280_v24 = vor.u32 %v13009_v62, %v11279_v36  ;;  %v11452_v34 = vor.u32 %v13046_v21, %v11449_v37  ;;  %v11417_v45 = vld [vmem:[%s14496_s29 + $0x138] sm:$0xf0]  ;;  %v13106_v51 = vld [vmem:[%s14496_s29 + $0x334] sm:$0xf0]  ;;  %v11608_v21 = vor.u32 %v13090_v31, %v11607_v42 }
 0x4a0   : > { %6112 = vmatpush.bf16.msrb.mxu1 %v11760_v38  ;;  %6138 = vmatpush.bf16.msrb.mxu3 %v11764_v46  ;;  %v11600_v38 = vor.u32 %v13089_v0, %v11599_v53  ;;  %v11604_v46 = vor.u32 %v13085_v28, %v11601_v20  ;;  %v13110_v53 = vld [vmem:[%s14496_s29 + $0x35c] sm:$0xf]  ;;  %v11420_v20 = vor.u32 %v13038_v2, %v11417_v45 }
 0x4a1   : > { %v11705_v0 = vld [vmem:[%s14496_s29 + $0x378] sm:$0xf0] }
 0x4a2   : > { %6101 = vmatpush.bf16.msrb.mxu0 %v11440_v29  ;;  %6127 = vmatpush.bf16.msrb.mxu2 %v11444_v26  ;;  %v13077_v29 = vld [vmem:[%s14496_s29 + $0x254] sm:$0xf]  ;;  %v13030_v36 = vld [vmem:[%s14496_s29 + $0xdc] sm:$0xf]  ;;  %v11708_v30 = vor.u32 %v13110_v53, %v11705_v0  ;;  %v11823_v0 = vld [vmem:[%s14500_s21 + $0x60] sm:$0xf] }
 0x4a3   : > { %v11569_v26 = vld [vmem:[%s14496_s29 + $0x270] sm:$0xf0]  ;;  %v11385_v62 = vld [vmem:[%s14496_s29 + $0xf8] sm:$0xf0] }
 0x4a4   : > { %6113 = vmatpush.bf16.msrb.mxu1 %v11728_v13  ;;  %6139 = vmatpush.bf16.msrb.mxu3 %v11732_v57  ;;  %v11479_v13 = vld [vmem:[%s14496_s29 + $0x198] sm:$0xf]  ;;  %v11572_v48 = vor.u32 %v13077_v29, %v11569_v26  ;;  %v11388_v1 = vor.u32 %v13030_v36, %v11385_v62  ;;  %v13022_v29 = vld [vmem:[%s14496_s29 + $0x9c] sm:$0xf]  ;;  %v11815_v36 = vld [vmem:[%s14500_s21 + $0x50] sm:$0xf] }
 0x4a5   : > { %v13058_v57 = vld [vmem:[%s14496_s29 + $0x1b4] sm:$0xf0]  ;;  %v11353_v26 = vld [vmem:[%s14496_s29 + $0xb8] sm:$0xf0] }
 0x4a6   : > { %6102 = vmatpush.bf16.msrb.mxu0 %v11408_v8  ;;  %6128 = vmatpush.bf16.msrb.mxu2 %v11412_v44  ;;  %v11535_v8 = vld [vmem:[%s14496_s29 + $0x210] sm:$0xf]  ;;  %v11480_v6 = vor.u32 %v13058_v57, %v11479_v13  ;;  %v13094_v13 = vld [vmem:[%s14496_s29 + $0x2dc] sm:$0xf] }
 0x4a7   : > { %v13073_v44 = vld [vmem:[%s14496_s29 + $0x22c] sm:$0xf0]  ;;  %v11641_v57 = vld [vmem:[%s14496_s29 + $0x2f8] sm:$0xf0] }
 0x4a8   : > { %6114 = vmatpush.bf16.msrb.mxu1 %v11696_v15  ;;  %6140 = vmatpush.bf16.msrb.mxu3 %v11700_v18  ;;  %v13126_v15 = vld [vmem:[%s14496_s29 + $0x3dc] sm:$0xf]  ;;  %v11536_v47 = vor.u32 %v13073_v44, %v11535_v8 }
 0x4a9   : > { %6055 = vmatmul.bf16.vlgmr.msra.gmra.mxu0 %v15835_v56  ;;  %6081 = vmatmul.bf16.vlgmr.msra.gmra.mxu2 %v15835_v56  ;;  %v11769_v18 = vld [vmem:[%s14496_s29 + $0x3f8] sm:$0xf0] }
 0x4aa   : > { %6103 = vmatpush.bf16.msrb.mxu0 %v11376_v12  ;;  %6129 = vmatpush.bf16.msrb.mxu2 %v11380_v23  ;;  %v11540_v12 = vor.u32 %v13069_v50, %v11537_v4  ;;  %v13050_v23 = vld [vmem:[%s14496_s29 + $0x174] sm:$0xf0]  ;;  %v11772_v19 = vor.u32 %v13126_v15, %v11769_v18  ;;  %v13014_v8 = vld [vmem:[%s14496_s29 + $0x5c] sm:$0xf]  ;;  %v11644_v4 = vor.u32 %v13094_v13, %v11641_v57  ;;  %v11791_v13 = vld [vmem:[%s14500_s21 + $0x20] sm:$0xf] }
 0x4ab   : > { %v11448_v32 = vor.u32 %v13050_v23, %v11447_v33  ;;  %v11321_v44 = vld [vmem:[%s14496_s29 + $0x78] sm:$0xf0]  ;;  %v11287_v33 = vld [vmem:[%s14496_s29 + $0x18] sm:$0xf] }
 0x4ac   : > { %6115 = vmatpush.bf16.msrb.mxu1 %v11664_v10  ;;  %6141 = vmatpush.bf16.msrb.mxu3 %v11668_v41  ;;  %v11735_v10 = vld [vmem:[%s14496_s29 + $0x398] sm:$0xf]  ;;  %v13086_v15 = vld [vmem:[%s14496_s29 + $0x29c] sm:$0xf] }
 0x4ad   : > { %v13122_v41 = vld [vmem:[%s14496_s29 + $0x3b4] sm:$0xf0]  ;;  %v11609_v18 = vld [vmem:[%s14496_s29 + $0x2b8] sm:$0xf0] }
 0x4ae   : > { %6104 = vmatpush.bf16.msrb.mxu0 %v11344_v25  ;;  %6130 = vmatpush.bf16.msrb.mxu2 %v11348_v59  ;;  %v11415_v25 = vld [vmem:[%s14496_s29 + $0x118] sm:$0xf]  ;;  %v11736_v49 = vor.u32 %v13122_v41, %v11735_v10  ;;  %v11289_v23 = vld [vmem:[%s14496_s29 + $0x38] sm:$0xf0]  ;;  %v11612_v37 = vor.u32 %v13086_v15, %v11609_v18  ;;  %v11855_v15 = vld [vmem:[%s14500_s21 + $0xa0] sm:$0xf] }
 0x4af   : > { %6068 = vmatmul.bf16.vlgmr.msra.gmra.mxu1 %v15851_v14  ;;  %6094 = vmatmul.bf16.vlgmr.msra.gmra.mxu3 %v15851_v14  ;;  %v13042_v59 = vld [vmem:[%s14496_s29 + $0x134] sm:$0xf0]  ;;  %v13078_v10 = vld [vmem:[%s14496_s29 + $0x25c] sm:$0xf] }
 0x4b0   : > { %6116 = vmatpush.bf16.msrb.mxu1 %v11632_v63  ;;  %6142 = vmatpush.bf16.msrb.mxu3 %v11636_v16  ;;  %v11703_v63 = vld [vmem:[%s14496_s29 + $0x358] sm:$0xf]  ;;  %v11416_v28 = vor.u32 %v13042_v59, %v11415_v25  ;;  %v11577_v41 = vld [vmem:[%s14496_s29 + $0x278] sm:$0xf0] }
 0x4b1   : > { %v13114_v16 = vld [vmem:[%s14496_s29 + $0x374] sm:$0xf0]  ;;  %v13070_v2 = vld [vmem:[%s14496_s29 + $0x21c] sm:$0xf] }
 0x4b2   : > { %6105 = vmatpush.bf16.msrb.mxu0 %v11312_v58  ;;  %6131 = vmatpush.bf16.msrb.mxu2 %v11316_v17  ;;  %v11383_v58 = vld [vmem:[%s14496_s29 + $0xd8] sm:$0xf]  ;;  %v11704_v35 = vor.u32 %v13114_v16, %v11703_v63  ;;  %v11545_v45 = vld [vmem:[%s14496_s29 + $0x238] sm:$0xf0]  ;;  %v11831_v63 = vld [vmem:[%s14500_s21 + $0x70] sm:$0xf] }
 0x4b3   : > { %v13034_v17 = vld [vmem:[%s14496_s29 + $0xf4] sm:$0xf0]  ;;  %v13146_v16 = vld [vmem:[%s14500_s21 + $0x74] sm:$0xf0] }
 0x4b4   : > { %6117 = vmatpush.bf16.msrb.mxu1 %v11600_v38  ;;  %6143 = vmatpush.bf16.msrb.mxu3 %v11604_v46  ;;  %v13102_v38 = vld [vmem:[%s14496_s29 + $0x31c] sm:$0xf]  ;;  %v11384_v9 = vor.u32 %v13034_v17, %v11383_v58  ;;  %v11543_v25 = vld [vmem:[%s14496_s29 + $0x218] sm:$0xf]  ;;  %v11832_v53 = vor.u32 %v13146_v16, %v11831_v63  ;;  %v13162_v58 = vld [vmem:[%s14500_s21 + $0xf4] sm:$0xf0] }
 0x4b5   : > { %v11673_v46 = vld [vmem:[%s14496_s29 + $0x338] sm:$0xf0]  ;;  %v13074_v59 = vld [vmem:[%s14496_s29 + $0x234] sm:$0xf0]  ;;  %v13150_v63 = vld [vmem:[%s14500_s21 + $0x94] sm:$0xf0] }
 0x4b6   : > { %6106 = vmatpush.bf16.msrb.mxu0 %v11280_v24  ;;  %6132 = vmatpush.bf16.msrb.mxu2 %v11284_v55  ;;  %v11672_v24 = vor.u32 %v13106_v51, %v11671_v7  ;;  %v11676_v55 = vor.u32 %v13102_v38, %v11673_v46  ;;  %v11807_v51 = vld [vmem:[%s14500_s21 + $0x40] sm:$0xf]  ;;  %v13140_v38 = vld [vmem:[%s14500_s21 + $0x44] sm:$0xf0] }
 0x4b7   : > { %v11808_v46 = vor.u32 %v13140_v38, %v11807_v51  ;;  %v13136_v57 = vld [vmem:[%s14500_s21 + $0x24] sm:$0xf0]  ;;  %v11951_v16 = vld [vmem:[%s14500_s21 + $0x160] sm:$0xf] }
 0x4b8   : > { %6118 = vmatpush.bf16.msrb.mxu1 %v11568_v52  ;;  %6144 = vmatpush.bf16.msrb.mxu3 %v11572_v48  ;;  %v11356_v52 = vor.u32 %v13022_v29, %v11353_v26  ;;  %v11319_v48 = vld [vmem:[%s14496_s29 + $0x58] sm:$0xf]  ;;  %v13138_v29 = vld [vmem:[%s14500_s21 + $0x34] sm:$0xf0] }
 0x4b9   : > { %6107 = vmatmul.bf16.vlgmr.msrb.gmra.mxu0 %v15835_v56  ;;  %6133 = vmatmul.bf16.vlgmr.msrb.gmra.mxu2 %v15835_v56  ;;  %v11800_v26 = vor.u32 %v13138_v29, %v11799_v54  ;;  %v13152_v18 = vld [vmem:[%s14500_s21 + $0xa4] sm:$0xf0] }
 0x4ba   : > { %6151 = vmatpush.bf16.msra.mxu0 %v11512_v22  ;;  %6177 = vmatpush.bf16.msra.mxu2 %v11516_v3  ;;  %v11639_v22 = vld [vmem:[%s14496_s29 + $0x2d8] sm:$0xf] }
 0x4bb   : > { %v13098_v3 = vld [vmem:[%s14496_s29 + $0x2f4] sm:$0xf0] }
 0x4bc   : > { %6119 = vmatpush.bf16.msrb.mxu1 %v11536_v47  ;;  %6145 = vmatpush.bf16.msrb.mxu3 %v11540_v12  ;;  %v11640_v50 = vor.u32 %v13098_v3, %v11639_v22  ;;  %v13010_v47 = vld [vmem:[%s14496_s29 + $0x34] sm:$0xf0]  ;;  %v13006_v12 = vld [vmem:[%s14496_s29 + $0x1c] sm:$0xf]  ;;  %v15997_v3 = vld [vmem:[%s14498_s5] sm:$0xff] }
 0x4bd   : > { %v11288_v61 = vor.u32 %v13010_v47, %v11287_v33  ;;  %v11292_v40 = vor.u32 %v13006_v12, %v11289_v23  ;;  %v11856_v33 = vor.u32 %v13152_v18, %v11855_v15  ;;  %v5340_v12 = vperm.slane %v15997_v3, 1 }
 0x4be   : > { %6152 = vmatpush.bf16.msra.mxu0 %v11480_v6  ;;  %6178 = vmatpush.bf16.msra.mxu2 %v11484_v11  ;;  %v11320_v6 = vor.u32 %v13018_v60, %v11319_v48  ;;  %v11324_v11 = vor.u32 %v13014_v8, %v11321_v44  ;;  %v5339_v48 = vperm.slane %v15997_v3, 0  ;;  %v11863_v60 = vld [vmem:[%s14500_s21 + $0xb0] sm:$0xf]  ;;  %v13154_v8 = vld [vmem:[%s14500_s21 + $0xb4] sm:$0xf0]  ;;  %v5343_v51 = vperm.slane %v15997_v3, 4 }
 0x4bf   : > { %6120 = vmatmul.bf16.vlgmr.msrb.gmra.mxu1 %v15851_v14  ;;  %6146 = vmatmul.bf16.vlgmr.msrb.gmra.mxu3 %v15851_v14  ;;  %v11864_v44 = vor.u32 %v13154_v8, %v11863_v60 }
 0x4c0   : > { %6164 = vmatpush.bf16.msra.mxu1 %v11768_v5  ;;  %6190 = vmatpush.bf16.msra.mxu3 %v11772_v19  ;;  %v11575_v5 = vld [vmem:[%s14496_s29 + $0x258] sm:$0xf] }
 0x4c1   : > { %v13082_v19 = vld [vmem:[%s14496_s29 + $0x274] sm:$0xf0] }
 0x4c2   : > { %6153 = vmatpush.bf16.msra.mxu0 %v11448_v32  ;;  %6179 = vmatpush.bf16.msra.mxu2 %v11452_v34  ;;  %v11576_v32 = vor.u32 %v13082_v19, %v11575_v5  ;;  %v11580_v34 = vor.u32 %v13078_v10, %v11577_v41  ;;  %v13132_v5 = vld [vmem:[%s14500_s21 + $0x4] sm:$0xf0]  ;;  %v11959_v19 = vld [vmem:[%s14500_s21 + $0x170] sm:$0xf] }
 0x4c4   : > { %6165 = vmatpush.bf16.msra.mxu1 %v11736_v49  ;;  %6191 = vmatpush.bf16.msra.mxu3 %v11740_v39  ;;  %v11544_v49 = vor.u32 %v13074_v59, %v11543_v25  ;;  %v11548_v39 = vor.u32 %v13070_v2, %v11545_v45  ;;  %v12087_v25 = vld [vmem:[%s14500_s21 + $0x270] sm:$0xf]  ;;  %v13210_v59 = vld [vmem:[%s14500_s21 + $0x274] sm:$0xf0] }
 0x4c5   : > { %v11847_v2 = vld [vmem:[%s14500_s21 + $0x90] sm:$0xf] }
 0x4c6   : > { %6154 = vmatpush.bf16.msra.mxu0 %v11416_v28  ;;  %6180 = vmatpush.bf16.msra.mxu2 %v11420_v20  ;;  %v13144_v28 = vld [vmem:[%s14500_s21 + $0x64] sm:$0xf0] }
 0x4c7   : > { %v11824_v20 = vor.u32 %v13144_v28, %v11823_v0  ;;  %v11848_v28 = vor.u32 %v13150_v63, %v11847_v2  ;;  %v13224_v2 = vld [vmem:[%s14500_s21 + $0x2e4] sm:$0xf0]  ;;  %v11935_v63 = vld [vmem:[%s14500_s21 + $0x140] sm:$0xf] }
 0x4c8   : > { %6166 = vmatpush.bf16.msra.mxu1 %v11704_v35  ;;  %6192 = vmatpush.bf16.msra.mxu3 %v11708_v30  ;;  %v11887_v35 = vld [vmem:[%s14500_s21 + $0xe0] sm:$0xf]  ;;  %v13160_v30 = vld [vmem:[%s14500_s21 + $0xe4] sm:$0xf0] }
 0x4c9   : > { %v11888_v7 = vor.u32 %v13160_v30, %v11887_v35 }
 0x4ca   : > { %6155 = vmatpush.bf16.msra.mxu0 %v11384_v9  ;;  %6181 = vmatpush.bf16.msra.mxu2 %v11388_v1  ;;  %v11879_v9 = vld [vmem:[%s14500_s21 + $0xd0] sm:$0xf]  ;;  %v13158_v1 = vld [vmem:[%s14500_s21 + $0xd4] sm:$0xf0] }
 0x4cb   : > { %v11880_v43 = vor.u32 %v13158_v1, %v11879_v9  ;;  %v12079_v9 = vld [vmem:[%s14500_s21 + $0x260] sm:$0xf]  ;;  %v13208_v1 = vld [vmem:[%s14500_s21 + $0x264] sm:$0xf0] }
 0x4cc   : > { %6167 = vmatpush.bf16.msra.mxu1 %v11672_v24  ;;  %6193 = vmatpush.bf16.msra.mxu3 %v11676_v55  ;;  %v11871_v24 = vld [vmem:[%s14500_s21 + $0xc0] sm:$0xf]  ;;  %v13156_v55 = vld [vmem:[%s14500_s21 + $0xc4] sm:$0xf0]  ;;  %v12080_v29 = vor.u32 %v13208_v1, %v12079_v9 }
 0x4cd   : > { %v11872_v22 = vor.u32 %v13156_v55, %v11871_v24  ;;  %v13148_v24 = vld [vmem:[%s14500_s21 + $0x84] sm:$0xf0] }
 0x4ce   : > { %6156 = vmatpush.bf16.msra.mxu0 %v11352_v27  ;;  %6182 = vmatpush.bf16.msra.mxu2 %v11356_v52  ;;  %v11792_v27 = vor.u32 %v13136_v57, %v11791_v13  ;;  %v12023_v13 = vld [vmem:[%s14500_s21 + $0x1f0] sm:$0xf]  ;;  %v13194_v57 = vld [vmem:[%s14500_s21 + $0x1f4] sm:$0xf0] }
 0x4d0   : > { %6168 = vmatpush.bf16.msra.mxu1 %v11640_v50  ;;  %6194 = vmatpush.bf16.msra.mxu3 %v11644_v4  ;;  %v11783_v50 = vld [vmem:[%s14500_s21 + $0x10] sm:$0xf]  ;;  %v13134_v4 = vld [vmem:[%s14500_s21 + $0x14] sm:$0xf0] }
 0x4d1   : > { %v11784_v42 = vor.u32 %v13134_v4, %v11783_v50  ;;  %v13226_v50 = vld [vmem:[%s14500_s21 + $0x2f4] sm:$0xf0]  ;;  %v11943_v4 = vld [vmem:[%s14500_s21 + $0x150] sm:$0xf] }
 0x4d2   : > { %6157 = vmatpush.bf16.msra.mxu0 %v11320_v6  ;;  %6183 = vmatpush.bf16.msra.mxu2 %v11324_v11 }
 0x4d4   : > { %6169 = vmatpush.bf16.msra.mxu1 %v11608_v21  ;;  %6195 = vmatpush.bf16.msra.mxu3 %v11612_v37  ;;  %v11775_v37 = vld [vmem:[%s14500_s21] sm:$0xf] }
 0x4d6   : > { %6158 = vmatpush.bf16.msra.mxu0 %v11288_v61  ;;  %6184 = vmatpush.bf16.msra.mxu2 %v11292_v40  ;;  %v11776_v61 = vor.u32 %v13132_v5, %v11775_v37  ;;  %v13178_v40 = vld [vmem:[%s14500_s21 + $0x174] sm:$0xf0]  ;;  %v5344_v37 = vperm.slane %v15997_v3, 5  ;;  %v12015_v5 = vld [vmem:[%s14500_s21 + $0x1e0] sm:$0xf] }
 0x4d8   : > { %6170 = vmatpush.bf16.msra.mxu1 %v11576_v32  ;;  %6196 = vmatpush.bf16.msra.mxu3 %v11580_v34  ;;  %v11960_v34 = vor.u32 %v13178_v40, %v11959_v19  ;;  %v13192_v19 = vld [vmem:[%s14500_s21 + $0x1e4] sm:$0xf0]  ;;  %v12143_v40 = vld [vmem:[%s14500_s21 + $0x2e0] sm:$0xf] }
 0x4d9   : > { %6159 = vmatmul.bf16.vlgmr.msra.gmra.mxu0 %v15835_v56  ;;  %6185 = vmatmul.bf16.vlgmr.msra.gmra.mxu2 %v15835_v56  ;;  %v11895_v56 = vld [vmem:[%s14500_s21 + $0xf0] sm:$0xf] }
 0x4da   : > { %7305 = vmatpush.bf16.msrb.mxu0 %v11832_v53  ;;  %v11896_v17 = vor.u32 %v13162_v58, %v11895_v56  ;;  %7331 = vmatpush.bf16.msrb.mxu2 %v11960_v34 }
 0x4dc   : > { %6171 = vmatpush.bf16.msra.mxu1 %v11544_v49  ;;  %6197 = vmatpush.bf16.msra.mxu3 %v11548_v39  ;;  %v12088_v39 = vor.u32 %v13210_v59, %v12087_v25 }
 0x4de   : > { %7306 = vmatpush.bf16.msrb.mxu0 %v11824_v20  ;;  %v13176_v20 = vld [vmem:[%s14500_s21 + $0x164] sm:$0xf0] }
 0x4df   : > { %6172 = vmatmul.bf16.vlgmr.msra.gmra.mxu1 %v15851_v14  ;;  %6198 = vmatmul.bf16.vlgmr.msra.gmra.mxu3 %v15851_v14  ;;  %v13142_v14 = vld [vmem:[%s14500_s21 + $0x54] sm:$0xf0] }
 0x4e0   : > { %7318 = vmatpush.bf16.msrb.mxu1 %v11896_v17  ;;  %v11816_v62 = vor.u32 %v13142_v14, %v11815_v36  ;;  %v11952_v14 = vor.u32 %v13176_v20, %v11951_v16  ;;  %v13172_v16 = vld [vmem:[%s14500_s21 + $0x144] sm:$0xf0] }
 0x4e2   : > { %7307 = vmatpush.bf16.msrb.mxu0 %v11816_v62  ;;  %v5341_v62 = vperm.slane %v15997_v3, 2  ;;  %7332 = vmatpush.bf16.msrb.mxu2 %v11952_v14 }
 0x4e4   : > { %7319 = vmatpush.bf16.msrb.mxu1 %v11888_v7  ;;  %v5342_v7 = vperm.slane %v15997_v3, 3 }
 0x4e6   : > { %7308 = vmatpush.bf16.msrb.mxu0 %v11808_v46 }
 0x4e8   : > { %7320 = vmatpush.bf16.msrb.mxu1 %v11880_v43 }
 0x4ea   : > { %7309 = vmatpush.bf16.msrb.mxu0 %v11800_v26  ;;  %v11839_v26 = vld [vmem:[%s14500_s21 + $0x80] sm:$0xf] }
 0x4ec   : > { %7321 = vmatpush.bf16.msrb.mxu1 %v11872_v22  ;;  %v11840_v22 = vor.u32 %v13148_v24, %v11839_v26 }
 0x4ee   : > { %7310 = vmatpush.bf16.msrb.mxu0 %v11792_v27  ;;  %v12151_v27 = vld [vmem:[%s14500_s21 + $0x2f0] sm:$0xf] }
 0x4ef   : > { %v12152_v18 = vor.u32 %v13226_v50, %v12151_v27 }
 0x4f0   : > { %7322 = vmatpush.bf16.msrb.mxu1 %v11864_v44  ;;  %v12024_v44 = vor.u32 %v13194_v57, %v12023_v13 }
 0x4f2   : > { %7311 = vmatpush.bf16.msrb.mxu0 %v11784_v42  ;;  %7344 = vmatpush.bf16.msrb.mxu3 %v12024_v44 }
 0x4f4   : > { %7323 = vmatpush.bf16.msrb.mxu1 %v11856_v33  ;;  %v13206_v33 = vld [vmem:[%s14500_s21 + $0x254] sm:$0xf0] }
 0x4f6   : > { %7312 = vmatpush.bf16.msrb.mxu0 %v11776_v61 }
 0x4f8   : > { %7324 = vmatpush.bf16.msrb.mxu1 %v11848_v28 }
 0x4fa   : > { %7357 = vmatpush.bf16.msra.mxu0 %v12088_v39  ;;  %v12016_v39 = vor.u32 %v13192_v19, %v12015_v5 }
 0x4fc   : > { %7325 = vmatpush.bf16.msrb.mxu1 %v11840_v22  ;;  %7345 = vmatpush.bf16.msrb.mxu3 %v12016_v39 }
 0x4fe   : > { %7358 = vmatpush.bf16.msra.mxu0 %v12080_v29 }
 0x500   : > { %7370 = vmatpush.bf16.msra.mxu1 %v12152_v18 }
 0x516   : > { %v6004_v52 = vpop.f32.mrf.mxu0 }
 0x517   : > { %v6005_v31 = vadd.f32 %v6004_v52, %v5339_v48 }
 0x51c   : > { %v6017_v6 = vpop.f32.mrf.mxu1  ;;  %v6030_v11 = vpop.f32.mrf.mxu2 }
 0x51d   : > { %v6018_v47 = vadd.f32 %v6017_v6, %v6005_v31  ;;  %v6031_v41 = vadd.f32 %v6030_v11, %v5340_v12  ;;  %v13174_v6 = vld [vmem:[%s14500_s21 + $0x154] sm:$0xf0]  ;;  %v12071_v11 = vld [vmem:[%s14500_s21 + $0x250] sm:$0xf] }
 0x51e   : > { %v6006_v23 = vpop.f32.mrf.mxu0  ;;  %v11944_v25 = vor.u32 %v13174_v6, %v11943_v4  ;;  %v12072_v59 = vor.u32 %v13206_v33, %v12071_v11  ;;  %v11927_v33 = vld [vmem:[%s14500_s21 + $0x130] sm:$0xf] }
 0x51f   : > { %v16009_v21 = vmul.f32 0.70710677, %v6018_v47  ;;  %v16040_v52 = vmul.f32 0.5, %v6018_v47 }
 0x520   : > { %7333 = vmatpush.bf16.msrb.mxu2 %v11944_v25  ;;  %7359 = vmatpush.bf16.msra.mxu0 %v12072_v59 }
 0x521   : > { %v6219_v10 = vand.u32 2147483647, %v16009_v21  ;;  %vm6483_vm8 = vcmp.lt.f32.partialorder %v16009_v21, 0.0 }
 0x522   : > { %v6043_v32 = vpop.f32.mrf.mxu3 }
 0x523   : > { %v6227_v45 = vmul.f32 0.3275911, %v6219_v10  ;;  %v6044_v49 = vadd.f32 %v6043_v32, %v6031_v41  ;;  %v6435_v58 = vmul.f32 %v6219_v10, %v6219_v10 }
 0x524   : > { %v6019_v53 = vpop.f32.mrf.mxu1  ;;  %v6032_v0 = vpop.f32.mrf.mxu2 }
 0x525   : > { %v16022_v56 = vadd.f32 1.0, %v6227_v45  ;;  %v16024_v17 = vmul.f32 0.70710677, %v6044_v49  ;;  %v6443_v46 = vsub.f32 0.0, %v6435_v58  ;;  %v16053_v12 = vmul.f32 0.5, %v6044_v49 }
 0x526   : > { %v6056_v36 = vpop.f32.mrf.mxu0  ;;  %v12144_v58 = vor.u32 %v13224_v2, %v12143_v40 }
 0x527   : > { %13548 = vrcp.f32 %v16022_v56  ;;  %v6252_v35 = vand.u32 2147483647, %v16022_v56  ;;  %v6220_v30 = vand.u32 2147483647, %v16024_v17  ;;  %v6254_v38 = vand.u32 2147483648, %v16022_v56 }
 0x528   : > { %v6057_v55 = vadd.f32 %v6056_v36, %v5341_v62  ;;  %v6451_v61 = vmul.f32 1.442695, %v6443_v46  ;;  %v12063_v36 = vld [vmem:[%s14500_s21 + $0x240] sm:$0xf]  ;;  %vm6248_vm14 = vweird.f32 %v16022_v56  ;;  %v11936_v62 = vor.u32 %v13172_v16, %v11935_v63  ;;  %7371 = vmatpush.bf16.msra.mxu1 %v12144_v58 }
 0x529   : > { %v6228_v43 = vmul.f32 0.3275911, %v6220_v30  ;;  %v6436_v31 = vmul.f32 %v6220_v30, %v6220_v30  ;;  %vm16059_vm12 = vcmp.eq.f32.partialorder %v6252_v35, 8.507059e+37  ;;  %v6255_v41 = vor.u32 1.1754944e-38, %v6254_v38  ;;  %v13204_v35 = vld [vmem:[%s14500_s21 + $0x244] sm:$0xf0] }
 0x52a   : > { %v6045_v54 = vpop.f32.mrf.mxu3  ;;  %v12007_v30 = vld [vmem:[%s14500_s21 + $0x1d0] sm:$0xf]  ;;  %v12064_v29 = vor.u32 %v13204_v35, %v12063_v36  ;;  %7334 = vmatpush.bf16.msrb.mxu2 %v11936_v62  ;;  %v13188_v35 = vld [vmem:[%s14500_s21 + $0x1c4] sm:$0xf0] }
 0x52b   : > { %v16042_v48 = vadd.f32 1.0, %v6228_v43  ;;  %v6444_v45 = vsub.f32 0.0, %v6436_v31  ;;  %v12135_v31 = vld [vmem:[%s14500_s21 + $0x2d0] sm:$0xf] }
 0x52c   : > { %v6069_v60 = vpop.f32.mrf.mxu1  ;;  %v6082_v8 = vpop.f32.mrf.mxu2  ;;  %7360 = vmatpush.bf16.msra.mxu0 %v12064_v29  ;;  %v11919_v29 = vld [vmem:[%s14500_s21 + $0x120] sm:$0xf] }
 0x52d   : > { %v16046_v42 = vpop.eup %13548  ;;  %v6070_v15 = vadd.f32 %v6069_v60, %v6057_v55  ;;  %13550 = vrcp.f32 %v16042_v48  ;;  %v6083_v49 = vadd.f32 %v6082_v8, %v5342_v7  ;;  %v6267_v0 = vand.u32 2147483647, %v16042_v48  ;;  %v13190_v7 = vld [vmem:[%s14500_s21 + $0x1d4] sm:$0xf0] }
 0x52e   : > { %v6244_v47 = vmul.f32 %v16046_v42, %v16022_v56  ;;  %v6058_v23 = vpop.f32.mrf.mxu0  ;;  %vm6249_vm13 = vweird.f32 %v16046_v42  ;;  %13552 = vpow2.f32 %v6451_v61  ;;  %v6269_v9 = vand.u32 2147483648, %v16042_v48 }
 0x52f   : > { %v16064_v34 = vmul.f32 0.70710677, %v6070_v15  ;;  %vm6250_vm15 = vmor %vm6248_vm14, %vm6249_vm13  ;;  %v6453_v24 = vmul.f32 1.442695, %v6444_v45  ;;  %v16085_v55 = vmul.f32 0.5, %v6070_v15  ;;  %v12008_v56 = vor.u32 %v13190_v7, %v12007_v30 }
 0x530   : > { %v6245_v32 = vsub.f32 1.0, %v6244_v47  ;;  %vm16096_vm0 = vcmp.eq.f32.partialorder %v6267_v0, 8.507059e+37  ;;  %v13222_v15 = vld [vmem:[%s14500_s21 + $0x2d4] sm:$0xf0]  ;;  %vm6263_vm1 = vweird.f32 %v16042_v48  ;;  %v6270_v5 = vor.u32 1.1754944e-38, %v6269_v9 }
 0x531   : > { %v6221_v28 = vand.u32 2147483647, %v16064_v34  ;;  %7346 = vmatpush.bf16.msrb.mxu3 %v12008_v56  ;;  %v13170_v47 = vld [vmem:[%s14500_s21 + $0x134] sm:$0xf0]  ;;  %vm6484_vm13 = vcmp.lt.f32.partialorder %v16024_v17, 0.0 }
 0x532   : > { %v6246_v53 = vmul.f32 %v16046_v42, %v6245_v32  ;;  %v6095_v20 = vpop.f32.mrf.mxu3  ;;  %v11928_v39 = vor.u32 %v13170_v47, %v11927_v33  ;;  %v13202_v0 = vld [vmem:[%s14500_s21 + $0x234] sm:$0xf0] }
 0x533   : > { %v6096_v14 = vadd.f32 %v6095_v20, %v6083_v49  ;;  %v13551_v38 = vpop.eup %13550  ;;  %v6229_v1 = vmul.f32 0.3275911, %v6221_v28  ;;  %v6437_v27 = vmul.f32 %v6221_v28, %v6221_v28  ;;  %v12136_v49 = vor.u32 %v13222_v15, %v12135_v31  ;;  %v11999_v28 = vld [vmem:[%s14500_s21 + $0x1c0] sm:$0xf] }
 0x534   : > { %v6247_v46 = vadd.f32 %v16046_v42, %v6246_v53  ;;  %v6071_v43 = vpop.f32.mrf.mxu1  ;;  %v6084_v54 = vpop.f32.mrf.mxu2  ;;  %v6259_v26 = vmul.f32 %v13551_v38, %v16042_v48  ;;  %vm6264_vm2 = vweird.f32 %v13551_v38  ;;  %v12055_v53 = vld [vmem:[%s14500_s21 + $0x230] sm:$0xf]  ;;  %7335 = vmatpush.bf16.msrb.mxu2 %v11928_v39  ;;  %v12000_v50 = vor.u32 %v13188_v35, %v11999_v28 }
 0x535   : > { %v16087_v22 = vmul.f32 0.70710677, %v6096_v14  ;;  %v16090_v57 = vadd.f32 1.0, %v6229_v1  ;;  %v16105_v18 = vpop.eup %13552  ;;  %v6445_v19 = vsub.f32 0.0, %v6437_v27  ;;  %v16110_v10 = vmul.f32 0.5, %v6096_v14  ;;  %vm6265_vm3 = vmor %vm6263_vm1, %vm6264_vm2  ;;  %7372 = vmatpush.bf16.msra.mxu1 %v12136_v49 }
 0x536   : > { %v6251_v13 = vsel %vm6250_vm15, %v16046_v42, %v6247_v46  ;;  %v6108_v60 = vpop.f32.mrf.mxu0  ;;  %v6260_v44 = vsub.f32 1.0, %v6259_v26  ;;  %v12127_v46 = vld [vmem:[%s14500_s21 + $0x2c0] sm:$0xf]  ;;  %v13168_v26 = vld [vmem:[%s14500_s21 + $0x124] sm:$0xf0]  ;;  %v12056_v27 = vor.u32 %v13202_v0, %v12055_v53  ;;  %7347 = vmatpush.bf16.msrb.mxu3 %v12000_v50  ;;  %vm6485_vm1 = vcmp.lt.f32.partialorder %v16064_v34, 0.0 }
 0x537   : > { %v16094_v8 = vsel %vm16059_vm12, %v6255_v41, %v6251_v13  ;;  %v6222_v4 = vand.u32 2147483647, %v16087_v22  ;;  %13554 = vrcp.f32 %v16090_v57  ;;  %v6282_v40 = vand.u32 2147483647, %v16090_v57  ;;  %v13214_v34 = vld [vmem:[%s14500_s21 + $0x294] sm:$0xf0] }
 0x538   : > { %v6363_v42 = vmul.f32 1.0614054, %v16094_v8  ;;  %v6261_v6 = vmul.f32 %v13551_v38, %v6260_v44  ;;  %v6284_v32 = vand.u32 2147483648, %v16090_v57  ;;  %v16129_v36 = vmul.f32 1.442695, %v6445_v19  ;;  %7361 = vmatpush.bf16.msra.mxu0 %v12056_v27 }
 0x539   : > { %v6230_v11 = vmul.f32 0.3275911, %v6222_v4  ;;  %v6438_v2 = vmul.f32 %v6222_v4, %v6222_v4  ;;  %v6109_v14 = vadd.f32 %v6108_v60, %v5343_v51  ;;  %vm6278_vm4 = vweird.f32 %v16090_v57  ;;  %v13220_v51 = vld [vmem:[%s14500_s21 + $0x2c4] sm:$0xf0] }
 0x53a   : > { %v6371_v23 = vadd.f32 -1.4531521, %v6363_v42  ;;  %v6097_v41 = vpop.f32.mrf.mxu3  ;;  %v6262_v61 = vadd.f32 %v13551_v38, %v6261_v6  ;;  %vm16138_vm5 = vcmp.eq.f32.partialorder %v6282_v40, 8.507059e+37  ;;  %v6285_v1 = vor.u32 1.1754944e-38, %v6284_v32 }
 0x53b   : > { %v16114_v25 = vadd.f32 1.0, %v6230_v11  ;;  %v6446_v43 = vsub.f32 0.0, %v6438_v2  ;;  %v12128_v6 = vor.u32 %v13220_v51, %v12127_v46  ;;  %v11920_v11 = vor.u32 %v13168_v26, %v11919_v29  ;;  %v13200_v26 = vld [vmem:[%s14500_s21 + $0x224] sm:$0xf0] }
 0x53c   : > { %v6379_v59 = vmul.f32 %v6371_v23, %v16094_v8  ;;  %v6134_v45 = vpop.f32.mrf.mxu2  ;;  %v6266_v63 = vsel %vm6265_vm3, %v13551_v38, %v6262_v61  ;;  %v6121_v16 = vpop.f32.mrf.mxu1 }
 0x53d   : > { %13556 = vrcp.f32 %v16114_v25  ;;  %v16123_v20 = vpop.eup %13554  ;;  %v16127_v48 = vsel %vm16096_vm0, %v6270_v5, %v6266_v63  ;;  %v16145_v54 = vadd.f32 %v6121_v16, %v6109_v14  ;;  %v6135_v44 = vadd.f32 %v6134_v45, %v5344_v37  ;;  %7373 = vmatpush.bf16.msra.mxu1 %v12128_v6  ;;  %7336 = vmatpush.bf16.msrb.mxu2 %v11920_v11 }
 0x53e   : > { %v6387_v58 = vadd.f32 1.4214138, %v6379_v59  ;;  %v6110_v62 = vpop.f32.mrf.mxu0  ;;  %v6364_v30 = vmul.f32 1.0614054, %v16127_v48  ;;  %13558 = vpow2.f32 %v6453_v24  ;;  %v6274_v7 = vmul.f32 %v16123_v20, %v16090_v57 }
 0x53f   : > { %vm6279_vm6 = vweird.f32 %v16123_v20  ;;  %v16151_v56 = vmul.f32 0.70710677, %v16145_v54  ;;  %v6297_v23 = vand.u32 2147483647, %v16114_v25  ;;  %v6457_v40 = vmul.f32 1.442695, %v6446_v43 }
 0x540   : > { %v6395_v9 = vmul.f32 %v6387_v58, %v16094_v8  ;;  %v6372_v24 = vadd.f32 -1.4531521, %v6364_v30  ;;  %v6275_v13 = vsub.f32 1.0, %v6274_v7  ;;  %vm6280_vm7 = vmor %vm6278_vm4, %vm6279_vm6  ;;  %v6299_v49 = vand.u32 2147483648, %v16114_v25 }
 0x541   : > { %v6223_v5 = vand.u32 2147483647, %v16151_v56  ;;  %13560 = vpow2.f32 %v16129_v36  ;;  %vm6293_vm10 = vweird.f32 %v16114_v25  ;;  %vm6298_vm12 = vcmp.eq.f32.partialorder %v6297_v23, 8.507059e+37 }
 0x542   : > { %v6403_v60 = vadd.f32 -0.28449672, %v6395_v9  ;;  %v6380_v42 = vmul.f32 %v6372_v24, %v16127_v48  ;;  %v6276_v31 = vmul.f32 %v16123_v20, %v6275_v13  ;;  %v6147_v15 = vpop.f32.mrf.mxu3  ;;  %v6300_v38 = vor.u32 1.1754944e-38, %v6299_v49  ;;  %v12047_v9 = vld [vmem:[%s14500_s21 + $0x220] sm:$0xf] }
 0x543   : > { %v13557_v4 = vpop.eup %13556  ;;  %v6148_v32 = vadd.f32 %v6147_v15, %v6135_v44  ;;  %v6231_v39 = vmul.f32 0.3275911, %v6223_v5  ;;  %v16192_v29 = vmul.f32 0.5, %v16145_v54  ;;  %v12048_v11 = vor.u32 %v13200_v26, %v12047_v9  ;;  %v12039_v9 = vld [vmem:[%s14500_s21 + $0x210] sm:$0xf] }
 0x544   : > { %v6411_v33 = vmul.f32 %v6403_v60, %v16094_v8  ;;  %v6289_v47 = vmul.f32 %v13557_v4, %v16114_v25  ;;  %v6136_v19 = vpop.f32.mrf.mxu2  ;;  %v13559_v37 = vpop.eup %13558  ;;  %v6388_v41 = vadd.f32 1.4214138, %v6380_v42  ;;  %v6277_v61 = vadd.f32 %v16123_v20, %v6276_v31 }
 0x545   : > { %v6123_v59 = vpop.f32.mrf.mxu1  ;;  %vm6294_vm9 = vweird.f32 %v13557_v4  ;;  %v16170_v53 = vmul.f32 0.70710677, %v6148_v32  ;;  %v16177_v58 = vadd.f32 1.0, %v6231_v39  ;;  %v16197_v60 = vmul.f32 0.5, %v6148_v32  ;;  %7362 = vmatpush.bf16.msra.mxu0 %v12048_v11  ;;  %v11991_v39 = vld [vmem:[%s14500_s21 + $0x1b0] sm:$0xf] }
 0x546   : > { %v6419_v2 = vadd.f32 0.2548296, %v6411_v33  ;;  %v6290_v45 = vsub.f32 1.0, %v6289_v47  ;;  %v6396_v63 = vmul.f32 %v6388_v41, %v16127_v48  ;;  %v6281_v16 = vsel %vm6280_vm7, %v16123_v20, %v6277_v61  ;;  %vm6295_vm11 = vmor %vm6293_vm10, %vm6294_vm9 }
 0x547   : > { %v16175_v28 = vsel %vm16138_vm5, %v6285_v1, %v6281_v16  ;;  %13562 = vrcp.f32 %v16177_v58  ;;  %v6224_v25 = vand.u32 2147483647, %v16170_v53  ;;  %v16199_v44 = vpop.eup %13560  ;;  %vm6308_vm14 = vweird.f32 %v16177_v58  ;;  %v12119_v16 = vld [vmem:[%s14500_s21 + $0x2b0] sm:$0xf] }
 0x548   : > { %v6427_v0 = vmul.f32 %v6419_v2, %v16094_v8  ;;  %v6291_v57 = vmul.f32 %v13557_v4, %v6290_v45  ;;  %v6404_v14 = vadd.f32 -0.28449672, %v6396_v63  ;;  %v6365_v62 = vmul.f32 1.0614054, %v16175_v28  ;;  %v13186_v63 = vld [vmem:[%s14500_s21 + $0x1b4] sm:$0xf0] }
 0x549   : > { %v6439_v8 = vmul.f32 %v6223_v5, %v6223_v5  ;;  %13564 = vpow2.f32 %v6457_v40  ;;  %v6232_v42 = vmul.f32 0.3275911, %v6224_v25  ;;  %v6312_v6 = vand.u32 2147483647, %v16177_v58 }
 0x54a   : > { %v6467_v20 = vmul.f32 %v16105_v18, %v6427_v0  ;;  %v6292_v35 = vadd.f32 %v13557_v4, %v6291_v57  ;;  %v6412_v30 = vmul.f32 %v6404_v14, %v16127_v48  ;;  %v6373_v7 = vadd.f32 -1.4531521, %v6365_v62  ;;  %v6149_v46 = vpop.f32.mrf.mxu3  ;;  %v13218_v62 = vld [vmem:[%s14500_s21 + $0x2b4] sm:$0xf0] }
 0x54b   : > { %v6447_v27 = vsub.f32 0.0, %v6439_v8  ;;  %v6314_v21 = vand.u32 2147483648, %v16177_v58  ;;  %v16217_v61 = vadd.f32 1.0, %v6232_v42  ;;  %v16222_v49 = vmul.f32 %v6224_v25, %v6224_v25  ;;  %v11983_v42 = vld [vmem:[%s14500_s21 + $0x1a0] sm:$0xf] }
 0x54c   : > { %v6475_v51 = vsub.f32 1.0, %v6467_v20  ;;  %v6296_v36 = vsel %vm6295_vm11, %v13557_v4, %v6292_v35  ;;  %v6420_v18 = vadd.f32 0.2548296, %v6412_v30  ;;  %v6381_v1 = vmul.f32 %v6373_v7, %v16175_v28  ;;  %v11911_v20 = vld [vmem:[%s14500_s21 + $0x110] sm:$0xf] }
 0x54d   : > { %v16189_v43 = vsel %vm6298_vm12, %v6300_v38, %v6296_v36  ;;  %v16203_v31 = vpop.eup %13562  ;;  %v16215_v41 = vmul.f32 1.442695, %v6447_v27  ;;  %13566 = vrcp.f32 %v16217_v61  ;;  %vm16234_vm0 = vcmp.eq.f32.partialorder %v6312_v6, 8.507059e+37  ;;  %v13166_v38 = vld [vmem:[%s14500_s21 + $0x114] sm:$0xf0] }
 0x54e   : > { %v6491_v24 = vsub.f32 0.0, %v6475_v51  ;;  %v6366_v13 = vmul.f32 1.0614054, %v16189_v43  ;;  %v6428_v50 = vmul.f32 %v6420_v18, %v16127_v48  ;;  %v6389_v4 = vadd.f32 1.4214138, %v6381_v1 }
 0x54f   : > { %v6304_v48 = vmul.f32 %v16203_v31, %v16177_v58  ;;  %v16211_v5 = vpop.eup %13564  ;;  %vm6309_vm15 = vweird.f32 %v16203_v31  ;;  %v6315_v30 = vor.u32 1.1754944e-38, %v6314_v21  ;;  %v5345_v7 = vperm.slane %v15997_v3, 6 }
 0x550   : > { %v6499_v54 = vsel %vm6483_vm8, %v6491_v24, %v6475_v51  ;;  %v6374_v15 = vadd.f32 -1.4531521, %v6366_v13  ;;  %v6468_v47 = vmul.f32 %v13559_v37, %v6428_v50  ;;  %v6397_v23 = vmul.f32 %v6389_v4, %v16175_v28  ;;  %vm16251_vm2 = vmor %vm6308_vm14, %vm6309_vm15  ;;  %v13198_v4 = vld [vmem:[%s14500_s21 + $0x214] sm:$0xf0] }
 0x551   : > { %v6507_v33 = vadd.f32 1.0, %v6499_v54  ;;  %v6305_v59 = vsub.f32 1.0, %v6304_v48  ;;  %v6327_v25 = vand.u32 2147483647, %v16217_v61  ;;  %v6329_v26 = vand.u32 2147483648, %v16217_v61 }
 0x552   : > { %v6382_v19 = vmul.f32 %v6374_v15, %v16189_v43  ;;  %v6476_v40 = vsub.f32 1.0, %v6468_v47  ;;  %v6405_v32 = vadd.f32 -0.28449672, %v6397_v23  ;;  %v6448_v24 = vsub.f32 0.0, %v16222_v49  ;;  %v13184_v54 = vld [vmem:[%s14500_s21 + $0x1a4] sm:$0xf0] }
 0x553   : > { %v6515_v37 = vmul.f32 %v6507_v33, %v16040_v52  ;;  %v6306_v14 = vmul.f32 %v16203_v31, %v6305_v59  ;;  %vm6323_vm3 = vweird.f32 %v16217_v61  ;;  %v11992_v50 = vor.u32 %v13186_v63, %v11991_v39  ;;  %v16267_v11 = vpop.eup %13566  ;;  %v12111_v23 = vld [vmem:[%s14500_s21 + $0x2a0] sm:$0xf]  ;;  %v13216_v48 = vld [vmem:[%s14500_s21 + $0x2a4] sm:$0xf0] }
 0x554   : > { %v6390_v45 = vadd.f32 1.4214138, %v6382_v19  ;;  %v6492_v52 = vsub.f32 0.0, %v6476_v40  ;;  %v6413_v57 = vmul.f32 %v6405_v32, %v16175_v28  ;;  %v12120_v58 = vor.u32 %v13218_v62, %v12119_v16  ;;  %v11903_v32 = vld [vmem:[%s14500_s21 + $0x100] sm:$0xf] }
 0x555   : > { %v16227_v0 = vpack.c.bf16 %v6515_v37, %v6515_v37  ;;  %v6307_v36 = vadd.f32 %v16203_v31, %v6306_v14  ;;  %v11912_v47 = vor.u32 %v13166_v38, %v11911_v20  ;;  %v6319_v37 = vmul.f32 %v16267_v11, %v16217_v61  ;;  %7348 = vmatpush.bf16.msrb.mxu3 %v11992_v50  ;;  %v13164_v59 = vld [vmem:[%s14500_s21 + $0x104] sm:$0xf0]  ;;  %v11833_v50 = vld [vmem:[%s14500_s21 + $0x78] sm:$0xf0] }
 0x556   : > { %v6160_v2 = vpop.f32.mrf.mxu0  ;;  %v6398_v35 = vmul.f32 %v6390_v45, %v16189_v43  ;;  %v6500_v46 = vsel %vm6484_vm13, %v6492_v52, %v6476_v40  ;;  %v6421_v51 = vadd.f32 0.2548296, %v6413_v57  ;;  %vm16281_vm4 = vcmp.eq.f32.partialorder %v6327_v25, 8.507059e+37  ;;  %7374 = vmatpush.bf16.msra.mxu1 %v12120_v58  ;;  %v12031_v52 = vld [vmem:[%s14500_s21 + $0x200] sm:$0xf] }
 0x557   : > { %7313 = vmatmul.bf16.vlgmr.msrb.gmra.mxu0 %v16227_v0  ;;  %v6508_v18 = vadd.f32 1.0, %v6500_v46  ;;  %v6311_v27 = vsel %vm16251_vm2, %v16203_v31, %v6307_v36  ;;  %v6161_v40 = vadd.f32 %v6160_v2, %v5345_v7  ;;  %7337 = vmatpush.bf16.msrb.mxu2 %v11912_v47  ;;  %v12040_v63 = vor.u32 %v13198_v4, %v12039_v9  ;;  %v13196_v57 = vld [vmem:[%s14500_s21 + $0x204] sm:$0xf0]  ;;  %v13242_v46 = vld [vmem:[%s14500_s21 + $0x374] sm:$0xf0] }
 0x558   : > { %v6406_v1 = vadd.f32 -0.28449672, %v6398_v35  ;;  %v6429_v13 = vmul.f32 %v6421_v51, %v16175_v28  ;;  %v16273_v31 = vsel %vm16234_vm0, %v6315_v30, %v6311_v27  ;;  %v11984_v16 = vor.u32 %v13184_v54, %v11983_v42  ;;  %v12215_v35 = vld [vmem:[%s14500_s21 + $0x370] sm:$0xf] }
 0x559   : > { %v6516_v28 = vmul.f32 %v6508_v18, %v16053_v12  ;;  %v6367_v21 = vmul.f32 1.0614054, %v16273_v31  ;;  %vm6486_vm5 = vcmp.lt.f32.partialorder %v16087_v22, 0.0  ;;  %v6320_v62 = vsub.f32 1.0, %v6319_v37  ;;  %7363 = vmatpush.bf16.msra.mxu0 %v12040_v63  ;;  %v11975_v51 = vld [vmem:[%s14500_s21 + $0x190] sm:$0xf] }
 0x55a   : > { %v6414_v33 = vmul.f32 %v6406_v1, %v16189_v43  ;;  %v6469_v19 = vmul.f32 %v16199_v44, %v6429_v13  ;;  %v5346_v30 = vperm.slane %v15997_v3, 7  ;;  %v12112_v7 = vor.u32 %v13216_v48, %v12111_v23  ;;  %7349 = vmatpush.bf16.msrb.mxu3 %v11984_v16  ;;  %v13145_v18 = vld [vmem:[%s14500_s21 + $0x74] sm:$0xf]  ;;  %v11967_v22 = vld [vmem:[%s14500_s21 + $0x180] sm:$0xf] }
 0x55b   : > { %v16287_v39 = vpack.c.bf16 %v6516_v28, %v6516_v28  ;;  %v6375_v2 = vadd.f32 -1.4531521, %v6367_v21  ;;  %v11904_v38 = vor.u32 %v13164_v59, %v11903_v32  ;;  %v6321_v9 = vmul.f32 %v16267_v11, %v6320_v62 }
 0x55c   : > { %v6173_v15 = vpop.f32.mrf.mxu1  ;;  %v16265_v6 = vpop.f32.mrf.mxu2  ;;  %v6422_v44 = vadd.f32 0.2548296, %v6414_v33  ;;  %v6477_v14 = vsub.f32 1.0, %v6469_v19  ;;  %vm6324_vm6 = vweird.f32 %v16267_v11  ;;  %v6330_v17 = vor.u32 1.1754944e-38, %v6329_v26  ;;  %7375 = vmatpush.bf16.msra.mxu1 %v12112_v7 }
 0x55d   : > { %v16292_v20 = vadd.f32 %v6173_v15, %v6161_v40  ;;  %7326 = vmatmul.bf16.vlgmr.msrb.gmra.mxu1 %v16287_v39  ;;  %v6383_v25 = vmul.f32 %v6375_v2, %v16273_v31  ;;  %7338 = vmatpush.bf16.msrb.mxu2 %v11904_v38  ;;  %v12032_v27 = vor.u32 %v13196_v57, %v12031_v52  ;;  %v12103_v15 = vld [vmem:[%s14500_s21 + $0x290] sm:$0xf]  ;;  %vm6325_vm7 = vmor %vm6323_vm3, %vm6324_vm6  ;;  %13568 = vpow2.f32 %v16215_v41  ;;  %v13240_v2 = vld [vmem:[%s14500_s21 + $0x364] sm:$0xf0] }
 0x55e   : > { %v6162_v45 = vpop.f32.mrf.mxu0  ;;  %v6430_v8 = vmul.f32 %v6422_v44, %v16189_v43  ;;  %v6493_v36 = vsub.f32 0.0, %v6477_v14  ;;  %v13182_v43 = vld [vmem:[%s14500_s21 + $0x194] sm:$0xf0]  ;;  %v6322_v42 = vadd.f32 %v16267_v11, %v6321_v9  ;;  %v12216_v54 = vor.u32 %v13242_v46, %v12215_v35  ;;  %v13180_v35 = vld [vmem:[%s14500_s21 + $0x184] sm:$0xf0] }
 0x55f   : > { %v16307_v13 = vmul.f32 0.70710677, %v16292_v20  ;;  %v6391_v4 = vadd.f32 1.4214138, %v6383_v25  ;;  %v6187_v23 = vadd.f32 %v16265_v6, %v5346_v30  ;;  %7364 = vmatpush.bf16.msra.mxu0 %v12032_v27  ;;  %v11976_v21 = vor.u32 %v13182_v43, %v11975_v51  ;;  %v11825_v30 = vld [vmem:[%s14500_s21 + $0x68] sm:$0xf0] }
 0x560   : > { %v6470_v3 = vmul.f32 %v16211_v5, %v6430_v8  ;;  %v6501_v58 = vsel %vm6485_vm1, %v6493_v36, %v6477_v14  ;;  %v6326_v19 = vsel %vm6325_vm7, %v16267_v11, %v6322_v42  ;;  %v11836_v37 = vor.u32 %v13145_v18, %v11833_v50  ;;  %v12207_v14 = vld [vmem:[%s14500_s21 + $0x360] sm:$0xf]  ;;  %v13143_v8 = vld [vmem:[%s14500_s21 + $0x64] sm:$0xf]  ;;  %v13212_v46 = vld [vmem:[%s14500_s21 + $0x284] sm:$0xf0] }
 0x561   : > { %v6509_v5 = vadd.f32 1.0, %v6501_v58  ;;  %v6225_v47 = vand.u32 2147483647, %v16307_v13  ;;  %v6399_v48 = vmul.f32 %v6391_v4, %v16273_v31  ;;  %7383 = vmatpush.bf16.msra.mxu2 %v12216_v54  ;;  %v16326_v61 = vsel %vm16281_vm4, %v6330_v17, %v6326_v19  ;;  %7350 = vmatpush.bf16.msrb.mxu3 %v11976_v21  ;;  %v12095_v38 = vld [vmem:[%s14500_s21 + $0x280] sm:$0xf] }
 0x562   : > { %v6199_v1 = vpop.f32.mrf.mxu3  ;;  %v6478_v26 = vsub.f32 1.0, %v6470_v3  ;;  %v6368_v6 = vmul.f32 1.0614054, %v16326_v61  ;;  %v12104_v11 = vor.u32 %v13214_v34, %v12103_v15  ;;  %v6461_v57 = vmul.f32 1.442695, %v6448_v24 }
 0x563   : > { %v6517_v40 = vmul.f32 %v6509_v5, %v16085_v55  ;;  %v6233_v59 = vmul.f32 0.3275911, %v6225_v47  ;;  %v6407_v45 = vadd.f32 -0.28449672, %v6399_v48  ;;  %7409 = vmatpush.bf16.msrb.mxu0 %v11836_v37  ;;  %v16336_v63 = vadd.f32 %v6199_v1, %v6187_v23  ;;  %v12279_v25 = vld [vmem:[%s14500_s21 + $0x3f0] sm:$0xf]  ;;  %v13569_v43 = vpop.eup %13568 }
 0x564   : > { %v6175_v28 = vpop.f32.mrf.mxu1  ;;  %v6188_v33 = vpop.f32.mrf.mxu2  ;;  %v6494_v32 = vsub.f32 0.0, %v6478_v26  ;;  %v6376_v52 = vadd.f32 -1.4531521, %v6368_v6  ;;  %7376 = vmatpush.bf16.msra.mxu1 %v12104_v11  ;;  %vm6487_vm8 = vcmp.lt.f32.partialorder %v16151_v56, 0.0  ;;  %v6441_v51 = vmul.f32 %v6225_v47, %v6225_v47  ;;  %v13258_v9 = vld [vmem:[%s14500_s21 + $0x3f4] sm:$0xf0] }
 0x565   : > { %v16330_v55 = vpack.c.bf16 %v6517_v40, %v6517_v40  ;;  %v16334_v44 = vadd.f32 1.0, %v6233_v59  ;;  %v6415_v41 = vmul.f32 %v6407_v45, %v16273_v31  ;;  %v16355_v36 = vmul.f32 0.70710677, %v16336_v63  ;;  %v13161_v1 = vld [vmem:[%s14500_s21 + $0xf4] sm:$0xf] }
 0x566   : > { %v6502_v12 = vsel %vm6486_vm5, %v6494_v32, %v6478_v26  ;;  %v6384_v24 = vmul.f32 %v6376_v52, %v16326_v61  ;;  %v11897_v3 = vld [vmem:[%s14500_s21 + $0xf8] sm:$0xf0]  ;;  %v12208_v50 = vor.u32 %v13240_v2, %v12207_v14  ;;  %v11968_v58 = vor.u32 %v13180_v35, %v11967_v22  ;;  %v12199_v4 = vld [vmem:[%s14500_s21 + $0x350] sm:$0xf]  ;;  %v13238_v42 = vld [vmem:[%s14500_s21 + $0x354] sm:$0xf0] }
 0x567   : > { %v6510_v16 = vadd.f32 1.0, %v6502_v12  ;;  %13570 = vrcp.f32 %v16334_v44  ;;  %7339 = vmatmul.bf16.vlgmr.msrb.gmra.mxu2 %v16330_v55  ;;  %v6423_v7 = vadd.f32 0.2548296, %v6415_v41  ;;  %v16365_v27 = vand.u32 2147483647, %v16355_v36 }
 0x568   : > { %13572 = vpow2.f32 %v6461_v57  ;;  %v12096_v28 = vor.u32 %v13212_v46, %v12095_v38  ;;  %v13141_v33 = vld [vmem:[%s14500_s21 + $0x54] sm:$0xf]  ;;  %v11817_v5 = vld [vmem:[%s14500_s21 + $0x58] sm:$0xf0]  ;;  %v12271_v26 = vld [vmem:[%s14500_s21 + $0x3e0] sm:$0xf]  ;;  %7384 = vmatpush.bf16.msra.mxu2 %v12208_v50  ;;  %7351 = vmatpush.bf16.msrb.mxu3 %v11968_v58  ;;  %v12280_v48 = vor.u32 %v13258_v9, %v12279_v25  ;;  %v11900_v19 = vor.u32 %v13161_v1, %v11897_v3 }
 0x569   : > { %v6518_v49 = vmul.f32 %v6510_v16, %v16110_v10  ;;  %v6431_v18 = vmul.f32 %v6423_v7, %v16273_v31  ;;  %v6392_v10 = vadd.f32 1.4214138, %v6384_v24  ;;  %v11828_v31 = vor.u32 %v13143_v8, %v11825_v30  ;;  %v13256_v21 = vld [vmem:[%s14500_s21 + $0x3e4] sm:$0xf0]  ;;  %v13159_v45 = vld [vmem:[%s14500_s21 + $0xe4] sm:$0xf] }
 0x56a   : > { %v6201_v62 = vpop.f32.mrf.mxu3  ;;  %v6449_v23 = vsub.f32 0.0, %v6441_v51  ;;  %v6234_v34 = vmul.f32 0.3275911, %v16365_v27  ;;  %v6342_v59 = vand.u32 2147483647, %v16334_v44  ;;  %7377 = vmatpush.bf16.msra.mxu1 %v12096_v28  ;;  %v6344_v11 = vand.u32 2147483648, %v16334_v44 }
 0x56b   : > { %v16362_v17 = vpack.c.bf16 %v6518_v49, %v6518_v49  ;;  %v6471_v54 = vmul.f32 %v13569_v43, %v6431_v18  ;;  %v6400_v15 = vmul.f32 %v6392_v10, %v16326_v61  ;;  %7410 = vmatpush.bf16.msrb.mxu0 %v11828_v31  ;;  %v11889_v6 = vld [vmem:[%s14500_s21 + $0xe8] sm:$0xf0]  ;;  %v12200_v16 = vor.u32 %v13238_v42, %v12199_v4  ;;  %v12191_v52 = vld [vmem:[%s14500_s21 + $0x340] sm:$0xf]  ;;  %v13236_v57 = vld [vmem:[%s14500_s21 + $0x344] sm:$0xf0] }
 0x56c   : > { %v16383_v12 = vadd.f32 1.0, %v6234_v34  ;;  %7396 = vmatpush.bf16.msra.mxu3 %v12280_v48  ;;  %v11820_v41 = vor.u32 %v13141_v33, %v11817_v5  ;;  %v12272_v35 = vor.u32 %v13256_v21, %v12271_v26  ;;  %v13139_v8 = vld [vmem:[%s14500_s21 + $0x44] sm:$0xf]  ;;  %v11809_v30 = vld [vmem:[%s14500_s21 + $0x48] sm:$0xf0]  ;;  %vm6338_vm9 = vweird.f32 %v16334_v44 }
 0x56d   : > { %v16373_v47 = vpop.eup %13570  ;;  %v6479_v37 = vsub.f32 1.0, %v6471_v54  ;;  %v6408_v40 = vadd.f32 -0.28449672, %v6400_v15  ;;  %v12263_v49 = vld [vmem:[%s14500_s21 + $0x3d0] sm:$0xf]  ;;  %7352 = vmatmul.bf16.vlgmr.msrb.gmra.mxu3 %v16362_v17  ;;  %7385 = vmatpush.bf16.msra.mxu2 %v12200_v16  ;;  %vm16406_vm11 = vcmp.eq.f32.partialorder %v6342_v59, 8.507059e+37  ;;  %v11892_v56 = vor.u32 %v13159_v45, %v11889_v6 }
 0x56e   : > { %v6334_v32 = vmul.f32 %v16373_v47, %v16334_v44  ;;  %7422 = vmatpush.bf16.msrb.mxu1 %v11900_v19  ;;  %v13573_v14 = vpop.eup %13572  ;;  %v13254_v7 = vld [vmem:[%s14500_s21 + $0x3d4] sm:$0xf0]  ;;  %v13157_v24 = vld [vmem:[%s14500_s21 + $0xd4] sm:$0xf]  ;;  %v16395_v38 = vmul.f32 1.442695, %v6449_v23  ;;  %13574 = vrcp.f32 %v16383_v12  ;;  %vm6339_vm10 = vweird.f32 %v16373_v47 }
 0x56f   : > { %v6495_v2 = vsub.f32 0.0, %v6479_v37  ;;  %v6416_v22 = vmul.f32 %v6408_v40, %v16326_v61  ;;  %v11881_v46 = vld [vmem:[%s14500_s21 + $0xd8] sm:$0xf0]  ;;  %v12183_v51 = vld [vmem:[%s14500_s21 + $0x330] sm:$0xf]  ;;  %7411 = vmatpush.bf16.msrb.mxu0 %v11820_v41  ;;  %v6345_v50 = vor.u32 1.1754944e-38, %v6344_v11  ;;  %v16415_v54 = vmul.f32 %v16365_v27, %v16365_v27  ;;  %vm16424_vm12 = vmor %vm6338_vm9, %vm6339_vm10 }
 0x570   : > { %v6335_v62 = vsub.f32 1.0, %v6334_v32  ;;  %v13234_v18 = vld [vmem:[%s14500_s21 + $0x334] sm:$0xf0]  ;;  %v13137_v10 = vld [vmem:[%s14500_s21 + $0x34] sm:$0xf]  ;;  %7397 = vmatpush.bf16.msra.mxu3 %v12272_v35  ;;  %v12192_v15 = vor.u32 %v13236_v57, %v12191_v52  ;;  %v11812_v5 = vor.u32 %v13139_v8, %v11809_v30  ;;  %v12264_v27 = vor.u32 %v13254_v7, %v12263_v49 }
 0x571   : > { %v6503_v25 = vsel %vm6487_vm8, %v6495_v2, %v6479_v37  ;;  %v6424_v9 = vadd.f32 0.2548296, %v6416_v22  ;;  %v11801_v58 = vld [vmem:[%s14500_s21 + $0x38] sm:$0xf0]  ;;  %v12255_v31 = vld [vmem:[%s14500_s21 + $0x3c0] sm:$0xf]  ;;  %v11884_v26 = vor.u32 %v13157_v24, %v11881_v46  ;;  %v12184_v44 = vor.u32 %v13234_v18, %v12183_v51 }
 0x572   : > { %v6336_v43 = vmul.f32 %v16373_v47, %v6335_v62  ;;  %v6511_v1 = vadd.f32 1.0, %v6503_v25  ;;  %v13252_v28 = vld [vmem:[%s14500_s21 + $0x3c4] sm:$0xf0]  ;;  %7423 = vmatpush.bf16.msrb.mxu1 %v11892_v56  ;;  %v13155_v23 = vld [vmem:[%s14500_s21 + $0xc4] sm:$0xf]  ;;  %7386 = vmatpush.bf16.msra.mxu2 %v12192_v15  ;;  %v11804_v19 = vor.u32 %v13137_v10, %v11801_v58  ;;  %vm6488_vm13 = vcmp.lt.f32.partialorder %v16170_v53, 0.0 }
 0x573   : > { %v6432_v4 = vmul.f32 %v6424_v9, %v16326_v61  ;;  %v11873_v34 = vld [vmem:[%s14500_s21 + $0xc8] sm:$0xf0]  ;;  %v12175_v21 = vld [vmem:[%s14500_s21 + $0x320] sm:$0xf]  ;;  %v13232_v37 = vld [vmem:[%s14500_s21 + $0x324] sm:$0xf0]  ;;  %7412 = vmatpush.bf16.msrb.mxu0 %v11812_v5  ;;  %vm6353_vm0 = vweird.f32 %v16383_v12  ;;  %13576 = vpow2.f32 %v16395_v38 }
 0x574   : > { %v6337_v42 = vadd.f32 %v16373_v47, %v6336_v43  ;;  %v6519_v33 = vmul.f32 %v6511_v1, %v16192_v29  ;;  %v13135_v40 = vld [vmem:[%s14500_s21 + $0x24] sm:$0xf]  ;;  %v16436_v32 = vpop.eup %13574  ;;  %7398 = vmatpush.bf16.msra.mxu3 %v12264_v27  ;;  %v11793_v6 = vld [vmem:[%s14500_s21 + $0x28] sm:$0xf0]  ;;  %v12247_v11 = vld [vmem:[%s14500_s21 + $0x3b0] sm:$0xf]  ;;  %v11876_v22 = vor.u32 %v13155_v23, %v11873_v34  ;;  %v12176_v7 = vor.u32 %v13232_v37, %v12175_v21 }
 0x575   : > { %v6472_v48 = vmul.f32 %v13573_v14, %v6432_v4  ;;  %v13250_v16 = vld [vmem:[%s14500_s21 + $0x3b4] sm:$0xf0]  ;;  %v6349_v57 = vmul.f32 %v16436_v32, %v16383_v12  ;;  %v13153_v14 = vld [vmem:[%s14500_s21 + $0xb4] sm:$0xf]  ;;  %v6357_v2 = vand.u32 2147483647, %v16383_v12  ;;  %v11796_v25 = vor.u32 %v13135_v40, %v11793_v6 }
 0x576   : > { %v6341_v29 = vsel %vm16424_vm12, %v16373_v47, %v6337_v42  ;;  %v16438_v59 = vpack.c.bf16 %v6519_v33, %v6519_v33  ;;  %v12256_v47 = vor.u32 %v13252_v28, %v12255_v31  ;;  %7424 = vmatpush.bf16.msrb.mxu1 %v11884_v26  ;;  %v11865_v62 = vld [vmem:[%s14500_s21 + $0xb8] sm:$0xf0]  ;;  %v12167_v35 = vld [vmem:[%s14500_s21 + $0x310] sm:$0xf]  ;;  %7387 = vmatpush.bf16.msra.mxu2 %v12184_v44  ;;  %v13230_v24 = vld [vmem:[%s14500_s21 + $0x314] sm:$0xf0]  ;;  %vm6354_vm14 = vweird.f32 %v16436_v32 }
 0x577   : > { %v16442_v45 = vsel %vm16406_vm11, %v6345_v50, %v6341_v29  ;;  %v6480_v41 = vsub.f32 1.0, %v6472_v48  ;;  %v6350_v49 = vsub.f32 1.0, %v6349_v57  ;;  %v6359_v46 = vand.u32 2147483648, %v16383_v12  ;;  %7413 = vmatpush.bf16.msrb.mxu0 %v11804_v19  ;;  %v13133_v43 = vld [vmem:[%s14500_s21 + $0x14] sm:$0xf]  ;;  %vm6355_vm1 = vmor %vm6353_vm0, %vm6354_vm14 }
 0x578   : > { %v6369_v52 = vmul.f32 1.0614054, %v16442_v45  ;;  %7365 = vmatmul.bf16.vlgmr.msra.gmra.mxu0 %v16438_v59  ;;  %v6450_v51 = vsub.f32 0.0, %v16415_v54  ;;  %7399 = vmatpush.bf16.msra.mxu3 %v12256_v47  ;;  %v12248_v9 = vor.u32 %v13250_v16, %v12247_v11  ;;  %v11785_v18 = vld [vmem:[%s14500_s21 + $0x18] sm:$0xf0]  ;;  %vm16469_vm15 = vcmp.eq.f32.partialorder %v6357_v2, 8.507059e+37 }
 0x579   : > { %v6496_v8 = vsub.f32 0.0, %v6480_v41  ;;  %v6351_v3 = vmul.f32 %v16436_v32, %v6350_v49  ;;  %v12239_v50 = vld [vmem:[%s14500_s21 + $0x3a0] sm:$0xf]  ;;  %v13248_v56 = vld [vmem:[%s14500_s21 + $0x3a4] sm:$0xf0]  ;;  %v11868_v15 = vor.u32 %v13153_v14, %v11865_v62  ;;  %v12168_v61 = vor.u32 %v13230_v24, %v12167_v35 }
 0x57a   : > { %v6377_v30 = vadd.f32 -1.4531521, %v6369_v52  ;;  %v13151_v58 = vld [vmem:[%s14500_s21 + $0xa4] sm:$0xf]  ;;  %7425 = vmatpush.bf16.msrb.mxu1 %v11876_v22  ;;  %v11857_v53 = vld [vmem:[%s14500_s21 + $0xa8] sm:$0xf0]  ;;  %7388 = vmatpush.bf16.msra.mxu2 %v12176_v7  ;;  %v11788_v34 = vor.u32 %v13133_v43, %v11785_v18  ;;  %v12240_v12 = vor.u32 %v13248_v56, %v12239_v50 }
 0x57b   : > { %v6504_v10 = vsel %vm6488_vm13, %v6496_v8, %v6480_v41  ;;  %v12159_v31 = vld [vmem:[%s14500_s21 + $0x300] sm:$0xf]  ;;  %v6352_v33 = vadd.f32 %v16436_v32, %v6351_v3  ;;  %v13228_v5 = vld [vmem:[%s14500_s21 + $0x304] sm:$0xf0]  ;;  %v13131_v27 = vld [vmem:[%s14500_s21 + $0x4] sm:$0xf]  ;;  %7414 = vmatpush.bf16.msrb.mxu0 %v11796_v25  ;;  %v11860_v6 = vor.u32 %v13151_v58, %v11857_v53 }
 0x57c   : > { %v6385_v1 = vmul.f32 %v6377_v30, %v16442_v45  ;;  %v6512_v4 = vadd.f32 1.0, %v6504_v10  ;;  %v6360_v23 = vor.u32 1.1754944e-38, %v6359_v46  ;;  %7400 = vmatpush.bf16.msra.mxu3 %v12248_v9  ;;  %v11777_v48 = vld [vmem:[%s14500_s21 + $0x8] sm:$0xf0]  ;;  %v13177_v29 = vld [vmem:[%s14500_s21 + $0x174] sm:$0xf]  ;;  %v12160_v57 = vor.u32 %v13228_v5, %v12159_v31 }
 0x57d   : > { %v6356_v19 = vsel %vm6355_vm1, %v16436_v32, %v6352_v33  ;;  %v11961_v21 = vld [vmem:[%s14500_s21 + $0x178] sm:$0xf0]  ;;  %v13246_v37 = vld [vmem:[%s14500_s21 + $0x394] sm:$0xf0]  ;;  %v13209_v11 = vld [vmem:[%s14500_s21 + $0x274] sm:$0xf]  ;;  %v11780_v2 = vor.u32 %v13131_v27, %v11777_v48 }
 0x57e   : > { %v6393_v28 = vadd.f32 1.4214138, %v6385_v1  ;;  %v6520_v26 = vmul.f32 %v6512_v4, %v16197_v60  ;;  %v12231_v60 = vld [vmem:[%s14500_s21 + $0x390] sm:$0xf]  ;;  %v16493_v47 = vsel %vm16469_vm15, %v6360_v23, %v6356_v19  ;;  %7426 = vmatpush.bf16.msrb.mxu1 %v11868_v15  ;;  %v12089_v16 = vld [vmem:[%s14500_s21 + $0x278] sm:$0xf0]  ;;  %7389 = vmatpush.bf16.msra.mxu2 %v12168_v61  ;;  %v11964_v22 = vor.u32 %v13177_v29, %v11961_v21  ;;  %v13577_v61 = vpop.eup %13576 }
 0x57f   : > { %v13149_v41 = vld [vmem:[%s14500_s21 + $0x94] sm:$0xf]  ;;  %v6370_v32 = vmul.f32 1.0614054, %v16493_v47  ;;  %v11849_v14 = vld [vmem:[%s14500_s21 + $0x98] sm:$0xf0]  ;;  %7415 = vmatpush.bf16.msrb.mxu0 %v11788_v34  ;;  %v12232_v7 = vor.u32 %v13246_v37, %v12231_v60  ;;  %v12092_v24 = vor.u32 %v13209_v11, %v12089_v16 }
 0x580   : > { %v6401_v44 = vmul.f32 %v6393_v28, %v16442_v45  ;;  %v16489_v40 = vpack.c.bf16 %v6520_v26, %v6520_v26  ;;  %7401 = vmatpush.bf16.msra.mxu3 %v12240_v12  ;;  %v13175_v62 = vld [vmem:[%s14500_s21 + $0x164] sm:$0xf]  ;;  %v11953_v35 = vld [vmem:[%s14500_s21 + $0x168] sm:$0xf0]  ;;  %v12223_v8 = vld [vmem:[%s14500_s21 + $0x380] sm:$0xf]  ;;  %v11852_v25 = vor.u32 %v13149_v41, %v11849_v14 }
 0x581   : > { %v6378_v49 = vadd.f32 -1.4531521, %v6370_v32  ;;  %v13244_v46 = vld [vmem:[%s14500_s21 + $0x384] sm:$0xf0]  ;;  %v13207_v38 = vld [vmem:[%s14500_s21 + $0x264] sm:$0xf]  ;;  %v11956_v56 = vor.u32 %v13175_v62, %v11953_v35 }
 0x582   : > { %v6409_v52 = vadd.f32 -0.28449672, %v6401_v44  ;;  %7378 = vmatmul.bf16.vlgmr.msra.gmra.mxu1 %v16489_v40  ;;  %v12081_v9 = vld [vmem:[%s14500_s21 + $0x268] sm:$0xf0]  ;;  %v13147_v43 = vld [vmem:[%s14500_s21 + $0x84] sm:$0xf]  ;;  %7390 = vmatpush.bf16.msra.mxu2 %v12160_v57  ;;  %v12224_v53 = vor.u32 %v13244_v46, %v12223_v8 }
 0x583   : > { %7427 = vmatpush.bf16.msrb.mxu1 %v11860_v6  ;;  %v11841_v18 = vld [vmem:[%s14500_s21 + $0x88] sm:$0xf0]  ;;  %v6386_v1 = vmul.f32 %v6378_v49, %v16493_v47  ;;  %v13193_v3 = vld [vmem:[%s14500_s21 + $0x1f4] sm:$0xf]  ;;  %v12025_v50 = vld [vmem:[%s14500_s21 + $0x1f8] sm:$0xf0]  ;;  %7416 = vmatpush.bf16.msrb.mxu0 %v11780_v2  ;;  %v12084_v31 = vor.u32 %v13207_v38, %v12081_v9 }
 0x584   : > { %v6417_v30 = vmul.f32 %v6409_v52, %v16442_v45  ;;  %v13225_v58 = vld [vmem:[%s14500_s21 + $0x2f4] sm:$0xf]  ;;  %v12153_v4 = vld [vmem:[%s14500_s21 + $0x2f8] sm:$0xf0]  ;;  %7402 = vmatpush.bf16.msra.mxu3 %v12232_v7  ;;  %v6465_v5 = vmul.f32 1.442695, %v6450_v51  ;;  %v11844_v27 = vor.u32 %v13147_v43, %v11841_v18  ;;  %v12028_v26 = vor.u32 %v13193_v3, %v12025_v50 }
 0x585   : > { %v6394_v15 = vadd.f32 1.4214138, %v6386_v1  ;;  %v13173_v28 = vld [vmem:[%s14500_s21 + $0x154] sm:$0xf]  ;;  %v11945_v33 = vld [vmem:[%s14500_s21 + $0x158] sm:$0xf0]  ;;  %v12156_v48 = vor.u32 %v13225_v58, %v12153_v4 }
 0x586   : > { %v6425_v10 = vadd.f32 0.2548296, %v6417_v30  ;;  %7435 = vmatpush.bf16.msrb.mxu2 %v11964_v22  ;;  %v12073_v23 = vld [vmem:[%s14500_s21 + $0x258] sm:$0xf0]  ;;  %v13191_v29 = vld [vmem:[%s14500_s21 + $0x1e4] sm:$0xf]  ;;  %v11948_v54 = vor.u32 %v13173_v28, %v11945_v33  ;;  %13578 = vpow2.f32 %v6465_v5 }
 0x587   : > { %7461 = vmatpush.bf16.msra.mxu0 %v12092_v24  ;;  %7428 = vmatpush.bf16.msrb.mxu1 %v11852_v25  ;;  %v6402_v12 = vmul.f32 %v6394_v15, %v16493_v47  ;;  %v12017_v44 = vld [vmem:[%s14500_s21 + $0x1e8] sm:$0xf0]  ;;  %v13223_v51 = vld [vmem:[%s14500_s21 + $0x2e4] sm:$0xf]  ;;  %v13189_v14 = vld [vmem:[%s14500_s21 + $0x1d4] sm:$0xf] }
 0x588   : > { %v6433_v42 = vmul.f32 %v6425_v10, %v16442_v45  ;;  %v13205_v45 = vld [vmem:[%s14500_s21 + $0x254] sm:$0xf]  ;;  %7417 = vmatmul.bf16.vlgmr.msrb.gmra.mxu0 %v16227_v0  ;;  %v12145_v19 = vld [vmem:[%s14500_s21 + $0x2e8] sm:$0xf0]  ;;  %v13171_v21 = vld [vmem:[%s14500_s21 + $0x144] sm:$0xf]  ;;  %7403 = vmatpush.bf16.msra.mxu3 %v12224_v53  ;;  %v12020_v0 = vor.u32 %v13191_v29, %v12017_v44 }
 0x589   : > { %v6410_v37 = vadd.f32 -0.28449672, %v6402_v12  ;;  %v12076_v6 = vor.u32 %v13205_v45, %v12073_v23  ;;  %v11937_v11 = vld [vmem:[%s14500_s21 + $0x148] sm:$0xf0]  ;;  %v13203_v16 = vld [vmem:[%s14500_s21 + $0x244] sm:$0xf]  ;;  %v12148_v57 = vor.u32 %v13223_v51, %v12145_v19 }
 0x58a   : > { %v6473_v34 = vmul.f32 %v13577_v61, %v6433_v42  ;;  %7436 = vmatpush.bf16.msrb.mxu2 %v11956_v56  ;;  %v12065_v41 = vld [vmem:[%s14500_s21 + $0x248] sm:$0xf0]  ;;  %v12009_v2 = vld [vmem:[%s14500_s21 + $0x1d8] sm:$0xf0]  ;;  %vm6489_vm2 = vcmp.lt.f32.partialorder %v16307_v13, 0.0  ;;  %v11940_v22 = vor.u32 %v13171_v21, %v11937_v11  ;;  %v6209_v46 = vmul.f32 0.5, %v16292_v20 }
 0x58b   : > { %7462 = vmatpush.bf16.msra.mxu0 %v12084_v31  ;;  %7429 = vmatpush.bf16.msrb.mxu1 %v11844_v27  ;;  %v6418_v32 = vmul.f32 %v6410_v37, %v16493_v47  ;;  %v13221_v62 = vld [vmem:[%s14500_s21 + $0x2d4] sm:$0xf]  ;;  %v12137_v35 = vld [vmem:[%s14500_s21 + $0x2d8] sm:$0xf0]  ;;  %v12068_v49 = vor.u32 %v13203_v16, %v12065_v41  ;;  %v12012_v13 = vor.u32 %v13189_v14, %v12009_v2  ;;  %v13187_v10 = vld [vmem:[%s14500_s21 + $0x1c4] sm:$0xf] }
 0x58c   : > { %v6481_v60 = vsub.f32 1.0, %v6473_v34  ;;  %7448 = vmatpush.bf16.msrb.mxu3 %v12028_v26  ;;  %v13169_v7 = vld [vmem:[%s14500_s21 + $0x134] sm:$0xf]  ;;  %v11929_v24 = vld [vmem:[%s14500_s21 + $0x138] sm:$0xf0]  ;;  %v12140_v18 = vor.u32 %v13221_v62, %v12137_v35  ;;  %v13579_v3 = vpop.eup %13578  ;;  %vm6490_vm3 = vcmp.lt.f32.partialorder %v16355_v36, 0.0 }
 0x58d   : > { %v6426_v30 = vadd.f32 0.2548296, %v6418_v32  ;;  %v13201_v25 = vld [vmem:[%s14500_s21 + $0x234] sm:$0xf]  ;;  %v12057_v9 = vld [vmem:[%s14500_s21 + $0x238] sm:$0xf0]  ;;  %v11932_v20 = vor.u32 %v13169_v7, %v11929_v24 }
 0x58e   : > { %v6497_v52 = vsub.f32 0.0, %v6481_v60  ;;  %7437 = vmatpush.bf16.msrb.mxu2 %v11948_v54  ;;  %v12001_v1 = vld [vmem:[%s14500_s21 + $0x1c8] sm:$0xf0]  ;;  %v13219_v56 = vld [vmem:[%s14500_s21 + $0x2c4] sm:$0xf]  ;;  %v12060_v42 = vor.u32 %v13201_v25, %v12057_v9  ;;  %vm7516_vm4 = vcmask 1043456  }
 0x58f   : > { %7474 = vmatpush.bf16.msra.mxu1 %v12156_v48  ;;  %7463 = vmatpush.bf16.msra.mxu0 %v12076_v6  ;;  %v6434_v43 = vmul.f32 %v6426_v30, %v16493_v47  ;;  %v12129_v58 = vld [vmem:[%s14500_s21 + $0x2c8] sm:$0xf0]  ;;  %v13167_v15 = vld [vmem:[%s14500_s21 + $0x124] sm:$0xf]  ;;  %v12004_v31 = vor.u32 %v13187_v10, %v12001_v1  ;;  %v13185_v27 = vld [vmem:[%s14500_s21 + $0x1b4] sm:$0xf] }
 0x590   : > { %v6505_v8 = vsel %vm6489_vm2, %v6497_v52, %v6481_v60  ;;  %7449 = vmatpush.bf16.msrb.mxu3 %v12020_v0  ;;  %v11921_v47 = vld [vmem:[%s14500_s21 + $0x128] sm:$0xf0]  ;;  %v13199_v28 = vld [vmem:[%s14500_s21 + $0x224] sm:$0xf]  ;;  %v12132_v5 = vor.u32 %v13219_v56, %v12129_v58  ;;  %v11993_v26 = vld [vmem:[%s14500_s21 + $0x1b8] sm:$0xf0] }
 0x591   : > { %v6513_v38 = vadd.f32 1.0, %v6505_v8  ;;  %v6474_v4 = vmul.f32 %v13579_v3, %v6434_v43  ;;  %v12049_v33 = vld [vmem:[%s14500_s21 + $0x228] sm:$0xf0]  ;;  %v11924_v45 = vor.u32 %v13167_v15, %v11921_v47  ;;  %v13217_v23 = vld [vmem:[%s14500_s21 + $0x2b4] sm:$0xf]  ;;  %v11996_v44 = vor.u32 %v13185_v27, %v11993_v26 }
 0x592   : > { %7438 = vmatpush.bf16.msrb.mxu2 %v11940_v22  ;;  %7430 = vmatmul.bf16.vlgmr.msrb.gmra.mxu1 %v16287_v39  ;;  %v12121_v39 = vld [vmem:[%s14500_s21 + $0x2b8] sm:$0xf0]  ;;  %v12052_v12 = vor.u32 %v13199_v28, %v12049_v33  ;;  %v13165_v48 = vld [vmem:[%s14500_s21 + $0x114] sm:$0xf]  ;;  %v13183_v60 = vld [vmem:[%s14500_s21 + $0x1a4] sm:$0xf] }
 0x593   : > { %7475 = vmatpush.bf16.msra.mxu1 %v12148_v57  ;;  %v6521_v50 = vmul.f32 %v6513_v38, %v6209_v46  ;;  %7464 = vmatpush.bf16.msra.mxu0 %v12068_v49  ;;  %v6482_v61 = vsub.f32 1.0, %v6474_v4  ;;  %v11913_v29 = vld [vmem:[%s14500_s21 + $0x118] sm:$0xf0]  ;;  %v13197_v54 = vld [vmem:[%s14500_s21 + $0x214] sm:$0xf]  ;;  %v12124_v21 = vor.u32 %v13217_v23, %v12121_v39  ;;  %v6210_v6 = vmul.f32 0.5, %v16336_v63 }
 0x594   : > { %7450 = vmatpush.bf16.msrb.mxu3 %v12012_v13  ;;  %v12041_v51 = vld [vmem:[%s14500_s21 + $0x218] sm:$0xf0]  ;;  %v11985_v37 = vld [vmem:[%s14500_s21 + $0x1a8] sm:$0xf0]  ;;  %v11916_v36 = vor.u32 %v13165_v48, %v11913_v29  ;;  %v13215_v0 = vld [vmem:[%s14500_s21 + $0x2a4] sm:$0xf] }
 0x595   : > { %v16552_v53 = vpack.c.bf16 %v6521_v50, %v6521_v50  ;;  %v6498_v34 = vsub.f32 0.0, %v6482_v61  ;;  %v12113_v16 = vld [vmem:[%s14500_s21 + $0x2a8] sm:$0xf0]  ;;  %v12044_v41 = vor.u32 %v13197_v54, %v12041_v51  ;;  %v13163_v52 = vld [vmem:[%s14500_s21 + $0x104] sm:$0xf]  ;;  %v11988_v2 = vor.u32 %v13183_v60, %v11985_v37 }
 0x596   : > { %7439 = vmatpush.bf16.msrb.mxu2 %v11932_v20  ;;  %v11905_v32 = vld [vmem:[%s14500_s21 + $0x108] sm:$0xf0]  ;;  %v13195_v57 = vld [vmem:[%s14500_s21 + $0x204] sm:$0xf]  ;;  %v13241_v63 = vld [vmem:[%s14500_s21 + $0x374] sm:$0xf]  ;;  %v12116_v35 = vor.u32 %v13215_v0, %v12113_v16 }
 0x597   : > { %7476 = vmatpush.bf16.msra.mxu1 %v12140_v18  ;;  %7465 = vmatpush.bf16.msra.mxu0 %v12060_v42  ;;  %v6506_v19 = vsel %vm6490_vm3, %v6498_v34, %v6482_v61  ;;  %v12033_v22 = vld [vmem:[%s14500_s21 + $0x208] sm:$0xf0]  ;;  %v12217_v62 = vld [vmem:[%s14500_s21 + $0x378] sm:$0xf0]  ;;  %v13181_v8 = vld [vmem:[%s14500_s21 + $0x194] sm:$0xf]  ;;  %v11908_v7 = vor.u32 %v13163_v52, %v11905_v32 }
 0x598   : > { %7391 = vmatmul.bf16.vlgmr.msra.gmra.mxu2 %v16552_v53  ;;  %7451 = vmatpush.bf16.msrb.mxu3 %v12004_v31  ;;  %v6514_v11 = vadd.f32 1.0, %v6506_v19  ;;  %v11977_v30 = vld [vmem:[%s14500_s21 + $0x198] sm:$0xf0]  ;;  %v13213_v24 = vld [vmem:[%s14500_s21 + $0x294] sm:$0xf]  ;;  %v12036_v38 = vor.u32 %v13195_v57, %v12033_v22  ;;  %v12220_v13 = vor.u32 %v13241_v63, %v12217_v62 }
 0x599   : > { %v12105_v46 = vld [vmem:[%s14500_s21 + $0x298] sm:$0xf0]  ;;  %v11980_v25 = vor.u32 %v13181_v8, %v11977_v30  ;;  %v13239_v9 = vld [vmem:[%s14500_s21 + $0x364] sm:$0xf]  ;;  %v12209_v43 = vld [vmem:[%s14500_s21 + $0x368] sm:$0xf0] }
 0x59a   : > { %7440 = vmatpush.bf16.msrb.mxu2 %v11924_v45  ;;  %v6522_v14 = vmul.f32 %v6514_v11, %v6210_v6  ;;  %v12108_v18 = vor.u32 %v13213_v24, %v12105_v46  ;;  %v13179_v10 = vld [vmem:[%s14500_s21 + $0x184] sm:$0xf]  ;;  %v11969_v1 = vld [vmem:[%s14500_s21 + $0x188] sm:$0xf0]  ;;  %v13257_v20 = vld [vmem:[%s14500_s21 + $0x3f4] sm:$0xf]  ;;  %v12212_v58 = vor.u32 %v13239_v9, %v12209_v43 }
 0x59b   : > { %7477 = vmatpush.bf16.msra.mxu1 %v12132_v5  ;;  %7466 = vmatpush.bf16.msra.mxu0 %v12052_v12  ;;  %v13211_v3 = vld [vmem:[%s14500_s21 + $0x284] sm:$0xf]  ;;  %v12097_v50 = vld [vmem:[%s14500_s21 + $0x288] sm:$0xf0]  ;;  %v12281_v56 = vld [vmem:[%s14500_s21 + $0x3f8] sm:$0xf0]  ;;  %v11972_v4 = vor.u32 %v13179_v10, %v11969_v1 }
 0x59c   : > { %7452 = vmatpush.bf16.msrb.mxu3 %v11996_v44  ;;  %v16579_v49 = vpack.c.bf16 %v6522_v14, %v6522_v14  ;;  %v13237_v42 = vld [vmem:[%s14500_s21 + $0x354] sm:$0xf]  ;;  %v12201_v15 = vld [vmem:[%s14500_s21 + $0x358] sm:$0xf0]  ;;  %v12100_v47 = vor.u32 %v13211_v3, %v12097_v50  ;;  %v12284_v31 = vor.u32 %v13257_v20, %v12281_v56  ;;  %v13255_v28 = vld [vmem:[%s14500_s21 + $0x3e4] sm:$0xf] }
 0x59d   : > { %v12273_v33 = vld [vmem:[%s14500_s21 + $0x3e8] sm:$0xf0]  ;;  %v12204_v61 = vor.u32 %v13237_v42, %v12201_v15  ;;  %v13235_v5 = vld [vmem:[%s14500_s21 + $0x344] sm:$0xf]  ;;  %v13253_v45 = vld [vmem:[%s14500_s21 + $0x3d4] sm:$0xf] }
 0x59e   : > { %7441 = vmatpush.bf16.msrb.mxu2 %v11916_v36  ;;  %7404 = vmatmul.bf16.vlgmr.msra.gmra.mxu3 %v16579_v49  ;;  %v12193_v27 = vld [vmem:[%s14500_s21 + $0x348] sm:$0xf0]  ;;  %v12276_v26 = vor.u32 %v13255_v28, %v12273_v33  ;;  %v13233_v39 = vld [vmem:[%s14500_s21 + $0x334] sm:$0xf]  ;;  %v12185_v34 = vld [vmem:[%s14500_s21 + $0x338] sm:$0xf0] }
 0x59f   : > { %7478 = vmatpush.bf16.msra.mxu1 %v12124_v21  ;;  %7467 = vmatpush.bf16.msra.mxu0 %v12044_v41  ;;  %v12196_v23 = vor.u32 %v13235_v5, %v12193_v27  ;;  %v12257_v48 = vld [vmem:[%s14500_s21 + $0x3c8] sm:$0xf0]  ;;  %v12188_v29 = vor.u32 %v13233_v39, %v12185_v34  ;;  %v13231_v44 = vld [vmem:[%s14500_s21 + $0x324] sm:$0xf]  ;;  %v12249_v19 = vld [vmem:[%s14500_s21 + $0x3b8] sm:$0xf0] }
 0x5a0   : > { %7453 = vmatpush.bf16.msrb.mxu3 %v11988_v2  ;;  %v12177_v54 = vld [vmem:[%s14500_s21 + $0x328] sm:$0xf0]  ;;  %v13229_v60 = vld [vmem:[%s14500_s21 + $0x314] sm:$0xf]  ;;  %v12169_v37 = vld [vmem:[%s14500_s21 + $0x318] sm:$0xf0] }
 0x5a1   : > { %v12180_v21 = vor.u32 %v13231_v44, %v12177_v54  ;;  %v13247_v11 = vld [vmem:[%s14500_s21 + $0x3a4] sm:$0xf]  ;;  %v12241_v36 = vld [vmem:[%s14500_s21 + $0x3a8] sm:$0xf0]  ;;  %v12172_v0 = vor.u32 %v13229_v60, %v12169_v37  ;;  %v13245_v52 = vld [vmem:[%s14500_s21 + $0x394] sm:$0xf] }
 0x5a2   : > { %7442 = vmatpush.bf16.msrb.mxu2 %v11908_v7  ;;  %v13227_v16 = vld [vmem:[%s14500_s21 + $0x304] sm:$0xf]  ;;  %v12161_v41 = vld [vmem:[%s14500_s21 + $0x308] sm:$0xf0]  ;;  %v12233_v32 = vld [vmem:[%s14500_s21 + $0x398] sm:$0xf0] }
 0x5a3   : > { %7479 = vmatpush.bf16.msra.mxu1 %v12116_v35  ;;  %7468 = vmatpush.bf16.msra.mxu0 %v12036_v38  ;;  %v12164_v57 = vor.u32 %v13227_v16, %v12161_v41  ;;  %v12236_v14 = vor.u32 %v13245_v52, %v12233_v32  ;;  %v13243_v2 = vld [vmem:[%s14500_s21 + $0x384] sm:$0xf]  ;;  %v12225_v22 = vld [vmem:[%s14500_s21 + $0x388] sm:$0xf0]  ;;  %v6659_v62 = vld [vmem:[%s837_s3] sm:$0x3] }
 0x5a4   : > { %7454 = vmatpush.bf16.msrb.mxu3 %v11980_v25  ;;  %v12228_v63 = vor.u32 %v13243_v2, %v12225_v22  ;;  %v6661_v8 = vperm.slane %v6659_v62, 0 }
 0x5a6   : > { %7487 = vmatpush.bf16.msra.mxu2 %v12220_v13  ;;  %7469 = vmatmul.bf16.vlgmr.msra.gmra.mxu0 %v16438_v59  ;;  %v12265_v59 = vld [vmem:[%s14500_s21 + $0x3d8] sm:$0xf0] }
 0x5a7   : > { %7480 = vmatpush.bf16.msra.mxu1 %v12108_v18  ;;  %v12268_v12 = vor.u32 %v13253_v45, %v12265_v59 }
 0x5a8   : > { %7455 = vmatpush.bf16.msrb.mxu3 %v11972_v4  ;;  %7443 = vmatmul.bf16.vlgmr.msrb.gmra.mxu2 %v16330_v55  ;;  %v13251_v55 = vld [vmem:[%s14500_s21 + $0x3c4] sm:$0xf] }
 0x5a9   : > { %v12260_v51 = vor.u32 %v13251_v55, %v12257_v48 }
 0x5aa   : > { %7488 = vmatpush.bf16.msra.mxu2 %v12212_v58 }
 0x5ab   : > { %7481 = vmatpush.bf16.msra.mxu1 %v12100_v47 }
 0x5ac   : > { %7500 = vmatpush.bf16.msra.mxu3 %v12284_v31 }
 0x5ae   : > { %7489 = vmatpush.bf16.msra.mxu2 %v12204_v61  ;;  %7482 = vmatmul.bf16.vlgmr.msra.gmra.mxu1 %v16489_v40  ;;  %v13249_v40 = vld [vmem:[%s14500_s21 + $0x3b4] sm:$0xf] }
 0x5af   : > { %7456 = vmatmul.bf16.vlgmr.msrb.gmra.mxu3 %v16362_v17  ;;  %v12252_v6 = vor.u32 %v13249_v40, %v12249_v19  ;;  %v12244_v17 = vor.u32 %v13247_v11, %v12241_v36 }
 0x5b0   : > { %7501 = vmatpush.bf16.msra.mxu3 %v12276_v26 }
 0x5b2   : > { %7490 = vmatpush.bf16.msra.mxu2 %v12196_v23  ;;  %v6662_v23 = vperm.slane %v6659_v62, 1 }
 0x5b4   : > { %7502 = vmatpush.bf16.msra.mxu3 %v12268_v12 }
 0x5b6   : > { %7491 = vmatpush.bf16.msra.mxu2 %v12188_v29 }
 0x5b8   : > { %7503 = vmatpush.bf16.msra.mxu3 %v12260_v51 }
 0x5ba   : > { %7492 = vmatpush.bf16.msra.mxu2 %v12180_v21 }
 0x5bc   : > { %7504 = vmatpush.bf16.msra.mxu3 %v12252_v6 }
 0x5be   : > { %7493 = vmatpush.bf16.msra.mxu2 %v12172_v0 }
 0x5c0   : > { %7505 = vmatpush.bf16.msra.mxu3 %v12244_v17 }
 0x5c2   : > { %7494 = vmatpush.bf16.msra.mxu2 %v12164_v57 }
 0x5c4   : > { %7506 = vmatpush.bf16.msra.mxu3 %v12236_v14 }
 0x5c5   : > { %7495 = vmatmul.bf16.vlgmr.msra.gmra.mxu2 %v16552_v53 }
 0x5c8   : > { %7507 = vmatpush.bf16.msra.mxu3 %v12228_v63 }
 0x5cb   : > { %7508 = vmatmul.bf16.vlgmr.msra.gmra.mxu3 %v16579_v49 }
 0x5d4   : > { %v7314_v35 = vpop.f32.mrf.mxu0 }
 0x5d5   : > { %v7315_v30 = vadd.f32 %v7314_v35, %v6661_v8 }
 0x5da   : > { %v7327_v7 = vpop.f32.mrf.mxu1 }
 0x5db   : > { %v7328_v24 = vadd.f32 %v7327_v7, %v7315_v30 }
 0x5dc   : > { %v7316_v46 = vpop.f32.mrf.mxu0 }
 0x5e2   : > { %v7329_v38 = vpop.f32.mrf.mxu1 }
 0x5ea   : > { %v7340_v13 = vpop.f32.mrf.mxu2 }
 0x5eb   : > { %v7341_v25 = vadd.f32 %v7340_v13, %v7328_v24 }
 0x5f0   : > { %v7353_v43 = vpop.f32.mrf.mxu3 }
 0x5f1   : > { %v7354_v18 = vadd.f32 %v7353_v43, %v7341_v25 }
 0x5f2   : > { %v7342_v9 = vpop.f32.mrf.mxu2 }
 0x5f5   : > { %v7366_v10 = vpop.f32.mrf.mxu0 }
 0x5f6   : > { %v7367_v1 = vadd.f32 %v7366_v10, %v7354_v18 }
 0x5f8   : > { %v7355_v53 = vpop.f32.mrf.mxu3 }
 0x5fd   : > { %v7368_v3 = vpop.f32.mrf.mxu0 }
 0x5ff   : > { %v7379_v50 = vpop.f32.mrf.mxu1 }
 0x600   : > { %v7380_v49 = vadd.f32 %v7379_v50, %v7367_v1 }
 0x605   : > { %v7418_v20 = vpop.f32.mrf.mxu0 }
 0x606   : > { %v7419_v39 = vadd.f32 %v7418_v20, %v6662_v23 }
 0x607   : > { %v7381_v56 = vpop.f32.mrf.mxu1 }
 0x60d   : > { %v7420_v58 = vpop.f32.mrf.mxu0 }
 0x60f   : > { %v7431_v4 = vpop.f32.mrf.mxu1 }
 0x610   : > { %v7432_v34 = vadd.f32 %v7431_v4, %v7419_v39 }
 0x617   : > { %v7433_v42 = vpop.f32.mrf.mxu1 }
 0x61b   : > { %v7392_v15 = vpop.f32.mrf.mxu2 }
 0x61c   : > { %v7393_v19 = vadd.f32 %v7392_v15, %v7380_v49 }
 0x621   : > { %v7405_v28 = vpop.f32.mrf.mxu3 }
 0x622   : > { %v7406_v37 = vadd.f32 %v7405_v28, %v7393_v19 }
 0x623   : > { %v7394_v47 = vpop.f32.mrf.mxu2  ;;  %v7470_v31 = vpop.f32.mrf.mxu0 }
 0x629   : > { %v7407_v27 = vpop.f32.mrf.mxu3 }
 0x62b   : > { %v7483_v33 = vpop.f32.mrf.mxu1  ;;  %v7472_v61 = vpop.f32.mrf.mxu0 }
 0x62c   : > { %v7444_v5 = vpop.f32.mrf.mxu2 }
 0x62d   : > { %v7445_v55 = vadd.f32 %v7444_v5, %v7432_v34 }
 0x632   : > { %v7457_v59 = vpop.f32.mrf.mxu3 }
 0x633   : > { %v7485_v26 = vpop.f32.mrf.mxu1  ;;  %v7458_v48 = vadd.f32 %v7457_v59, %v7445_v55 }
 0x634   : > { %v7446_v45 = vpop.f32.mrf.mxu2 }
 0x635   : > { %v7471_v29 = vadd.f32 %v7470_v31, %v7458_v48 }
 0x637   : > { %v7484_v54 = vadd.f32 %v7483_v33, %v7471_v29 }
 0x63a   : > { %v7459_v12 = vpop.f32.mrf.mxu3 }
 0x648   : > { %v7496_v44 = vpop.f32.mrf.mxu2 }
 0x649   : > { %v7497_v51 = vadd.f32 %v7496_v44, %v7484_v54 }
 0x64e   : > { %v7509_v40 = vpop.f32.mrf.mxu3 }
 0x64f   : > { %v7510_v21 = vadd.f32 %v7509_v40, %v7497_v51 }
 0x650   : > { %v7498_v60 = vpop.f32.mrf.mxu2 }
 0x651   : > { %v7515_v6 = vrot.slane %v7510_v21, 4 }
 0x653   : > { %v7517_v11 = vsel %vm7516_vm4, %v7406_v37, %v7515_v6 }
 0x654   : > { %7522 = vst [vmem:[%s7521_s26] sm:$0xff] %v7517_v11 }
 0x656   : > { %v7511_v36 = vpop.f32.mrf.mxu3 }
 0x657 PF: > { %s17920_s2 = sld [smem:[#allocation29_spill]] }
 0x65d   : > { %p12287_p5 = scmp.ne.s32.totalorder %s17920_s2, 4 }
 0x65e   : > { %s14123_s0 = smov (!%p12287_p5), 120   ;;  %s14124_s29 = smov (!%p12287_p5), 124  }
 0x65f   : > { %7526 = sbr.rel (%p12287_p5) target bundleno = 3268 (0xcc4), region = 144  ;;  %s14125_s5 = smov (!%p12287_p5), 116  }
 0x660   : > { %s17964_s20 = sld [smem:[#allocation64_spill]] (!%p12287_p5) }
 0x664   : > { %v16628_v0 = vld [vmem:[#allocation3] sm:$0xff]  ;;  %v16631_v16 = vld [vmem:[#allocation3 + $0x8] sm:$0xff]  ;;  %v16634_v52 = vld [vmem:[#allocation3 + $0x10] sm:$0xff]  ;;  %vm7560_vm5 = vcmask 1043456   ;;  %v7611_v24 = vlaneseq  ;;  %vm17722_vm7 = vcmask 130048  }
 0x665   : > { %7535 = vst [vmem:[#allocation1] ss:$2 sm:$0xff] %v16628_v0  ;;  %v16637_v14 = vld [vmem:[#allocation3 + $0x18] sm:$0xff] }
 0x666   : > { %v16644_v46 = vshrl.u32 %v7611_v24, 7  ;;  %v16646_v38 = vand.u32 127, %v7611_v24 }
 0x668   : > { %v16649_v13 = vcvt.s32.f32 %v16644_v46  ;;  %v16652_v25 = vcvt.s32.f32 %v16646_v38  ;;  %v7613_v18 = vadd.s32 8, %v16644_v46 }
 0x66a   : > { %vm17720_vm6 = vcmp.eq.f32.partialorder %v16649_v13, %v16652_v25  ;;  %v16664_v3 = vcvt.s32.f32 %v7613_v18 }
 0x66c   : > { %v7536_v41 = vld.sshfl [vmem:[#allocation1] sm:$0xff pattern:$0x75316420]  ;;  %v7537_v17 = vld.sshfl [vmem:[#allocation1 + $0x8] sm:$0xff pattern:$0x75316420]  ;;  %vm17723_vm8 = vcmp.eq.f32.partialorder %v16664_v3, %v16652_v25 }
 0x66d   : > { %7542 = vst [vmem:[#allocation1 + $0x1] ss:$2 sm:$0xff] %v16631_v16 }
 0x674   : > { %v7543_v32 = vld.sshfl [vmem:[#allocation1] sm:$0xff pattern:$0x75316420]  ;;  %v7544_v57 = vld.sshfl [vmem:[#allocation1 + $0x8] sm:$0xff pattern:$0x75316420] }
 0x675   : > { %7548 = vst [vmem:[#allocation1] ss:$2 sm:$0xff] %v16634_v52  ;;  %v7561_v30 = vsel %vm7560_vm5, %v7536_v41, %v7543_v32  ;;  %v7562_v7 = vsel %vm7560_vm5, %v7537_v17, %v7544_v57 }
 0x67c   : > { %v7549_v2 = vld.sshfl [vmem:[#allocation1] sm:$0xff pattern:$0x75316420]  ;;  %v7550_v22 = vld.sshfl [vmem:[#allocation1 + $0x8] sm:$0xff pattern:$0x75316420] }
 0x67d   : > { %7555 = vst [vmem:[#allocation1 + $0x1] ss:$2 sm:$0xff] %v16637_v14 }
 0x684   : > { %v7556_v63 = vld.sshfl [vmem:[#allocation1] sm:$0xff pattern:$0x75316420]  ;;  %v7557_v62 = vld.sshfl [vmem:[#allocation1 + $0x8] sm:$0xff pattern:$0x75316420] }
 0x685   : > { %v7563_v35 = vsel %vm7560_vm5, %v7549_v2, %v7556_v63  ;;  %v7564_v8 = vsel %vm7560_vm5, %v7550_v22, %v7557_v62 }
 0x686   : > { %7579 = vmatpush.xpose.msra.mxu0 %v7563_v35  ;;  %7602 = vmatpush.xpose.msra.mxu1 %v7564_v8 }
 0x68a   : > { %7580 = vmatpush.xpose.msra.mxu0 %v7561_v30  ;;  %7603 = vmatpush.xpose.msra.mxu1 %v7562_v7 }
 0x68d   : > { %7581 = vmatmul.f32.vlgmr.msra.gmra.mxu0 %v7561_v30  ;;  %7604 = vmatmul.f32.vlgmr.msra.gmra.mxu1 %v7562_v7 }
 0x695   : > { %7584 = vmatmul.f32.gmra.mxu0 %v7563_v35  ;;  %7607 = vmatmul.f32.gmra.mxu1 %v7564_v8  ;;  %v7619_v35 = vmul.f32 0.25, %v16649_v13  ;;  %v7623_v8 = vmul.f32 0.25, %v16652_v25 }
 0x70a   : > { %v7582_v9 = vpop.f32.mrf.mxu0  ;;  %v7605_v43 = vpop.f32.mrf.mxu1 }
 0x70b   : > { %v16657_v10 = vadd.f32 %v7605_v43, %v7582_v9  ;;  %v16687_v9 = vfloor.f32 %v7619_v35  ;;  %v16689_v43 = vfloor.f32 %v7623_v8 }
 0x70d   : > { %v7635_v1 = vsel %vm17720_vm6, %v16657_v10, 0.0 }
 0x70e   : > { %v7638_v53 = vsel %vm17722_vm7, %v7635_v1, 0.0 }
 0x70f   : > { %7639 = vadd.xlane.f32.xlu0 %v7638_v53 }
 0x712   : > { %v7585_v50 = vpop.f32.mrf.mxu0  ;;  %v7608_v49 = vpop.f32.mrf.mxu1 }
 0x713   : > { %v16668_v20 = vadd.f32 %v7608_v49, %v7585_v50  ;;  %v7625_v50 = vmul.f32 4.0, %v16687_v9  ;;  %v7620_v49 = vmul.f32 0.25, %v16664_v3 }
 0x715   : > { %v7636_v56 = vsel %vm17723_vm8, %v16668_v20, 0.0 }
 0x716   : > { %v7641_v58 = vsel %vm17722_vm7, %v7636_v56, 0.0  ;;  %v7629_v56 = vmul.f32 4.0, %v16689_v43 }
 0x717   : > { %7642 = vadd.xlane.f32.xlu0 %v7641_v58  ;;  %v7644_v4 = vadd.f32 %v7641_v58, %v7638_v53 }
 0x719   : > { %v7645_v42 = vrot.slane %v7644_v4, 4 }
 0x71b   : > { %v7646_v15 = vadd.f32 %v7645_v42, %v7644_v4 }
 0x71d   : > { %v7647_v47 = vrot.slane %v7646_v15, 2 }
 0x71f   : > { %v7648_v31 = vadd.f32 %v7647_v47, %v7646_v15  ;;  %v7627_v47 = vsub.f32 %v16649_v13, %v7625_v50 }
 0x721   : > { %v7649_v28 = vrot.slane %v7648_v31, 1 }
 0x723   : > { %v7650_v33 = vadd.f32 %v7649_v28, %v7648_v31  ;;  %v16695_v31 = vfloor.f32 %v7620_v49  ;;  %v7630_v28 = vsub.f32 %v16652_v25, %v7629_v56 }
 0x725   : > { %13584 = vrsqrt.f32 %v7650_v33  ;;  %vm7682_vm9 = vcmp.eq.f32.partialorder %v7650_v33, inf  ;;  %v7685_v6 = vand.u32 2147483648, %v7650_v33  ;;  %vm7684_vm12 = vcmp.eq.f32.partialorder %v7650_v33, 0.0 }
 0x726   : > { %vm16699_vm3 = vcmp.eq.f32.partialorder %v7627_v47, %v7630_v28 }
 0x72b   : > { %v13585_v61 = vpop.eup %13584 }
 0x72c   : > { %v7676_v5 = vmul.f32 %v13585_v61, %v7650_v33 }
 0x72e   : > { %v7677_v27 = vmul.f32 %v13585_v61, %v7676_v5 }
 0x730   : > { %v7678_v45 = vmul.f32 0.5, %v7677_v27 }
 0x732   : > { %v7679_v59 = vsub.f32 1.5, %v7678_v45  ;;  %v7626_v45 = vmul.f32 4.0, %v16695_v31 }
 0x734   : > { %v7680_v55 = vmul.f32 %v13585_v61, %v7679_v59  ;;  %v17921_v59 = vmov 0 }
 0x735   : > { %v17922_v59 = vsel %vm16699_vm3, 4294967295, %v17921_v59 }
 0x736   : > { %v7681_v44 = vmul.f32 %v7680_v55, %v7650_v33 }
 0x738   : > { %v7683_v21 = vsel %vm7682_vm9, %v7650_v33, %v7681_v44  ;;  %v7628_v44 = vsub.f32 %v16664_v3, %v7626_v45 }
 0x739   : > { %v16677_v17 = vsel %vm7684_vm12, %v7685_v6, %v7683_v21  ;;  %v17923_v21 = vmov 0 }
 0x73a   : > { %vm16708_vm12 = vcmp.eq.f32.partialorder %v7628_v44, %v7630_v28 }
 0x73b   : > { %v17924_v21 = vsel %vm16708_vm12, 4294967295, %v17923_v21 }
 0x782   : > { %v7640_v26 = vpop.xlane.xlu0 %7639 }
 0x783   : > { %13586 = vrsqrt.f32 %v7640_v26  ;;  %vm7658_vm10 = vcmp.eq.f32.partialorder %v7640_v26, inf  ;;  %v7661_v37 = vand.u32 2147483648, %v7640_v26  ;;  %vm7660_vm11 = vcmp.eq.f32.partialorder %v7640_v26, 0.0 }
 0x789   : > { %v13587_v23 = vpop.eup %13586 }
 0x78a   : > { %v7652_v39 = vmul.f32 %v13587_v23, %v7640_v26  ;;  %v7643_v34 = vpop.xlane.xlu0 %7642 }
 0x78b   : > { %13588 = vrsqrt.f32 %v7643_v34  ;;  %vm7670_vm13 = vcmp.eq.f32.partialorder %v7643_v34, inf  ;;  %v7673_v63 = vand.u32 2147483648, %v7643_v34  ;;  %vm7672_vm14 = vcmp.eq.f32.partialorder %v7643_v34, 0.0 }
 0x78c   : > { %v7653_v12 = vmul.f32 %v13587_v23, %v7652_v39 }
 0x78e   : > { %v7654_v48 = vmul.f32 0.5, %v7653_v12 }
 0x790   : > { %v7655_v29 = vsub.f32 1.5, %v7654_v48 }
 0x791   : > { %v13589_v54 = vpop.eup %13588 }
 0x792   : > { %v7656_v51 = vmul.f32 %v13587_v23, %v7655_v29  ;;  %v7664_v40 = vmul.f32 %v13589_v54, %v7643_v34 }
 0x794   : > { %v7657_v19 = vmul.f32 %v7656_v51, %v7640_v26  ;;  %v7665_v60 = vmul.f32 %v13589_v54, %v7664_v40 }
 0x796   : > { %v7659_v11 = vsel %vm7658_vm10, %v7640_v26, %v7657_v19  ;;  %v7666_v36 = vmul.f32 0.5, %v7665_v60 }
 0x797   : > { %v16675_v41 = vsel %vm7660_vm11, %v7661_v37, %v7659_v11 }
 0x798   : > { %v7722_v32 = vmul.f32 %v16677_v17, %v16675_v41  ;;  %v7667_v57 = vsub.f32 1.5, %v7666_v36 }
 0x79a   : > { %v7668_v2 = vmul.f32 %v13589_v54, %v7667_v57  ;;  %v7724_v22 = vmax.f32 %v7722_v32, 1e-08 }
 0x79c   : > { %v7669_v62 = vmul.f32 %v7668_v2, %v7643_v34  ;;  %13590 = vrcp.f32 %v7724_v22  ;;  %v7737_v4 = vand.u32 2147483648, %v7724_v22  ;;  %v7735_v15 = vand.u32 2147483647, %v7724_v22 }
 0x79d   : > { %vm7731_vm0 = vweird.f32 %v7724_v22 }
 0x79e   : > { %v7671_v30 = vsel %vm7670_vm13, %v7643_v34, %v7669_v62  ;;  %v7738_v5 = vor.u32 1.1754944e-38, %v7737_v4  ;;  %vm7736_vm2 = vcmp.eq.f32.partialorder %v7735_v15, 8.507059e+37 }
 0x79f   : > { %v16683_v7 = vsel %vm7672_vm14, %v7673_v63, %v7671_v30 }
 0x7a0   : > { %v7723_v24 = vmul.f32 %v16677_v17, %v16683_v7 }
 0x7a2   : > { %v7725_v18 = vmax.f32 %v7723_v24, 1e-08  ;;  %v13591_v1 = vpop.eup %13590 }
 0x7a3   : > { %v7727_v53 = vmul.f32 %v13591_v1, %v7724_v22  ;;  %vm7732_vm15 = vweird.f32 %v13591_v1 }
 0x7a4   : > { %13592 = vrcp.f32 %v7725_v18  ;;  %vm7733_vm1 = vmor %vm7731_vm0, %vm7732_vm15  ;;  %v7752_v12 = vand.u32 2147483648, %v7725_v18  ;;  %v7750_v29 = vand.u32 2147483647, %v7725_v18  ;;  %vm7746_vm9 = vweird.f32 %v7725_v18 }
 0x7a5   : > { %v7728_v58 = vsub.f32 1.0, %v7727_v53 }
 0x7a6   : > { %v7753_v40 = vor.u32 1.1754944e-38, %v7752_v12  ;;  %vm7751_vm11 = vcmp.eq.f32.partialorder %v7750_v29, 8.507059e+37 }
 0x7a7   : > { %v7729_v42 = vmul.f32 %v13591_v1, %v7728_v58 }
 0x7a9   : > { %v7730_v33 = vadd.f32 %v13591_v1, %v7729_v42 }
 0x7aa   : > { %v13593_v61 = vpop.eup %13592 }
 0x7ab   : > { %v7734_v27 = vsel %vm7733_vm1, %v13591_v1, %v7730_v33  ;;  %v7742_v26 = vmul.f32 %v13593_v61, %v7725_v18  ;;  %vm7747_vm4 = vweird.f32 %v13593_v61 }
 0x7ac   : > { %v7739_v23 = vsel %vm7736_vm2, %v7738_v5, %v7734_v27  ;;  %vm7748_vm10 = vmor %vm7746_vm9, %vm7747_vm4 }
 0x7ad   : > { %v7740_v39 = vmul.f32 %v7739_v23, %v16657_v10  ;;  %v7743_v34 = vsub.f32 1.0, %v7742_v26 }
 0x7af   : > { %v7756_v55 = vsel %vm16699_vm3, %v7740_v39, -1e+30  ;;  %v7744_v48 = vmul.f32 %v13593_v61, %v7743_v34 }
 0x7b0   : > { %v7758_v54 = vsel %vm17722_vm7, %v7756_v55, -inf }
 0x7b1   : > { %7759 = vmax.xlane.f32.xlu1 %v7758_v54  ;;  %v7745_v51 = vadd.f32 %v13593_v61, %v7744_v48 }
 0x7b3   : > { %v7749_v19 = vsel %vm7748_vm10, %v13593_v61, %v7745_v51 }
 0x7b4   : > { %v7754_v60 = vsel %vm7751_vm11, %v7753_v40, %v7749_v19 }
 0x7b5   : > { %v7755_v37 = vmul.f32 %v7754_v60, %v16668_v20 }
 0x7b7   : > { %v7757_v6 = vsel %vm16708_vm12, %v7755_v37, -1e+30 }
 0x7b8   : > { %v7761_v11 = vsel %vm17722_vm7, %v7757_v6, -inf }
 0x7b9   : > { %7762 = vmax.xlane.f32.xlu1 %v7761_v11 }
 0x824   : > { %v7760_v36 = vpop.xlane.xlu1 %7759 }
 0x825   : > { %v7764_v32 = vsub.f32 %v7756_v55, %v7760_v36 }
 0x827   : > { %v7766_v57 = vmul.f32 1.442695, %v7764_v32 }
 0x829   : > { %13594 = vpow2.f32 %v7766_v57 }
 0x82c   : > { %v7763_v2 = vpop.xlane.xlu1 %7762 }
 0x82d   : > { %v7765_v22 = vsub.f32 %v7757_v6, %v7763_v2 }
 0x82f   : > { %v13595_v63 = vpop.eup %13594  ;;  %v7768_v62 = vmul.f32 1.442695, %v7765_v22 }
 0x830   : > { %v7770_v35 = vsel %vm17722_vm7, %v13595_v63, 0.0 }
 0x831   : > { %13596 = vpow2.f32 %v7768_v62  ;;  %7771 = vadd.xlane.f32.xlu2 %v7770_v35 }
 0x837   : > { %v13597_v8 = vpop.eup %13596 }
 0x838   : > { %v7773_v30 = vsel %vm17722_vm7, %v13597_v8, 0.0 }
 0x839   : > { %7774 = vadd.xlane.f32.xlu2 %v7773_v30 }
 0x8a4   : > { %v7772_v24 = vpop.xlane.xlu2 %7771 }
 0x8a5   : > { %13598 = vrcp.f32 %v7772_v24  ;;  %v7787_v49 = vand.u32 2147483648, %v7772_v24  ;;  %v7785_v58 = vand.u32 2147483647, %v7772_v24  ;;  %vm7781_vm14 = vweird.f32 %v7772_v24 }
 0x8a7   : > { %v7788_v15 = vor.u32 1.1754944e-38, %v7787_v49  ;;  %vm7786_vm0 = vcmp.eq.f32.partialorder %v7785_v58, 8.507059e+37 }
 0x8ab   : > { %v13599_v18 = vpop.eup %13598 }
 0x8ac   : > { %v7777_v1 = vmul.f32 %v13599_v18, %v7772_v24  ;;  %v7775_v53 = vpop.xlane.xlu2 %7774  ;;  %vm7782_vm13 = vweird.f32 %v13599_v18 }
 0x8ad   : > { %13600 = vrcp.f32 %v7775_v53  ;;  %vm7783_vm15 = vmor %vm7781_vm14, %vm7782_vm13  ;;  %v7802_v27 = vand.u32 2147483648, %v7775_v53  ;;  %v7800_v45 = vand.u32 2147483647, %v7775_v53  ;;  %vm7796_vm2 = vweird.f32 %v7775_v53 }
 0x8ae   : > { %v7778_v50 = vsub.f32 1.0, %v7777_v1 }
 0x8af   : > { %v7803_v55 = vor.u32 1.1754944e-38, %v7802_v27  ;;  %vm7801_vm9 = vcmp.eq.f32.partialorder %v7800_v45, 8.507059e+37 }
 0x8b0   : > { %v7779_v56 = vmul.f32 %v13599_v18, %v7778_v50 }
 0x8b2   : > { %v7780_v4 = vadd.f32 %v13599_v18, %v7779_v56 }
 0x8b3   : > { %v13601_v42 = vpop.eup %13600 }
 0x8b4   : > { %v7792_v47 = vmul.f32 %v13601_v42, %v7775_v53  ;;  %v7784_v28 = vsel %vm7783_vm15, %v13599_v18, %v7780_v4  ;;  %vm7797_vm1 = vweird.f32 %v13601_v42 }
 0x8b5   : > { %v7789_v33 = vsel %vm7786_vm0, %v7788_v15, %v7784_v28  ;;  %vm7798_vm4 = vmor %vm7796_vm2, %vm7797_vm1 }
 0x8b6   : > { %v7793_v61 = vsub.f32 1.0, %v7792_v47  ;;  %v7790_v5 = vmul.f32 %v13595_v63, %v7789_v33 }
 0x8b8   : > { %v7794_v26 = vmul.f32 %v13601_v42, %v7793_v61  ;;  %v16718_v23 = vmul.f32 %v7790_v5, %v7740_v39 }
 0x8ba   : > { %v7795_v34 = vadd.f32 %v13601_v42, %v7794_v26  ;;  %v7808_v12 = vmul.f32 %v16718_v23, %v16718_v23 }
 0x8bc   : > { %v7810_v48 = vsel %vm17722_vm7, %v7808_v12, 0.0  ;;  %v7799_v29 = vsel %vm7798_vm4, %v13601_v42, %v7795_v34 }
 0x8bd   : > { %7811 = vadd.xlane.f32.xlu0 %v7810_v48  ;;  %v7804_v44 = vsel %vm7801_vm9, %v7803_v55, %v7799_v29 }
 0x8be   : > { %v7805_v54 = vmul.f32 %v13597_v8, %v7804_v44 }
 0x8c0   : > { %v16723_v51 = vmul.f32 %v7805_v54, %v7755_v37 }
 0x8c2   : > { %v7809_v39 = vmul.f32 %v16723_v51, %v16723_v51 }
 0x8c4   : > { %v7813_v40 = vsel %vm17722_vm7, %v7809_v39, 0.0 }
 0x8c5   : > { %7814 = vadd.xlane.f32.xlu1 %v7813_v40 }
 0x930   : > { %v7812_v19 = vpop.xlane.xlu0 %7811 }
 0x931   : > { %13602 = vrsqrt.f32 %v7812_v19  ;;  %vm7823_vm10 = vcmp.eq.f32.partialorder %v7812_v19, inf  ;;  %v7826_v35 = vand.u32 2147483648, %v7812_v19  ;;  %vm7825_vm11 = vcmp.eq.f32.partialorder %v7812_v19, 0.0 }
 0x937   : > { %v13603_v60 = vpop.eup %13602 }
 0x938   : > { %v7817_v6 = vmul.f32 %v13603_v60, %v7812_v19  ;;  %v7815_v11 = vpop.xlane.xlu1 %7814 }
 0x939   : > { %13604 = vrsqrt.f32 %v7815_v11  ;;  %vm7835_vm13 = vcmp.eq.f32.partialorder %v7815_v11, inf  ;;  %v7838_v49 = vand.u32 2147483648, %v7815_v11  ;;  %vm7837_vm14 = vcmp.eq.f32.partialorder %v7815_v11, 0.0 }
 0x93a   : > { %v7818_v36 = vmul.f32 %v13603_v60, %v7817_v6 }
 0x93c   : > { %v7819_v32 = vmul.f32 0.5, %v7818_v36 }
 0x93e   : > { %v7820_v57 = vsub.f32 1.5, %v7819_v32 }
 0x93f   : > { %v13605_v2 = vpop.eup %13604 }
 0x940   : > { %v7821_v22 = vmul.f32 %v13603_v60, %v7820_v57  ;;  %v7829_v63 = vmul.f32 %v13605_v2, %v7815_v11 }
 0x942   : > { %v7822_v37 = vmul.f32 %v7821_v22, %v7812_v19  ;;  %v7830_v62 = vmul.f32 %v13605_v2, %v7829_v63 }
 0x944   : > { %v7824_v8 = vsel %vm7823_vm10, %v7812_v19, %v7822_v37  ;;  %v7831_v30 = vmul.f32 0.5, %v7830_v62  ;;  %v13283_v37 = vld [vmem:[#allocation17 + $0xb8] sm:$0xff] }
 0x945   : > { %v7827_v24 = vsel %vm7825_vm11, %v7826_v35, %v7824_v8  ;;  %v13291_v62 = vld [vmem:[#allocation17 + $0xf8] sm:$0xff]  ;;  %8661 = vmatpush.bf16.msra.mxu2 %v13283_v37  ;;  %v13306_v37 = vld [vmem:[#allocation17 + $0x170] sm:$0xff] }
 0x946   : > { %v7840_v18 = vmax.f32 %v7827_v24, 1e-12  ;;  %v7832_v1 = vsub.f32 1.5, %v7831_v30  ;;  %v13267_v35 = vld [vmem:[#allocation17 + $0x38] sm:$0xff]  ;;  %8674 = vmatpush.bf16.msra.mxu3 %v13291_v62  ;;  %v13266_v30 = vld [vmem:[#allocation17 + $0x30] sm:$0xff] }
 0x947   : > { %v13275_v8 = vld [vmem:[#allocation17 + $0x78] sm:$0xff]  ;;  %8783 = vmatpush.bf16.msrb.mxu0 %v13267_v35  ;;  %v13274_v24 = vld [vmem:[#allocation17 + $0x70] sm:$0xff] }
 0x948   : > { %13606 = vrcp.f32 %v7840_v18  ;;  %v7833_v53 = vmul.f32 %v13605_v2, %v7832_v1  ;;  %v7853_v28 = vand.u32 2147483648, %v7840_v18  ;;  %v7851_v61 = vand.u32 2147483647, %v7840_v18  ;;  %8796 = vmatpush.bf16.msrb.mxu1 %v13275_v8  ;;  %v13289_v1 = vld [vmem:[#allocation17 + $0xe8] sm:$0xff]  ;;  %v13314_v62 = vld [vmem:[#allocation17 + $0x1b0] sm:$0xff] }
 0x949   : > { %vm7847_vm0 = vweird.f32 %v7840_v18  ;;  %v13322_v35 = vld [vmem:[#allocation17 + $0x1f0] sm:$0xff] }
 0x94a   : > { %v7834_v50 = vmul.f32 %v7833_v53, %v7815_v11  ;;  %v7854_v26 = vor.u32 1.1754944e-38, %v7853_v28  ;;  %vm7852_vm2 = vcmp.eq.f32.partialorder %v7851_v61, 8.507059e+37  ;;  %v13265_v53 = vld [vmem:[#allocation17 + $0x28] sm:$0xff]  ;;  %v13279_v28 = vld [vmem:[#allocation17 + $0x98] sm:$0xff] }
 0x94b   : > { %8784 = vmatpush.bf16.msrb.mxu0 %v13266_v30  ;;  %v13263_v61 = vld [vmem:[#allocation17 + $0x18] sm:$0xff]  ;;  %v13305_v30 = vld [vmem:[#allocation17 + $0x168] sm:$0xff] }
 0x94c   : > { %v7836_v56 = vsel %vm7835_vm13, %v7815_v11, %v7834_v50  ;;  %vm16740_vm13 = vcmp.eq.s32.totalorder %v16644_v46, %v16646_v38  ;;  %v13282_v46 = vld [vmem:[#allocation17 + $0xb0] sm:$0xff]  ;;  %8797 = vmatpush.bf16.msrb.mxu1 %v13274_v24  ;;  %v13273_v50 = vld [vmem:[#allocation17 + $0x68] sm:$0xff] }
 0x94d   : > { %v7839_v58 = vsel %vm7837_vm14, %v7838_v49, %v7836_v56  ;;  %vm7886_vm14 = vcmask 27648   ;;  %v13290_v38 = vld [vmem:[#allocation17 + $0xf0] sm:$0xff]  ;;  %8662 = vmatpush.bf16.msra.mxu2 %v13282_v46  ;;  %v13280_v49 = vld [vmem:[#allocation17 + $0xa0] sm:$0xff]  ;;  %v13313_v24 = vld [vmem:[#allocation17 + $0x1a8] sm:$0xff] }
 0x94e   : > { %v13607_v4 = vpop.eup %13606  ;;  %v7841_v42 = vmax.f32 %v7839_v58, 1e-12  ;;  %8675 = vmatpush.bf16.msra.mxu3 %v13290_v38  ;;  %v13288_v56 = vld [vmem:[#allocation17 + $0xe0] sm:$0xff]  ;;  %v13297_v38 = vld [vmem:[#allocation17 + $0x128] sm:$0xff] }
 0x94f   : > { %v7843_v15 = vmul.f32 %v13607_v4, %v7840_v18  ;;  %vm7848_vm15 = vweird.f32 %v13607_v4  ;;  %v13281_v18 = vld [vmem:[#allocation17 + $0xa8] sm:$0xff]  ;;  %8785 = vmatpush.bf16.msrb.mxu0 %v13265_v53  ;;  %v13264_v58 = vld [vmem:[#allocation17 + $0x20] sm:$0xff] }
 0x950   : > { %13608 = vrcp.f32 %v7841_v42  ;;  %vm7849_vm1 = vmor %vm7847_vm0, %vm7848_vm15  ;;  %v7868_v29 = vand.u32 2147483648, %v7841_v42  ;;  %v7866_v54 = vand.u32 2147483647, %v7841_v42  ;;  %vm7862_vm9 = vweird.f32 %v7841_v42  ;;  %8798 = vmatpush.bf16.msrb.mxu1 %v13273_v50  ;;  %v13296_v53 = vld [vmem:[#allocation17 + $0x120] sm:$0xff] }
 0x951   : > { %v7844_v47 = vsub.f32 1.0, %v7843_v15  ;;  %8663 = vmatpush.bf16.msra.mxu2 %v13281_v18  ;;  %v13304_v50 = vld [vmem:[#allocation17 + $0x160] sm:$0xff]  ;;  %vm17727_vm15 = vcmp.eq.f32.partialorder %v16695_v31, 0.0  ;;  %vm17729_vm0 = vcmp.eq.f32.partialorder %v16689_v43, 2.0 }
 0x952   : > { %v7869_v40 = vor.u32 1.1754944e-38, %v7868_v29  ;;  %vm7867_vm11 = vcmp.eq.f32.partialorder %v7866_v54, 8.507059e+37  ;;  %8676 = vmatpush.bf16.msra.mxu3 %v13289_v1  ;;  %v13277_v29 = vld [vmem:[#allocation17 + $0x88] sm:$0xff] }
 0x953   : > { %v7845_v33 = vmul.f32 %v13607_v4, %v7844_v47  ;;  %8786 = vmatpush.bf16.msrb.mxu0 %v13264_v58  ;;  %v13261_v54 = vld [vmem:[#allocation17 + $0x8] sm:$0xff]  ;;  %v13295_v58 = vld [vmem:[#allocation17 + $0x118] sm:$0xff] }
 0x954   : > { %v13321_v1 = vld [vmem:[#allocation17 + $0x1e8] sm:$0xff] }
 0x955   : > { %v7846_v5 = vadd.f32 %v13607_v4, %v7845_v33  ;;  %8664 = vmatpush.bf16.msra.mxu2 %v13280_v49  ;;  %v13287_v33 = vld [vmem:[#allocation17 + $0xd8] sm:$0xff]  ;;  %v13312_v49 = vld [vmem:[#allocation17 + $0x1a0] sm:$0xff] }
 0x956   : > { %v13609_v27 = vpop.eup %13608  ;;  %8677 = vmatpush.bf16.msra.mxu3 %v13288_v56  ;;  %v13320_v56 = vld [vmem:[#allocation17 + $0x1e0] sm:$0xff] }
 0x957   : > { %v7850_v45 = vsel %vm7849_vm1, %v13607_v4, %v7846_v5  ;;  %v7858_v34 = vmul.f32 %v13609_v27, %v7841_v42  ;;  %vm7863_vm4 = vweird.f32 %v13609_v27  ;;  %v13272_v42 = vld [vmem:[#allocation17 + $0x60] sm:$0xff]  ;;  %v13271_v5 = vld [vmem:[#allocation17 + $0x58] sm:$0xff]  ;;  %8787 = vmatpush.bf16.msrb.mxu0 %v13263_v61  ;;  %v13302_v61 = vld [vmem:[#allocation17 + $0x150] sm:$0xff]  ;;  %vm17726_vm1 = vcmp.eq.f32.partialorder %v16695_v31, 2.0 }
 0x958   : > { %v7855_v12 = vsel %vm7852_vm2, %v7854_v26, %v7850_v45  ;;  %vm7864_vm10 = vmor %vm7862_vm9, %vm7863_vm4  ;;  %8799 = vmatpush.bf16.msrb.mxu1 %v13272_v42  ;;  %v13286_v26 = vld [vmem:[#allocation17 + $0xd0] sm:$0xff]  ;;  %v13311_v42 = vld [vmem:[#allocation17 + $0x198] sm:$0xff]  ;;  %vm17721_vm4 = vcmp.eq.f32.partialorder %v16687_v9, 0.0 }
 0x959   : > { %v7856_v55 = vmul.f32 %v7855_v12, %v16718_v23  ;;  %v7859_v48 = vsub.f32 1.0, %v7858_v34  ;;  %8665 = vmatpush.bf16.msra.mxu2 %v13279_v28  ;;  %v13262_v45 = vld [vmem:[#allocation17 + $0x10] sm:$0xff]  ;;  %v14126_v28 = vmov 839922192   ;;  %vm16785_vm2 = vmand %vm17727_vm15, %vm17729_vm0 }
 0x95a   : > { %8678 = vmatpush.bf16.msra.mxu3 %v13287_v33  ;;  %v13270_v12 = vld [vmem:[#allocation17 + $0x50] sm:$0xff]  ;;  %v8473_v33 = vunpack.c.l.s4 %v14126_v28 }
 0x95b   : > { %7985 = vrot.lane.b32.xlu2 %v7856_v55, %s14123_s0  ;;  %7882 = vrot.lane.b32.xlu1 %v7856_v55, %s14124_s29  ;;  %v7860_v44 = vmul.f32 %v13609_v27, %v7859_v48  ;;  %v8177_v36 = vrot.slane %v7856_v55, 4  ;;  %v7872_v32 = vsel %vm17720_vm6, %v7856_v55, 0.0  ;;  %vm16835_vm6 = vmor %vm17727_vm15, %vm17726_vm1 }
 0x95c   : > { %v7874_v57 = vsel %vm17722_vm7, %v7872_v32, 0.0  ;;  %8800 = vmatpush.bf16.msrb.mxu1 %v13271_v5  ;;  %8788 = vmatpush.bf16.msrb.mxu0 %v13262_v45  ;;  %v13307_v32 = vld [vmem:[#allocation17 + $0x178] sm:$0xff]  ;;  %v13310_v5 = vld [vmem:[#allocation17 + $0x190] sm:$0xff]  ;;  %v8474_v45 = vunpack.c.0.s8 %v8473_v33 }
 0x95d   : > { %v7861_v39 = vadd.f32 %v13609_v27, %v7860_v44  ;;  %v13285_v44 = vld [vmem:[#allocation17 + $0xc8] sm:$0xff] }
 0x95e   : > { %8679 = vmatpush.bf16.msra.mxu3 %v13286_v26  ;;  %v13293_v26 = vld [vmem:[#allocation17 + $0x108] sm:$0xff] }
 0x95f   : > { %v7865_v19 = vsel %vm7864_vm10, %v13609_v27, %v7861_v39  ;;  %v13278_v27 = vld [vmem:[#allocation17 + $0x90] sm:$0xff]  ;;  %v13269_v39 = vld [vmem:[#allocation17 + $0x48] sm:$0xff]  ;;  %vm17724_vm10 = vcmp.eq.f32.partialorder %v16687_v9, 2.0 }
 0x960   : > { %v7870_v60 = vsel %vm7867_vm11, %v7869_v40, %v7865_v19  ;;  %8666 = vmatpush.bf16.msra.mxu2 %v13278_v27  ;;  %8801 = vmatpush.bf16.msrb.mxu1 %v13270_v12  ;;  %v13276_v40 = vld [vmem:[#allocation17 + $0x80] sm:$0xff]  ;;  %v13318_v27 = vld [vmem:[#allocation17 + $0x1d0] sm:$0xff]  ;;  %v13309_v12 = vld [vmem:[#allocation17 + $0x188] sm:$0xff] }
 0x961   : > { %v7871_v6 = vmul.f32 %v7870_v60, %v16723_v51  ;;  %8789 = vmatpush.bf16.msrb.mxu0 %v13261_v54  ;;  %v13284_v19 = vld [vmem:[#allocation17 + $0xc0] sm:$0xff] }
 0x962   : > { %8680 = vmatpush.bf16.msra.mxu3 %v13285_v44  ;;  %v13260_v60 = vld [vmem:[#allocation17] sm:$0xff] }
 0x963   : > { %8081 = vrot.lane.b32.xlu1 %v7856_v55, %s14125_s5  ;;  %v7873_v23 = vsel %vm17723_vm8, %v7871_v6, 0.0 }
 0x964   : > { %v7877_v11 = vsel %vm17722_vm7, %v7873_v23, 0.0  ;;  %8667 = vmatpush.bf16.msra.mxu2 %v13277_v29  ;;  %8802 = vmatpush.bf16.msrb.mxu1 %v13269_v39  ;;  %v13268_v23 = vld [vmem:[#allocation17 + $0x40] sm:$0xff]  ;;  %v14127_v29 = vmov 1985246804  }
 0x965   : > { %7878 = vadd.xlane.f32.xlu0 %v7877_v11  ;;  %v13299_v11 = vld [vmem:[#allocation17 + $0x138] sm:$0xff]  ;;  %8790 = vmatpush.bf16.msrb.mxu0 %v13260_v60  ;;  %v8520_v44 = vunpack.c.l.s4 %v14127_v29  ;;  %v13292_v39 = vld [vmem:[#allocation17 + $0x100] sm:$0xff] }
 0x966   : > { %8681 = vmatpush.bf16.msra.mxu3 %v13284_v19  ;;  %v13300_v19 = vld [vmem:[#allocation17 + $0x140] sm:$0xff] }
 0x967   : > { %v13308_v60 = vld [vmem:[#allocation17 + $0x180] sm:$0xff] }
 0x968   : > { %8668 = vmatpush.bf16.msra.mxu2 %v13276_v40  ;;  %8803 = vmatpush.bf16.msrb.mxu1 %v13268_v23  ;;  %v8521_v23 = vunpack.c.0.s8 %v8520_v44 }
 0x96a   : > { %8966 = vmatpush.bf16.msrb.mxu3 %v13307_v32 }
 0x96b   : > { %8178 = vrot.lane.b32.xlu1 %v8177_v36, %s14123_s0 }
 0x96c   : > { %8953 = vmatpush.bf16.msrb.mxu2 %v13299_v11 }
 0x96e   : > { %8967 = vmatpush.bf16.msrb.mxu3 %v13306_v37 }
 0x972   : > { %8968 = vmatpush.bf16.msrb.mxu3 %v13305_v30 }
 0x973   : > { %8365 = vrot.lane.b32.xlu1 %v7871_v6, %s14125_s5 }
 0x976   : > { %8969 = vmatpush.bf16.msrb.mxu3 %v13304_v50 }
 0x984   : > { %7875 = vadd.xlane.f32.xlu2 %v7874_v57  ;;  %v13315_v57 = vld [vmem:[#allocation17 + $0x1b8] sm:$0xff] }
 0x985   : > { %9123 = vmatpush.bf16.msra.mxu0 %v13315_v57 }
 0x989   : > { %9124 = vmatpush.bf16.msra.mxu0 %v13314_v62 }
 0x98d   : > { %9125 = vmatpush.bf16.msra.mxu0 %v13313_v24  ;;  %v14128_v24 = vmov 0  }
 0x98e   : > { %13581 = vset.pattern.permute.xlu1 %v14128_v24  ;;  %13580 = vset.pattern.permute.xlu0 %v14128_v24 }
 0x98f   : > { %13582 = vset.pattern.permute.xlu2 %v14128_v24 }
 0x991   : > { %9126 = vmatpush.bf16.msra.mxu0 %v13312_v49 }
 0x995   : > { %9127 = vmatpush.bf16.msra.mxu0 %v13311_v42 }
 0x999   : > { %9128 = vmatpush.bf16.msra.mxu0 %v13310_v5 }
 0x99c   : > { %8271 = vrot.lane.b32.xlu2 %v8177_v36, %s14125_s5 }
 0x99d   : > { %9129 = vmatpush.bf16.msra.mxu0 %v13309_v12 }
 0x9a1   : > { %9130 = vmatpush.bf16.msra.mxu0 %v13308_v60 }
 0x9b5   : > { %v7986_v2 = vpop.permute.xlu2 %7985 }
 0x9b6   : > { %v7988_v22 = vsel %vm16740_vm13, %v7986_v2, 0.0 }
 0x9b7   : > { %v7989_v63 = vsel %vm7886_vm14, %v7988_v22, 0.0  ;;  %v13323_v22 = vld [vmem:[#allocation17 + $0x1f8] sm:$0xff] }
 0x9b8   : > { %7990 = vadd.xlane.f32.xlu0 %v7989_v63  ;;  %v13298_v63 = vld [vmem:[#allocation17 + $0x130] sm:$0xff]  ;;  %9136 = vmatpush.bf16.msra.mxu1 %v13323_v22 }
 0x9b9   : > { %8954 = vmatpush.bf16.msrb.mxu2 %v13298_v63 }
 0x9bc   : > { %9137 = vmatpush.bf16.msra.mxu1 %v13322_v35 }
 0x9bd   : > { %8955 = vmatpush.bf16.msrb.mxu2 %v13297_v38 }
 0x9c0   : > { %9138 = vmatpush.bf16.msra.mxu1 %v13321_v1 }
 0x9c1   : > { %8956 = vmatpush.bf16.msrb.mxu2 %v13296_v53 }
 0x9c4   : > { %9139 = vmatpush.bf16.msra.mxu1 %v13320_v56 }
 0x9c5   : > { %8957 = vmatpush.bf16.msrb.mxu2 %v13295_v58 }
 0x9cd   : > { %v7883_v4 = vpop.permute.xlu1 %7882 }
 0x9ce   : > { %v7885_v15 = vsel %vm16740_vm13, %v7883_v4, 0.0  ;;  %v13303_v4 = vld [vmem:[#allocation17 + $0x158] sm:$0xff] }
 0x9cf   : > { %v7887_v47 = vsel %vm7886_vm14, %v7885_v15, 0.0  ;;  %v13319_v15 = vld [vmem:[#allocation17 + $0x1d8] sm:$0xff]  ;;  %8970 = vmatpush.bf16.msrb.mxu3 %v13303_v4 }
 0x9d0   : > { %7888 = vadd.xlane.f32.xlu2 %v7887_v47  ;;  %v13294_v47 = vld [vmem:[#allocation17 + $0x110] sm:$0xff]  ;;  %9140 = vmatpush.bf16.msra.mxu1 %v13319_v15 }
 0x9d1   : > { %8958 = vmatpush.bf16.msrb.mxu2 %v13294_v47 }
 0x9d3   : > { %8971 = vmatpush.bf16.msrb.mxu3 %v13302_v61 }
 0x9d4   : > { %9141 = vmatpush.bf16.msra.mxu1 %v13318_v27 }
 0x9d5   : > { %v8082_v34 = vpop.permute.xlu1 %8081  ;;  %8959 = vmatpush.bf16.msrb.mxu2 %v13293_v26 }
 0x9d6   : > { %v8084_v55 = vsel %vm16740_vm13, %v8082_v34, 0.0  ;;  %v13301_v34 = vld [vmem:[#allocation17 + $0x148] sm:$0xff] }
 0x9d7   : > { %v8085_v48 = vsel %vm7886_vm14, %v8084_v55, 0.0  ;;  %8972 = vmatpush.bf16.msrb.mxu3 %v13301_v34 }
 0x9d8   : > { %8086 = vadd.xlane.f32.xlu1 %v8085_v48  ;;  %v13317_v48 = vld [vmem:[#allocation17 + $0x1c8] sm:$0xff] }
 0x9d9   : > { %9142 = vmatpush.bf16.msra.mxu1 %v13317_v48  ;;  %8960 = vmatpush.bf16.msrb.mxu2 %v13292_v39 }
 0x9db   : > { %8973 = vmatpush.bf16.msrb.mxu3 %v13300_v19  ;;  %v7689_v19 = vmax.f32 %v16677_v17, 1e-12 }
 0x9dd   : > { %v8179_v6 = vpop.permute.xlu1 %8178 }
 0x9de   : > { %v8181_v36 = vsel %vm16740_vm13, %v8179_v6, 0.0  ;;  %v13316_v6 = vld [vmem:[#allocation17 + $0x1c0] sm:$0xff] }
 0x9df   : > { %v8182_v2 = vsel %vm7886_vm14, %v8181_v36, 0.0  ;;  %9143 = vmatpush.bf16.msra.mxu1 %v13316_v6 }
 0x9e0   : > { %8183 = vadd.xlane.f32.xlu2 %v8182_v2  ;;  %v7879_v2 = vpop.xlane.xlu0 %7878 }
 0x9e1   : > { %v8814_v35 = vperm.slane %v7879_v2, %v8474_v45 }
 0x9e5   : > { %v8366_v8 = vpop.permute.xlu1 %8365 }
 0x9e6   : > { %v8368_v46 = vsel %vm16740_vm13, %v8366_v8, 0.0  ;;  %v8816_v8 = vmul.f32 %v8814_v35, %v16634_v52 }
 0x9e7   : > { %v8369_v18 = vsel %vm7886_vm14, %v8368_v46, 0.0 }
 0x9e8   : > { %8370 = vadd.xlane.f32.xlu1 %v8369_v18 }
 0x9f7   : > { %v7876_v55 = vpop.xlane.xlu2 %7875 }
 0x9f8   : > { %v8475_v54 = vperm.slane %v7876_v55, %v8474_v45  ;;  %v8522_v11 = vperm.slane %v7876_v55, %v8521_v23 }
 0x9fa   : > { %v8477_v40 = vmul.f32 %v8475_v54, %v16628_v0  ;;  %v8524_v0 = vmul.f32 %v8522_v11, %v16631_v16  ;;  %v8984_v16 = vperm.slane %v7879_v2, %v8521_v23  ;;  %v7687_v54 = vmax.f32 %v16675_v41, 1e-12 }
 0x9fc   : > { %8479 = vst [vmem:[#allocation1] ss:$2 sm:$0xff] %v8477_v40  ;;  %v8986_v18 = vmul.f32 %v8984_v16, %v16637_v14  ;;  %v7688_v40 = vmax.f32 %v16683_v7, 1e-12  ;;  %v7690_v60 = vmul.f32 %v7689_v19, %v7687_v54 }
 0x9fe   : > { %v7691_v6 = vmul.f32 %v7689_v19, %v7688_v40  ;;  %13610 = vrcp.f32 %v7690_v60  ;;  %vm7697_vm11 = vweird.f32 %v7690_v60  ;;  %v7703_v16 = vand.u32 2147483648, %v7690_v60 }
 0x9ff   : > { %v8272_v36 = vpop.permute.xlu2 %8271 }
 0xa00   : > { %v8274_v32 = vsel %vm16740_vm13, %v8272_v36, 0.0  ;;  %13612 = vrcp.f32 %v7691_v6  ;;  %vm16807_vm13 = vmand %vm17721_vm4, %vm17729_vm0 }
 0xa01   : > { %v8275_v57 = vsel %vm7886_vm14, %v8274_v32, 0.0 }
 0xa02   : > { %8276 = vadd.xlane.f32.xlu0 %v8275_v57 }
 0xa03   : > { %v8480_v22 = vld.sshfl [vmem:[#allocation1] sm:$0xff pattern:$0x75316420]  ;;  %v8481_v63 = vld.sshfl [vmem:[#allocation1 + $0x8] sm:$0xff pattern:$0x75316420] }
 0xa04   : > { %v8484_v37 = vpack.c.bf16 %v8480_v22, %v8480_v22  ;;  %v8485_v62 = vpack.c.bf16 %v8481_v63, %v8481_v63  ;;  %8526 = vst [vmem:[#allocation1] ss:$2 sm:$0xff] %v8524_v0  ;;  %v13611_v36 = vpop.eup %13610 }
 0xa05   : > { %v7693_v7 = vmul.f32 %v13611_v36, %v7690_v60  ;;  %vm7698_vm4 = vweird.f32 %v13611_v36 }
 0xa06   : > { %8791 = vmatmul.bf16.vlgmr.msrb.gmra.mxu0 %v8484_v37  ;;  %8804 = vmatmul.bf16.vlgmr.msrb.gmra.mxu1 %v8485_v62  ;;  %v13613_v41 = vpop.eup %13612  ;;  %vm16823_vm8 = vmor %vm7697_vm11, %vm7698_vm4  ;;  %vm17944_vm11 = vcmp.eq.f32.partialorder %v16664_v3, %v16652_v25 }
 0xa07   : > { %v7708_v32 = vmul.f32 %v13613_v41, %v7691_v6  ;;  %v7694_v63 = vsub.f32 1.0, %v7693_v7  ;;  %vm7713_vm7 = vweird.f32 %v13613_v41  ;;  %v17957_v7 = vmov 0 }
 0xa09   : > { %v7709_v37 = vsub.f32 1.0, %v7708_v32  ;;  %v17959_v32 = vmov 0 }
 0xa0b   : > { %v8527_v46 = vld.sshfl [vmem:[#allocation1] sm:$0xff pattern:$0x75316420]  ;;  %v8528_v38 = vld.sshfl [vmem:[#allocation1 + $0x8] sm:$0xff pattern:$0x75316420] }
 0xa0c   : > { %v8531_v51 = vpack.c.bf16 %v8527_v46, %v8527_v46  ;;  %v8532_v30 = vpack.c.bf16 %v8528_v38, %v8528_v38  ;;  %8818 = vst [vmem:[#allocation1] ss:$2 sm:$0xff] %v8816_v8  ;;  %v7695_v46 = vmul.f32 %v13611_v36, %v7694_v63  ;;  %v7710_v38 = vmul.f32 %v13613_v41, %v7709_v37 }
 0xa0d   : > { %v17962_v63 = vmov 0 }
 0xa0e   : > { %8669 = vmatmul.bf16.vlgmr.msra.gmra.mxu2 %v8531_v51  ;;  %8682 = vmatmul.bf16.vlgmr.msra.gmra.mxu3 %v8532_v30  ;;  %v7696_v51 = vadd.f32 %v13611_v36, %v7695_v46  ;;  %v7711_v24 = vadd.f32 %v13613_v41, %v7710_v38  ;;  %v17987_v30 = vmov 0 }
 0xa13   : > { %v8819_v1 = vld.sshfl [vmem:[#allocation1] sm:$0xff pattern:$0x75316420]  ;;  %v8820_v53 = vld.sshfl [vmem:[#allocation1 + $0x8] sm:$0xff pattern:$0x75316420] }
 0xa14   : > { %8988 = vst [vmem:[#allocation1] ss:$2 sm:$0xff] %v8986_v18  ;;  %v8823_v52 = vpack.c.bf16 %v8819_v1, %v8819_v1  ;;  %v8824_v56 = vpack.c.bf16 %v8820_v53, %v8820_v53  ;;  %v7718_v1 = vand.u32 2147483648, %v7691_v6  ;;  %v7701_v53 = vand.u32 2147483647, %v7690_v60 }
 0xa15   : > { %v17996_v18 = vmov 0 }
 0xa1b   : > { %v8989_v50 = vld.sshfl [vmem:[#allocation1] sm:$0xff pattern:$0x75316420]  ;;  %v8990_v49 = vld.sshfl [vmem:[#allocation1 + $0x8] sm:$0xff pattern:$0x75316420] }
 0xa1c   : > { %v8993_v58 = vpack.c.bf16 %v8989_v50, %v8989_v50  ;;  %v8994_v4 = vpack.c.bf16 %v8990_v49, %v8990_v49  ;;  %v7716_v50 = vand.u32 2147483647, %v7691_v6  ;;  %v17939_v49 = vmov 0 }
 0xa1d   : > { %v17940_v49 = vsel %vm16835_vm6, 4294967295, %v17939_v49 }
 0xa1e   : > { %8961 = vmatmul.bf16.vlgmr.msrb.gmra.mxu2 %v8823_v52  ;;  %8974 = vmatmul.bf16.vlgmr.msrb.gmra.mxu3 %v8824_v56  ;;  %vm7717_vm15 = vcmp.eq.f32.partialorder %v7716_v50, 8.507059e+37 }
 0xa1f   : > { %9131 = vmatmul.bf16.vlgmr.msra.gmra.mxu0 %v8993_v58  ;;  %9144 = vmatmul.bf16.vlgmr.msra.gmra.mxu1 %v8994_v4  ;;  %v17942_v58 = vmov 0  ;;  %v7700_v4 = vsel %vm16823_vm8, %v13611_v36, %v7696_v51 }
 0xa2b   : > { %v7991_v42 = vpop.xlane.xlu0 %7990 }
 0xa2c   : > { %v7993_v15 = vrot.slane %v7991_v42, 4 }
 0xa2e   : > { %v7995_v47 = vsel %vm7560_vm5, %v7991_v42, %v7993_v15  ;;  %v17945_v15 = vmov 0 }
 0xa2f   : > { %7998 = vperm.xlu1 %13581, %v7995_v47  }
 0xa43   : > { %v7889_v28 = vpop.xlane.xlu2 %7888 }
 0xa44   : > { %v7891_v14 = vrot.slane %v7889_v28, 4 }
 0xa46   : > { %v7893_v33 = vsel %vm7560_vm5, %v7889_v28, %v7891_v14  ;;  %v7704_v28 = vor.u32 1.1754944e-38, %v7703_v16  ;;  %v7719_v14 = vor.u32 1.1754944e-38, %v7718_v1 }
 0xa47   : > { %7896 = vperm.xlu0 %13580, %v7893_v33  }
 0xa4b   : > { %v8087_v61 = vpop.xlane.xlu1 %8086 }
 0xa4c   : > { %v8089_v5 = vrot.slane %v8087_v61, 4 }
 0xa4e   : > { %v8091_v27 = vsel %vm7560_vm5, %v8087_v61, %v8089_v5 }
 0xa4f   : > { %8094 = vperm.xlu0 %13580, %v8091_v27  }
 0xa53   : > { %v8184_v26 = vpop.xlane.xlu2 %8183 }
 0xa54   : > { %v8186_v45 = vrot.slane %v8184_v26, 4 }
 0xa56   : > { %v8188_v34 = vsel %vm7560_vm5, %v8184_v26, %v8186_v45 }
 0xa57   : > { %8191 = vperm.xlu2 %13582, %v8188_v34  }
 0xa5b   : > { %v8371_v12 = vpop.xlane.xlu1 %8370 }
 0xa5c   : > { %v8373_v55 = vrot.slane %v8371_v12, 4 }
 0xa5e   : > { %v8375_v48 = vsel %vm7560_vm5, %v8371_v12, %v8373_v55 }
 0xa5f   : > { %8378 = vperm.xlu0 %13580, %v8375_v48  }
 0xa75   : > { %v8277_v29 = vpop.xlane.xlu0 %8276 }
 0xa76   : > { %v8279_v44 = vrot.slane %v8277_v29, 4 }
 0xa78   : > { %v8281_v39 = vsel %vm7560_vm5, %v8277_v29, %v8279_v44  ;;  %vm17725_vm5 = vcmp.eq.f32.partialorder %v16689_v43, 0.0 }
 0xa79   : > { %8284 = vperm.xlu1 %13581, %v8281_v39   ;;  %vm16794_vm9 = vmand %vm17726_vm1, %vm17725_vm5 }
 0xa7a   : > { %vm16815_vm14 = vmand %vm17724_vm10, %vm17725_vm5  ;;  %vm7712_vm10 = vweird.f32 %v7691_v6 }
 0xa7b   : > { %vm16827_vm5 = vmor %vm7712_vm10, %vm7713_vm7  ;;  %vm17941_vm7 = vcmp.eq.f32.partialorder %v16689_v43, 0.0  ;;  %vm17730_vm10 = vmmov 1  }
 0xa7c   : > { %vm16843_vm4 = vmor %vm17941_vm7, %vm17729_vm0  ;;  %v7715_v42 = vsel %vm16827_vm5, %v13613_v41, %v7711_v24  ;;  %vm7702_vm7 = vcmp.eq.f32.partialorder %v7701_v53, 8.507059e+37  ;;  %v13583_v41 = vld [vmem:[#allocation18] ss:$0 sm:$0xff]  ;;  %v17991_v24 = vmov 0 }
 0xa7d   : > { %v17943_v58 = vsel %vm16843_vm4, 4294967295, %v17942_v58  ;;  %vm16855_vm1 = vmxor %vm17944_vm11, %vm17730_vm10  ;;  %v7705_v5 = vsel %vm7702_vm7, %v7704_v28, %v7700_v4  ;;  %v7720_v27 = vsel %vm7717_vm15, %v7719_v14, %v7715_v42  ;;  %v18008_v4 = vmov 0 }
 0xa7e   : > { %v17946_v15 = vsel %vm16855_vm1, 4294967295, %v17945_v15  ;;  %vm8010_vm8 = vmand %vm16835_vm6, %vm16843_vm4  ;;  %v16870_v45 = vmul.f32 %v7705_v5, %v16657_v10  ;;  %v16873_v34 = vmul.f32 %v7720_v27, %v16668_v20  ;;  %vm17969_vm6 = vcmp.eq.f32.partialorder %v16649_v13, %v16652_v25 }
 0xa7f   : > { %vm16865_vm5 = vmand %vm8010_vm8, %vm16855_vm1  ;;  %v17978_v13 = vmov 0  ;;  %v18011_v28 = vmov 0 }
 0xa80   : > { %vm17949_vm11 = vmor %vm16785_vm2, %vm16794_vm9  ;;  %vm17728_vm2 = vcmp.eq.f32.partialorder %v16687_v9, 1.0  ;;  %vm17735_vm9 = vcmp.eq.f32.partialorder %v16689_v43, 1.0 }
 0xa81   : > { %vm16882_vm15 = vmand %vm16708_vm12, %vm17949_vm11 }
 0xa82   : > { %vm17952_vm7 = vmor %vm16807_vm13, %vm16815_vm14  ;;  %vm17955_vm13 = vcmask 130048   ;;  %vm17956_vm14 = vcmp.eq.f32.partialorder %v16687_v9, 2.0 }
 0xa83   : > { %v8792_v23 = vpop.f32.mrf.mxu0  ;;  %v16775_v11 = vpop.f32.mrf.mxu1  ;;  %vm16893_vm8 = vmand %vm16699_vm3, %vm17952_vm7 }
 0xa84   : > { %vm16931_vm11 = vmor %vm17735_vm9, %vm17729_vm0  ;;  %vm17965_vm0 = vcmp.eq.f32.partialorder %v16689_v43, 0.0 }
 0xa85   : > { %v17960_v32 = vsel %vm16931_vm11, 4294967295, %v17959_v32  ;;  %vm16955_vm10 = vmor %vm17965_vm0, %vm17735_vm9  ;;  %vm17972_vm0 = vcmp.eq.f32.partialorder %v16687_v9, 1.0  ;;  %vm17973_vm9 = vcmp.eq.f32.partialorder %v16687_v9, 0.0 }
 0xa8b   : > { %v8794_v0 = vpop.f32.mrf.mxu0  ;;  %v8807_v2 = vpop.f32.mrf.mxu1 }
 0xa91   : > { %v8670_v35 = vpop.f32.mrf.mxu2  ;;  %v8683_v8 = vpop.f32.mrf.mxu3 }
 0xa92   : > { %v8684_v47 = vadd.f32 %v8683_v8, %v8670_v35  ;;  %v17974_v35 = vmov 0 }
 0xa94   : > { %v8793_v26 = vadd.f32 %v8792_v23, %v8684_v47 }
 0xa96   : > { %v8806_v54 = vadd.f32 %v16775_v11, %v8793_v26 }
 0xa99   : > { %v8672_v52 = vpop.f32.mrf.mxu2  ;;  %v8685_v56 = vpop.f32.mrf.mxu3 }
 0xa9c   : > { %v9132_v33 = vpop.f32.mrf.mxu0  ;;  %v9145_v61 = vpop.f32.mrf.mxu1 }
 0xa9d   : > { %v9146_v36 = vadd.f32 %v9145_v61, %v9132_v33  ;;  %v18088_v61 = vmov 0 }
 0xaa1   : > { %v7999_v55 = vpop.permute.xlu1 %7998  ;;  %v8962_v48 = vpop.f32.mrf.mxu2 }
 0xaa2   : > { %v16898_v20 = vmul.f32 %v7999_v55, %v16870_v45  ;;  %v16901_v29 = vmul.f32 %v7999_v55, %v16873_v34  ;;  %v8975_v44 = vpop.f32.mrf.mxu3 }
 0xaa3   : > { %v8976_v39 = vadd.f32 %v8975_v44, %v8962_v48  ;;  %v18035_v48 = vmov 0 }
 0xaa4   : > { %v9134_v40 = vpop.f32.mrf.mxu0  ;;  %v9147_v19 = vpop.f32.mrf.mxu1  ;;  %v16909_v60 = vsel %vm16865_vm5, %v16901_v29, -1e+30  ;;  %v8048_v6 = vsel %vm16882_vm15, %v16901_v29, 0.0  ;;  %v8047_v23 = vsel %vm16893_vm8, %v16898_v20, 0.0  ;;  %vm16923_vm5 = vmor %vm17728_vm2, %vm17956_vm14  ;;  %vm17961_vm14 = vcmp.eq.f32.partialorder %v16695_v31, 0.0 }
 0xaa5   : > { %v8979_v11 = vadd.f32 %v8976_v39, %v8806_v54  ;;  %v8026_v17 = vsel %vm17955_vm13, %v16909_v60, -inf  ;;  %v17958_v7 = vsel %vm16923_vm5, 4294967295, %v17957_v7  ;;  %vm8199_vm7 = vmand %vm16923_vm5, %vm16931_vm11  ;;  %vm17733_vm13 = vcmp.eq.f32.partialorder %v16695_v31, 1.0 }
 0xaa6   : > { %8027 = vmax.xlane.f32.xlu1 %v8026_v17  ;;  %vm16944_vm2 = vmor %vm17961_vm14, %vm17733_vm13  ;;  %vm17968_vm5 = vmmov 1   ;;  %vm17999_vm11 = vcmp.eq.f32.partialorder %v16687_v9, 1.0  ;;  %v18042_v19 = vmov 0 }
 0xaa7   : > { %v9149_v57 = vadd.f32 %v9146_v36, %v8979_v11  ;;  %v17963_v63 = vsel %vm16944_vm2, 4294967295, %v17962_v63  ;;  %vm16963_vm14 = vmxor %vm17969_vm6, %vm17968_vm5  ;;  %vm17976_vm6 = vcmp.eq.f32.partialorder %v16695_v31, 2.0  ;;  %vm17977_vm5 = vcmp.eq.f32.partialorder %v16695_v31, 1.0 }
 0xaa8   : > { %vm8201_vm13 = vmand %vm8199_vm7, %vm16963_vm14  ;;  %v18046_v36 = vmov 0  ;;  %v18050_v11 = vmov 0 }
 0xaa9   : > { %v9154_v0 = vadd.f32 %v13583_v41, %v9149_v57  ;;  %v8964_v2 = vpop.f32.mrf.mxu2  ;;  %vm7911_vm8 = vmand %vm16944_vm2, %vm16955_vm10  ;;  %vm17983_vm2 = vcmp.eq.f32.partialorder %v16687_v9, 0.0  ;;  %v18054_v41 = vmov 0 }
 0xaaa   : > { %v8977_v22 = vpop.f32.mrf.mxu3  ;;  %vm16977_vm15 = vmor %vm17973_vm9, %vm17972_vm0  ;;  %vm17744_vm9 = vcmp.eq.f32.partialorder %v16687_v9, 3.0 }
 0xaab   : > { %9155 = vst [vmem:[%s17964_s20] sm:$0xf] %v9154_v0  ;;  %v17975_v35 = vsel %vm16977_vm15, 4294967295, %v17974_v35  ;;  %vm16985_vm12 = vmor %vm17977_vm5, %vm17976_vm6  ;;  %vm17982_vm5 = vcmp.eq.f32.partialorder %v16689_v43, 1.0 }
 0xaac   : > { %v17979_v13 = vsel %vm16985_vm12, 4294967295, %v17978_v13  ;;  %vm16991_vm7 = vmand %vm7911_vm8, %vm16855_vm1 }
 0xaad   : > { %vm7910_vm0 = vmand %vm16977_vm15, %vm16955_vm10 }
 0xaae   : > { %vm17008_vm8 = vmand %vm17983_vm2, %vm17982_vm5 }
 0xaaf   : > { %vm17986_vm4 = vmmov %vm17983_vm2  ;;  %vm17989_vm2 = vcmp.eq.f32.partialorder %v16687_v9, 2.0 }
 0xab0   : > { %vm17019_vm1 = vmor %vm17986_vm4, %vm17744_vm9  ;;  %vm17995_vm9 = vcmp.eq.f32.partialorder %v16689_v43, 0.0 }
 0xab1   : > { %v8192_v25 = vpop.permute.xlu2 %8191  ;;  %v17988_v30 = vsel %vm17019_vm1, 4294967295, %v17987_v30  ;;  %vm17990_vm5 = vmmov %vm17986_vm4  ;;  %vm17994_vm4 = vcmp.eq.f32.partialorder %v16689_v43, 3.0 }
 0xab2   : > { %v16997_v46 = vmul.f32 %v8192_v25, %v16870_v45  ;;  %vm17031_vm6 = vmor %vm17990_vm5, %vm17989_vm2  ;;  %v17174_v40 = vmul.f32 %v8192_v25, %v16873_v34 }
 0xab3   : > { %v17992_v24 = vsel %vm17031_vm6, 4294967295, %v17991_v24  ;;  %vm17041_vm15 = vmor %vm17995_vm9, %vm17994_vm4  ;;  %vm17751_vm4 = vcmp.eq.f32.partialorder %v16695_v31, 3.0 }
 0xab4   : > { %v17013_v51 = vsel %vm8201_vm13, %v16997_v46, -1e+30  ;;  %vm17993_vm13 = vcmask 130048   ;;  %v17997_v18 = vsel %vm17041_vm15, 4294967295, %v17996_v18  ;;  %vm17998_vm10 = vmmov %vm17995_vm9  ;;  %vm18006_vm9 = vcmp.eq.f32.partialorder %v16689_v43, 3.0 }
 0xab5   : > { %v8213_v16 = vsel %vm17993_vm13, %v17013_v51, -inf  ;;  %vm17049_vm2 = vmand %vm17999_vm11, %vm17998_vm10  ;;  %vm18002_vm11 = vcmp.eq.f32.partialorder %v16689_v43, 1.0  ;;  %vm18010_vm13 = vcmp.eq.f32.partialorder %v16689_v43, 0.0 }
 0xab6   : > { %8214 = vmax.xlane.f32.xlu1 %v8213_v16  ;;  %vm7914_vm5 = vmand %vm7910_vm0, %vm16963_vm14  ;;  %vm18003_vm0 = vcmp.eq.f32.partialorder %v16695_v31, 0.0 }
 0xab7   : > { %vm17070_vm10 = vmand %vm18003_vm0, %vm18002_vm11 }
 0xab8   : > { %vm18007_vm15 = vmmov %vm18003_vm0  ;;  %vm18013_vm0 = vcmask 130048  }
 0xab9   : > { %v7897_v53 = vpop.permute.xlu0 %7896  ;;  %vm17078_vm1 = vmand %vm18007_vm15, %vm18006_vm9  ;;  %vm18016_vm9 = vcmp.eq.f32.partialorder %v16695_v31, 1.0 }
 0xaba   : > { %v7899_v50 = vmul.f32 %v7897_v53, %v16870_v45  ;;  %v7900_v52 = vmul.f32 %v7897_v53, %v16873_v34  ;;  %v18009_v4 = vsel %vm17078_vm1, 4294967295, %v18008_v4  ;;  %vm17092_vm11 = vmand %vm17751_vm4, %vm18010_vm13  ;;  %vm18021_vm4 = vnez %v17960_v32 }
 0xabb   : > { %v18012_v28 = vsel %vm17092_vm11, 4294967295, %v18011_v28  ;;  %vm18014_vm15 = vmmov %vm18013_vm0 }
 0xabc   : > { %v17084_v42 = vsel %vm16991_vm7, %v7900_v52, -1e+30  ;;  %v17086_v47 = vsel %vm7914_vm5, %v7899_v50, -1e+30  ;;  %vm18015_vm5 = vmmov %vm18010_vm13  ;;  %vm18020_vm7 = vnez %v17946_v15 }
 0xabd   : > { %v7929_v14 = vsel %vm18013_vm0, %v17084_v42, -inf  ;;  %v7926_v33 = vsel %vm18014_vm15, %v17086_v47, -inf  ;;  %vm17108_vm13 = vmand %vm18016_vm9, %vm18015_vm5  ;;  %vm18025_vm5 = vnez %v17943_v58  ;;  %vm18030_vm9 = vcmp.eq.f32.partialorder %v16695_v31, 2.0 }
 0xabe   : > { %7930 = vmax.xlane.f32.xlu0 %v7929_v14  ;;  %7927 = vmax.xlane.f32.xlu2 %v7926_v33  ;;  %vm18019_vm0 = vmor %vm17008_vm8, %vm17049_vm2  ;;  %vm18026_vm8 = vnez %v17988_v30  ;;  %vm18027_vm2 = vnez %v17997_v18  ;;  %v18061_v58 = vmov 0 }
 0xabf   : > { %vm7922_vm15 = vmand %vm16699_vm3, %vm18019_vm0 }
 0xac0   : > { %vm18022_vm11 = vmand %vm16985_vm12, %vm18021_vm4  ;;  %v7950_v3 = vsel %vm7922_vm15, %v7899_v50, 0.0 }
 0xac1   : > { %vm17126_vm1 = vmand %vm18022_vm11, %vm18020_vm7  ;;  %v8095_v27 = vpop.permute.xlu0 %8094  ;;  %vm18029_vm11 = vcmp.eq.f32.partialorder %v16689_v43, 3.0 }
 0xac2   : > { %vm18028_vm0 = vmand %vm18026_vm8, %vm18027_vm2  ;;  %v8097_v26 = vmul.f32 %v8095_v27, %v16870_v45  ;;  %vm18033_vm8 = vcmp.eq.f32.partialorder %v16689_v43, 2.0  ;;  %vm18049_vm2 = vcmp.eq.f32.partialorder %v16689_v43, 2.0  ;;  %v17211_v17 = vsel %vm17126_vm1, %v17174_v40, -1e+30 }
 0xac3   : > { %vm8107_vm3 = vmand %vm18028_vm0, %vm16963_vm14  ;;  %vm18034_vm0 = vcmp.eq.f32.partialorder %v16695_v31, 3.0  ;;  %vm18063_vm1 = vcmp.eq.f32.partialorder %v16689_v43, 3.0 }
 0xac4   : > { %vm7921_vm4 = vmor %vm17070_vm10, %vm17108_vm13  ;;  %v17162_v44 = vsel %vm8107_vm3, %v8097_v26, -1e+30  ;;  %vm18037_vm13 = vcmask 130048   ;;  %vm18040_vm3 = vcmp.eq.f32.partialorder %v16689_v43, 3.0 }
 0xac5   : > { %vm17150_vm12 = vmand %vm18030_vm9, %vm18029_vm11  ;;  %v8119_v54 = vsel %vm18037_vm13, %v17162_v44, -inf  ;;  %vm18039_vm9 = vnez %v17924_v21 }
 0xac6   : > { %vm17158_vm7 = vmand %vm18034_vm0, %vm18033_vm8  ;;  %8120 = vmax.xlane.f32.xlu0 %v8119_v54  ;;  %vm18041_vm8 = vcmp.eq.f32.partialorder %v16687_v9, 0.0 }
 0xac7   : > { %v18036_v48 = vsel %vm17158_vm7, 4294967295, %v18035_v48  ;;  %vm18038_vm15 = vmmov %vm18037_vm13  ;;  %vm18044_vm13 = vcmp.eq.f32.partialorder %v16687_v9, 3.0 }
 0xac8   : > { %v7952_v39 = vsel %vm18038_vm15, %v7950_v3, 0.0  ;;  %vm7923_vm11 = vmand %vm18039_vm9, %vm7921_vm4  ;;  %vm18045_vm15 = vcmp.eq.f32.partialorder %v16687_v9, 2.0  ;;  %v18099_v3 = vmov 0 }
 0xac9   : > { %7953 = vadd.xlane.f32.xlu2 %v7952_v39  ;;  %vm17180_vm0 = vmand %vm18041_vm8, %vm18040_vm3  ;;  %v7951_v32 = vsel %vm7923_vm11, %v7900_v52, 0.0  ;;  %vm18057_vm11 = vcmask 130048   ;;  %v8098_v52 = vmul.f32 %v8095_v27, %v16873_v34 }
 0xaca   : > { %v18043_v19 = vsel %vm17180_vm0, 4294967295, %v18042_v19  ;;  %vm17188_vm10 = vmor %vm18045_vm15, %vm18044_vm13  ;;  %v8216_v57 = vsel %vm18057_vm11, %v17211_v17, -inf }
 0xacb   : > { %v18047_v36 = vsel %vm17188_vm10, 4294967295, %v18046_v36  ;;  %vm18048_vm4 = vmmov %vm18040_vm3  ;;  %vm18052_vm3 = vcmp.eq.f32.partialorder %v16689_v43, 0.0 }
 0xacc   : > { %vm17196_vm9 = vmor %vm18049_vm2, %vm18048_vm4 }
 0xacd   : > { %v18051_v11 = vsel %vm17196_vm9, 4294967295, %v18050_v11  ;;  %vm18053_vm8 = vmmov %vm18044_vm13 }
 0xace   : > { %vm17204_vm7 = vmand %vm18053_vm8, %vm18052_vm3  ;;  %vm18059_vm3 = vcmp.eq.f32.partialorder %v16695_v31, 3.0  ;;  %8217 = vmax.xlane.f32.xlu0 %v8216_v57 }
 0xacf   : > { %v18055_v41 = vsel %vm17204_vm7, 4294967295, %v18054_v41  ;;  %vm18056_vm2 = vmand %vm17031_vm6, %vm18025_vm5  ;;  %vm18060_vm5 = vcmp.eq.f32.partialorder %v16695_v31, 0.0  ;;  %vm18066_vm6 = vcmp.eq.f32.partialorder %v16687_v9, 3.0  ;;  %vm18069_vm7 = vnez %v17924_v21 }
 0xad0   : > { %vm8011_vm13 = vmand %vm18056_vm2, %vm16963_vm14 }
 0xad1   : > { %vm8386_vm15 = vmand %vm17188_vm10, %vm17196_vm9  ;;  %vm18064_vm10 = vcmp.eq.f32.partialorder %v16687_v9, 2.0  ;;  %v8379_v2 = vpop.permute.xlu0 %8378  ;;  %v17267_v8 = vsel %vm8011_vm13, %v16898_v20, -1e+30  ;;  %vm18076_vm13 = vcmask 130048  }
 0xad2   : > { %vm18058_vm4 = vmmov %vm18057_vm11  ;;  %v17261_v37 = vmul.f32 %v8379_v2, %v16870_v45  ;;  %v17264_v25 = vmul.f32 %v8379_v2, %v16873_v34 }
 0xad3   : > { %v7955_v0 = vsel %vm18058_vm4, %v7951_v32, 0.0  ;;  %vm17235_vm8 = vmor %vm18060_vm5, %vm18059_vm3  ;;  %vm18065_vm4 = vcmp.eq.f32.partialorder %v16689_v43, 2.0  ;;  %vm18067_vm3 = vnez %v18036_v48 }
 0xad4   : > { %v18062_v58 = vsel %vm17235_vm8, 4294967295, %v18061_v58  ;;  %7956 = vadd.xlane.f32.xlu2 %v7955_v0  ;;  %vm8388_vm2 = vmand %vm8386_vm15, %vm16963_vm14  ;;  %vm18073_vm15 = vnez %v17922_v59 }
 0xad5   : > { %vm8390_vm11 = vmand %vm18064_vm10, %vm18063_vm1  ;;  %v17274_v38 = vsel %vm8388_vm2, %v17261_v37, -1e+30  ;;  %vm18079_vm2 = vnez %v18055_v41 }
 0xad6   : > { %vm8392_vm9 = vmand %vm18066_vm6, %vm18065_vm4  ;;  %vm18072_vm6 = vnez %v17997_v18  ;;  %v8400_v18 = vsel %vm18076_vm13, %v17274_v38, -inf }
 0xad7   : > { %vm18068_vm5 = vmor %vm17150_vm12, %vm18067_vm3  ;;  %8401 = vmax.xlane.f32.xlu0 %v8400_v18 }
 0xad8   : > { %vm17256_vm0 = vmand %vm18069_vm7, %vm18068_vm5  ;;  %vm18081_vm5 = vnez %v17946_v15 }
 0xad9   : > { %vm8106_vm12 = vmand %vm17235_vm8, %vm18072_vm6  ;;  %v8425_v16 = vsel %vm17256_vm0, %v17264_v25, 0.0  ;;  %vm18086_vm8 = vcmp.eq.f32.partialorder %v16689_v43, 1.0 }
 0xada   : > { %vm8394_vm10 = vmor %vm8390_vm11, %vm8392_vm9  ;;  %vm18078_vm9 = vnez %v18043_v19 }
 0xadb   : > { %vm17281_vm1 = vmand %vm18073_vm15, %vm8394_vm10  ;;  %vm18082_vm10 = vcmp.eq.f32.partialorder %v16689_v43, 3.0 }
 0xadc   : > { %vm18077_vm4 = vmmov %vm18076_vm13  ;;  %v8424_v50 = vsel %vm17281_vm1, %v17261_v37, 0.0  ;;  %vm18083_vm13 = vcmp.eq.f32.partialorder %v16687_v9, 1.0 }
 0xadd   : > { %v8023_v53 = vsel %vm18077_vm4, %v17267_v8, -inf  ;;  %vm18080_vm11 = vmor %vm18078_vm9, %vm18079_vm2  ;;  %vm18087_vm9 = vcmp.eq.f32.partialorder %v16687_v9, 3.0 }
 0xade   : > { %8024 = vmax.xlane.f32.xlu2 %v8023_v53  ;;  %vm8115_vm3 = vmand %vm18073_vm15, %vm18080_vm11  ;;  %vm18090_vm11 = vcmask 130048   ;;  %vm18102_vm15 = vcmp.eq.f32.partialorder %v16687_v9, 3.0 }
 0xadf   : > { %vm8108_vm6 = vmand %vm8106_vm12, %vm18081_vm5  ;;  %v8143_v14 = vsel %vm8115_vm3, %v8097_v26, 0.0  ;;  %vm18092_vm3 = vcmp.eq.f32.partialorder %v16689_v43, 3.0 }
 0xae0   : > { %vm17306_vm4 = vmand %vm18083_vm13, %vm18082_vm10  ;;  %v17310_v33 = vsel %vm8108_vm6, %v8098_v52, -1e+30  ;;  %v8145_v5 = vsel %vm18090_vm11, %v8143_v14, 0.0  ;;  %vm18093_vm6 = vcmp.eq.f32.partialorder %v16695_v31, 1.0 }
 0xae1   : > { %vm17316_vm2 = vmand %vm18087_vm9, %vm18086_vm8  ;;  %8146 = vadd.xlane.f32.xlu0 %v8145_v5  ;;  %vm18096_vm9 = vcmp.eq.f32.partialorder %v16695_v31, 3.0 }
 0xae2   : > { %v18089_v61 = vsel %vm17316_vm2, 4294967295, %v18088_v61  ;;  %vm18091_vm10 = vmmov %vm18090_vm11 }
 0xae3   : > { %v8122_v27 = vsel %vm18091_vm10, %v17310_v33, -inf  ;;  %vm17331_vm13 = vmand %vm18093_vm6, %vm18092_vm3 }
 0xae4   : > { %vm8299_vm12 = vmand %vm18096_vm9, %vm18086_vm8 }
 0xae5   : > { %vm8301_vm11 = vmor %vm17331_vm13, %vm8299_vm12 }
 0xae6   : > { %8123 = vmax.xlane.f32.xlu2 %v8122_v27  ;;  %vm18097_vm10 = vmmov %vm18096_vm9 }
 0xae7   : > { %vm18098_vm1 = vmmov %vm18093_vm6 }
 0xae8   : > { %vm17345_vm0 = vmor %vm18098_vm1, %vm18097_vm10 }
 0xae9   : > { %v18100_v3 = vsel %vm17345_vm0, 4294967295, %v18099_v3  ;;  %vm18101_vm6 = vmmov %vm18086_vm8  ;;  %vm18103_vm8 = vcmp.eq.f32.partialorder %v16687_v9, 1.0 }
 0xaea   : > { %vm8291_vm7 = vmor %vm18101_vm6, %vm18092_vm3  ;;  %vm18110_vm6 = vnez %v18089_v61 }
 0xaeb   : > { %vm17357_vm9 = vmor %vm18103_vm8, %vm18102_vm15  ;;  %v8285_v39 = vpop.permute.xlu1 %8284 }
 0xaec   : > { %vm8293_vm12 = vmand %vm17345_vm0, %vm8291_vm7  ;;  %v17395_v62 = vmul.f32 %v8285_v39, %v16870_v45  ;;  %v17398_v41 = vmul.f32 %v8285_v39, %v16873_v34 }
 0xaed   : > { %vm8292_vm1 = vmand %vm17357_vm9, %vm8291_vm7  ;;  %vm18112_vm7 = vnez %v17922_v59 }
 0xaee   : > { %vm18106_vm13 = vmmov %vm18097_vm10  ;;  %vm18107_vm10 = vcmp.eq.f32.partialorder %v16695_v31, 2.0 }
 0xaef   : > { %vm17369_vm2 = vmor %vm18107_vm10, %vm18106_vm13  ;;  %vm18115_vm13 = vnez %v17924_v21 }
 0xaf0   : > { %vm8295_vm15 = vmand %vm8293_vm12, %vm18081_vm5 }
 0xaf1   : > { %vm8294_vm3 = vmand %vm8292_vm1, %vm16963_vm14  ;;  %v17401_v32 = vsel %vm8295_vm15, %v17398_v41, -1e+30  ;;  %vm18118_vm14 = vnez %v18051_v11 }
 0xaf2   : > { %vm18111_vm8 = vmor %vm17306_vm4, %vm18110_vm6  ;;  %v17404_v57 = vsel %vm8294_vm3, %v17395_v62, -1e+30 }
 0xaf3   : > { %vm17384_vm0 = vmand %vm18112_vm7, %vm18111_vm8 }
 0xaf4   : > { %vm17390_vm10 = vmand %vm18115_vm13, %vm8301_vm11  ;;  %v8330_v0 = vsel %vm17384_vm0, %v17395_v62, 0.0  ;;  %vm18119_vm11 = vcmask 130048   ;;  %vm18169_vm0 = vnez %v18047_v36 }
 0xaf5   : > { %vm8387_vm4 = vmand %vm17369_vm2, %vm18118_vm14  ;;  %v8331_v45 = vsel %vm17390_vm10, %v17398_v41, 0.0  ;;  %v8309_v34 = vsel %vm18119_vm11, %v17401_v32, -inf  ;;  %vm18160_vm10 = vnez %v17963_v63 }
 0xaf6   : > { %vm18120_vm12 = vmmov %vm18119_vm11  ;;  %8310 = vmax.xlane.f32.xlu1 %v8309_v34 }
 0xaf7   : > { %v8306_v2 = vsel %vm18120_vm12, %v17404_v57, -inf  ;;  %vm8389_vm1 = vmand %vm8387_vm4, %vm18081_vm5  ;;  %vm18126_vm5 = vnez %v18009_v4  ;;  %vm18127_vm4 = vnez %v18012_v28 }
 0xaf8   : > { %8307 = vmax.xlane.f32.xlu2 %v8306_v2  ;;  %v17423_v11 = vsel %vm8389_vm1, %v17264_v25, -1e+30  ;;  %vm18122_vm3 = vmmov %vm18119_vm11 }
 0xaf9   : > { %v8052_v18 = vsel %vm18122_vm3, %v8048_v6, 0.0  ;;  %vm18123_vm6 = vmmov %vm18122_vm3 }
 0xafa   : > { %v8403_v53 = vsel %vm18123_vm6, %v17423_v11, -inf  ;;  %vm18125_vm14 = vmmov %vm18122_vm3 }
 0xafb   : > { %v8049_v15 = vsel %vm18125_vm14, %v8047_v23, 0.0  ;;  %vm18128_vm11 = vmor %vm18126_vm5, %vm18127_vm4 }
 0xafc   : > { %vm8116_vm12 = vmand %vm18115_vm13, %vm18128_vm11 }
 0xafd   : > { %v8144_v12 = vsel %vm8116_vm12, %v8098_v52, 0.0  ;;  %vm18129_vm1 = vmmov %vm18122_vm3  ;;  %vm18138_vm12 = vcmp.eq.f32.partialorder %v16689_v43, 2.0 }
 0xafe   : > { %8053 = vadd.xlane.f32.xlu1 %v8052_v18  ;;  %v8148_v29 = vsel %vm18129_vm1, %v8144_v12, 0.0  ;;  %vm18130_vm15 = vmmov %vm18129_vm1 }
 0xaff   : > { %vm18131_vm3 = vmmov %vm18129_vm1 }
 0xb00   : > { %8404 = vmax.xlane.f32.xlu2 %v8403_v53  ;;  %vm18132_vm6 = vmmov %vm18129_vm1 }
 0xb01   : > { %vm18133_vm8 = vmmov %vm18129_vm1 }
 0xb02   : > { %vm18134_vm14 = vmmov %vm18129_vm1 }
 0xb03   : > { %vm18135_vm5 = vmmov %vm18129_vm1 }
 0xb04   : > { %vm18136_vm4 = vmmov %vm18129_vm1 }
 0xb05   : > { %vm18137_vm11 = vmmov %vm18129_vm1  ;;  %vm18139_vm1 = vcmp.eq.f32.partialorder %v16687_v9, 1.0 }
 0xb08   : > { %8050 = vadd.xlane.f32.xlu2 %v8049_v15 }
 0xb10   : > { %8149 = vadd.xlane.f32.xlu2 %v8148_v29 }
 0xb19   : > { %v17445_v6 = vpop.xlane.xlu1 %8027 }
 0xb1a   : > { %v8030_v10 = vsub.f32 %v16909_v60, %v17445_v6 }
 0xb1c   : > { %v8033_v20 = vmul.f32 1.442695, %v8030_v10 }
 0xb1e   : > { %13614 = vpow2.f32 %v8033_v20 }
 0xb24   : > { %v13615_v23 = vpop.eup %13614 }
 0xb25   : > { %v8038_v4 = vsel %vm18130_vm15, %v13615_v23, 0.0  ;;  %vm17505_vm15 = vmand %vm18139_vm1, %vm18138_vm12  ;;  %vm18148_vm1 = vcmp.eq.f32.partialorder %v16689_v43, 2.0 }
 0xb26   : > { %8039 = vadd.xlane.f32.xlu0 %v8038_v4 }
 0xb29   : > { %v17462_v26 = vpop.xlane.xlu1 %8214 }
 0xb31   : > { %v17450_v28 = vpop.xlane.xlu0 %7930  ;;  %v17452_v56 = vpop.xlane.xlu2 %7927 }
 0xb32   : > { %v7933_v52 = vsub.f32 %v17084_v42, %v17450_v28  ;;  %v7932_v14 = vsub.f32 %v17086_v47, %v17452_v56  ;;  %v8219_v42 = vsub.f32 %v17013_v51, %v17462_v26 }
 0xb34   : > { %v7936_v61 = vmul.f32 1.442695, %v7933_v52  ;;  %v7934_v5 = vmul.f32 1.442695, %v7932_v14  ;;  %v8221_v15 = vmul.f32 1.442695, %v8219_v42 }
 0xb36   : > { %13616 = vpow2.f32 %v7936_v61 }
 0xb37   : > { %13618 = vpow2.f32 %v7934_v5 }
 0xb39   : > { %v17458_v60 = vpop.xlane.xlu0 %8120 }
 0xb3a   : > { %v8125_v39 = vsub.f32 %v17162_v44, %v17458_v60 }
 0xb3c   : > { %v17460_v27 = vpop.xlane.xlu2 %7953  ;;  %v13617_v34 = vpop.eup %13616  ;;  %v8127_v2 = vmul.f32 1.442695, %v8125_v39 }
 0xb3d   : > { %v13619_v18 = vpop.eup %13618  ;;  %v7941_v47 = vsel %vm18131_vm3, %v13617_v34, 0.0  ;;  %vm18142_vm3 = vcmp.eq.f32.partialorder %v16689_v43, 1.0 }
 0xb3e   : > { %13620 = vpow2.f32 %v8127_v2  ;;  %7942 = vadd.xlane.f32.xlu1 %v7941_v47  ;;  %v7938_v53 = vsel %vm18132_vm6, %v13619_v18, 0.0  ;;  %vm18143_vm6 = vcmp.eq.f32.partialorder %v16687_v9, 2.0 }
 0xb3f   : > { %7939 = vadd.xlane.f32.xlu2 %v7938_v53  ;;  %13622 = vpow2.f32 %v8221_v15 }
 0xb41   : > { %v17478_v52 = vpop.xlane.xlu0 %8217 }
 0xb42   : > { %v8220_v34 = vsub.f32 %v17211_v17, %v17478_v52 }
 0xb44   : > { %v13621_v29 = vpop.eup %13620  ;;  %v8223_v2 = vmul.f32 1.442695, %v8220_v34 }
 0xb45   : > { %v8131_v44 = vsel %vm18133_vm8, %v13621_v29, 0.0  ;;  %v13623_v20 = vpop.eup %13622  ;;  %vm17513_vm8 = vmand %vm18143_vm6, %vm18142_vm3  ;;  %vm18150_vm6 = vcmp.eq.f32.partialorder %v16689_v43, 1.0 }
 0xb46   : > { %v8225_v4 = vsel %vm18134_vm14, %v13623_v20, 0.0  ;;  %vm8207_vm14 = vmor %vm17505_vm15, %vm17513_vm8  ;;  %vm18149_vm15 = vcmp.eq.f32.partialorder %v16695_v31, 1.0  ;;  %vm18151_vm8 = vcmp.eq.f32.partialorder %v16695_v31, 2.0 }
 0xb47   : > { %v17470_v12 = vpop.xlane.xlu2 %7956  ;;  %8132 = vadd.xlane.f32.xlu2 %v8131_v44  ;;  %vm8209_vm12 = vmand %vm18112_vm7, %vm8207_vm14 }
 0xb48   : > { %vm8204_vm3 = vmand %vm18149_vm15, %vm18148_vm1 }
 0xb49   : > { %vm18152_vm7 = vmmov %vm18136_vm4 }
 0xb4a   : > { %v17487_v18 = vpop.xlane.xlu0 %8401  ;;  %v8332_v59 = vsel %vm18152_vm7, %v8330_v0, 0.0  ;;  %vm18153_vm14 = vmmov %vm18136_vm4  ;;  %vm18163_vm7 = vnez %v17992_v24 }
 0xb4b   : > { %v8406_v47 = vsub.f32 %v17274_v38, %v17487_v18  ;;  %vm18154_vm1 = vmmov %vm18136_vm4 }
 0xb4c   : > { %v8335_v31 = vsel %vm18154_vm1, %v8331_v45, 0.0  ;;  %vm18156_vm15 = vmmov %vm18154_vm1 }
 0xb4d   : > { %v8429_v54 = vsel %vm18156_vm15, %v8425_v16, 0.0 }
 0xb4f   : > { %8226 = vadd.xlane.f32.xlu2 %v8225_v4 }
 0xb51   : > { %v17473_v10 = vpop.xlane.xlu2 %8024 }
 0xb52   : > { %v8029_v51 = vsub.f32 %v17267_v8, %v17473_v10 }
 0xb54   : > { %v8031_v23 = vmul.f32 1.442695, %v8029_v51  ;;  %v8147_v25 = vpop.xlane.xlu0 %8146 }
 0xb56   : > { %13624 = vpow2.f32 %v8031_v23 }
 0xb59   : > { %v17480_v14 = vpop.xlane.xlu2 %8123 }
 0xb5a   : > { %v8126_v61 = vsub.f32 %v17310_v33, %v17480_v14  ;;  %v8408_v33 = vmul.f32 1.442695, %v8406_v47 }
 0xb5c   : > { %v8129_v5 = vmul.f32 1.442695, %v8126_v61  ;;  %v13625_v39 = vpop.eup %13624 }
 0xb5d   : > { %v8035_v8 = vsel %vm18135_vm5, %v13625_v39, 0.0  ;;  %vm18146_vm5 = vmmov %vm18136_vm4 }
 0xb5e   : > { %13626 = vpow2.f32 %v8129_v5  ;;  %8036 = vadd.xlane.f32.xlu1 %v8035_v8 }
 0xb5f   : > { %13628 = vpow2.f32 %v8223_v2 }
 0xb60   : > { %13630 = vpow2.f32 %v8408_v33 }
 0xb64   : > { %v13627_v42 = vpop.eup %13626 }
 0xb65   : > { %v8134_v53 = vsel %vm18136_vm4, %v13627_v42, 0.0  ;;  %v13629_v15 = vpop.eup %13628 }
 0xb66   : > { %8135 = vadd.xlane.f32.xlu1 %v8134_v53  ;;  %v8228_v38 = vsel %vm18137_vm11, %v13629_v15, 0.0  ;;  %vm18147_vm11 = vmmov %vm18136_vm4 }
 0xb69   : > { %v17492_v29 = vpop.xlane.xlu1 %8310 }
 0xb6a   : > { %v8313_v44 = vsub.f32 %v17401_v32, %v17492_v29 }
 0xb6b   : > { %v17494_v17 = vpop.xlane.xlu2 %8307 }
 0xb6c   : > { %v8312_v51 = vsub.f32 %v17404_v57, %v17494_v17  ;;  %v8316_v20 = vmul.f32 1.442695, %v8313_v44  ;;  %v13631_v57 = vpop.eup %13630 }
 0xb6d   : > { %v8412_v8 = vsel %vm18146_vm5, %v13631_v57, 0.0  ;;  %vm8206_vm5 = vmand %vm18151_vm8, %vm18150_vm6  ;;  %vm7962_vm8 = vcmask 7168  }
 0xb6e   : > { %v8314_v23 = vmul.f32 1.442695, %v8312_v51  ;;  %8229 = vadd.xlane.f32.xlu1 %v8228_v38  ;;  %13632 = vpow2.f32 %v8316_v20  ;;  %vm18159_vm6 = vmmov %vm18154_vm1 }
 0xb6f   : > { %v8426_v21 = vsel %vm18159_vm6, %v8424_v50, 0.0 }
 0xb70   : > { %13634 = vpow2.f32 %v8314_v23 }
 0xb71   : > { %v8054_v19 = vpop.xlane.xlu1 %8053 }
 0xb73   : > { %v17517_v61 = vpop.xlane.xlu2 %8404 }
 0xb74   : > { %v8407_v5 = vsub.f32 %v17423_v11, %v17517_v61  ;;  %v13633_v39 = vpop.eup %13632  ;;  %v8237_v11 = vsel %vm8209_vm12, %v16997_v46, 0.0 }
 0xb75   : > { %v8321_v2 = vsel %vm18136_vm4, %v13633_v39, 0.0  ;;  %v8239_v53 = vsel %vm18136_vm4, %v8237_v11, 0.0  ;;  %vm18162_vm4 = vnez %v17940_v49 }
 0xb76   : > { %v8410_v34 = vmul.f32 1.442695, %v8407_v5  ;;  %v13635_v9 = vpop.eup %13634  ;;  %8413 = vadd.xlane.f32.xlu1 %v8412_v8  ;;  %8322 = vadd.xlane.f32.xlu2 %v8321_v2 }
 0xb77   : > { %v8318_v42 = vsel %vm18147_vm11, %v13635_v9, 0.0  ;;  %vm8208_vm11 = vmor %vm8204_vm3, %vm8206_vm5  ;;  %vm18161_vm5 = vnez %v17975_v35 }
 0xb78   : > { %13636 = vpow2.f32 %v8410_v34  ;;  %8319 = vadd.xlane.f32.xlu0 %v8318_v42  ;;  %vm8210_vm12 = vmand %vm18115_vm13, %vm8208_vm11  ;;  %vm18165_vm11 = vnez %v18062_v58 }
 0xb79   : > { %v8238_v43 = vsel %vm8210_vm12, %v17174_v40, 0.0  ;;  %vm18157_vm3 = vmmov %vm18154_vm1  ;;  %vm18166_vm12 = vnez %v17958_v7  ;;  %vm18167_vm1 = vnez %v18100_v3 }
 0xb7a   : > { %v8242_v62 = vsel %vm18157_vm3, %v8238_v43, 0.0 }
 0xb7b   : > { %v8051_v40 = vpop.xlane.xlu2 %8050 }
 0xb7e   : > { %v13637_v47 = vpop.eup %13636  ;;  %8240 = vadd.xlane.f32.xlu1 %v8239_v53  ;;  %8333 = vadd.xlane.f32.xlu2 %v8332_v59 }
 0xb7f   : > { %v8415_v46 = vsel %vm18153_vm14, %v13637_v47, 0.0  ;;  %vm18164_vm14 = vnez %v17988_v30 }
 0xb80   : > { %8416 = vadd.xlane.f32.xlu0 %v8415_v46 }
 0xb83   : > { %v8150_v41 = vpop.xlane.xlu2 %8149 }
 0xb86   : > { %8336 = vadd.xlane.f32.xlu1 %v8335_v31  ;;  %8430 = vadd.xlane.f32.xlu2 %v8429_v54 }
 0xb88   : > { %8243 = vadd.xlane.f32.xlu0 %v8242_v62 }
 0xb90   : > { %8427 = vadd.xlane.f32.xlu0 %v8426_v21 }
 0xb99   : > { %v8040_v50 = vpop.xlane.xlu0 %8039 }
 0xbb1   : > { %v7943_v0 = vpop.xlane.xlu1 %7942 }
 0xbb2   : > { %13638 = vlog2.f32 %v7943_v0  ;;  %v7940_v22 = vpop.xlane.xlu2 %7939 }
 0xbb3   : > { %13640 = vlog2.f32 %v7940_v22 }
 0xbb4   : > { %13642 = vlog2.f32 %v8040_v50 }
 0xbb8   : > { %v13639_v16 = vpop.eup %13638 }
 0xbb9   : > { %v13641_v45 = vpop.eup %13640  ;;  %v7947_v33 = vmul.f32 0.6931472, %v13639_v16 }
 0xbba   : > { %v7945_v15 = vmul.f32 0.6931472, %v13641_v45  ;;  %v13643_v32 = vpop.eup %13642 }
 0xbbb   : > { %v7949_v44 = vadd.f32 %v7947_v33, %v17450_v28 }
 0xbbc   : > { %v7948_v1 = vadd.f32 %v7945_v15, %v17452_v56  ;;  %v8133_v56 = vpop.xlane.xlu2 %8132 }
 0xbbd   : > { %v7959_v37 = vsub.f32 %v7949_v44, %v17470_v12  ;;  %13644 = vlog2.f32 %v8133_v56  ;;  %v8044_v12 = vmul.f32 0.6931472, %v13643_v32 }
 0xbbe   : > { %v7958_v51 = vsub.f32 %v7948_v1, %v17460_v27 }
 0xbbf   : > { %v7961_v20 = vsel %vm18160_vm10, %v7959_v37, 0.0  ;;  %v8046_v63 = vadd.f32 %v8044_v12, %v17445_v6 }
 0xbc0   : > { %v7960_v23 = vsel %vm18161_vm5, %v7958_v51, 0.0  ;;  %v7964_v38 = vsel %vm7962_vm8, %v7961_v20, 0.0 }
 0xbc1   : > { %v7963_v4 = vsel %vm7962_vm8, %v7960_v23, 0.0  ;;  %v8056_v8 = vsub.f32 %v8046_v63, %v8054_v19 }
 0xbc2   : > { %v7965_v28 = vadd.f32 %v7964_v38, %v7963_v4 }
 0xbc3   : > { %v13645_v27 = vpop.eup %13644  ;;  %v8058_v11 = vsel %vm18162_vm4, %v8056_v8, 0.0 }
 0xbc4   : > { %7966 = vadd.xlane.f32.xlu0 %v7965_v28  ;;  %v8138_v39 = vmul.f32 0.6931472, %v13645_v27  ;;  %v8060_v59 = vsel %vm7962_vm8, %v8058_v11, 0.0  ;;  %v8227_v62 = vpop.xlane.xlu2 %8226 }
 0xbc6   : > { %v8141_v2 = vadd.f32 %v8138_v39, %v17458_v60 }
 0xbc8   : > { %v8151_v54 = vsub.f32 %v8141_v2, %v8147_v25 }
 0xbca   : > { %v8153_v49 = vsel %vm18164_vm14, %v8151_v54, 0.0 }
 0xbcb   : > { %v8155_v21 = vsel %vm7962_vm8, %v8153_v49, 0.0 }
 0xbd1   : > { %v8037_v57 = vpop.xlane.xlu1 %8036 }
 0xbd2   : > { %13646 = vlog2.f32 %v8037_v57 }
 0xbd8   : > { %v13647_v5 = vpop.eup %13646 }
 0xbd9   : > { %v8042_v35 = vmul.f32 0.6931472, %v13647_v5  ;;  %v8136_v34 = vpop.xlane.xlu1 %8135 }
 0xbda   : > { %13648 = vlog2.f32 %v8136_v34 }
 0xbdb   : > { %v8045_v9 = vadd.f32 %v8042_v35, %v17473_v10  ;;  %13650 = vlog2.f32 %v8227_v62 }
 0xbdd   : > { %v8055_v42 = vsub.f32 %v8045_v9, %v8051_v40 }
 0xbdf   : > { %v8057_v47 = vsel %vm18163_vm7, %v8055_v42, 0.0 }
 0xbe0   : > { %v13649_v53 = vpop.eup %13648  ;;  %v8059_v6 = vsel %vm7962_vm8, %v8057_v47, 0.0 }
 0xbe1   : > { %v8140_v46 = vmul.f32 0.6931472, %v13649_v53  ;;  %v8230_v43 = vpop.xlane.xlu1 %8229  ;;  %v8061_v31 = vadd.f32 %v8060_v59, %v8059_v6 }
 0xbe3   : > { %v8142_v10 = vadd.f32 %v8140_v46, %v17480_v14  ;;  %8062 = vadd.xlane.f32.xlu0 %v8061_v31  ;;  %v13651_v14 = vpop.eup %13650  ;;  %v14130_v46 = vmov 8.0  }
 0xbe4   : > { %v8232_v45 = vmul.f32 0.6931472, %v13651_v14 }
 0xbe5   : > { %v8152_v60 = vsub.f32 %v8142_v10, %v8150_v41 }
 0xbe6   : > { %v8235_v51 = vadd.f32 %v8232_v45, %v17462_v26 }
 0xbe7   : > { %v8154_v24 = vsel %vm18165_vm11, %v8152_v60, 0.0 }
 0xbe8   : > { %v8156_v40 = vsel %vm7962_vm8, %v8154_v24, 0.0 }
 0xbe9   : > { %v8414_v19 = vpop.xlane.xlu1 %8413  ;;  %v8157_v0 = vadd.f32 %v8156_v40, %v8155_v21  ;;  %v8323_v22 = vpop.xlane.xlu2 %8322 }
 0xbea   : > { %13652 = vlog2.f32 %v8323_v22 }
 0xbeb   : > { %v8320_v25 = vpop.xlane.xlu0 %8319  ;;  %8158 = vadd.xlane.f32.xlu1 %v8157_v0 }
 0xbec   : > { %13654 = vlog2.f32 %v8320_v25 }
 0xbed   : > { %13656 = vlog2.f32 %v8230_v43 }
 0xbf0   : > { %v13653_v41 = vpop.eup %13652 }
 0xbf1   : > { %v8241_v30 = vpop.xlane.xlu1 %8240  ;;  %v8327_v44 = vmul.f32 0.6931472, %v13653_v41  ;;  %v8334_v37 = vpop.xlane.xlu2 %8333 }
 0xbf2   : > { %v13655_v16 = vpop.eup %13654  ;;  %v8245_v23 = vsub.f32 %v8235_v51, %v8241_v30 }
 0xbf3   : > { %v13657_v58 = vpop.eup %13656  ;;  %v8325_v33 = vmul.f32 0.6931472, %v13655_v16  ;;  %v8417_v15 = vpop.xlane.xlu0 %8416  ;;  %v8329_v38 = vadd.f32 %v8327_v44, %v17492_v29 }
 0xbf4   : > { %13658 = vlog2.f32 %v8417_v15  ;;  %v8234_v50 = vmul.f32 0.6931472, %v13657_v58 }
 0xbf5   : > { %13660 = vlog2.f32 %v8414_v19  ;;  %v8328_v1 = vadd.f32 %v8325_v33, %v17494_v17  ;;  %v8247_v17 = vsel %vm18166_vm12, %v8245_v23, 0.0 }
 0xbf6   : > { %v8236_v12 = vadd.f32 %v8234_v50, %v17478_v52  ;;  %v8249_v9 = vsel %vm7962_vm8, %v8247_v17, 0.0  ;;  %13662 = vrcp.f32 %v14130_v46 }
 0xbf7   : > { %v8338_v20 = vsub.f32 %v8328_v1, %v8334_v37  ;;  %v14131_v37 = vmov 6.0  }
 0xbf8   : > { %13664 = vrcp.f32 %v14131_v37 }
 0xbf9   : > { %v8337_v4 = vpop.xlane.xlu1 %8336  ;;  %v8340_v56 = vsel %vm17357_vm9, %v8338_v20, 0.0  ;;  %vm18168_vm9 = vnez %v17979_v13  ;;  %v8431_v8 = vpop.xlane.xlu2 %8430 }
 0xbfa   : > { %v13659_v28 = vpop.eup %13658  ;;  %v8339_v32 = vsub.f32 %v8329_v38, %v8337_v4  ;;  %v8342_v39 = vsel %vm7962_vm8, %v8340_v56, 0.0 }
 0xbfb   : > { %v13661_v57 = vpop.eup %13660  ;;  %v8421_v63 = vmul.f32 0.6931472, %v13659_v28  ;;  %v8244_v27 = vpop.xlane.xlu0 %8243 }
 0xbfc   : > { %v8341_v26 = vsel %vm18167_vm1, %v8339_v32, 0.0  ;;  %v8246_v5 = vsub.f32 %v8236_v12, %v8244_v27  ;;  %v8419_v35 = vmul.f32 0.6931472, %v13661_v57  ;;  %v13663_v43 = vpop.eup %13662 }
 0xbfd   : > { %v8423_v29 = vadd.f32 %v8421_v63, %v17517_v61  ;;  %v8343_v55 = vsel %vm7962_vm8, %v8341_v26, 0.0  ;;  %v7976_v31 = vmul.f32 8.0, %v13663_v43 }
 0xbfe   : > { %v8248_v52 = vsel %vm18168_vm9, %v8246_v5, 0.0  ;;  %v8344_v34 = vadd.f32 %v8343_v55, %v8342_v39  ;;  %v8422_v61 = vadd.f32 %v8419_v35, %v17487_v18  ;;  %v13665_v20 = vpop.eup %13664 }
 0xbff   : > { %v8250_v7 = vsel %vm7962_vm8, %v8248_v52, 0.0  ;;  %v8433_v2 = vsub.f32 %v8423_v29, %v8431_v8  ;;  %v7977_v54 = vsub.f32 1.0, %v7976_v31  ;;  %v8459_v32 = vmul.f32 6.0, %v13665_v20 }
 0xc00   : > { %8345 = vadd.xlane.f32.xlu2 %v8344_v34  ;;  %v8251_v3 = vadd.f32 %v8250_v7, %v8249_v9  ;;  %vm8463_vm15 = vweird.f32 %v13665_v20 }
 0xc01   : > { %v8435_v11 = vsel %vm17369_vm2, %v8433_v2, 0.0  ;;  %v7978_v48 = vmul.f32 %v13663_v43, %v7977_v54  ;;  %vm7980_vm2 = vweird.f32 %v13663_v43  ;;  %v8460_v27 = vsub.f32 1.0, %v8459_v32 }
 0xc02   : > { %8252 = vadd.xlane.f32.xlu0 %v8251_v3  ;;  %v8437_v6 = vsel %vm7962_vm8, %v8435_v11, 0.0 }
 0xc03   : > { %v8428_v42 = vpop.xlane.xlu0 %8427  ;;  %v7979_v24 = vadd.f32 %v13663_v43, %v7978_v48  ;;  %v8461_v35 = vmul.f32 %v13665_v20, %v8460_v27 }
 0xc04   : > { %v8432_v47 = vsub.f32 %v8422_v61, %v8428_v42 }
 0xc05   : > { %v7981_v40 = vsel %vm7980_vm2, %v13663_v43, %v7979_v24  ;;  %v8462_v9 = vadd.f32 %v13665_v20, %v8461_v35 }
 0xc06   : > { %v8434_v13 = vsel %vm18169_vm0, %v8432_v47, 0.0 }
 0xc07   : > { %v8436_v53 = vsel %vm7962_vm8, %v8434_v13, 0.0  ;;  %v8464_v3 = vsel %vm8463_vm15, %v13665_v20, %v8462_v9 }
 0xc08   : > { %v8438_v59 = vadd.f32 %v8437_v6, %v8436_v53 }
 0xc0a   : > { %8439 = vadd.xlane.f32.xlu1 %v8438_v59 }
 0xc37   : > { %v7967_v18 = vpop.xlane.xlu0 %7966 }
 0xc38   : > { %v7968_v62 = vrot.slane %v7967_v18, 4 }
 0xc3a   : > { %v7969_v10 = vadd.f32 %v7968_v62, %v7967_v18 }
 0xc3c   : > { %v7970_v60 = vrot.slane %v7969_v10, 2 }
 0xc3e   : > { %v7971_v49 = vadd.f32 %v7970_v60, %v7969_v10 }
 0xc40   : > { %v7972_v36 = vrot.slane %v7971_v49, 1 }
 0xc42   : > { %v7973_v21 = vadd.f32 %v7972_v36, %v7971_v49 }
 0xc44   : > { %13324 = vpush %v7973_v21 }
 0xc45   : > { %13326 = vpush %v7981_v40 }
 0xc56   : > { %v8063_v19 = vpop.xlane.xlu0 %8062 }
 0xc57   : > { %v8064_v0 = vrot.slane %v8063_v19, 4 }
 0xc59   : > { %v8065_v22 = vadd.f32 %v8064_v0, %v8063_v19 }
 0xc5b   : > { %v8066_v25 = vrot.slane %v8065_v22, 2 }
 0xc5d   : > { %v8067_v14 = vadd.f32 %v8066_v25, %v8065_v22 }
 0xc5e   : > { %v8159_v41 = vpop.xlane.xlu1 %8158 }
 0xc5f   : > { %v8160_v30 = vrot.slane %v8159_v41, 4  ;;  %v8068_v16 = vrot.slane %v8067_v14, 1 }
 0xc61   : > { %v8161_v45 = vadd.f32 %v8160_v30, %v8159_v41  ;;  %v8069_v58 = vadd.f32 %v8068_v16, %v8067_v14 }
 0xc63   : > { %v8162_v33 = vrot.slane %v8161_v45, 2  ;;  %13328 = vpush %v8069_v58 }
 0xc65   : > { %v8163_v15 = vadd.f32 %v8162_v33, %v8161_v45 }
 0xc67   : > { %v8164_v44 = vrot.slane %v8163_v15, 1 }
 0xc69   : > { %v8165_v1 = vadd.f32 %v8164_v44, %v8163_v15 }
 0xc6b   : > { %13330 = vpush %v8165_v1 }
 0xc73   : > { %v8346_v50 = vpop.xlane.xlu2 %8345 }
 0xc74   : > { %v8347_v51 = vrot.slane %v8346_v50, 4 }
 0xc75   : > { %v8253_v23 = vpop.xlane.xlu0 %8252  ;;  %s13325_s22 = spop %13324 }
 0xc76   : > { %v8348_v38 = vadd.f32 %v8347_v51, %v8346_v50  ;;  %v8254_v4 = vrot.slane %v8253_v23, 4  ;;  %s13327_s24 = spop %13326 }
 0xc77   : > { %s7983_s7 = smul.f32 %s13327_s24, %s13325_s22 }
 0xc78   : > { %v8349_v28 = vrot.slane %v8348_v38, 2  ;;  %v8255_v56 = vadd.f32 %v8254_v4, %v8253_v23 }
 0xc7a   : > { %v8350_v12 = vadd.f32 %v8349_v28, %v8348_v38  ;;  %v8256_v57 = vrot.slane %v8255_v56, 2 }
 0xc7c   : > { %v8257_v63 = vadd.f32 %v8256_v57, %v8255_v56  ;;  %v8351_v26 = vrot.slane %v8350_v12, 1 }
 0xc7d   : > { %v8440_v17 = vpop.xlane.xlu1 %8439 }
 0xc7e   : > { %v8441_v5 = vrot.slane %v8440_v17, 4  ;;  %v8258_v29 = vrot.slane %v8257_v63, 1  ;;  %v8352_v52 = vadd.f32 %v8351_v26, %v8350_v12 }
 0xc80   : > { %v8442_v39 = vadd.f32 %v8441_v5, %v8440_v17  ;;  %v8259_v55 = vadd.f32 %v8258_v29, %v8257_v63 }
 0xc82   : > { %v8443_v34 = vrot.slane %v8442_v39, 2  ;;  %13332 = vpush %v8259_v55 }
 0xc83   : > { %13334 = vpush %v8352_v52 }
 0xc84   : > { %v8444_v8 = vadd.f32 %v8443_v34, %v8442_v39 }
 0xc86   : > { %v8445_v7 = vrot.slane %v8444_v8, 1 }
 0xc88   : > { %v8446_v2 = vadd.f32 %v8445_v7, %v8444_v8 }
 0xc8a   : > { %13336 = vpush %v8446_v2 }
 0xc8b   : > { %13338 = vpush %v8464_v3 }
 0xc94   : > { %s13329_s28 = spop %13328 }
 0xc95   : > { %s8079_s25 = smul.f32 %s13329_s28, %s13327_s24 }
 0xc97   : > { %s8080_s23 = sadd.f32 %s8079_s25, %s7983_s7 }
 0xc9c   : > { %s13331_s17 = spop %13330 }
 0xc9d   : > { %s8175_s16 = smul.f32 %s13331_s17, %s13327_s24 }
 0xc9f   : > { %s8176_s13 = sadd.f32 %s8175_s16, %s8080_s23 }
 0xcb3   : > { %s13333_s19 = spop %13332 }
 0xcb4   : > { %s8269_s6 = smul.f32 %s13333_s19, %s13327_s24  ;;  %s13335_s15 = spop %13334 }
 0xcb5   : > { %s8362_s1 = smul.f32 %s13335_s15, %s13327_s24 }
 0xcb6   : > { %s8270_s27 = sadd.f32 %s8269_s6, %s8176_s13 }
 0xcb8   : > { %s8363_s14 = sadd.f32 %s8362_s1, %s8270_s27 }
 0xcbb   : > { %s13337_s8 = spop %13336 }
 0xcbc   : > { %s8456_s12 = smul.f32 %s13337_s8, %s13327_s24  ;;  %s13339_s26 = spop %13338 }
 0xcbe   : > { %s8457_s2 = sadd.f32 %s8456_s12, %s8363_s14 }
 0xcc0   : > { %s8466_s0 = smul.f32 %s13339_s26, %s8457_s2 }
 0xcc2   : > { %v8467_v61 = vstv %s8466_s0 }
 0xcc3   : > { %8469 = vst [vmem:[#allocation20] sm:$0x1] %v8467_v61 }
 0xcc4 PF: > { %s18170_s29 = sld [smem:[#allocation29_spill]]  ;;  %s14132_s5 = smov [#allocation20]  }
 0xcc5   : > { %s9165_s21 = sshll.u32 %s14132_s5, 4  ;;  %s18171_s22 = sld [smem:[#allocation65_spill]]  ;;  %s9166_s21 = int_to_ptr.vmem [resolvable:$true] %s9165_s21 }
 0xcca   : > { %p13423_p7 = scmp.eq.s32.totalorder %s18170_s29, 4 }
 0xccb   : > { %s9167_s28 = sshll.u32 %s18171_s22, 4  ;;  %s9168_s28 = int_to_ptr.hbm [resolvable:$true] %s9167_s28 }
 0xccc   : > { %13373 = dma.vmem_to_hbm [thread:$0]  (%p13423_p7), %s9166_s21, 16, %s9168_s28, [#allocation6]  }
 0xccd   : > { %14091 = dma.done.wait (%p13423_p7), [#allocation6], 16  }
 0xcce   : > { %14093 = vsyncadd (%p13423_p7), [#allocation6], 4294967280 }
 0xccf PF: > { %s18172_s24 = sld [smem:[#allocation32_spill]] }
 0xcd0   : > { %s18173_s21 = sld [smem:[#allocation27_spill]] }
 0xcd1   : > { %s18174_s22 = sld [smem:[#allocation28_spill]] }
 0xcd2   : > { %s18175_s23 = sld [smem:[#allocation33_spill]] }
 0xcd5   : > { %p28_p9 = scmp.ge.s32.totalorder %s18172_s24, 7  }
 0xcd7   :  { %30 = sbr.rel (!%p28_p9) target bundleno = 19 (0x13), region = 245 }
 0xcdc   :  { %9184 = vsyncpa [#allocation5], 1 }
 0xcdd   :  { %9186 = vsyncpa [#allocation5 + $0x1], 1 }
 0xcde   :  { %9187 = vsyncpa [#allocation8], 1 }
 0xcdf   :  { %9188 = vsyncpa [#allocation19], 1 }
 0xce0   :  { %9189 = vsyncpa [#allocation6], 1 }
 0xce1   :  { %9191 = vsyncpa [#allocation6 + $0x1], 1 }

</bundles_post_ra>
